<compile_context>
chip_gen: v7x
topology: tpu7x:2x2x1
jax: 0.10.0
libtpu: 0.0.40
codegen_flags: <defaults>
</compile_context>

<pallas_src>
import jax
import jax.numpy as jnp
from jax import lax
from jax.experimental import pallas as pl
from jax.experimental.pallas import tpu as pltpu


def _round_up(x, m):
    return ((x + m - 1) // m) * m


def dbn_forward_kernel(v_ref, u1_ref, u2_ref, u3_ref,
                       w1_ref, bh1_ref, bv1_ref,
                       w2_ref, bh2_ref, bv2_ref,
                       w3_ref, bh3_ref, bv3_ref,
                       out_ref):
    v = v_ref[...]

    # ---------------- upward pass: p_h = sigmoid(x @ W + b_h); h = bernoulli --
    def up(x, w_ref, bh_ref, u_ref):
        # bf16 operands on the MXU, f32 accumulation; epilogue stays f32 (v5e
        # has no bf16 VPU/EUP path).
        pre = jnp.dot(x.astype(jnp.bfloat16), w_ref[...],
                      preferred_element_type=jnp.float32) + bh_ref[...]
        p = jax.nn.sigmoid(pre)
        return (p > u_ref[...]).astype(jnp.float32)

    h1 = up(v, w1_ref, bh1_ref, u1_ref)
    h2 = up(h1, w2_ref, bh2_ref, u2_ref)
    h3 = up(h2, w3_ref, bh3_ref, u3_ref)

    # ------------- downward pass: v = sigmoid(h @ W.T + b_v), prob. is kept ---
    def down(h, w_ref, bv_ref):
        # contract hidden axis of h with the out axis of W -> trans_b matmul on
        # the MXU (no materialized transpose of W).
        s = lax.dot_general(h.astype(jnp.bfloat16), w_ref[...],
                            (((1,), (1,)), ((), ())),
                            preferred_element_type=jnp.float32)
        return jax.nn.sigmoid(s + bv_ref[...])

    d3 = down(h3, w3_ref, bv3_ref)
    d2 = down(d3, w2_ref, bv2_ref)
    out_ref[...] = down(d2, w1_ref, bv1_ref).astype(out_ref.dtype)


def dbn_forward(v, params, key, *, batch_tile=128):
    """Fused DBN forward (up + down) pass.  v: (B, 784) float32 in [0, 1]."""
    (w1, bh1, bv1), (w2, bh2, bv2), (w3, bh3, bv3) = params
    B, n_in = v.shape
    n_h1, n_h2, n_h3 = w1.shape[1], w2.shape[1], w3.shape[1]

    # --- padding: lane-dense visible dim (784 -> 896), sublane-aligned batch ---
    n_in_pad = _round_up(n_in, 128)
    tile_b = min(batch_tile, _round_up(B, 8))
    b_pad = _round_up(B, tile_b)

    v_p = jnp.pad(v, ((0, b_pad - B), (0, n_in_pad - n_in)))
    w1_p = jnp.pad(w1, ((0, n_in_pad - n_in), (0, 0)))       # zero rows: no-op in up pass
    bv1_p = jnp.pad(bv1, ((0, 0), (0, n_in_pad - n_in)))

    # bf16 weights: halves HBM traffic and feeds the native bf16 MXU.
    w1_b = w1_p.astype(jnp.bfloat16)
    w2_b = w2.astype(jnp.bfloat16)
    w3_b = w3.astype(jnp.bfloat16)

    # host-side uniforms for the Bernoulli sampling of each hidden layer
    k1, k2, k3 = jax.random.split(key, 3)
    u1 = jax.random.uniform(k1, (b_pad, n_h1), dtype=jnp.float32)
    u2 = jax.random.uniform(k2, (b_pad, n_h2), dtype=jnp.float32)
    u3 = jax.random.uniform(k3, (b_pad, n_h3), dtype=jnp.float32)

    grid = (pl.cdiv(b_pad, tile_b),)
    batch_spec = lambda n: pl.BlockSpec((tile_b, n), lambda i: (i, 0))
    const_spec = lambda r, c: pl.BlockSpec((r, c), lambda i: (0, 0))

    out = pl.pallas_call(
        dbn_forward_kernel,
        out_shape=jax.ShapeDtypeStruct((b_pad, n_in_pad), jnp.float32),
        grid=grid,
        in_specs=[
            batch_spec(n_in_pad),                 # v
            batch_spec(n_h1),                     # u1
            batch_spec(n_h2),                     # u2
            batch_spec(n_h3),                     # u3
            const_spec(n_in_pad, n_h1),           # w1
            const_spec(1, n_h1),                  # b_h1
            const_spec(1, n_in_pad),              # b_v1
            const_spec(n_h1, n_h2),               # w2
            const_spec(1, n_h2),                  # b_h2
            const_spec(1, n_h1),                  # b_v2
            const_spec(n_h2, n_h3),               # w3
            const_spec(1, n_h3),                  # b_h3
            const_spec(1, n_h2),                  # b_v3
        ],
        out_specs=batch_spec(n_in_pad),
        compiler_params=pltpu.CompilerParams(
            dimension_semantics=("parallel",),
            vmem_limit_bytes=32 * 1024 * 1024,
        ),
    )(v_p, u1, u2, u3,
      w1_b, bh1, bv1_p,
      w2_b, bh2, bv2,
      w3_b, bh3, bv3)

    return out[:B, :n_in]


def init_dbn_params(key, layer_sizes=((784, 500), (500, 500), (500, 2000))):
    """Synthetic RBM parameters: W (Nin, Nout), b_h (1, Nout), b_v (1, Nin)."""
    params = []
    for (nin, nout) in layer_sizes:
        key, kw = jax.random.split(key)
        w = 0.01 * jax.random.normal(kw, (nin, nout), dtype=jnp.float32)
        bh = jnp.zeros((1, nout), dtype=jnp.float32)
        bv = jnp.zeros((1, nin), dtype=jnp.float32)
        params.append((w, bh, bv))
    return params


if __name__ == "__main__":
    key = jax.random.PRNGKey(0)
    key, kx, ku = jax.random.split(key, 3)

    B = 16                          # small batch
    params = init_dbn_params(key)   # MNIST DBN: 784 -> 500 -> 500 -> 2000
    # visible input in [0, 1], as the DBN expects (MNIST-like pixels)
    x = jax.random.uniform(kx, (B, 784), dtype=jnp.float32)

    out = dbn_forward(x, params, ku)
    out = jax.block_until_ready(out)

    assert out.shape == (B, 784)
    assert out.dtype == jnp.float32
    assert bool(jnp.all(jnp.isfinite(out)))
    assert bool(jnp.all((out >= 0.0) & (out <= 1.0)))   # sigmoid probabilities
    print("KERNEL_OK")
</pallas_src>

<mosaic_0001>
module attributes {stable_mosaic.version = 11 : i64} {
  func.func @dbn_forward_kernel(%arg0: i32, %arg1: memref<16x896xf32, #tpu.memory_space<vmem>>, %arg2: memref<16x500xf32, #tpu.memory_space<vmem>>, %arg3: memref<16x500xf32, #tpu.memory_space<vmem>>, %arg4: memref<16x2000xf32, #tpu.memory_space<vmem>>, %arg5: memref<896x500xbf16, #tpu.memory_space<vmem>>, %arg6: memref<1x500xf32, #tpu.memory_space<vmem>>, %arg7: memref<1x896xf32, #tpu.memory_space<vmem>>, %arg8: memref<500x500xbf16, #tpu.memory_space<vmem>>, %arg9: memref<1x500xf32, #tpu.memory_space<vmem>>, %arg10: memref<1x500xf32, #tpu.memory_space<vmem>>, %arg11: memref<500x2000xbf16, #tpu.memory_space<vmem>>, %arg12: memref<1x2000xf32, #tpu.memory_space<vmem>>, %arg13: memref<1x500xf32, #tpu.memory_space<vmem>>, %arg14: memref<16x896xf32, #tpu.memory_space<vmem>>) attributes {dimension_semantics = [#tpu.dimension_semantics<parallel>], iteration_bounds = array<i64: 1>, scalar_prefetch = 0 : i64, scratch_operands = 0 : i64, tpu.core_type = #tpu.core_type<tc>, window_params = [{transform_indices = @transform_0, window_bounds = array<i64: 16, 896>}, {transform_indices = @transform_1, window_bounds = array<i64: 16, 500>}, {transform_indices = @transform_2, window_bounds = array<i64: 16, 500>}, {transform_indices = @transform_3, window_bounds = array<i64: 16, 2000>}, {pipeline_mode = #tpu.pipeline_mode<synchronous>, transform_indices = @transform_4, window_bounds = array<i64: 896, 500>}, {pipeline_mode = #tpu.pipeline_mode<synchronous>, transform_indices = @transform_5, window_bounds = array<i64: 1, 500>}, {pipeline_mode = #tpu.pipeline_mode<synchronous>, transform_indices = @transform_6, window_bounds = array<i64: 1, 896>}, {pipeline_mode = #tpu.pipeline_mode<synchronous>, transform_indices = @transform_7, window_bounds = array<i64: 500, 500>}, {pipeline_mode = #tpu.pipeline_mode<synchronous>, transform_indices = @transform_8, window_bounds = array<i64: 1, 500>}, {pipeline_mode = #tpu.pipeline_mode<synchronous>, transform_indices = @transform_9, window_bounds = array<i64: 1, 500>}, {pipeline_mode = #tpu.pipeline_mode<synchronous>, transform_indices = @transform_10, window_bounds = array<i64: 500, 2000>}, {pipeline_mode = #tpu.pipeline_mode<synchronous>, transform_indices = @transform_11, window_bounds = array<i64: 1, 2000>}, {pipeline_mode = #tpu.pipeline_mode<synchronous>, transform_indices = @transform_12, window_bounds = array<i64: 1, 500>}, {transform_indices = @transform_13, window_bounds = array<i64: 16, 896>}]} {
    %c0 = arith.constant 0 : index
    %c0_0 = arith.constant 0 : index
    %0 = vector.load %arg1[%c0, %c0_0] : memref<16x896xf32, #tpu.memory_space<vmem>>, vector<16x896xf32>
    %1 = arith.truncf %0 : vector<16x896xf32> to vector<16x896xbf16>
    %c0_1 = arith.constant 0 : index
    %c0_2 = arith.constant 0 : index
    %2 = vector.load %arg5[%c0_1, %c0_2] : memref<896x500xbf16, #tpu.memory_space<vmem>>, vector<896x500xbf16>
    %cst = arith.constant dense<0.000000e+00> : vector<16x500xf32>
    %3 = tpu.matmul %1, %2, %cst {dimension_numbers = #tpu.dot_dimension_numbers<[1], [0], [0], [1], [0, 0, 1, 1], [], []>} : vector<16x896xbf16>, vector<896x500xbf16>, vector<16x500xf32> -> vector<16x500xf32>
    %c0_3 = arith.constant 0 : index
    %c0_4 = arith.constant 0 : index
    %4 = vector.load %arg6[%c0_3, %c0_4] : memref<1x500xf32, #tpu.memory_space<vmem>>, vector<1x500xf32>
    %5 = vector.broadcast %4 : vector<1x500xf32> to vector<16x500xf32>
    %6 = arith.addf %3, %5 : vector<16x500xf32>
    %7 = arith.negf %6 : vector<16x500xf32>
    %8 = math.exp %7 : vector<16x500xf32>
    %cst_5 = arith.constant 1.000000e+00 : f32
    %9 = vector.broadcast %cst_5 : f32 to vector<16x500xf32>
    %10 = arith.addf %9, %8 : vector<16x500xf32>
    %11 = arith.divf %9, %10 : vector<16x500xf32>
    %c0_6 = arith.constant 0 : index
    %c0_7 = arith.constant 0 : index
    %12 = vector.load %arg2[%c0_6, %c0_7] : memref<16x500xf32, #tpu.memory_space<vmem>>, vector<16x500xf32>
    %13 = arith.cmpf ogt, %11, %12 : vector<16x500xf32>
    %14 = arith.extui %13 : vector<16x500xi1> to vector<16x500xi32>
    %15 = arith.sitofp %14 : vector<16x500xi32> to vector<16x500xf32>
    %16 = arith.truncf %15 : vector<16x500xf32> to vector<16x500xbf16>
    %c0_8 = arith.constant 0 : index
    %c0_9 = arith.constant 0 : index
    %17 = vector.load %arg8[%c0_8, %c0_9] : memref<500x500xbf16, #tpu.memory_space<vmem>>, vector<500x500xbf16>
    %cst_10 = arith.constant dense<0.000000e+00> : vector<16x500xf32>
    %18 = tpu.matmul %16, %17, %cst_10 {dimension_numbers = #tpu.dot_dimension_numbers<[1], [0], [0], [1], [0, 0, 1, 1], [], []>} : vector<16x500xbf16>, vector<500x500xbf16>, vector<16x500xf32> -> vector<16x500xf32>
    %c0_11 = arith.constant 0 : index
    %c0_12 = arith.constant 0 : index
    %19 = vector.load %arg9[%c0_11, %c0_12] : memref<1x500xf32, #tpu.memory_space<vmem>>, vector<1x500xf32>
    %20 = vector.broadcast %19 : vector<1x500xf32> to vector<16x500xf32>
    %21 = arith.addf %18, %20 : vector<16x500xf32>
    %22 = arith.negf %21 : vector<16x500xf32>
    %23 = math.exp %22 : vector<16x500xf32>
    %cst_13 = arith.constant 1.000000e+00 : f32
    %24 = vector.broadcast %cst_13 : f32 to vector<16x500xf32>
    %25 = arith.addf %24, %23 : vector<16x500xf32>
    %26 = arith.divf %24, %25 : vector<16x500xf32>
    %c0_14 = arith.constant 0 : index
    %c0_15 = arith.constant 0 : index
    %27 = vector.load %arg3[%c0_14, %c0_15] : memref<16x500xf32, #tpu.memory_space<vmem>>, vector<16x500xf32>
    %28 = arith.cmpf ogt, %26, %27 : vector<16x500xf32>
    %29 = arith.extui %28 : vector<16x500xi1> to vector<16x500xi32>
    %30 = arith.sitofp %29 : vector<16x500xi32> to vector<16x500xf32>
    %31 = arith.truncf %30 : vector<16x500xf32> to vector<16x500xbf16>
    %c0_16 = arith.constant 0 : index
    %c0_17 = arith.constant 0 : index
    %32 = vector.load %arg11[%c0_16, %c0_17] : memref<500x2000xbf16, #tpu.memory_space<vmem>>, vector<500x2000xbf16>
    %cst_18 = arith.constant dense<0.000000e+00> : vector<16x2000xf32>
    %33 = tpu.matmul %31, %32, %cst_18 {dimension_numbers = #tpu.dot_dimension_numbers<[1], [0], [0], [1], [0, 0, 1, 1], [], []>} : vector<16x500xbf16>, vector<500x2000xbf16>, vector<16x2000xf32> -> vector<16x2000xf32>
    %c0_19 = arith.constant 0 : index
    %c0_20 = arith.constant 0 : index
    %34 = vector.load %arg12[%c0_19, %c0_20] : memref<1x2000xf32, #tpu.memory_space<vmem>>, vector<1x2000xf32>
    %35 = vector.broadcast %34 : vector<1x2000xf32> to vector<16x2000xf32>
    %36 = arith.addf %33, %35 : vector<16x2000xf32>
    %37 = arith.negf %36 : vector<16x2000xf32>
    %38 = math.exp %37 : vector<16x2000xf32>
    %cst_21 = arith.constant 1.000000e+00 : f32
    %39 = vector.broadcast %cst_21 : f32 to vector<16x2000xf32>
    %40 = arith.addf %39, %38 : vector<16x2000xf32>
    %41 = arith.divf %39, %40 : vector<16x2000xf32>
    %c0_22 = arith.constant 0 : index
    %c0_23 = arith.constant 0 : index
    %42 = vector.load %arg4[%c0_22, %c0_23] : memref<16x2000xf32, #tpu.memory_space<vmem>>, vector<16x2000xf32>
    %43 = arith.cmpf ogt, %41, %42 : vector<16x2000xf32>
    %44 = arith.extui %43 : vector<16x2000xi1> to vector<16x2000xi32>
    %45 = arith.sitofp %44 : vector<16x2000xi32> to vector<16x2000xf32>
    %46 = arith.truncf %45 : vector<16x2000xf32> to vector<16x2000xbf16>
    %c0_24 = arith.constant 0 : index
    %c0_25 = arith.constant 0 : index
    %47 = vector.load %arg11[%c0_24, %c0_25] : memref<500x2000xbf16, #tpu.memory_space<vmem>>, vector<500x2000xbf16>
    %cst_26 = arith.constant dense<0.000000e+00> : vector<16x500xf32>
    %48 = tpu.matmul %46, %47, %cst_26 {dimension_numbers = #tpu.dot_dimension_numbers<[1], [1], [0], [0], [0, 0, 1, 0], [], []>} : vector<16x2000xbf16>, vector<500x2000xbf16>, vector<16x500xf32> -> vector<16x500xf32>
    %c0_27 = arith.constant 0 : index
    %c0_28 = arith.constant 0 : index
    %49 = vector.load %arg13[%c0_27, %c0_28] : memref<1x500xf32, #tpu.memory_space<vmem>>, vector<1x500xf32>
    %50 = vector.broadcast %49 : vector<1x500xf32> to vector<16x500xf32>
    %51 = arith.addf %48, %50 : vector<16x500xf32>
    %52 = arith.negf %51 : vector<16x500xf32>
    %53 = math.exp %52 : vector<16x500xf32>
    %cst_29 = arith.constant 1.000000e+00 : f32
    %54 = vector.broadcast %cst_29 : f32 to vector<16x500xf32>
    %55 = arith.addf %54, %53 : vector<16x500xf32>
    %56 = arith.divf %54, %55 : vector<16x500xf32>
    %57 = arith.truncf %56 : vector<16x500xf32> to vector<16x500xbf16>
    %c0_30 = arith.constant 0 : index
    %c0_31 = arith.constant 0 : index
    %58 = vector.load %arg8[%c0_30, %c0_31] : memref<500x500xbf16, #tpu.memory_space<vmem>>, vector<500x500xbf16>
    %cst_32 = arith.constant dense<0.000000e+00> : vector<16x500xf32>
    %59 = tpu.matmul %57, %58, %cst_32 {dimension_numbers = #tpu.dot_dimension_numbers<[1], [1], [0], [0], [0, 0, 1, 0], [], []>} : vector<16x500xbf16>, vector<500x500xbf16>, vector<16x500xf32> -> vector<16x500xf32>
    %c0_33 = arith.constant 0 : index
    %c0_34 = arith.constant 0 : index
    %60 = vector.load %arg10[%c0_33, %c0_34] : memref<1x500xf32, #tpu.memory_space<vmem>>, vector<1x500xf32>
    %61 = vector.broadcast %60 : vector<1x500xf32> to vector<16x500xf32>
    %62 = arith.addf %59, %61 : vector<16x500xf32>
    %63 = arith.negf %62 : vector<16x500xf32>
    %64 = math.exp %63 : vector<16x500xf32>
    %cst_35 = arith.constant 1.000000e+00 : f32
    %65 = vector.broadcast %cst_35 : f32 to vector<16x500xf32>
    %66 = arith.addf %65, %64 : vector<16x500xf32>
    %67 = arith.divf %65, %66 : vector<16x500xf32>
    %68 = arith.truncf %67 : vector<16x500xf32> to vector<16x500xbf16>
    %c0_36 = arith.constant 0 : index
    %c0_37 = arith.constant 0 : index
    %69 = vector.load %arg5[%c0_36, %c0_37] : memref<896x500xbf16, #tpu.memory_space<vmem>>, vector<896x500xbf16>
    %cst_38 = arith.constant dense<0.000000e+00> : vector<16x896xf32>
    %70 = tpu.matmul %68, %69, %cst_38 {dimension_numbers = #tpu.dot_dimension_numbers<[1], [1], [0], [0], [0, 0, 1, 0], [], []>} : vector<16x500xbf16>, vector<896x500xbf16>, vector<16x896xf32> -> vector<16x896xf32>
    %c0_39 = arith.constant 0 : index
    %c0_40 = arith.constant 0 : index
    %71 = vector.load %arg7[%c0_39, %c0_40] : memref<1x896xf32, #tpu.memory_space<vmem>>, vector<1x896xf32>
    %72 = vector.broadcast %71 : vector<1x896xf32> to vector<16x896xf32>
    %73 = arith.addf %70, %72 : vector<16x896xf32>
    %74 = arith.negf %73 : vector<16x896xf32>
    %75 = math.exp %74 : vector<16x896xf32>
    %cst_41 = arith.constant 1.000000e+00 : f32
    %76 = vector.broadcast %cst_41 : f32 to vector<16x896xf32>
    %77 = arith.addf %76, %75 : vector<16x896xf32>
    %78 = arith.divf %76, %77 : vector<16x896xf32>
    %c0_42 = arith.constant 0 : index
    %c0_43 = arith.constant 0 : index
    %79 = vector.load %arg14[%c0_42, %c0_43] : memref<16x896xf32, #tpu.memory_space<vmem>>, vector<16x896xf32>
    tpu.vector_store %arg14[%c0_42, %c0_43], %78 {strides = array<i32>} : memref<16x896xf32, #tpu.memory_space<vmem>>, vector<16x896xf32>,
    return
  }
  func.func @transform_0(%arg0: i32) -> (i32, i32) {
    %c0_i32 = arith.constant 0 : i32
    %c0_i32_0 = arith.constant 0 : i32
    return %arg0, %c0_i32 : i32, i32
  }
  func.func @transform_1(%arg0: i32) -> (i32, i32) {
    %c0_i32 = arith.constant 0 : i32
    %c0_i32_0 = arith.constant 0 : i32
    return %arg0, %c0_i32 : i32, i32
  }
  func.func @transform_2(%arg0: i32) -> (i32, i32) {
    %c0_i32 = arith.constant 0 : i32
    %c0_i32_0 = arith.constant 0 : i32
    return %arg0, %c0_i32 : i32, i32
  }
  func.func @transform_3(%arg0: i32) -> (i32, i32) {
    %c0_i32 = arith.constant 0 : i32
    %c0_i32_0 = arith.constant 0 : i32
    return %arg0, %c0_i32 : i32, i32
  }
  func.func @transform_4(%arg0: i32) -> (i32, i32) {
    %c0_i32 = arith.constant 0 : i32
    %c0_i32_0 = arith.constant 0 : i32
    %c0_i32_1 = arith.constant 0 : i32
    return %c0_i32, %c0_i32_0 : i32, i32
  }
  func.func @transform_5(%arg0: i32) -> (i32, i32) {
    %c0_i32 = arith.constant 0 : i32
    %c0_i32_0 = arith.constant 0 : i32
    %c0_i32_1 = arith.constant 0 : i32
    return %c0_i32, %c0_i32_0 : i32, i32
  }
  func.func @transform_6(%arg0: i32) -> (i32, i32) {
    %c0_i32 = arith.constant 0 : i32
    %c0_i32_0 = arith.constant 0 : i32
    %c0_i32_1 = arith.constant 0 : i32
    return %c0_i32, %c0_i32_0 : i32, i32
  }
  func.func @transform_7(%arg0: i32) -> (i32, i32) {
    %c0_i32 = arith.constant 0 : i32
    %c0_i32_0 = arith.constant 0 : i32
    %c0_i32_1 = arith.constant 0 : i32
    return %c0_i32, %c0_i32_0 : i32, i32
  }
  func.func @transform_8(%arg0: i32) -> (i32, i32) {
    %c0_i32 = arith.constant 0 : i32
    %c0_i32_0 = arith.constant 0 : i32
    %c0_i32_1 = arith.constant 0 : i32
    return %c0_i32, %c0_i32_0 : i32, i32
  }
  func.func @transform_9(%arg0: i32) -> (i32, i32) {
    %c0_i32 = arith.constant 0 : i32
    %c0_i32_0 = arith.constant 0 : i32
    %c0_i32_1 = arith.constant 0 : i32
    return %c0_i32, %c0_i32_0 : i32, i32
  }
  func.func @transform_10(%arg0: i32) -> (i32, i32) {
    %c0_i32 = arith.constant 0 : i32
    %c0_i32_0 = arith.constant 0 : i32
    %c0_i32_1 = arith.constant 0 : i32
    return %c0_i32, %c0_i32_0 : i32, i32
  }
  func.func @transform_11(%arg0: i32) -> (i32, i32) {
    %c0_i32 = arith.constant 0 : i32
    %c0_i32_0 = arith.constant 0 : i32
    %c0_i32_1 = arith.constant 0 : i32
    return %c0_i32, %c0_i32_0 : i32, i32
  }
  func.func @transform_12(%arg0: i32) -> (i32, i32) {
    %c0_i32 = arith.constant 0 : i32
    %c0_i32_0 = arith.constant 0 : i32
    %c0_i32_1 = arith.constant 0 : i32
    return %c0_i32, %c0_i32_0 : i32, i32
  }
  func.func @transform_13(%arg0: i32) -> (i32, i32) {
    %c0_i32 = arith.constant 0 : i32
    %c0_i32_0 = arith.constant 0 : i32
    return %arg0, %c0_i32 : i32, i32
  }
}

</mosaic_0001>

<bundles_post_ra>
// kernel: tpu_custom_call.1
= control target key start
LH: loop header
LB: loop body
LE: loop exit
PB: predicated region body
PF: predicated region fallthrough
CT: control target
= control target key end

     0   :  { %s18269_s0 = inlined_call_operand.vmem [shape: f32[16,896], index: 0, kind: input, shape index: {}]   ;;  %s18270_s1 = inlined_call_operand.vmem [shape: f32[16,500], index: 1, kind: input, shape index: {}]   ;;  %s18271_s2 = inlined_call_operand.vmem [shape: f32[16,500], index: 2, kind: input, shape index: {}]   ;;  %s18272_s3 = inlined_call_operand.vmem [shape: f32[16,2000], index: 3, kind: input, shape index: {}]   ;;  %s18273_s4 = inlined_call_operand.vmem [shape: bf16[896,500], index: 4, kind: input, shape index: {}]   ;;  %s18274_s5 = inlined_call_operand.vmem [shape: f32[1,500], index: 5, kind: input, shape index: {}]   ;;  %s18275_s6 = inlined_call_operand.vmem [shape: f32[1,896], index: 6, kind: input, shape index: {}]   ;;  %s18276_s7 = inlined_call_operand.vmem [shape: bf16[500,500], index: 7, kind: input, shape index: {}]   ;;  %s18277_s8 = inlined_call_operand.vmem [shape: f32[1,500], index: 8, kind: input, shape index: {}]   ;;  %s18278_s9 = inlined_call_operand.vmem [shape: f32[1,500], index: 9, kind: input, shape index: {}]   ;;  %s18279_s10 = inlined_call_operand.vmem [shape: bf16[500,2000], index: 10, kind: input, shape index: {}]   ;;  %s18280_s11 = inlined_call_operand.vmem [shape: f32[1,2000], index: 11, kind: input, shape index: {}]   ;;  %s18281_s12 = inlined_call_operand.vmem [shape: f32[1,500], index: 12, kind: input, shape index: {}]   ;;  %s18282_s13 = inlined_call_operand.hbm [shape: f32[16,896], index: 13, kind: output, shape index: {}]  }
   0x1   :  { %v10466_v0 = vld [vmem:[%s18273_s4 + $0x4] ss:$16 sps:$4 sm:$0xff]   ;;  %v10470_v2 = vld [vmem:[%s18273_s4] ss:$16 sps:$4 sm:$0xff]   ;;  %v47_v46 = vld [vmem:[%s18269_s0 + $0x8] sm:$0xff] }
   0x2   :  { %v10468_v1 = vld [vmem:[%s18273_s4 + $0x204] ss:$16 sps:$4 sm:$0xff]   ;;  %1433 = vmatprep.subr.bf16.mxu1 %v10466_v0  ;;  %v10471_v3 = vld [vmem:[%s18273_s4 + $0x200] ss:$16 sps:$4 sm:$0xff]   ;;  %v49_v51 = vld [vmem:[%s18269_s0 + $0x18] sm:$0xff] }
   0x3   :  { %1476 = vmatprep.subr.bf16.mxu0 %v10468_v1  ;;  %v10472_v4 = vld [vmem:[%s18273_s4 + $0x24] ss:$16 sps:$4 sm:$0xff]   ;;  %1434 = vmatpush1.bf16.msra.mxu1 %v10470_v2  ;;  %v10476_v6 = vld [vmem:[%s18273_s4 + $0x20] ss:$16 sps:$4 sm:$0xff]  }
   0x4   :  { %1477 = vmatpush1.bf16.msra.mxu0 %v10471_v3  ;;  %v10474_v5 = vld [vmem:[%s18273_s4 + $0x224] ss:$16 sps:$4 sm:$0xff]   ;;  %1435 = vmatprep.subr.bf16.mxu1 %v10472_v4  ;;  %v10477_v7 = vld [vmem:[%s18273_s4 + $0x220] ss:$16 sps:$4 sm:$0xff]  }
   0x5   :  { %1478 = vmatprep.subr.bf16.mxu0 %v10474_v5  ;;  %v10478_v8 = vld [vmem:[%s18273_s4 + $0x44] ss:$16 sps:$4 sm:$0xff]   ;;  %v10482_v10 = vld [vmem:[%s18273_s4 + $0x40] ss:$16 sps:$4 sm:$0xff]  }
   0x6   :  { %v10480_v9 = vld [vmem:[%s18273_s4 + $0x244] ss:$16 sps:$4 sm:$0xff]   ;;  %v10483_v11 = vld [vmem:[%s18273_s4 + $0x240] ss:$16 sps:$4 sm:$0xff]  }
   0x7   :  { %1436 = vmatpush1.bf16.msra.mxu1 %v10476_v6  ;;  %v10484_v12 = vld [vmem:[%s18273_s4 + $0x64] ss:$16 sps:$4 sm:$0xff]   ;;  %v10488_v14 = vld [vmem:[%s18273_s4 + $0x60] ss:$16 sps:$4 sm:$0xff]  }
   0x8   :  { %1479 = vmatpush1.bf16.msra.mxu0 %v10477_v7  ;;  %1437 = vmatprep.subr.bf16.mxu1 %v10478_v8  ;;  %v10486_v13 = vld [vmem:[%s18273_s4 + $0x264] ss:$16 sps:$4 sm:$0xff]   ;;  %v10489_v15 = vld [vmem:[%s18273_s4 + $0x260] ss:$16 sps:$4 sm:$0xff]   ;;  %v53_v7 = vld [vmem:[%s18269_s0 + $0x38] sm:$0xff] }
   0x9   :  { %1480 = vmatprep.subr.bf16.mxu0 %v10480_v9  ;;  %v10490_v16 = vld [vmem:[%s18273_s4 + $0x84] ss:$16 sps:$4 sm:$0xff]   ;;  %v10494_v18 = vld [vmem:[%s18273_s4 + $0x80] ss:$16 sps:$4 sm:$0xff]  }
   0xa   :  { %v10492_v17 = vld [vmem:[%s18273_s4 + $0x284] ss:$16 sps:$4 sm:$0xff]   ;;  %v10495_v19 = vld [vmem:[%s18273_s4 + $0x280] ss:$16 sps:$4 sm:$0xff]  }
   0xb   :  { %1438 = vmatpush1.bf16.msra.mxu1 %v10482_v10  ;;  %v10496_v20 = vld [vmem:[%s18273_s4 + $0xa4] ss:$16 sps:$4 sm:$0xff]   ;;  %v10500_v22 = vld [vmem:[%s18273_s4 + $0xa0] ss:$16 sps:$4 sm:$0xff]   ;;  %v55_v10 = vld [vmem:[%s18269_s0 + $0x48] sm:$0xff] }
   0xc   :  { %1481 = vmatpush1.bf16.msra.mxu0 %v10483_v11  ;;  %1439 = vmatprep.subr.bf16.mxu1 %v10484_v12  ;;  %v10498_v21 = vld [vmem:[%s18273_s4 + $0x2a4] ss:$16 sps:$4 sm:$0xff]   ;;  %v10501_v23 = vld [vmem:[%s18273_s4 + $0x2a0] ss:$16 sps:$4 sm:$0xff]   ;;  %v10567_v11 = vld [vmem:[%s18273_s4 + $0xc] ss:$16 sps:$4 sm:$0xff]  }
   0xd   :  { %1482 = vmatprep.subr.bf16.mxu0 %v10486_v13  ;;  %v10502_v24 = vld [vmem:[%s18273_s4 + $0xc4] ss:$16 sps:$4 sm:$0xff]   ;;  %v10506_v26 = vld [vmem:[%s18273_s4 + $0xc0] ss:$16 sps:$4 sm:$0xff]  }
   0xe   :  { %v10504_v25 = vld [vmem:[%s18273_s4 + $0x2c4] ss:$16 sps:$4 sm:$0xff]   ;;  %v10507_v27 = vld [vmem:[%s18273_s4 + $0x2c0] ss:$16 sps:$4 sm:$0xff]  }
   0xf   :  { %1440 = vmatpush1.bf16.msra.mxu1 %v10488_v14  ;;  %v10508_v28 = vld [vmem:[%s18273_s4 + $0xe4] ss:$16 sps:$4 sm:$0xff]   ;;  %v10512_v30 = vld [vmem:[%s18273_s4 + $0xe0] ss:$16 sps:$4 sm:$0xff]   ;;  %v10565_v14 = vld [vmem:[%s18273_s4 + $0x8] ss:$16 sps:$4 sm:$0xff]  }
  0x10   :  { %1483 = vmatpush1.bf16.msra.mxu0 %v10489_v15  ;;  %1441 = vmatprep.subr.bf16.mxu1 %v10490_v16  ;;  %v10510_v29 = vld [vmem:[%s18273_s4 + $0x2e4] ss:$16 sps:$4 sm:$0xff]   ;;  %v10513_v31 = vld [vmem:[%s18273_s4 + $0x2e0] ss:$16 sps:$4 sm:$0xff]  }
  0x11   :  { %1484 = vmatprep.subr.bf16.mxu0 %v10492_v17  ;;  %v10514_v32 = vld [vmem:[%s18273_s4 + $0x104] ss:$16 sps:$4 sm:$0xff]   ;;  %v10518_v34 = vld [vmem:[%s18273_s4 + $0x100] ss:$16 sps:$4 sm:$0xff]   ;;  %v10573_v17 = vld [vmem:[%s18273_s4 + $0x2c] ss:$16 sps:$4 sm:$0xff]  }
  0x12   :  { %v10516_v33 = vld [vmem:[%s18273_s4 + $0x304] ss:$16 sps:$4 sm:$0xff]   ;;  %v10519_v35 = vld [vmem:[%s18273_s4 + $0x300] ss:$16 sps:$4 sm:$0xff]  }
  0x13   :  { %1442 = vmatpush1.bf16.msra.mxu1 %v10494_v18  ;;  %v10520_v36 = vld [vmem:[%s18273_s4 + $0x124] ss:$16 sps:$4 sm:$0xff]   ;;  %v10524_v38 = vld [vmem:[%s18273_s4 + $0x120] ss:$16 sps:$4 sm:$0xff]  }
  0x14   :  { %1485 = vmatpush1.bf16.msra.mxu0 %v10495_v19  ;;  %1443 = vmatprep.subr.bf16.mxu1 %v10496_v20  ;;  %v10522_v37 = vld [vmem:[%s18273_s4 + $0x324] ss:$16 sps:$4 sm:$0xff]   ;;  %v10525_v39 = vld [vmem:[%s18273_s4 + $0x320] ss:$16 sps:$4 sm:$0xff]   ;;  %v10571_v19 = vld [vmem:[%s18273_s4 + $0x28] ss:$16 sps:$4 sm:$0xff]  }
  0x15   :  { %1486 = vmatprep.subr.bf16.mxu0 %v10498_v21  ;;  %v10526_v40 = vld [vmem:[%s18273_s4 + $0x144] ss:$16 sps:$4 sm:$0xff]   ;;  %v10530_v42 = vld [vmem:[%s18273_s4 + $0x140] ss:$16 sps:$4 sm:$0xff]   ;;  %v10579_v21 = vld [vmem:[%s18273_s4 + $0x4c] ss:$16 sps:$4 sm:$0xff]  }
  0x16   :  { %v10528_v41 = vld [vmem:[%s18273_s4 + $0x344] ss:$16 sps:$4 sm:$0xff]   ;;  %v10531_v43 = vld [vmem:[%s18273_s4 + $0x340] ss:$16 sps:$4 sm:$0xff]  }
  0x17   :  { %1444 = vmatpush1.bf16.msra.mxu1 %v10500_v22  ;;  %v10532_v44 = vld [vmem:[%s18273_s4 + $0x164] ss:$16 sps:$4 sm:$0xff]   ;;  %v10536_v47 = vld [vmem:[%s18273_s4 + $0x160] ss:$16 sps:$4 sm:$0xff]  }
  0x18   :  { %1487 = vmatpush1.bf16.msra.mxu0 %v10501_v23  ;;  %1445 = vmatprep.subr.bf16.mxu1 %v10502_v24  ;;  %v10534_v45 = vld [vmem:[%s18273_s4 + $0x364] ss:$16 sps:$4 sm:$0xff]   ;;  %v10537_v48 = vld [vmem:[%s18273_s4 + $0x360] ss:$16 sps:$4 sm:$0xff]   ;;  %v10577_v23 = vld [vmem:[%s18273_s4 + $0x48] ss:$16 sps:$4 sm:$0xff]  }
  0x19   :  { %1488 = vmatprep.subr.bf16.mxu0 %v10504_v25  ;;  %v54_v49 = vld [vmem:[%s18269_s0 + $0x40] sm:$0xff]  ;;  %v56_v52 = vld [vmem:[%s18269_s0 + $0x50] sm:$0xff]  ;;  %v10585_v25 = vld [vmem:[%s18273_s4 + $0x6c] ss:$16 sps:$4 sm:$0xff]  }
  0x1a   :  { %v11918_v50 = vpack.c.bf16 %v54_v49, %v47_v46  ;;  %v10538_v53 = vld [vmem:[%s18273_s4 + $0x184] ss:$16 sps:$4 sm:$0xff]   ;;  %v11932_v55 = vpack.c.bf16 %v56_v52, %v49_v51  ;;  %v10542_v56 = vld [vmem:[%s18273_s4 + $0x180] ss:$16 sps:$4 sm:$0xff]   ;;  %v10607_v46 = vld [vmem:[%s18273_s4 + $0xe8] ss:$16 sps:$4 sm:$0xff]  }
  0x1b   :  { %1446 = vmatpush1.bf16.msra.mxu1 %v10506_v26  ;;  %v10540_v54 = vld [vmem:[%s18273_s4 + $0x384] ss:$16 sps:$4 sm:$0xff]   ;;  %v10543_v57 = vld [vmem:[%s18273_s4 + $0x380] ss:$16 sps:$4 sm:$0xff]   ;;  %v10621_v52 = vld [vmem:[%s18273_s4 + $0x12c] ss:$16 sps:$4 sm:$0xff]  }
  0x1c   :  { %1489 = vmatpush1.bf16.msra.mxu0 %v10507_v27  ;;  %1447 = vmatprep.subr.bf16.mxu1 %v10508_v28  ;;  %v10544_v58 = vld [vmem:[%s18273_s4 + $0x1a4] ss:$16 sps:$4 sm:$0xff]   ;;  %v10548_v60 = vld [vmem:[%s18273_s4 + $0x1a0] ss:$16 sps:$4 sm:$0xff]   ;;  %v10583_v27 = vld [vmem:[%s18273_s4 + $0x68] ss:$16 sps:$4 sm:$0xff]  }
  0x1d   :  { %1490 = vmatprep.subr.bf16.mxu0 %v10510_v29  ;;  %1465 = vmatprep.mubr.bf16.mxu1 %v11918_v50  ;;  %v10546_v59 = vld [vmem:[%s18273_s4 + $0x3a4] ss:$16 sps:$4 sm:$0xff]   ;;  %v10549_v61 = vld [vmem:[%s18273_s4 + $0x3a0] ss:$16 sps:$4 sm:$0xff]   ;;  %v10591_v29 = vld [vmem:[%s18273_s4 + $0x8c] ss:$16 sps:$4 sm:$0xff]  }
  0x1e   :  { %1508 = vmatprep.mubr.bf16.mxu0 %v11932_v55  ;;  %v10550_v62 = vld [vmem:[%s18273_s4 + $0x1c4] ss:$16 sps:$4 sm:$0xff]   ;;  %v10554_v0 = vld [vmem:[%s18273_s4 + $0x1c0] ss:$16 sps:$4 sm:$0xff]  }
  0x1f   :  { %1448 = vmatpush1.bf16.msra.mxu1 %v10512_v30  ;;  %v10552_v63 = vld [vmem:[%s18273_s4 + $0x3c4] ss:$16 sps:$4 sm:$0xff]   ;;  %v10555_v1 = vld [vmem:[%s18273_s4 + $0x3c0] ss:$16 sps:$4 sm:$0xff]  }
  0x20   :  { %1491 = vmatpush1.bf16.msra.mxu0 %v10513_v31  ;;  %1449 = vmatprep.subr.bf16.mxu1 %v10514_v32  ;;  %v10556_v2 = vld [vmem:[%s18273_s4 + $0x1e4] ss:$16 sps:$4 sm:$0xff]   ;;  %v10560_v4 = vld [vmem:[%s18273_s4 + $0x1e0] ss:$16 sps:$4 sm:$0xff]   ;;  %v10589_v31 = vld [vmem:[%s18273_s4 + $0x88] ss:$16 sps:$4 sm:$0xff]  }
  0x21   :  { %1492 = vmatprep.subr.bf16.mxu0 %v10516_v33  ;;  %v10558_v3 = vld [vmem:[%s18273_s4 + $0x3e4] ss:$16 sps:$4 sm:$0xff]   ;;  %v10561_v5 = vld [vmem:[%s18273_s4 + $0x3e0] ss:$16 sps:$4 sm:$0xff]   ;;  %v10597_v33 = vld [vmem:[%s18273_s4 + $0xac] ss:$16 sps:$4 sm:$0xff]  }
  0x22   :  { %v46_v6 = vld [vmem:[%s18269_s0] sm:$0xff]  ;;  %v48_v9 = vld [vmem:[%s18269_s0 + $0x10] sm:$0xff] }
  0x23   :  { %1450 = vmatpush1.bf16.msra.mxu1 %v10518_v34  ;;  %v10564_v8 = vld [vmem:[%s18273_s4 + $0x404] ss:$16 sps:$4 sm:$0xff]   ;;  %v11996_v12 = vpack.c.bf16 %v53_v7, %v46_v6  ;;  %v10562_v13 = vld [vmem:[%s18273_s4 + $0x400] ss:$16 sps:$4 sm:$0xff]   ;;  %v12004_v15 = vpack.c.bf16 %v55_v10, %v48_v9  ;;  %v10643_v7 = vld [vmem:[%s18273_s4 + $0x1a8] ss:$16 sps:$4 sm:$0xff]  }
  0x24   :  { %1493 = vmatpush1.bf16.msra.mxu0 %v10519_v35  ;;  %1451 = vmatprep.subr.bf16.mxu1 %v10520_v36  ;;  %v10570_v16 = vld [vmem:[%s18273_s4 + $0x424] ss:$16 sps:$4 sm:$0xff]   ;;  %v10568_v18 = vld [vmem:[%s18273_s4 + $0x420] ss:$16 sps:$4 sm:$0xff]   ;;  %v10595_v35 = vld [vmem:[%s18273_s4 + $0xa8] ss:$16 sps:$4 sm:$0xff]  }
  0x25   :  { %1494 = vmatprep.subr.bf16.mxu0 %v10522_v37  ;;  %v10576_v20 = vld [vmem:[%s18273_s4 + $0x444] ss:$16 sps:$4 sm:$0xff]   ;;  %v10574_v22 = vld [vmem:[%s18273_s4 + $0x440] ss:$16 sps:$4 sm:$0xff]   ;;  %v10603_v37 = vld [vmem:[%s18273_s4 + $0xcc] ss:$16 sps:$4 sm:$0xff]  }
  0x26   :  { %v10582_v24 = vld [vmem:[%s18273_s4 + $0x464] ss:$16 sps:$4 sm:$0xff]   ;;  %v10580_v26 = vld [vmem:[%s18273_s4 + $0x460] ss:$16 sps:$4 sm:$0xff]   ;;  %v10651_v9 = vld [vmem:[%s18273_s4 + $0x1cc] ss:$16 sps:$4 sm:$0xff]  }
  0x27   :  { %1452 = vmatpush1.bf16.msra.mxu1 %v10524_v38  ;;  %v10588_v28 = vld [vmem:[%s18273_s4 + $0x484] ss:$16 sps:$4 sm:$0xff]   ;;  %v10586_v30 = vld [vmem:[%s18273_s4 + $0x480] ss:$16 sps:$4 sm:$0xff]  }
  0x28   :  { %1495 = vmatpush1.bf16.msra.mxu0 %v10525_v39  ;;  %1453 = vmatprep.subr.bf16.mxu1 %v10526_v40  ;;  %v10594_v32 = vld [vmem:[%s18273_s4 + $0x4a4] ss:$16 sps:$4 sm:$0xff]   ;;  %v10592_v34 = vld [vmem:[%s18273_s4 + $0x4a0] ss:$16 sps:$4 sm:$0xff]   ;;  %v10601_v39 = vld [vmem:[%s18273_s4 + $0xc8] ss:$16 sps:$4 sm:$0xff]  }
  0x29   :  { %1496 = vmatprep.subr.bf16.mxu0 %v10528_v41  ;;  %v10600_v36 = vld [vmem:[%s18273_s4 + $0x4c4] ss:$16 sps:$4 sm:$0xff]   ;;  %v10598_v38 = vld [vmem:[%s18273_s4 + $0x4c0] ss:$16 sps:$4 sm:$0xff]   ;;  %v51_v40 = vld [vmem:[%s18269_s0 + $0x28] sm:$0xff] }
  0x2a   :  { %v58_v41 = vld [vmem:[%s18269_s0 + $0x60] sm:$0xff] }
  0x2b   :  { %1454 = vmatpush1.bf16.msra.mxu1 %v10530_v42  ;;  %v10606_v42 = vld [vmem:[%s18273_s4 + $0x4e4] ss:$16 sps:$4 sm:$0xff]   ;;  %v10610_v49 = vld [vmem:[%s18273_s4 + $0x500] ss:$16 sps:$4 sm:$0xff]  }
  0x2c   :  { %1497 = vmatpush1.bf16.msra.mxu0 %v10531_v43  ;;  %1455 = vmatprep.subr.bf16.mxu1 %v10532_v44  ;;  %v10609_v43 = vld [vmem:[%s18273_s4 + $0xec] ss:$16 sps:$4 sm:$0xff]   ;;  %v12093_v44 = vpack.c.bf16 %v58_v41, %v51_v40  ;;  %v10618_v51 = vld [vmem:[%s18273_s4 + $0x524] ss:$16 sps:$4 sm:$0xff]   ;;  %v10640_v6 = vld [vmem:[%s18273_s4 + $0x5a0] ss:$16 sps:$4 sm:$0xff]  }
  0x2d   :  { %1498 = vmatprep.subr.bf16.mxu0 %v10534_v45  ;;  %v10604_v45 = vld [vmem:[%s18273_s4 + $0x4e0] ss:$16 sps:$4 sm:$0xff]   ;;  %v10690_v40 = vld [vmem:[%s18273_s4 + $0x6a4] ss:$16 sps:$4 sm:$0xff]   ;;  %v10693_v41 = vld [vmem:[%s18273_s4 + $0x2ac] ss:$16 sps:$4 sm:$0xff]  }
  0x2e   :  { %v10646_v10 = vld [vmem:[%s18273_s4 + $0x5c0] ss:$16 sps:$4 sm:$0xff]  }
  0x2f   :  { %1456 = vmatpush1.bf16.msra.mxu1 %v10536_v47  ;;  %v10612_v47 = vld [vmem:[%s18273_s4 + $0x504] ss:$16 sps:$4 sm:$0xff]  }
  0x30   :  { %1499 = vmatpush1.bf16.msra.mxu0 %v10537_v48  ;;  %1457 = vmatprep.subr.bf16.mxu1 %v10538_v53  ;;  %v10615_v48 = vld [vmem:[%s18273_s4 + $0x10c] ss:$16 sps:$4 sm:$0xff]   ;;  %v10616_v53 = vld [vmem:[%s18273_s4 + $0x520] ss:$16 sps:$4 sm:$0xff]  }
  0x31   :  { %1500 = vmatprep.subr.bf16.mxu0 %v10540_v54  ;;  %v10619_v54 = vld [vmem:[%s18273_s4 + $0x128] ss:$16 sps:$4 sm:$0xff]  }
  0x33   :  { %1458 = vmatpush1.bf16.msra.mxu1 %v10542_v56  ;;  %v10624_v56 = vld [vmem:[%s18273_s4 + $0x544] ss:$16 sps:$4 sm:$0xff]  }
  0x34   :  { %1501 = vmatpush1.bf16.msra.mxu0 %v10543_v57  ;;  %1459 = vmatprep.subr.bf16.mxu1 %v10544_v58  ;;  %v10627_v57 = vld [vmem:[%s18273_s4 + $0x14c] ss:$16 sps:$4 sm:$0xff]   ;;  %v10622_v58 = vld [vmem:[%s18273_s4 + $0x540] ss:$16 sps:$4 sm:$0xff]  }
  0x35   :  { %1502 = vmatprep.subr.bf16.mxu0 %v10546_v59  ;;  %v10625_v59 = vld [vmem:[%s18273_s4 + $0x148] ss:$16 sps:$4 sm:$0xff]  }
  0x37   :  { %1460 = vmatpush1.bf16.msra.mxu1 %v10548_v60  ;;  %v10630_v60 = vld [vmem:[%s18273_s4 + $0x564] ss:$16 sps:$4 sm:$0xff]  }
  0x38   :  { %1503 = vmatpush1.bf16.msra.mxu0 %v10549_v61  ;;  %1461 = vmatprep.subr.bf16.mxu1 %v10550_v62  ;;  %v10633_v61 = vld [vmem:[%s18273_s4 + $0x16c] ss:$16 sps:$4 sm:$0xff]   ;;  %v10628_v62 = vld [vmem:[%s18273_s4 + $0x560] ss:$16 sps:$4 sm:$0xff]  }
  0x39   :  { %1504 = vmatprep.subr.bf16.mxu0 %v10552_v63  ;;  %v10631_v63 = vld [vmem:[%s18273_s4 + $0x168] ss:$16 sps:$4 sm:$0xff]  }
  0x3b   :  { %1462 = vmatpush1.bf16.msra.mxu1 %v10554_v0  ;;  %v10636_v0 = vld [vmem:[%s18273_s4 + $0x584] ss:$16 sps:$4 sm:$0xff]  }
  0x3c   :  { %1505 = vmatpush1.bf16.msra.mxu0 %v10555_v1  ;;  %1463 = vmatprep.subr.bf16.mxu1 %v10556_v2  ;;  %v10639_v1 = vld [vmem:[%s18273_s4 + $0x18c] ss:$16 sps:$4 sm:$0xff]   ;;  %v10634_v2 = vld [vmem:[%s18273_s4 + $0x580] ss:$16 sps:$4 sm:$0xff]  }
  0x3d   :  { %1506 = vmatprep.subr.bf16.mxu0 %v10558_v3  ;;  %v10637_v3 = vld [vmem:[%s18273_s4 + $0x188] ss:$16 sps:$4 sm:$0xff]  }
  0x3f   :  { %1464 = vmatpush1.bf16.msra.mxu1 %v10560_v4  ;;  %v10642_v4 = vld [vmem:[%s18273_s4 + $0x5a4] ss:$16 sps:$4 sm:$0xff]  }
  0x40   :  { %1507 = vmatpush1.bf16.msra.mxu0 %v10561_v5  ;;  %1605 = vmatprep.subr.bf16.mxu1 %v10567_v11  ;;  %v10645_v5 = vld [vmem:[%s18273_s4 + $0x1ac] ss:$16 sps:$4 sm:$0xff]   ;;  %v10649_v11 = vld [vmem:[%s18273_s4 + $0x1c8] ss:$16 sps:$4 sm:$0xff]  }
  0x41   :  { %1519 = vmatprep.subr.bf16.mxu0 %v10564_v8  ;;  %v10648_v8 = vld [vmem:[%s18273_s4 + $0x5c4] ss:$16 sps:$4 sm:$0xff]  }
  0x42   :  { %1466 = vmatmul.mubr.bf16.vlgmr.msra.gmra.mrb[0].mxu1 %v11996_v12 }
  0x43   :  { %1509 = vmatmul.mubr.bf16.vlgmr.msra.gmra.mrb[0].mxu0 %v12004_v15  ;;  %1606 = vmatpush1.bf16.msra.mxu1 %v10565_v14  ;;  %v10657_v14 = vld [vmem:[%s18273_s4 + $0x1ec] ss:$16 sps:$4 sm:$0xff]  }
  0x44   :  { %1520 = vmatpush1.bf16.msra.mxu0 %v10562_v13  ;;  %1607 = vmatprep.subr.bf16.mxu1 %v10573_v17  ;;  %v10654_v13 = vld [vmem:[%s18273_s4 + $0x5e4] ss:$16 sps:$4 sm:$0xff]   ;;  %v10655_v17 = vld [vmem:[%s18273_s4 + $0x1e8] ss:$16 sps:$4 sm:$0xff]  }
  0x45   :  { %1521 = vmatprep.subr.bf16.mxu0 %v10570_v16  ;;  %1637 = vmatprep.mubr.bf16.mxu1 %v11918_v50  ;;  %v10613_v50 = vld [vmem:[%s18273_s4 + $0x108] ss:$16 sps:$4 sm:$0xff]   ;;  %v10652_v16 = vld [vmem:[%s18273_s4 + $0x5e0] ss:$16 sps:$4 sm:$0xff]  }
  0x46   :  { %1551 = vmatprep.mubr.bf16.mxu0 %v12093_v44 }
  0x47   :  { %1608 = vmatpush1.bf16.msra.mxu1 %v10571_v19  ;;  %v57_v19 = vld [vmem:[%s18269_s0 + $0x58] sm:$0xff] }
  0x48   :  { %1522 = vmatpush1.bf16.msra.mxu0 %v10568_v18  ;;  %1609 = vmatprep.subr.bf16.mxu1 %v10579_v21  ;;  %v50_v18 = vld [vmem:[%s18269_s0 + $0x20] sm:$0xff]  ;;  %v10663_v21 = vld [vmem:[%s18273_s4 + $0x20c] ss:$16 sps:$4 sm:$0xff]  }
  0x49   :  { %1523 = vmatprep.subr.bf16.mxu0 %v10576_v20  ;;  %v10660_v20 = vld [vmem:[%s18273_s4 + $0x604] ss:$16 sps:$4 sm:$0xff]  }
  0x4b   :  { %1610 = vmatpush1.bf16.msra.mxu1 %v10577_v23  ;;  %v10658_v23 = vld [vmem:[%s18273_s4 + $0x600] ss:$16 sps:$4 sm:$0xff]  }
  0x4c   :  { %1524 = vmatpush1.bf16.msra.mxu0 %v10574_v22  ;;  %1611 = vmatprep.subr.bf16.mxu1 %v10585_v25  ;;  %v12210_v22 = vpack.c.bf16 %v57_v19, %v50_v18  ;;  %v10666_v25 = vld [vmem:[%s18273_s4 + $0x624] ss:$16 sps:$4 sm:$0xff]   ;;  %v10832_v19 = vld [vmem:[%s18276_s7 + $0xa0] ss:$16 sps:$4 sm:$0xff]  }
  0x4d   :  { %1525 = vmatprep.subr.bf16.mxu0 %v10582_v24  ;;  %v10661_v24 = vld [vmem:[%s18273_s4 + $0x208] ss:$16 sps:$4 sm:$0xff]   ;;  %v10834_v18 = vld [vmem:[%s18276_s7 + $0xa4] ss:$16 sps:$4 sm:$0xff]  }
  0x4f   :  { %1612 = vmatpush1.bf16.msra.mxu1 %v10583_v27  ;;  %v10664_v27 = vld [vmem:[%s18273_s4 + $0x620] ss:$16 sps:$4 sm:$0xff]  }
  0x50   :  { %1526 = vmatpush1.bf16.msra.mxu0 %v10580_v26  ;;  %1613 = vmatprep.subr.bf16.mxu1 %v10591_v29  ;;  %v10669_v26 = vld [vmem:[%s18273_s4 + $0x22c] ss:$16 sps:$4 sm:$0xff]   ;;  %v10672_v29 = vld [vmem:[%s18273_s4 + $0x644] ss:$16 sps:$4 sm:$0xff]  }
  0x51   :  { %1527 = vmatprep.subr.bf16.mxu0 %v10588_v28  ;;  %v10667_v28 = vld [vmem:[%s18273_s4 + $0x228] ss:$16 sps:$4 sm:$0xff]  }
  0x53   :  { %1614 = vmatpush1.bf16.msra.mxu1 %v10589_v31  ;;  %v10670_v31 = vld [vmem:[%s18273_s4 + $0x640] ss:$16 sps:$4 sm:$0xff]  }
  0x54   :  { %1528 = vmatpush1.bf16.msra.mxu0 %v10586_v30  ;;  %1615 = vmatprep.subr.bf16.mxu1 %v10597_v33  ;;  %v11692_v30 = vmov 0   ;;  %v10678_v33 = vld [vmem:[%s18273_s4 + $0x664] ss:$16 sps:$4 sm:$0xff]  }
  0x55   :  { %1529 = vmatprep.subr.bf16.mxu0 %v10594_v32  ;;  %v10673_v32 = vld [vmem:[%s18273_s4 + $0x248] ss:$16 sps:$4 sm:$0xff]  }
  0x57   :  { %1616 = vmatpush1.bf16.msra.mxu1 %v10595_v35  ;;  %v10679_v35 = vld [vmem:[%s18273_s4 + $0x268] ss:$16 sps:$4 sm:$0xff]  }
  0x58   :  { %1530 = vmatpush1.bf16.msra.mxu0 %v10592_v34  ;;  %1617 = vmatprep.subr.bf16.mxu1 %v10603_v37  ;;  %v10676_v34 = vld [vmem:[%s18273_s4 + $0x660] ss:$16 sps:$4 sm:$0xff]   ;;  %v10687_v37 = vld [vmem:[%s18273_s4 + $0x28c] ss:$16 sps:$4 sm:$0xff]  }
  0x59   :  { %1531 = vmatprep.subr.bf16.mxu0 %v10600_v36  ;;  %v10684_v36 = vld [vmem:[%s18273_s4 + $0x684] ss:$16 sps:$4 sm:$0xff]  }
  0x5b   :  { %1618 = vmatpush1.bf16.msra.mxu1 %v10601_v39  ;;  %v10685_v39 = vld [vmem:[%s18273_s4 + $0x288] ss:$16 sps:$4 sm:$0xff]  }
  0x5c   :  { %1532 = vmatpush1.bf16.msra.mxu0 %v10598_v38  ;;  %1619 = vmatprep.subr.bf16.mxu1 %v10609_v43  ;;  %v10682_v38 = vld [vmem:[%s18273_s4 + $0x680] ss:$16 sps:$4 sm:$0xff]   ;;  %v10691_v43 = vld [vmem:[%s18273_s4 + $0x2a8] ss:$16 sps:$4 sm:$0xff]  }
  0x5d   :  { %1533 = vmatprep.subr.bf16.mxu0 %v10606_v42  ;;  %v10688_v42 = vld [vmem:[%s18273_s4 + $0x6a0] ss:$16 sps:$4 sm:$0xff]  }
  0x5f   :  { %1620 = vmatpush1.bf16.msra.mxu1 %v10607_v46  ;;  %v10699_v46 = vld [vmem:[%s18273_s4 + $0x2cc] ss:$16 sps:$4 sm:$0xff]  }
  0x60   :  { %1534 = vmatpush1.bf16.msra.mxu0 %v10604_v45  ;;  %1621 = vmatprep.subr.bf16.mxu1 %v10615_v48  ;;  %v10696_v45 = vld [vmem:[%s18273_s4 + $0x6c4] ss:$16 sps:$4 sm:$0xff]   ;;  %v10697_v48 = vld [vmem:[%s18273_s4 + $0x2c8] ss:$16 sps:$4 sm:$0xff]  }
  0x61   :  { %1535 = vmatprep.subr.bf16.mxu0 %v10612_v47  ;;  %v10694_v47 = vld [vmem:[%s18273_s4 + $0x6c0] ss:$16 sps:$4 sm:$0xff]  }
  0x63   :  { %1622 = vmatpush1.bf16.msra.mxu1 %v10613_v50  ;;  %v10705_v50 = vld [vmem:[%s18273_s4 + $0x2ec] ss:$16 sps:$4 sm:$0xff]  }
  0x64   :  { %1536 = vmatpush1.bf16.msra.mxu0 %v10610_v49  ;;  %1623 = vmatprep.subr.bf16.mxu1 %v10621_v52  ;;  %v10702_v49 = vld [vmem:[%s18273_s4 + $0x6e4] ss:$16 sps:$4 sm:$0xff]   ;;  %v10703_v52 = vld [vmem:[%s18273_s4 + $0x2e8] ss:$16 sps:$4 sm:$0xff]  }
  0x65   :  { %1537 = vmatprep.subr.bf16.mxu0 %v10618_v51  ;;  %v10700_v51 = vld [vmem:[%s18273_s4 + $0x6e0] ss:$16 sps:$4 sm:$0xff]  }
  0x67   :  { %1624 = vmatpush1.bf16.msra.mxu1 %v10619_v54  ;;  %v59_v54 = vld [vmem:[%s18269_s0 + $0x68] sm:$0xff] }
  0x68   :  { %1538 = vmatpush1.bf16.msra.mxu0 %v10616_v53  ;;  %1625 = vmatprep.subr.bf16.mxu1 %v10627_v57  ;;  %v52_v53 = vld [vmem:[%s18269_s0 + $0x30] sm:$0xff]  ;;  %v10706_v57 = vld [vmem:[%s18273_s4 + $0x308] ss:$16 sps:$4 sm:$0xff]  }
  0x69   :  { %1539 = vmatprep.subr.bf16.mxu0 %v10624_v56  ;;  %v10708_v56 = vld [vmem:[%s18273_s4 + $0x30c] ss:$16 sps:$4 sm:$0xff]  }
  0x6b   :  { %1626 = vmatpush1.bf16.msra.mxu1 %v10625_v59  ;;  %v10711_v59 = vld [vmem:[%s18273_s4 + $0x32c] ss:$16 sps:$4 sm:$0xff]  }
  0x6c   :  { %1540 = vmatpush1.bf16.msra.mxu0 %v10622_v58  ;;  %1627 = vmatprep.subr.bf16.mxu1 %v10633_v61  ;;  %v12318_v58 = vpack.c.bf16 %v59_v54, %v52_v53  ;;  %v10804_v61 = vld [vmem:[%s18276_s7 + $0x4] ss:$16 sps:$4 sm:$0xff]  }
  0x6d   :  { %1541 = vmatprep.subr.bf16.mxu0 %v10630_v60  ;;  %v10802_v60 = vld [vmem:[%s18276_s7] ss:$16 sps:$4 sm:$0xff]  }
  0x6f   :  { %1628 = vmatpush1.bf16.msra.mxu1 %v10631_v63  ;;  %v10810_v63 = vld [vmem:[%s18276_s7 + $0x24] ss:$16 sps:$4 sm:$0xff]  }
  0x70   :  { %1542 = vmatpush1.bf16.msra.mxu0 %v10628_v62  ;;  %1629 = vmatprep.subr.bf16.mxu1 %v10639_v1  ;;  %v10709_v62 = vld [vmem:[%s18273_s4 + $0x328] ss:$16 sps:$4 sm:$0xff]   ;;  %v10808_v1 = vld [vmem:[%s18276_s7 + $0x20] ss:$16 sps:$4 sm:$0xff]  }
  0x71   :  { %1543 = vmatprep.subr.bf16.mxu0 %v10636_v0  ;;  %v10714_v0 = vld [vmem:[%s18273_s4 + $0x34c] ss:$16 sps:$4 sm:$0xff]  }
  0x73   :  { %1630 = vmatpush1.bf16.msra.mxu1 %v10637_v3  ;;  %v10717_v3 = vld [vmem:[%s18273_s4 + $0x36c] ss:$16 sps:$4 sm:$0xff]  }
  0x74   :  { %1544 = vmatpush1.bf16.msra.mxu0 %v10634_v2  ;;  %1631 = vmatprep.subr.bf16.mxu1 %v10645_v5  ;;  %v10712_v2 = vld [vmem:[%s18273_s4 + $0x348] ss:$16 sps:$4 sm:$0xff]   ;;  %v10814_v5 = vld [vmem:[%s18276_s7 + $0x40] ss:$16 sps:$4 sm:$0xff]  }
  0x75   :  { %1545 = vmatprep.subr.bf16.mxu0 %v10642_v4  ;;  %v10816_v4 = vld [vmem:[%s18276_s7 + $0x44] ss:$16 sps:$4 sm:$0xff]  }
  0x77   :  { %1632 = vmatpush1.bf16.msra.mxu1 %v10643_v7  ;;  %v10720_v7 = vld [vmem:[%s18273_s4 + $0x38c] ss:$16 sps:$4 sm:$0xff]  }
  0x78   :  { %1546 = vmatpush1.bf16.msra.mxu0 %v10640_v6  ;;  %1633 = vmatprep.subr.bf16.mxu1 %v10651_v9  ;;  %v10715_v6 = vld [vmem:[%s18273_s4 + $0x368] ss:$16 sps:$4 sm:$0xff]   ;;  %v10820_v9 = vld [vmem:[%s18276_s7 + $0x60] ss:$16 sps:$4 sm:$0xff]  }
  0x79   :  { %1547 = vmatprep.subr.bf16.mxu0 %v10648_v8  ;;  %v10822_v8 = vld [vmem:[%s18276_s7 + $0x64] ss:$16 sps:$4 sm:$0xff]  }
  0x7b   :  { %1634 = vmatpush1.bf16.msra.mxu1 %v10649_v11  ;;  %v10723_v11 = vld [vmem:[%s18273_s4 + $0x3ac] ss:$16 sps:$4 sm:$0xff]  }
  0x7c   :  { %1548 = vmatpush1.bf16.msra.mxu0 %v10646_v10  ;;  %1635 = vmatprep.subr.bf16.mxu1 %v10657_v14  ;;  %v10718_v10 = vld [vmem:[%s18273_s4 + $0x388] ss:$16 sps:$4 sm:$0xff]   ;;  %v10826_v14 = vld [vmem:[%s18276_s7 + $0x80] ss:$16 sps:$4 sm:$0xff]  }
  0x7d   :  { %1549 = vmatprep.subr.bf16.mxu0 %v10654_v13  ;;  %v10828_v13 = vld [vmem:[%s18276_s7 + $0x84] ss:$16 sps:$4 sm:$0xff]  }
  0x7f   :  { %1636 = vmatpush1.bf16.msra.mxu1 %v10655_v17  ;;  %v10726_v17 = vld [vmem:[%s18273_s4 + $0x3cc] ss:$16 sps:$4 sm:$0xff]  }
  0x80   :  { %1550 = vmatpush1.bf16.msra.mxu0 %v10652_v16  ;;  %1648 = vmatprep.subr.bf16.mxu1 %v10663_v21  ;;  %v10721_v16 = vld [vmem:[%s18273_s4 + $0x3a8] ss:$16 sps:$4 sm:$0xff]   ;;  %v10729_v21 = vld [vmem:[%s18273_s4 + $0x3ec] ss:$16 sps:$4 sm:$0xff]  }
  0x81   :  { %1562 = vmatprep.subr.bf16.mxu0 %v10660_v20  ;;  %v10724_v20 = vld [vmem:[%s18273_s4 + $0x3c8] ss:$16 sps:$4 sm:$0xff]  }
  0x82   :  { %1638 = vmatmul.mubr.bf16.vlgmr.msra.gmra.mrb[4].mxu1 %v11996_v12  ;;  %v10675_v12 = vld [vmem:[%s18273_s4 + $0x24c] ss:$16 sps:$4 sm:$0xff]  }
  0x83   :  { %1552 = vmatmul.mubr.bf16.vlgmr.msra.gmra.mrb[0].mxu0 %v12210_v22  ;;  %1649 = vmatpush1.bf16.msra.mxu1 %v10661_v24  ;;  %v10838_v24 = vld [vmem:[%s18276_s7 + $0xc0] ss:$16 sps:$4 sm:$0xff]  }
  0x84   :  { %1563 = vmatpush1.bf16.msra.mxu0 %v10658_v23  ;;  %1650 = vmatprep.subr.bf16.mxu1 %v10669_v26  ;;  %v10840_v23 = vld [vmem:[%s18276_s7 + $0xc4] ss:$16 sps:$4 sm:$0xff]   ;;  %v10732_v26 = vld [vmem:[%s18273_s4 + $0x40c] ss:$16 sps:$4 sm:$0xff]  }
  0x85   :  { %1564 = vmatprep.subr.bf16.mxu0 %v10666_v25  ;;  %1594 = vmatprep.mubr.bf16.mxu0 %v11692_v30  ;;  %v10727_v25 = vld [vmem:[%s18273_s4 + $0x3e8] ss:$16 sps:$4 sm:$0xff]  }
  0x86   :  { %1680 = vmatprep.mubr.bf16.mxu1 %v11932_v55  ;;  %v10681_v55 = vld [vmem:[%s18273_s4 + $0x26c] ss:$16 sps:$4 sm:$0xff]  }
  0x87   :  { %1651 = vmatpush1.bf16.msra.mxu1 %v10667_v28  ;;  %v10844_v28 = vld [vmem:[%s18276_s7 + $0xe0] ss:$16 sps:$4 sm:$0xff]  }
  0x88   :  { %1565 = vmatpush1.bf16.msra.mxu0 %v10664_v27  ;;  %1652 = vmatprep.subr.bf16.mxu1 %v10675_v12  ;;  %v10846_v27 = vld [vmem:[%s18276_s7 + $0xe4] ss:$16 sps:$4 sm:$0xff]   ;;  %v10735_v12 = vld [vmem:[%s18273_s4 + $0x42c] ss:$16 sps:$4 sm:$0xff]  }
  0x89   :  { %1566 = vmatprep.subr.bf16.mxu0 %v10672_v29  ;;  %v10730_v29 = vld [vmem:[%s18273_s4 + $0x408] ss:$16 sps:$4 sm:$0xff]  }
  0x8b   :  { %1653 = vmatpush1.bf16.msra.mxu1 %v10673_v32  ;;  %v10738_v32 = vld [vmem:[%s18273_s4 + $0x44c] ss:$16 sps:$4 sm:$0xff]  }
  0x8c   :  { %1567 = vmatpush1.bf16.msra.mxu0 %v10670_v31  ;;  %1654 = vmatprep.subr.bf16.mxu1 %v10681_v55  ;;  %v10733_v31 = vld [vmem:[%s18273_s4 + $0x428] ss:$16 sps:$4 sm:$0xff]   ;;  %v10741_v55 = vld [vmem:[%s18273_s4 + $0x46c] ss:$16 sps:$4 sm:$0xff]  }
  0x8d   :  { %1568 = vmatprep.subr.bf16.mxu0 %v10678_v33  ;;  %v10736_v33 = vld [vmem:[%s18273_s4 + $0x448] ss:$16 sps:$4 sm:$0xff]  }
  0x8f   :  { %1655 = vmatpush1.bf16.msra.mxu1 %v10679_v35 }
  0x90   :  { %1569 = vmatpush1.bf16.msra.mxu0 %v10676_v34  ;;  %1656 = vmatprep.subr.bf16.mxu1 %v10687_v37  ;;  %v10744_v34 = vld [vmem:[%s18273_s4 + $0x48c] ss:$16 sps:$4 sm:$0xff]  }
  0x91   :  { %1570 = vmatprep.subr.bf16.mxu0 %v10684_v36 }
  0x93   :  { %1657 = vmatpush1.bf16.msra.mxu1 %v10685_v39 }
  0x94   :  { %1571 = vmatpush1.bf16.msra.mxu0 %v10682_v38  ;;  %1658 = vmatprep.subr.bf16.mxu1 %v10693_v41 }
  0x95   :  { %1572 = vmatprep.subr.bf16.mxu0 %v10690_v40 }
  0x97   :  { %1659 = vmatpush1.bf16.msra.mxu1 %v10691_v43 }
  0x98   :  { %1573 = vmatpush1.bf16.msra.mxu0 %v10688_v42  ;;  %1660 = vmatprep.subr.bf16.mxu1 %v10699_v46 }
  0x99   :  { %1574 = vmatprep.subr.bf16.mxu0 %v10696_v45 }
  0x9b   :  { %1661 = vmatpush1.bf16.msra.mxu1 %v10697_v48 }
  0x9c   :  { %1575 = vmatpush1.bf16.msra.mxu0 %v10694_v47  ;;  %1662 = vmatprep.subr.bf16.mxu1 %v10705_v50 }
  0x9d   :  { %1576 = vmatprep.subr.bf16.mxu0 %v10702_v49 }
  0x9f   :  { %1663 = vmatpush1.bf16.msra.mxu1 %v10703_v52 }
  0xa0   :  { %1577 = vmatpush1.bf16.msra.mxu0 %v10700_v51  ;;  %1664 = vmatprep.subr.bf16.mxu1 %v10708_v56 }
  0xa1   :  { %2656 = vmatprep.subr.bf16.mxu0 %v10804_v61 }
  0xa3   :  { %1595 = vmatmul.mubr.bf16.vlgmr.msra.gmra.mrb[0].mxu0 %v12318_v58  ;;  %1665 = vmatpush1.bf16.msra.mxu1 %v10706_v57 }
  0xa4   :  { %1666 = vmatprep.subr.bf16.mxu1 %v10711_v59  ;;  %2657 = vmatpush1.bf16.msra.mxu0 %v10802_v60 }
  0xa5   :  { %2658 = vmatprep.subr.bf16.mxu0 %v10810_v63 }
  0xa7   :  { %1667 = vmatpush1.bf16.msra.mxu1 %v10709_v62 }
  0xa8   :  { %1668 = vmatprep.subr.bf16.mxu1 %v10714_v0  ;;  %2659 = vmatpush1.bf16.msra.mxu0 %v10808_v1 }
  0xa9   :  { %2660 = vmatprep.subr.bf16.mxu0 %v10816_v4 }
  0xab   :  { %1669 = vmatpush1.bf16.msra.mxu1 %v10712_v2 }
  0xac   :  { %1670 = vmatprep.subr.bf16.mxu1 %v10717_v3  ;;  %2661 = vmatpush1.bf16.msra.mxu0 %v10814_v5 }
  0xad   :  { %2662 = vmatprep.subr.bf16.mxu0 %v10822_v8 }
  0xaf   :  { %1671 = vmatpush1.bf16.msra.mxu1 %v10715_v6 }
  0xb0   :  { %1672 = vmatprep.subr.bf16.mxu1 %v10720_v7  ;;  %2663 = vmatpush1.bf16.msra.mxu0 %v10820_v9 }
  0xb1   :  { %2664 = vmatprep.subr.bf16.mxu0 %v10828_v13 }
  0xb3   :  { %1673 = vmatpush1.bf16.msra.mxu1 %v10718_v10 }
  0xb4   :  { %1674 = vmatprep.subr.bf16.mxu1 %v10723_v11  ;;  %2665 = vmatpush1.bf16.msra.mxu0 %v10826_v14 }
  0xb5   :  { %2666 = vmatprep.subr.bf16.mxu0 %v10834_v18 }
  0xb7   :  { %1675 = vmatpush1.bf16.msra.mxu1 %v10721_v16 }
  0xb8   :  { %1676 = vmatprep.subr.bf16.mxu1 %v10726_v17  ;;  %2667 = vmatpush1.bf16.msra.mxu0 %v10832_v19 }
  0xb9   :  { %2668 = vmatprep.subr.bf16.mxu0 %v10840_v23 }
  0xbb   :  { %1677 = vmatpush1.bf16.msra.mxu1 %v10724_v20 }
  0xbc   :  { %1678 = vmatprep.subr.bf16.mxu1 %v10729_v21  ;;  %2669 = vmatpush1.bf16.msra.mxu0 %v10838_v24 }
  0xbd   :  { %2670 = vmatprep.subr.bf16.mxu0 %v10846_v27 }
  0xbf   :  { %1679 = vmatpush1.bf16.msra.mxu1 %v10727_v25 }
  0xc0   :  { %1691 = vmatprep.subr.bf16.mxu1 %v10732_v26  ;;  %2671 = vmatpush1.bf16.msra.mxu0 %v10844_v28 }
  0xc2   :  { %1681 = vmatmul.mubr.bf16.vlgmr.msra.gmra.mrb[4].mxu1 %v12004_v15  ;;  %v10739_v15 = vld [vmem:[%s18273_s4 + $0x468] ss:$16 sps:$4 sm:$0xff]  }
  0xc3   :  { %1692 = vmatpush1.bf16.msra.mxu1 %v10730_v29  ;;  %1723 = vmatprep.mubr.bf16.mxu1 %v12093_v44 }
  0xc4   :  { %1693 = vmatprep.subr.bf16.mxu1 %v10735_v12 }
  0xc7   :  { %1694 = vmatpush1.bf16.msra.mxu1 %v10733_v31 }
  0xc8   :  { %1695 = vmatprep.subr.bf16.mxu1 %v10738_v32 }
  0xcb   :  { %1696 = vmatpush1.bf16.msra.mxu1 %v10736_v33 }
  0xcc   :  { %1697 = vmatprep.subr.bf16.mxu1 %v10741_v55 }
  0xcd   :  { %18 = vsyncpa [#allocation3], 0  ;;  %v10742_v44 = vld [vmem:[%s18273_s4 + $0x488] ss:$16 sps:$4 sm:$0xff]   ;;  %v10747_v35 = vld [vmem:[%s18273_s4 + $0x4ac] ss:$16 sps:$4 sm:$0xff]  }
  0xce   :  { %v10745_v36 = vld [vmem:[%s18273_s4 + $0x4a8] ss:$16 sps:$4 sm:$0xff]   ;;  %v10750_v37 = vld [vmem:[%s18273_s4 + $0x4cc] ss:$16 sps:$4 sm:$0xff]   ;;  %v10852_v56 = vld [vmem:[%s18276_s7 + $0x104] ss:$16 sps:$4 sm:$0xff]  }
  0xcf   :  { %1698 = vmatpush1.bf16.msra.mxu1 %v10739_v15  ;;  %v10748_v38 = vld [vmem:[%s18273_s4 + $0x4c8] ss:$16 sps:$4 sm:$0xff]   ;;  %v10753_v39 = vld [vmem:[%s18273_s4 + $0x4ec] ss:$16 sps:$4 sm:$0xff]   ;;  %v10850_v59 = vld [vmem:[%s18276_s7 + $0x100] ss:$16 sps:$4 sm:$0xff]   ;;  %2672 = vmatprep.subr.bf16.mxu0 %v10852_v56 }
  0xd0   :  { %1699 = vmatprep.subr.bf16.mxu1 %v10744_v34  ;;  %v10751_v40 = vld [vmem:[%s18273_s4 + $0x4e8] ss:$16 sps:$4 sm:$0xff]   ;;  %v10756_v41 = vld [vmem:[%s18273_s4 + $0x50c] ss:$16 sps:$4 sm:$0xff]   ;;  %2673 = vmatpush1.bf16.msra.mxu0 %v10850_v59  ;;  %v10858_v61 = vld [vmem:[%s18276_s7 + $0x124] ss:$16 sps:$4 sm:$0xff]  }
  0xd1   :  { %v10754_v42 = vld [vmem:[%s18273_s4 + $0x508] ss:$16 sps:$4 sm:$0xff]   ;;  %v10759_v43 = vld [vmem:[%s18273_s4 + $0x52c] ss:$16 sps:$4 sm:$0xff]   ;;  %v10856_v63 = vld [vmem:[%s18276_s7 + $0x120] ss:$16 sps:$4 sm:$0xff]   ;;  %2674 = vmatprep.subr.bf16.mxu0 %v10858_v61 }
  0xd2   :  { %v10757_v45 = vld [vmem:[%s18273_s4 + $0x528] ss:$16 sps:$4 sm:$0xff]   ;;  %v10762_v46 = vld [vmem:[%s18273_s4 + $0x54c] ss:$16 sps:$4 sm:$0xff]   ;;  %v10864_v1 = vld [vmem:[%s18276_s7 + $0x144] ss:$16 sps:$4 sm:$0xff]  }
  0xd3   :  { %1700 = vmatpush1.bf16.msra.mxu1 %v10742_v44  ;;  %v10760_v47 = vld [vmem:[%s18273_s4 + $0x548] ss:$16 sps:$4 sm:$0xff]   ;;  %v10765_v48 = vld [vmem:[%s18273_s4 + $0x56c] ss:$16 sps:$4 sm:$0xff]   ;;  %v10862_v3 = vld [vmem:[%s18276_s7 + $0x140] ss:$16 sps:$4 sm:$0xff]  }
  0xd4   :  { %1701 = vmatprep.subr.bf16.mxu1 %v10747_v35  ;;  %v10763_v49 = vld [vmem:[%s18273_s4 + $0x568] ss:$16 sps:$4 sm:$0xff]   ;;  %v10768_v50 = vld [vmem:[%s18273_s4 + $0x58c] ss:$16 sps:$4 sm:$0xff]   ;;  %2675 = vmatpush1.bf16.msra.mxu0 %v10856_v63  ;;  %v10870_v5 = vld [vmem:[%s18276_s7 + $0x164] ss:$16 sps:$4 sm:$0xff]  }
  0xd5   :  { %v10766_v51 = vld [vmem:[%s18273_s4 + $0x588] ss:$16 sps:$4 sm:$0xff]   ;;  %v10771_v52 = vld [vmem:[%s18273_s4 + $0x5ac] ss:$16 sps:$4 sm:$0xff]   ;;  %2676 = vmatprep.subr.bf16.mxu0 %v10864_v1  ;;  %v10868_v7 = vld [vmem:[%s18276_s7 + $0x160] ss:$16 sps:$4 sm:$0xff]  }
  0xd6   :  { %v10769_v53 = vld [vmem:[%s18273_s4 + $0x5a8] ss:$16 sps:$4 sm:$0xff]   ;;  %v10774_v54 = vld [vmem:[%s18273_s4 + $0x5cc] ss:$16 sps:$4 sm:$0xff]   ;;  %v10876_v8 = vld [vmem:[%s18276_s7 + $0x184] ss:$16 sps:$4 sm:$0xff]  }
  0xd7   :  { %1702 = vmatpush1.bf16.msra.mxu1 %v10745_v36  ;;  %v10772_v57 = vld [vmem:[%s18273_s4 + $0x5c8] ss:$16 sps:$4 sm:$0xff]   ;;  %v10777_v60 = vld [vmem:[%s18273_s4 + $0x5ec] ss:$16 sps:$4 sm:$0xff]   ;;  %v10874_v9 = vld [vmem:[%s18276_s7 + $0x180] ss:$16 sps:$4 sm:$0xff]  }
  0xd8   :  { %1703 = vmatprep.subr.bf16.mxu1 %v10750_v37  ;;  %v10775_v62 = vld [vmem:[%s18273_s4 + $0x5e8] ss:$16 sps:$4 sm:$0xff]   ;;  %v10780_v0 = vld [vmem:[%s18273_s4 + $0x60c] ss:$16 sps:$4 sm:$0xff]   ;;  %2677 = vmatpush1.bf16.msra.mxu0 %v10862_v3  ;;  %v10880_v11 = vld [vmem:[%s18276_s7 + $0x1a0] ss:$16 sps:$4 sm:$0xff]  }
  0xd9   :  { %v10778_v2 = vld [vmem:[%s18273_s4 + $0x608] ss:$16 sps:$4 sm:$0xff]   ;;  %v10783_v4 = vld [vmem:[%s18273_s4 + $0x62c] ss:$16 sps:$4 sm:$0xff]   ;;  %2678 = vmatprep.subr.bf16.mxu0 %v10870_v5  ;;  %v10882_v13 = vld [vmem:[%s18276_s7 + $0x1a4] ss:$16 sps:$4 sm:$0xff]  }
  0xda   :  { %v10781_v6 = vld [vmem:[%s18273_s4 + $0x628] ss:$16 sps:$4 sm:$0xff]   ;;  %v10789_v10 = vld [vmem:[%s18273_s4 + $0x66c] ss:$16 sps:$4 sm:$0xff]   ;;  %v10888_v16 = vld [vmem:[%s18276_s7 + $0x1c4] ss:$16 sps:$4 sm:$0xff]  }
  0xdb   :  { %1704 = vmatpush1.bf16.msra.mxu1 %v10748_v38  ;;  %v10787_v14 = vld [vmem:[%s18273_s4 + $0x668] ss:$16 sps:$4 sm:$0xff]   ;;  %v10792_v17 = vld [vmem:[%s18273_s4 + $0x68c] ss:$16 sps:$4 sm:$0xff]   ;;  %v10886_v18 = vld [vmem:[%s18276_s7 + $0x1c0] ss:$16 sps:$4 sm:$0xff]  }
  0xdc   :  { %1705 = vmatprep.subr.bf16.mxu1 %v10753_v39  ;;  %2679 = vmatpush1.bf16.msra.mxu0 %v10868_v7  ;;  %v10894_v19 = vld [vmem:[%s18276_s7 + $0x1e4] ss:$16 sps:$4 sm:$0xff]   ;;  %v10790_v20 = vld [vmem:[%s18273_s4 + $0x688] ss:$16 sps:$4 sm:$0xff]   ;;  %v10795_v21 = vld [vmem:[%s18273_s4 + $0x6ac] ss:$16 sps:$4 sm:$0xff]  }
  0xdd   :  { %2680 = vmatprep.subr.bf16.mxu0 %v10876_v8  ;;  %v10892_v23 = vld [vmem:[%s18276_s7 + $0x1e0] ss:$16 sps:$4 sm:$0xff]   ;;  %v10793_v24 = vld [vmem:[%s18273_s4 + $0x6a8] ss:$16 sps:$4 sm:$0xff]   ;;  %v10798_v25 = vld [vmem:[%s18273_s4 + $0x6cc] ss:$16 sps:$4 sm:$0xff]  }
  0xde   :  { %v10796_v29 = vld [vmem:[%s18273_s4 + $0x6c8] ss:$16 sps:$4 sm:$0xff]   ;;  %v10801_v31 = vld [vmem:[%s18273_s4 + $0x6ec] ss:$16 sps:$4 sm:$0xff]   ;;  %v10900_v32 = vld [vmem:[%s18276_s7 + $0x204] ss:$16 sps:$4 sm:$0xff]  }
  0xdf   :  { %1706 = vmatpush1.bf16.msra.mxu1 %v10751_v40  ;;  %v10799_v33 = vld [vmem:[%s18273_s4 + $0x6e8] ss:$16 sps:$4 sm:$0xff]   ;;  %v10807_v55 = vld [vmem:[%s18276_s7 + $0xc] ss:$16 sps:$4 sm:$0xff]   ;;  %v12726_v5 = vld [vmem:[%s18274_s5] sm:$0xf] }
  0xe0   :  { %1707 = vmatprep.subr.bf16.mxu1 %v10756_v41  ;;  %2681 = vmatpush1.bf16.msra.mxu0 %v10874_v9  ;;  %v10805_v15 = vld [vmem:[%s18276_s7 + $0x8] ss:$16 sps:$4 sm:$0xff]   ;;  %v10813_v34 = vld [vmem:[%s18276_s7 + $0x2c] ss:$16 sps:$4 sm:$0xff]   ;;  %vm2643_vm6 = vcmask 1041408   ;;  %vm18776_vm12 = vcmask 949248  }
  0xe1   :  { %2682 = vmatprep.subr.bf16.mxu0 %v10882_v13  ;;  %v10811_v44 = vld [vmem:[%s18276_s7 + $0x28] ss:$16 sps:$4 sm:$0xff]   ;;  %v10819_v35 = vld [vmem:[%s18276_s7 + $0x4c] ss:$16 sps:$4 sm:$0xff]  }
  0xe2   :  { %v10817_v36 = vld [vmem:[%s18276_s7 + $0x48] ss:$16 sps:$4 sm:$0xff]   ;;  %v10831_v38 = vld [vmem:[%s18276_s7 + $0x8c] ss:$16 sps:$4 sm:$0xff]  }
  0xe3   :  { %1708 = vmatpush1.bf16.msra.mxu1 %v10754_v42  ;;  %v10823_v37 = vld [vmem:[%s18276_s7 + $0x68] ss:$16 sps:$4 sm:$0xff]   ;;  %v10837_v40 = vld [vmem:[%s18276_s7 + $0xac] ss:$16 sps:$4 sm:$0xff]  }
  0xe4   :  { %1709 = vmatprep.subr.bf16.mxu1 %v10759_v43  ;;  %2683 = vmatpush1.bf16.msra.mxu0 %v10880_v11  ;;  %v10829_v39 = vld [vmem:[%s18276_s7 + $0x88] ss:$16 sps:$4 sm:$0xff]   ;;  %v10843_v42 = vld [vmem:[%s18276_s7 + $0xcc] ss:$16 sps:$4 sm:$0xff]  }
  0xe5   :  { %2684 = vmatprep.subr.bf16.mxu0 %v10888_v16  ;;  %v10835_v41 = vld [vmem:[%s18276_s7 + $0xa8] ss:$16 sps:$4 sm:$0xff]   ;;  %v10879_v56 = vld [vmem:[%s18276_s7 + $0x18c] ss:$16 sps:$4 sm:$0xff]  }
  0xe6   :  { %v10841_v43 = vld [vmem:[%s18276_s7 + $0xc8] ss:$16 sps:$4 sm:$0xff]   ;;  %v10885_v59 = vld [vmem:[%s18276_s7 + $0x1ac] ss:$16 sps:$4 sm:$0xff]  }
  0xe7   :  { %1710 = vmatpush1.bf16.msra.mxu1 %v10757_v45  ;;  %v10849_v45 = vld [vmem:[%s18276_s7 + $0xec] ss:$16 sps:$4 sm:$0xff]  }
  0xe8   :  { %1711 = vmatprep.subr.bf16.mxu1 %v10762_v46  ;;  %2685 = vmatpush1.bf16.msra.mxu0 %v10886_v18  ;;  %v10847_v46 = vld [vmem:[%s18276_s7 + $0xe8] ss:$16 sps:$4 sm:$0xff]   ;;  %v10891_v61 = vld [vmem:[%s18276_s7 + $0x1cc] ss:$16 sps:$4 sm:$0xff]  }
  0xe9   :  { %2686 = vmatprep.subr.bf16.mxu0 %v10894_v19  ;;  %v10897_v63 = vld [vmem:[%s18276_s7 + $0x1ec] ss:$16 sps:$4 sm:$0xff]  }
  0xea   :  { %v10903_v1 = vld [vmem:[%s18276_s7 + $0x20c] ss:$16 sps:$4 sm:$0xff]  }
  0xeb   :  { %1712 = vmatpush1.bf16.msra.mxu1 %v10760_v47  ;;  %v10855_v47 = vld [vmem:[%s18276_s7 + $0x10c] ss:$16 sps:$4 sm:$0xff]  }
  0xec   :  { %1713 = vmatprep.subr.bf16.mxu1 %v10765_v48  ;;  %2687 = vmatpush1.bf16.msra.mxu0 %v10892_v23  ;;  %v10853_v48 = vld [vmem:[%s18276_s7 + $0x108] ss:$16 sps:$4 sm:$0xff]  }
  0xed   :  { %2699 = vmatprep.subr.bf16.mxu0 %v10900_v32 }
  0xef   :  { %1714 = vmatpush1.bf16.msra.mxu1 %v10763_v49  ;;  %v10861_v49 = vld [vmem:[%s18276_s7 + $0x12c] ss:$16 sps:$4 sm:$0xff]  }
  0xf0   :  { %1715 = vmatprep.subr.bf16.mxu1 %v10768_v50  ;;  %v10859_v50 = vld [vmem:[%s18276_s7 + $0x128] ss:$16 sps:$4 sm:$0xff]  }
  0xf3   :  { %1716 = vmatpush1.bf16.msra.mxu1 %v10766_v51  ;;  %v10867_v51 = vld [vmem:[%s18276_s7 + $0x14c] ss:$16 sps:$4 sm:$0xff]  }
  0xf4   :  { %1717 = vmatprep.subr.bf16.mxu1 %v10771_v52  ;;  %v10865_v52 = vld [vmem:[%s18276_s7 + $0x148] ss:$16 sps:$4 sm:$0xff]  }
  0xf7   :  { %1718 = vmatpush1.bf16.msra.mxu1 %v10769_v53  ;;  %v10873_v53 = vld [vmem:[%s18276_s7 + $0x16c] ss:$16 sps:$4 sm:$0xff]  }
  0xf8   :  { %1719 = vmatprep.subr.bf16.mxu1 %v10774_v54  ;;  %v10871_v54 = vld [vmem:[%s18276_s7 + $0x168] ss:$16 sps:$4 sm:$0xff]  }
  0xfb   :  { %1720 = vmatpush1.bf16.msra.mxu1 %v10772_v57  ;;  %v10877_v57 = vld [vmem:[%s18276_s7 + $0x188] ss:$16 sps:$4 sm:$0xff]  }
  0xfc   :  { %1721 = vmatprep.subr.bf16.mxu1 %v10777_v60  ;;  %v10883_v60 = vld [vmem:[%s18276_s7 + $0x1a8] ss:$16 sps:$4 sm:$0xff]  }
  0xff   :  { %1722 = vmatpush1.bf16.msra.mxu1 %v10775_v62  ;;  %v10889_v62 = vld [vmem:[%s18276_s7 + $0x1c8] ss:$16 sps:$4 sm:$0xff]  }
 0x100   :  { %1734 = vmatprep.subr.bf16.mxu1 %v10780_v0  ;;  %v10895_v0 = vld [vmem:[%s18276_s7 + $0x1e8] ss:$16 sps:$4 sm:$0xff]  }
 0x102   :  { %1724 = vmatmul.mubr.bf16.vlgmr.msra.gmra.mrb[4].mxu1 %v12210_v22  ;;  %v10786_v22 = vld [vmem:[%s18273_s4 + $0x64c] ss:$16 sps:$4 sm:$0xff]  }
 0x103   :  { %1735 = vmatpush1.bf16.msra.mxu1 %v10778_v2  ;;  %1766 = vmatprep.mubr.bf16.mxu1 %v11692_v30  ;;  %v10784_v30 = vld [vmem:[%s18273_s4 + $0x648] ss:$16 sps:$4 sm:$0xff]   ;;  %v293_v2 = vlaneseq }
 0x104   :  { %1736 = vmatprep.subr.bf16.mxu1 %v10783_v4 }
 0x105   :  { %v12718_v3 = vshrl.u32 %v293_v2, 7  ;;  %v10930_v2 = vld [vmem:[%s18276_s7 + $0x2a4] ss:$16 sps:$4 sm:$0xff]  }
 0x107   :  { %1737 = vmatpush1.bf16.msra.mxu1 %v10781_v6  ;;  %18779 = vst [vmem:[#allocation5_spill] sm:$0xff] %v12718_v3  ;;  %v12721_v4 = vsub.s32 0, %v12718_v3  ;;  %v12729_v6 = vsub.s32 1, %v12718_v3 }
 0x108   :  { %1738 = vmatprep.subr.bf16.mxu1 %v10786_v22 }
 0x109   :  { %18780 = vst [vmem:[#allocation6_spill] sm:$0xff] %v12721_v4  ;;  %18781 = vst [vmem:[#allocation7_spill] sm:$0xff] %v12729_v6  ;;  %v296_v7 = vrot.slane %v12726_v5, %v12721_v4  ;;  %v300_v22 = vrot.slane %v12726_v5, %v12729_v6 }
 0x10b   :  { %1739 = vmatpush1.bf16.msra.mxu1 %v10784_v30 }
 0x10c   :  { %1740 = vmatprep.subr.bf16.mxu1 %v10789_v10 }
 0x10f   :  { %1741 = vmatpush1.bf16.msra.mxu1 %v10787_v14 }
 0x110   :  { %1742 = vmatprep.subr.bf16.mxu1 %v10792_v17 }
 0x113   :  { %1743 = vmatpush1.bf16.msra.mxu1 %v10790_v20 }
 0x114   :  { %1744 = vmatprep.subr.bf16.mxu1 %v10795_v21 }
 0x115   :  { %v12598_v26 = vpop.f32.mrb[0].mxu1 }
 0x116   :  { %v12600_v27 = vpop.f32.mrb[1].mxu1  ;;  %v1468_v8 = vadd.f32 %v12598_v26, %v296_v7 }
 0x117   :  { %v12602_v28 = vpop.f32.mrb[2].mxu1  ;;  %1745 = vmatpush1.bf16.msra.mxu1 %v10793_v24  ;;  %v1470_v30 = vadd.f32 %v12600_v27, %v300_v22 }
 0x118   :  { %v12607_v12 = vpop.f32.mrb[3].mxu1  ;;  %1746 = vmatprep.subr.bf16.mxu1 %v10798_v25  ;;  %v1472_v10 = vadd.f32 %v12602_v28, %v296_v7  ;;  %v10933_v7 = vld [vmem:[%s18276_s7 + $0x2ac] ss:$16 sps:$4 sm:$0xff]  }
 0x119   :  { %v1474_v14 = vadd.f32 %v12607_v12, %v300_v22  ;;  %v10928_v22 = vld [vmem:[%s18276_s7 + $0x2a0] ss:$16 sps:$4 sm:$0xff]  }
 0x11b   :  { %1747 = vmatpush1.bf16.msra.mxu1 %v10796_v29 }
 0x11c   :  { %1748 = vmatprep.subr.bf16.mxu1 %v10801_v31 }
 0x11f   :  { %1749 = vmatpush1.bf16.msra.mxu1 %v10799_v33 }
 0x120   :  { %2742 = vmatprep.subr.bf16.mxu1 %v10807_v55 }
 0x122   :  { %1767 = vmatmul.mubr.bf16.vlgmr.msra.gmra.mrb[4].mxu1 %v12318_v58  ;;  %v10825_v58 = vld [vmem:[%s18276_s7 + $0x6c] ss:$16 sps:$4 sm:$0xff]  }
 0x123   :  { %2743 = vmatpush1.bf16.msra.mxu1 %v10805_v15  ;;  %v1825_v15 = vld [vmem:[%s18270_s1] sm:$0xff] }
 0x124   :  { %2744 = vmatprep.subr.bf16.mxu1 %v10813_v34  ;;  %v1829_v34 = vld [vmem:[%s18270_s1 + $0x20] sm:$0xff] }
 0x127   :  { %2745 = vmatpush1.bf16.msra.mxu1 %v10811_v44 }
 0x128   :  { %2746 = vmatprep.subr.bf16.mxu1 %v10819_v35  ;;  %v1826_v35 = vld [vmem:[%s18270_s1 + $0x8] sm:$0xff] }
 0x12b   :  { %2747 = vmatpush1.bf16.msra.mxu1 %v10817_v36  ;;  %v1830_v36 = vld [vmem:[%s18270_s1 + $0x28] sm:$0xff] }
 0x12c   :  { %2748 = vmatprep.subr.bf16.mxu1 %v10825_v58 }
 0x12f   :  { %2749 = vmatpush1.bf16.msra.mxu1 %v10823_v37 }
 0x130   :  { %2750 = vmatprep.subr.bf16.mxu1 %v10831_v38  ;;  %v10898_v38 = vld [vmem:[%s18276_s7 + $0x200] ss:$16 sps:$4 sm:$0xff]  }
 0x133   :  { %2751 = vmatpush1.bf16.msra.mxu1 %v10829_v39  ;;  %v10901_v39 = vld [vmem:[%s18276_s7 + $0x208] ss:$16 sps:$4 sm:$0xff]  }
 0x134   :  { %2752 = vmatprep.subr.bf16.mxu1 %v10837_v40  ;;  %v10906_v40 = vld [vmem:[%s18276_s7 + $0x224] ss:$16 sps:$4 sm:$0xff]  }
 0x137   :  { %2753 = vmatpush1.bf16.msra.mxu1 %v10835_v41  ;;  %v10909_v41 = vld [vmem:[%s18276_s7 + $0x22c] ss:$16 sps:$4 sm:$0xff]  }
 0x138   :  { %2754 = vmatprep.subr.bf16.mxu1 %v10843_v42  ;;  %v18283_v42 = vmov 1.0|1.0  }
 0x13b   :  { %2755 = vmatpush1.bf16.msra.mxu1 %v10841_v43  ;;  %v10904_v43 = vld [vmem:[%s18276_s7 + $0x220] ss:$16 sps:$4 sm:$0xff]  }
 0x13c   :  { %2756 = vmatprep.subr.bf16.mxu1 %v10849_v45  ;;  %v10907_v45 = vld [vmem:[%s18276_s7 + $0x228] ss:$16 sps:$4 sm:$0xff]  }
 0x13f   :  { %2757 = vmatpush1.bf16.msra.mxu1 %v10847_v46  ;;  %v10912_v46 = vld [vmem:[%s18276_s7 + $0x244] ss:$16 sps:$4 sm:$0xff]  }
 0x140   :  { %2758 = vmatprep.subr.bf16.mxu1 %v10855_v47  ;;  %v10915_v47 = vld [vmem:[%s18276_s7 + $0x24c] ss:$16 sps:$4 sm:$0xff]  }
 0x143   :  { %2759 = vmatpush1.bf16.msra.mxu1 %v10853_v48  ;;  %v12782_v48 = vld [vmem:[%s18279_s10] sm:$0xff] }
 0x144   :  { %2760 = vmatprep.subr.bf16.mxu1 %v10861_v49  ;;  %v12787_v49 = vld [vmem:[%s18279_s10 + $0x40] sm:$0xff] }
 0x147   :  { %2761 = vmatpush1.bf16.msra.mxu1 %v10859_v50  ;;  %v12792_v50 = vld [vmem:[%s18279_s10 + $0x8] sm:$0xff] }
 0x148   :  { %2762 = vmatprep.subr.bf16.mxu1 %v10867_v51  ;;  %v12796_v51 = vcombine.low %v12782_v48, %v12787_v49 }
 0x14b   :  { %2763 = vmatpush1.bf16.msra.mxu1 %v10865_v52  ;;  %v12801_v52 = vld [vmem:[%s18279_s10 + $0x48] sm:$0xff] }
 0x14c   :  { %2764 = vmatprep.subr.bf16.mxu1 %v10873_v53  ;;  %v12805_v53 = vcombine.low %v12792_v50, %v12801_v52 }
 0x14e   :  { %18782 = vst [vmem:[#allocation8_spill] sm:$0xff] %v12805_v53 }
 0x14f   :  { %2765 = vmatpush1.bf16.msra.mxu1 %v10871_v54  ;;  %v10910_v54 = vld [vmem:[%s18276_s7 + $0x240] ss:$16 sps:$4 sm:$0xff]  }
 0x150   :  { %2766 = vmatprep.subr.bf16.mxu1 %v10879_v56  ;;  %v10913_v56 = vld [vmem:[%s18276_s7 + $0x248] ss:$16 sps:$4 sm:$0xff]  }
 0x153   :  { %2767 = vmatpush1.bf16.msra.mxu1 %v10877_v57  ;;  %v10918_v57 = vld [vmem:[%s18276_s7 + $0x264] ss:$16 sps:$4 sm:$0xff]  }
 0x154   :  { %2768 = vmatprep.subr.bf16.mxu1 %v10885_v59  ;;  %v10921_v59 = vld [vmem:[%s18276_s7 + $0x26c] ss:$16 sps:$4 sm:$0xff]  }
 0x157   :  { %2769 = vmatpush1.bf16.msra.mxu1 %v10883_v60  ;;  %v10916_v60 = vld [vmem:[%s18276_s7 + $0x260] ss:$16 sps:$4 sm:$0xff]  }
 0x158   :  { %2770 = vmatprep.subr.bf16.mxu1 %v10891_v61  ;;  %v10919_v61 = vld [vmem:[%s18276_s7 + $0x268] ss:$16 sps:$4 sm:$0xff]  }
 0x15b   :  { %2771 = vmatpush1.bf16.msra.mxu1 %v10889_v62  ;;  %v10924_v62 = vld [vmem:[%s18276_s7 + $0x284] ss:$16 sps:$4 sm:$0xff]  }
 0x15c   :  { %2772 = vmatprep.subr.bf16.mxu1 %v10897_v63  ;;  %v10927_v63 = vld [vmem:[%s18276_s7 + $0x28c] ss:$16 sps:$4 sm:$0xff]  }
 0x15f   :  { %2773 = vmatpush1.bf16.msra.mxu1 %v10895_v0  ;;  %v10922_v0 = vld [vmem:[%s18276_s7 + $0x280] ss:$16 sps:$4 sm:$0xff]  }
 0x160   :  { %2785 = vmatprep.subr.bf16.mxu1 %v10903_v1  ;;  %v10925_v1 = vld [vmem:[%s18276_s7 + $0x288] ss:$16 sps:$4 sm:$0xff]  }
 0x176   :  { %v1596_v9 = vpop.f32.mrb[0].mxu0 }
 0x177   :  { %v10239_v11 = vadd.f32 %v1596_v9, %v1468_v8  ;;  %v1598_v13 = vpop.f32.mrb[1].mxu0  ;;  %v10931_v8 = vld [vmem:[%s18276_s7 + $0x2a8] ss:$16 sps:$4 sm:$0xff]   ;;  %v10939_v9 = vld [vmem:[%s18276_s7 + $0x2cc] ss:$16 sps:$4 sm:$0xff]  }
 0x178   :  { %v10241_v16 = vadd.f32 %v1598_v13, %v1470_v30  ;;  %v1600_v17 = vpop.f32.mrb[2].mxu0  ;;  %v10936_v30 = vld [vmem:[%s18276_s7 + $0x2c4] ss:$16 sps:$4 sm:$0xff]  }
 0x179   :  { %v9204_v18 = vmul.f32 -1.442695, %v10239_v11  ;;  %v10243_v19 = vadd.f32 %v1600_v17, %v1472_v10  ;;  %v1602_v20 = vpop.f32.mrb[3].mxu0  ;;  %v10934_v10 = vld [vmem:[%s18276_s7 + $0x2c0] ss:$16 sps:$4 sm:$0xff]  }
 0x17a   :  { %v9205_v21 = vmul.f32 -1.442695, %v10241_v16  ;;  %v10245_v23 = vadd.f32 %v1602_v20, %v1474_v14  ;;  %v10937_v11 = vld [vmem:[%s18276_s7 + $0x2c8] ss:$16 sps:$4 sm:$0xff]   ;;  %v10942_v13 = vld [vmem:[%s18276_s7 + $0x2e4] ss:$16 sps:$4 sm:$0xff]  }
 0x17b   :  { %11008 = vpow2.f32 %v9204_v18  ;;  %v9208_v24 = vmul.f32 -1.442695, %v10243_v19  ;;  %v10945_v14 = vld [vmem:[%s18276_s7 + $0x2ec] ss:$16 sps:$4 sm:$0xff]   ;;  %v10940_v16 = vld [vmem:[%s18276_s7 + $0x2e0] ss:$16 sps:$4 sm:$0xff]  }
 0x17c   :  { %11010 = vpow2.f32 %v9205_v21  ;;  %v9209_v25 = vmul.f32 -1.442695, %v10245_v23  ;;  %v10943_v17 = vld [vmem:[%s18276_s7 + $0x2e8] ss:$16 sps:$4 sm:$0xff]   ;;  %v10948_v18 = vld [vmem:[%s18276_s7 + $0x304] ss:$16 sps:$4 sm:$0xff]  }
 0x17d   :  { %11012 = vpow2.f32 %v9208_v24  ;;  %v10951_v19 = vld [vmem:[%s18276_s7 + $0x30c] ss:$16 sps:$4 sm:$0xff]   ;;  %v10946_v20 = vld [vmem:[%s18276_s7 + $0x300] ss:$16 sps:$4 sm:$0xff]   ;;  %v10949_v21 = vld [vmem:[%s18276_s7 + $0x308] ss:$16 sps:$4 sm:$0xff]  }
 0x17e   :  { %11014 = vpow2.f32 %v9209_v25  ;;  %v10954_v23 = vld [vmem:[%s18276_s7 + $0x324] ss:$16 sps:$4 sm:$0xff]   ;;  %v10957_v24 = vld [vmem:[%s18276_s7 + $0x32c] ss:$16 sps:$4 sm:$0xff]   ;;  %v10952_v25 = vld [vmem:[%s18276_s7 + $0x320] ss:$16 sps:$4 sm:$0xff]  }
 0x185   :  { %v11009_v26 = vpop.eup %11008 }
 0x186   :  { %v11011_v27 = vpop.eup %11010  ;;  %v1801_v28 = vadd.f32 1.0, %v11009_v26  ;;  %v10955_v26 = vld [vmem:[%s18276_s7 + $0x328] ss:$16 sps:$4 sm:$0xff]  }
 0x187   :  { %v11013_v29 = vpop.eup %11012  ;;  %v1802_v31 = vadd.f32 1.0, %v11011_v27  ;;  %v10960_v27 = vld [vmem:[%s18276_s7 + $0x344] ss:$16 sps:$4 sm:$0xff]  }
 0x188   :  { %v11015_v32 = vpop.eup %11014  ;;  %11016 = vrcp.f32 %v1801_v28  ;;  %v1805_v12 = vadd.f32 1.0, %v11013_v29  ;;  %v10963_v28 = vld [vmem:[%s18276_s7 + $0x34c] ss:$16 sps:$4 sm:$0xff]   ;;  %v10958_v29 = vld [vmem:[%s18276_s7 + $0x340] ss:$16 sps:$4 sm:$0xff]  }
 0x189   :  { %11018 = vrcp.f32 %v1802_v31  ;;  %v1806_v33 = vadd.f32 1.0, %v11015_v32  ;;  %v10961_v31 = vld [vmem:[%s18276_s7 + $0x348] ss:$16 sps:$4 sm:$0xff]   ;;  %v10966_v32 = vld [vmem:[%s18276_s7 + $0x364] ss:$16 sps:$4 sm:$0xff]  }
 0x18a   :  { %11020 = vrcp.f32 %v1805_v12  ;;  %v10969_v12 = vld [vmem:[%s18276_s7 + $0x36c] ss:$16 sps:$4 sm:$0xff]  }
 0x18b   :  { %11022 = vrcp.f32 %v1806_v33  ;;  %v10964_v33 = vld [vmem:[%s18276_s7 + $0x360] ss:$16 sps:$4 sm:$0xff]  }
 0x192   :  { %v11017_v55 = vpop.eup %11016 }
 0x193   :  { %v11019_v44 = vpop.eup %11018  ;;  %vm1833_vm0 = vcmp.gt.f32.partialorder %v11017_v55, %v1825_v15  ;;  %v10967_v55 = vld [vmem:[%s18276_s7 + $0x368] ss:$16 sps:$4 sm:$0xff]   ;;  %v10972_v15 = vld [vmem:[%s18276_s7 + $0x384] ss:$16 sps:$4 sm:$0xff]  }
 0x194   :  { %v11021_v58 = vpop.eup %11020  ;;  %vm1834_vm2 = vcmp.gt.f32.partialorder %v11019_v44, %v1826_v35  ;;  %v10970_v44 = vld [vmem:[%s18276_s7 + $0x380] ss:$16 sps:$4 sm:$0xff]   ;;  %v10973_v35 = vld [vmem:[%s18276_s7 + $0x388] ss:$16 sps:$4 sm:$0xff]  }
 0x195   :  { %v11023_v37 = vpop.eup %11022  ;;  %vm1837_vm1 = vcmp.gt.f32.partialorder %v11021_v58, %v1829_v34  ;;  %v10975_v34 = vld [vmem:[%s18276_s7 + $0x38c] ss:$16 sps:$4 sm:$0xff]  }
 0x196   :  { %vm1838_vm3 = vcmp.gt.f32.partialorder %v11023_v37, %v1830_v36  ;;  %vm9350_vm4 = vmpackc.low %vm1837_vm1, %vm1833_vm0  ;;  %v10978_v36 = vld [vmem:[%s18276_s7 + $0x3a4] ss:$16 sps:$4 sm:$0xff]   ;;  %v10981_v58 = vld [vmem:[%s18276_s7 + $0x3ac] ss:$16 sps:$4 sm:$0xff]  }
 0x197   :  { %vm9348_vm5 = vmpackc.low %vm1838_vm3, %vm1834_vm2  ;;  %v10976_v37 = vld [vmem:[%s18276_s7 + $0x3a0] ss:$16 sps:$4 sm:$0xff]  }
 0x198   :  { %9349 = vmatprep.mubr.msk.bf16.mxu0 %vm9348_vm5, %v18283_v42  ;;  %9357 = vmatprep.mubr.msk.bf16.mxu1 %vm9348_vm5, %v18283_v42 }
 0x199   :  { %9351 = vmatmul.mubr.msk.bf16.vlgmr.msra.gmra.mrb[4].mxu0 %vm9350_vm4, %v18283_v42  ;;  %9359 = vmatmul.mubr.msk.bf16.vlgmr.msra.gmra.mrb[8].mxu1 %vm9350_vm4, %v18283_v42 }
 0x19a   :  { %2700 = vmatpush1.bf16.msra.mxu0 %v10898_v38  ;;  %2786 = vmatpush1.bf16.msra.mxu1 %v10901_v39  ;;  %v10979_v38 = vld [vmem:[%s18276_s7 + $0x3a8] ss:$16 sps:$4 sm:$0xff]   ;;  %v10984_v39 = vld [vmem:[%s18276_s7 + $0x3c4] ss:$16 sps:$4 sm:$0xff]  }
 0x19b   :  { %2701 = vmatprep.subr.bf16.mxu0 %v10906_v40  ;;  %2787 = vmatprep.subr.bf16.mxu1 %v10909_v41  ;;  %v10987_v40 = vld [vmem:[%s18276_s7 + $0x3cc] ss:$16 sps:$4 sm:$0xff]   ;;  %v1985_v41 = vld [vmem:[%s18276_s7 + $0x3e0] sm:$0x33] }
 0x19e   :  { %2702 = vmatpush1.bf16.msra.mxu0 %v10904_v43  ;;  %2788 = vmatpush1.bf16.msra.mxu1 %v10907_v45  ;;  %v1986_v43 = vld [vmem:[%s18276_s7 + $0x3e8] sm:$0x33]  ;;  %v10982_v45 = vld [vmem:[%s18276_s7 + $0x3c0] ss:$16 sps:$4 sm:$0xff]  }
 0x19f   :  { %2703 = vmatprep.subr.bf16.mxu0 %v10912_v46  ;;  %2789 = vmatprep.subr.bf16.mxu1 %v10915_v47  ;;  %v10985_v46 = vld [vmem:[%s18276_s7 + $0x3c8] ss:$16 sps:$4 sm:$0xff]   ;;  %v12963_v47 = vcombine.high %v1985_v41, %v1985_v41 }
 0x1a1   :  { %18783 = vst [vmem:[#allocation9_spill] sm:$0xff] %v12963_v47 }
 0x1a2   :  { %2704 = vmatpush1.bf16.msra.mxu0 %v10910_v54  ;;  %2790 = vmatpush1.bf16.msra.mxu1 %v10913_v56  ;;  %v12965_v54 = vcombine.high %v1986_v43, %v1986_v43  ;;  %v12967_v56 = vcombine.low %v1985_v41, %v1985_v41  ;;  %v2953_v41 = vld [vmem:[%s18279_s10 + $0x148] sm:$0xff] }
 0x1a3   :  { %2705 = vmatprep.subr.bf16.mxu0 %v10918_v57  ;;  %2791 = vmatprep.subr.bf16.mxu1 %v10921_v59  ;;  %v12969_v57 = vcombine.low %v1986_v43, %v1986_v43 }
 0x1a4   :  { %18784 = vst [vmem:[#allocation10_spill] sm:$0xff] %v12965_v54  ;;  %18785 = vst [vmem:[#allocation11_spill] sm:$0xff] %v12967_v56  ;;  %v2645_v59 = vsel %vm2643_vm6, %v12967_v56, 0  ;;  %v3128_v56 = vld [vmem:[%s18279_s10 + $0x6c0] sm:$0xff] }
 0x1a5   :  { %18786 = vst [vmem:[#allocation12_spill] sm:$0xff] %v12969_v57 }
 0x1a6   :  { %2706 = vmatpush1.bf16.msra.mxu0 %v10916_v60  ;;  %2792 = vmatpush1.bf16.msra.mxu1 %v10919_v61  ;;  %v2651_v60 = vsel %vm2643_vm6, %v12969_v57, 0  ;;  %v12981_v61 = vcombine.high %v12782_v48, %v12787_v49 }
 0x1a7   :  { %2707 = vmatprep.subr.bf16.mxu0 %v10924_v62  ;;  %2793 = vmatprep.subr.bf16.mxu1 %v10927_v63  ;;  %v12985_v62 = vcombine.high %v12792_v50, %v12801_v52  ;;  %v12990_v63 = vsub.s32 2, %v12718_v3 }
 0x1a9   :  { %18787 = vst [vmem:[#allocation13_spill] sm:$0xff] %v12985_v62  ;;  %18788 = vst [vmem:[#allocation14_spill] sm:$0xff] %v12990_v63  ;;  %v304_v48 = vrot.slane %v12726_v5, %v12990_v63 }
 0x1aa   :  { %2708 = vmatpush1.bf16.msra.mxu0 %v10922_v0  ;;  %2794 = vmatpush1.bf16.msra.mxu1 %v10925_v1  ;;  %v12993_v0 = vsub.s32 3, %v12718_v3 }
 0x1ab   :  { %2709 = vmatprep.subr.bf16.mxu0 %v10930_v2  ;;  %2795 = vmatprep.subr.bf16.mxu1 %v10933_v7 }
 0x1ac   :  { %18789 = vst [vmem:[#allocation15_spill] sm:$0xff] %v12993_v0  ;;  %v308_v49 = vrot.slane %v12726_v5, %v12993_v0 }
 0x1ae   :  { %2710 = vmatpush1.bf16.msra.mxu0 %v10928_v22  ;;  %2796 = vmatpush1.bf16.msra.mxu1 %v10931_v8 }
 0x1af   :  { %2711 = vmatprep.subr.bf16.mxu0 %v10936_v30  ;;  %2797 = vmatprep.subr.bf16.mxu1 %v10939_v9 }
 0x1b2   :  { %2712 = vmatpush1.bf16.msra.mxu0 %v10934_v10  ;;  %2798 = vmatpush1.bf16.msra.mxu1 %v10937_v11 }
 0x1b3   :  { %2713 = vmatprep.subr.bf16.mxu0 %v10942_v13  ;;  %2799 = vmatprep.subr.bf16.mxu1 %v10945_v14 }
 0x1b6   :  { %2714 = vmatpush1.bf16.msra.mxu0 %v10940_v16  ;;  %2800 = vmatpush1.bf16.msra.mxu1 %v10943_v17 }
 0x1b7   :  { %2715 = vmatprep.subr.bf16.mxu0 %v10948_v18  ;;  %2801 = vmatprep.subr.bf16.mxu1 %v10951_v19 }
 0x1ba   :  { %2716 = vmatpush1.bf16.msra.mxu0 %v10946_v20  ;;  %2802 = vmatpush1.bf16.msra.mxu1 %v10949_v21 }
 0x1bb   :  { %2717 = vmatprep.subr.bf16.mxu0 %v10954_v23  ;;  %2803 = vmatprep.subr.bf16.mxu1 %v10957_v24  ;;  %v1828_v23 = vld [vmem:[%s18270_s1 + $0x18] sm:$0xff] }
 0x1be   :  { %2718 = vmatpush1.bf16.msra.mxu0 %v10952_v25  ;;  %2804 = vmatpush1.bf16.msra.mxu1 %v10955_v26  ;;  %v1827_v25 = vld [vmem:[%s18270_s1 + $0x10] sm:$0xff] }
 0x1bf   :  { %2719 = vmatprep.subr.bf16.mxu0 %v10960_v27  ;;  %2805 = vmatprep.subr.bf16.mxu1 %v10963_v28  ;;  %v1831_v26 = vld [vmem:[%s18270_s1 + $0x30] sm:$0xff]  ;;  %v1832_v28 = vld [vmem:[%s18270_s1 + $0x38] sm:$0xff] }
 0x1c2   :  { %2720 = vmatpush1.bf16.msra.mxu0 %v10958_v29  ;;  %2806 = vmatpush1.bf16.msra.mxu1 %v10961_v31 }
 0x1c3   :  { %2721 = vmatprep.subr.bf16.mxu0 %v10966_v32  ;;  %2807 = vmatprep.subr.bf16.mxu1 %v10969_v12  ;;  %v2928_v32 = vld [vmem:[%s18279_s10 + $0x80] sm:$0xff] }
 0x1c4   :  { %v2936_v12 = vld [vmem:[%s18279_s10 + $0xc0] sm:$0xff] }
 0x1c5   :  { %v13055_v43 = vcombine.low %v2928_v32, %v2936_v12 }
 0x1c6   :  { %2722 = vmatpush1.bf16.msra.mxu0 %v10964_v33  ;;  %2808 = vmatpush1.bf16.msra.mxu1 %v10967_v55  ;;  %v2929_v55 = vld [vmem:[%s18279_s10 + $0x88] sm:$0xff]  ;;  %v3032_v33 = vld [vmem:[%s18279_s10 + $0x3c0] sm:$0xff] }
 0x1c7   :  { %2723 = vmatprep.subr.bf16.mxu0 %v10972_v15  ;;  %2809 = vmatprep.subr.bf16.mxu1 %v10975_v34  ;;  %v2937_v15 = vld [vmem:[%s18279_s10 + $0xc8] sm:$0xff]  ;;  %v18285_v34 = vmov 0.0  }
 0x1ca   :  { %2724 = vmatpush1.bf16.msra.mxu0 %v10970_v44  ;;  %2810 = vmatpush1.bf16.msra.mxu1 %v10973_v35 }
 0x1cb   :  { %2725 = vmatprep.subr.bf16.mxu0 %v10978_v36  ;;  %2811 = vmatprep.subr.bf16.mxu1 %v10981_v58  ;;  %v13029_v58 = vcombine.high %v2928_v32, %v2936_v12  ;;  %v3024_v12 = vld [vmem:[%s18279_s10 + $0x380] sm:$0xff] }
 0x1ce   :  { %2726 = vmatpush1.bf16.msra.mxu0 %v10976_v37  ;;  %2812 = vmatpush1.bf16.msra.mxu1 %v10979_v38  ;;  %v13031_v37 = vcombine.high %v2929_v55, %v2937_v15  ;;  %v2944_v38 = vld [vmem:[%s18279_s10 + $0x100] sm:$0xff] }
 0x1cf   :  { %2727 = vmatprep.subr.bf16.mxu0 %v10984_v39  ;;  %2813 = vmatprep.subr.bf16.mxu1 %v10987_v40  ;;  %v2952_v39 = vld [vmem:[%s18279_s10 + $0x140] sm:$0xff]  ;;  %v2945_v40 = vld [vmem:[%s18279_s10 + $0x108] sm:$0xff] }
 0x1d0   :  { %18792 = vst [vmem:[#allocation16_spill] sm:$0xff] %v13031_v37 }
 0x1d2   :  { %2728 = vmatpush1.bf16.msra.mxu0 %v10982_v45  ;;  %2814 = vmatpush1.bf16.msra.mxu1 %v10985_v46  ;;  %v13057_v45 = vcombine.low %v2929_v55, %v2937_v15  ;;  %v13061_v46 = vcombine.high %v2944_v38, %v2952_v39  ;;  %v3025_v55 = vld [vmem:[%s18279_s10 + $0x388] sm:$0xff] }
 0x1d3   :  { %9352 = vmatprep.subr.msk.bf16.mxu0 %vm2643_vm6, %v12963_v47  ;;  %9360 = vmatprep.subr.msk.bf16.mxu1 %vm2643_vm6, %v12965_v54  ;;  %v3033_v15 = vld [vmem:[%s18279_s10 + $0x3c8] sm:$0xff]  ;;  %v3120_v54 = vld [vmem:[%s18279_s10 + $0x680] sm:$0xff] }
 0x1d4   :  { %18793 = vst [vmem:[#allocation17_spill] sm:$0xff] %v13057_v45 }
 0x1d6   :  { %2730 = vmatpush1.bf16.msra.mxu0 %v2645_v59  ;;  %2816 = vmatpush1.bf16.msra.mxu1 %v2651_v60  ;;  %v13063_v59 = vcombine.high %v2945_v40, %v2953_v41  ;;  %v2960_v60 = vld [vmem:[%s18279_s10 + $0x180] sm:$0xff] }
 0x1d7   :  { %6071 = vmatprep.subr.bf16.mxu0 %v12981_v61  ;;  %6157 = vmatprep.subr.bf16.mxu1 %v12985_v62 }
 0x1d8   :  { %18794 = vst [vmem:[#allocation18_spill] sm:$0xff] %v13063_v59 }
 0x1f5   :  { %v1768_v50 = vpop.f32.mrb[4].mxu1 }
 0x1f6   :  { %v10246_v52 = vadd.f32 %v1768_v50, %v304_v48  ;;  %v1770_v1 = vpop.f32.mrb[5].mxu1  ;;  %v2969_v50 = vld [vmem:[%s18279_s10 + $0x1c8] sm:$0xff] }
 0x1f7   :  { %v10247_v2 = vadd.f32 %v1770_v1, %v308_v49  ;;  %v1772_v7 = vpop.f32.mrb[6].mxu1  ;;  %v13081_v1 = vcombine.low %v2945_v40, %v2953_v41  ;;  %v13189_v40 = vcombine.low %v3025_v55, %v3033_v15  ;;  %v3040_v41 = vld [vmem:[%s18279_s10 + $0x400] sm:$0xff] }
 0x1f8   :  { %v9206_v22 = vmul.f32 -1.442695, %v10246_v52  ;;  %v10248_v8 = vadd.f32 %v1772_v7, %v304_v48  ;;  %v1774_v30 = vpop.f32.mrb[7].mxu1  ;;  %v2968_v48 = vld [vmem:[%s18279_s10 + $0x1c0] sm:$0xff]  ;;  %v13079_v52 = vcombine.low %v2944_v38, %v2952_v39  ;;  %v13183_v38 = vcombine.high %v3025_v55, %v3033_v15  ;;  %v3081_v15 = vld [vmem:[%s18279_s10 + $0x548] sm:$0xff] }
 0x1f9   :  { %v9207_v9 = vmul.f32 -1.442695, %v10247_v2  ;;  %v10249_v10 = vadd.f32 %v1774_v30, %v308_v49  ;;  %v2961_v49 = vld [vmem:[%s18279_s10 + $0x188] sm:$0xff]  ;;  %18795 = vst [vmem:[#allocation19_spill] sm:$0xff] %v13081_v1  ;;  %v13085_v2 = vcombine.high %v2960_v60, %v2968_v48  ;;  %v13187_v39 = vcombine.low %v3024_v12, %v3032_v33  ;;  %18808 = vst [vmem:[#allocation32_spill] sm:$0xff] %v13189_v40 }
 0x1fa   :  { %11024 = vpow2.f32 %v9206_v22  ;;  %v9210_v11 = vmul.f32 -1.442695, %v10248_v8  ;;  %v13087_v7 = vcombine.high %v2961_v49, %v2969_v50  ;;  %v2976_v22 = vld [vmem:[%s18279_s10 + $0x200] sm:$0xff]  ;;  %v2977_v30 = vld [vmem:[%s18279_s10 + $0x208] sm:$0xff]  ;;  %18806 = vst [vmem:[#allocation30_spill] sm:$0xff] %v13183_v38 }
 0x1fb   :  { %11026 = vpow2.f32 %v9207_v9  ;;  %v9211_v13 = vmul.f32 -1.442695, %v10249_v10  ;;  %v2984_v8 = vld [vmem:[%s18279_s10 + $0x240] sm:$0xff]  ;;  %v2985_v9 = vld [vmem:[%s18279_s10 + $0x248] sm:$0xff]  ;;  %v13103_v10 = vcombine.low %v2960_v60, %v2968_v48  ;;  %18807 = vst [vmem:[#allocation31_spill] sm:$0xff] %v13187_v39 }
 0x1fc   :  { %11028 = vpow2.f32 %v9210_v11  ;;  %18796 = vst [vmem:[#allocation20_spill] sm:$0xff] %v13087_v7  ;;  %v13105_v11 = vcombine.low %v2961_v49, %v2969_v50  ;;  %v3048_v60 = vld [vmem:[%s18279_s10 + $0x440] sm:$0xff]  ;;  %v3041_v48 = vld [vmem:[%s18279_s10 + $0x408] sm:$0xff] }
 0x1fd   :  { %11030 = vpow2.f32 %v9211_v13  ;;  %v13109_v13 = vcombine.high %v2976_v22, %v2984_v8  ;;  %v13204_v49 = vcombine.high %v3040_v41, %v3048_v60  ;;  %v3049_v50 = vld [vmem:[%s18279_s10 + $0x448] sm:$0xff] }
 0x1fe   :  { %18797 = vst [vmem:[#allocation21_spill] sm:$0xff] %v13105_v11 }
 0x1ff   :  { %18809 = vst [vmem:[#allocation33_spill] sm:$0xff] %v13204_v49 }
 0x204   :  { %v11025_v14 = vpop.eup %11024 }
 0x205   :  { %v11027_v16 = vpop.eup %11026  ;;  %v1803_v17 = vadd.f32 1.0, %v11025_v14  ;;  %v13111_v14 = vcombine.high %v2977_v30, %v2985_v9 }
 0x206   :  { %v11029_v5 = vpop.eup %11028  ;;  %v1804_v18 = vadd.f32 1.0, %v11027_v16  ;;  %v2992_v16 = vld [vmem:[%s18279_s10 + $0x280] sm:$0xff] }
 0x207   :  { %v11031_v19 = vpop.eup %11030  ;;  %11032 = vrcp.f32 %v1803_v17  ;;  %v1807_v20 = vadd.f32 1.0, %v11029_v5  ;;  %18798 = vst [vmem:[#allocation22_spill] sm:$0xff] %v13111_v14  ;;  %v3000_v17 = vld [vmem:[%s18279_s10 + $0x2c0] sm:$0xff]  ;;  %v2993_v5 = vld [vmem:[%s18279_s10 + $0x288] sm:$0xff] }
 0x208   :  { %11034 = vrcp.f32 %v1804_v18  ;;  %v1808_v21 = vadd.f32 1.0, %v11031_v19  ;;  %v3001_v18 = vld [vmem:[%s18279_s10 + $0x2c8] sm:$0xff]  ;;  %v13127_v19 = vcombine.low %v2976_v22, %v2984_v8  ;;  %v13209_v22 = vcombine.low %v3040_v41, %v3048_v60 }
 0x209   :  { %11036 = vrcp.f32 %v1807_v20  ;;  %v13129_v20 = vcombine.low %v2977_v30, %v2985_v9  ;;  %v13211_v8 = vcombine.low %v3041_v48, %v3049_v50  ;;  %v13213_v30 = vcombine.high %v3041_v48, %v3049_v50  ;;  %v3056_v9 = vld [vmem:[%s18279_s10 + $0x480] sm:$0xff] }
 0x20a   :  { %11038 = vrcp.f32 %v1808_v21  ;;  %v13133_v21 = vcombine.high %v2992_v16, %v3000_v17  ;;  %18810 = vst [vmem:[#allocation34_spill] sm:$0xff] %v13209_v22  ;;  %v3088_v50 = vld [vmem:[%s18279_s10 + $0x580] sm:$0xff] }
 0x20b   :  { %18799 = vst [vmem:[#allocation23_spill] sm:$0xff] %v13129_v20  ;;  %18811 = vst [vmem:[#allocation35_spill] sm:$0xff] %v13211_v8 }
 0x20c   :  { %18812 = vst [vmem:[#allocation36_spill] sm:$0xff] %v13213_v30 }
 0x211   :  { %v11033_v24 = vpop.eup %11032 }
 0x212   :  { %v11035_v27 = vpop.eup %11034  ;;  %vm1835_vm8 = vcmp.gt.f32.partialorder %v11033_v24, %v1827_v25  ;;  %v3008_v24 = vld [vmem:[%s18279_s10 + $0x300] sm:$0xff] }
 0x213   :  { %v11037_v29 = vpop.eup %11036  ;;  %vm1836_vm7 = vcmp.gt.f32.partialorder %v11035_v27, %v1828_v23  ;;  %v13135_v23 = vcombine.high %v2993_v5, %v3001_v18  ;;  %v3016_v25 = vld [vmem:[%s18279_s10 + $0x340] sm:$0xff]  ;;  %v3017_v27 = vld [vmem:[%s18279_s10 + $0x348] sm:$0xff] }
 0x214   :  { %v11039_v31 = vpop.eup %11038  ;;  %vm1839_vm9 = vcmp.gt.f32.partialorder %v11037_v29, %v1831_v26  ;;  %v9215_v44 = vsel %vm1836_vm7, 1.0, %v18285_v34  ;;  %v3009_v26 = vld [vmem:[%s18279_s10 + $0x308] sm:$0xff]  ;;  %v13153_v29 = vcombine.low %v2993_v5, %v3001_v18 }
 0x215   :  { %vm1840_vm10 = vcmp.gt.f32.partialorder %v11039_v31, %v1832_v28  ;;  %vm13017_vm11 = vmpackc.low %vm1839_vm9, %vm1835_vm8  ;;  %18800 = vst [vmem:[#allocation24_spill] sm:$0xff] %v13135_v23  ;;  %v13151_v28 = vcombine.low %v2992_v16, %v3000_v17  ;;  %v13157_v31 = vcombine.high %v3008_v24, %v3016_v25  ;;  %v13159_v32 = vcombine.high %v3009_v26, %v3017_v27  ;;  %v3064_v16 = vld [vmem:[%s18279_s10 + $0x4c0] sm:$0xff]  ;;  %v3057_v17 = vld [vmem:[%s18279_s10 + $0x488] sm:$0xff] }
 0x216   :  { %v9219_v35 = vsel %vm1840_vm10, 1.0, %v18285_v34  ;;  %18801 = vst [vmem:[#allocation25_spill] sm:$0xff] %v13153_v29  ;;  %v13228_v5 = vcombine.high %v3056_v9, %v3064_v16  ;;  %v3065_v18 = vld [vmem:[%s18279_s10 + $0x4c8] sm:$0xff] }
 0x217   :  { %v1860_v36 = vpack.c.bf16 %v9219_v35, %v9215_v44  ;;  %18802 = vst [vmem:[#allocation26_spill] sm:$0xff] %v13159_v32  ;;  %v13175_v44 = vcombine.low %v3008_v24, %v3016_v25  ;;  %v13177_v35 = vcombine.low %v3009_v26, %v3017_v27  ;;  %v13233_v24 = vcombine.low %v3056_v9, %v3064_v16  ;;  %v3072_v27 = vld [vmem:[%s18279_s10 + $0x500] sm:$0xff]  ;;  %v3089_v16 = vld [vmem:[%s18279_s10 + $0x588] sm:$0xff] }
 0x218   :  { %18813 = vst [vmem:[#allocation37_spill] sm:$0xff] %v13228_v5  ;;  %v13235_v25 = vcombine.low %v3057_v17, %v3065_v18  ;;  %v13237_v26 = vcombine.high %v3057_v17, %v3065_v18  ;;  %v3096_v9 = vld [vmem:[%s18279_s10 + $0x5c0] sm:$0xff]  ;;  %v3097_v18 = vld [vmem:[%s18279_s10 + $0x5c8] sm:$0xff] }
 0x219   :  { %9353 = vmatprep.mubr.msk.bf16.mxu0 %vm18776_vm12, %v1860_v36  ;;  %9361 = vmatprep.mubr.msk.bf16.mxu1 %vm18776_vm12, %v1860_v36  ;;  %18803 = vst [vmem:[#allocation27_spill] sm:$0xff] %v13175_v44  ;;  %18804 = vst [vmem:[#allocation28_spill] sm:$0xff] %v13177_v35  ;;  %v13181_v36 = vcombine.high %v3024_v12, %v3032_v33  ;;  %v3080_v12 = vld [vmem:[%s18279_s10 + $0x540] sm:$0xff]  ;;  %v3073_v33 = vld [vmem:[%s18279_s10 + $0x508] sm:$0xff]  ;;  %v13276_v17 = vcombine.high %v3088_v50, %v3096_v9 }
 0x21a   :  { %9355 = vmatmul.mubr.msk.bf16.vlgmr.msra.gmra.mrb[4].mxu0 %vm13017_vm11, %v18283_v42  ;;  %9363 = vmatmul.mubr.msk.bf16.vlgmr.msra.gmra.mrb[8].mxu1 %vm13017_vm11, %v18283_v42  ;;  %18814 = vst [vmem:[#allocation38_spill] sm:$0xff] %v13233_v24  ;;  %18815 = vst [vmem:[#allocation39_spill] sm:$0xff] %v13235_v25  ;;  %v13252_v55 = vcombine.high %v3072_v27, %v3080_v12  ;;  %v13257_v41 = vcombine.low %v3072_v27, %v3080_v12  ;;  %v3112_v42 = vld [vmem:[%s18279_s10 + $0x640] sm:$0xff] }
 0x21b   :  { %6072 = vmatpush1.bf16.msra.mxu0 %v12796_v51  ;;  %6158 = vmatpush1.bf16.msra.mxu1 %v12805_v53  ;;  %18805 = vst [vmem:[#allocation29_spill] sm:$0xff] %v13181_v36  ;;  %18816 = vst [vmem:[#allocation40_spill] sm:$0xff] %v13237_v26  ;;  %v13259_v60 = vcombine.low %v3073_v33, %v3081_v15  ;;  %v13261_v48 = vcombine.high %v3073_v33, %v3081_v15  ;;  %v3104_v15 = vld [vmem:[%s18279_s10 + $0x600] sm:$0xff] }
 0x21c   :  { %6073 = vmatprep.subr.bf16.mxu0 %v13029_v58  ;;  %6159 = vmatprep.subr.bf16.mxu1 %v13031_v37  ;;  %18817 = vst [vmem:[#allocation41_spill] sm:$0xff] %v13252_v55  ;;  %18818 = vst [vmem:[#allocation42_spill] sm:$0xff] %v13257_v41  ;;  %v13281_v27 = vcombine.low %v3088_v50, %v3096_v9  ;;  %v13283_v12 = vcombine.low %v3089_v16, %v3097_v18  ;;  %v3105_v50 = vld [vmem:[%s18279_s10 + $0x608] sm:$0xff] }
 0x21d   :  { %18819 = vst [vmem:[#allocation43_spill] sm:$0xff] %v13259_v60  ;;  %18820 = vst [vmem:[#allocation44_spill] sm:$0xff] %v13261_v48  ;;  %v13285_v33 = vcombine.high %v3089_v16, %v3097_v18  ;;  %v13300_v9 = vcombine.high %v3104_v15, %v3112_v42  ;;  %v3113_v16 = vld [vmem:[%s18279_s10 + $0x648] sm:$0xff]  ;;  %v13305_v18 = vcombine.low %v3104_v15, %v3112_v42 }
 0x21e   :  { %18821 = vst [vmem:[#allocation45_spill] sm:$0xff] %v13276_v17  ;;  %18822 = vst [vmem:[#allocation46_spill] sm:$0xff] %v13281_v27  ;;  %v13307_v34 = vcombine.low %v3105_v50, %v3113_v16  ;;  %v13309_v57 = vcombine.high %v3105_v50, %v3113_v16  ;;  %v3121_v42 = vld [vmem:[%s18279_s10 + $0x688] sm:$0xff]  ;;  %v13324_v15 = vcombine.high %v3120_v54, %v3128_v56 }
 0x21f   :  { %6074 = vmatpush1.bf16.msra.mxu0 %v13055_v43  ;;  %6160 = vmatpush1.bf16.msra.mxu1 %v13057_v45  ;;  %18823 = vst [vmem:[#allocation47_spill] sm:$0xff] %v13283_v12  ;;  %18824 = vst [vmem:[#allocation48_spill] sm:$0xff] %v13285_v33  ;;  %v3129_v50 = vld [vmem:[%s18279_s10 + $0x6c8] sm:$0xff]  ;;  %v13329_v16 = vcombine.low %v3120_v54, %v3128_v56 }
 0x220   :  { %6075 = vmatprep.subr.bf16.mxu0 %v13061_v46  ;;  %6161 = vmatprep.subr.bf16.mxu1 %v13063_v59  ;;  %18825 = vst [vmem:[#allocation49_spill] sm:$0xff] %v13300_v9  ;;  %18826 = vst [vmem:[#allocation50_spill] sm:$0xff] %v13305_v18  ;;  %v13331_v47 = vcombine.low %v3121_v42, %v3129_v50  ;;  %v3137_v54 = vld [vmem:[%s18279_s10 + $0x708] sm:$0xff] }
 0x221   :  { %18827 = vst [vmem:[#allocation51_spill] sm:$0xff] %v13307_v34  ;;  %18828 = vst [vmem:[#allocation52_spill] sm:$0xff] %v13309_v57 }
 0x222   :  { %18829 = vst [vmem:[#allocation53_spill] sm:$0xff] %v13324_v15  ;;  %18830 = vst [vmem:[#allocation54_spill] sm:$0xff] %v13329_v16 }
 0x223   :  { %6076 = vmatpush1.bf16.msra.mxu0 %v13079_v52  ;;  %6162 = vmatpush1.bf16.msra.mxu1 %v13081_v1  ;;  %18831 = vst [vmem:[#allocation55_spill] sm:$0xff] %v13331_v47 }
 0x224   :  { %6077 = vmatprep.subr.bf16.mxu0 %v13085_v2  ;;  %6163 = vmatprep.subr.bf16.mxu1 %v13087_v7 }
 0x227   :  { %6078 = vmatpush1.bf16.msra.mxu0 %v13103_v10  ;;  %6164 = vmatpush1.bf16.msra.mxu1 %v13105_v11 }
 0x228   :  { %6079 = vmatprep.subr.bf16.mxu0 %v13109_v13  ;;  %6165 = vmatprep.subr.bf16.mxu1 %v13111_v14 }
 0x22b   :  { %6080 = vmatpush1.bf16.msra.mxu0 %v13127_v19  ;;  %6166 = vmatpush1.bf16.msra.mxu1 %v13129_v20 }
 0x22c   :  { %6081 = vmatprep.subr.bf16.mxu0 %v13133_v21  ;;  %6167 = vmatprep.subr.bf16.mxu1 %v13135_v23 }
 0x22f   :  { %6082 = vmatpush1.bf16.msra.mxu0 %v13151_v28  ;;  %6168 = vmatpush1.bf16.msra.mxu1 %v13153_v29 }
 0x230   :  { %6083 = vmatprep.subr.bf16.mxu0 %v13157_v31  ;;  %6169 = vmatprep.subr.bf16.mxu1 %v13159_v32 }
 0x233   :  { %6084 = vmatpush1.bf16.msra.mxu0 %v13175_v44  ;;  %6170 = vmatpush1.bf16.msra.mxu1 %v13177_v35 }
 0x234   :  { %6085 = vmatprep.subr.bf16.mxu0 %v13181_v36  ;;  %6171 = vmatprep.subr.bf16.mxu1 %v13183_v38 }
 0x237   :  { %6086 = vmatpush1.bf16.msra.mxu0 %v13187_v39  ;;  %6172 = vmatpush1.bf16.msra.mxu1 %v13189_v40 }
 0x238   :  { %6087 = vmatprep.subr.bf16.mxu0 %v13204_v49  ;;  %6173 = vmatprep.subr.bf16.mxu1 %v13213_v30 }
 0x23b   :  { %6088 = vmatpush1.bf16.msra.mxu0 %v13209_v22  ;;  %6174 = vmatpush1.bf16.msra.mxu1 %v13211_v8 }
 0x23c   :  { %6089 = vmatprep.subr.bf16.mxu0 %v13228_v5  ;;  %6175 = vmatprep.subr.bf16.mxu1 %v13237_v26 }
 0x23f   :  { %6090 = vmatpush1.bf16.msra.mxu0 %v13233_v24  ;;  %6176 = vmatpush1.bf16.msra.mxu1 %v13235_v25  ;;  %v3176_v25 = vld [vmem:[%s18279_s10 + $0x840] sm:$0xff] }
 0x240   :  { %6091 = vmatprep.subr.bf16.mxu0 %v13252_v55  ;;  %6177 = vmatprep.subr.bf16.mxu1 %v13261_v48  ;;  %v3344_v55 = vld [vmem:[%s18279_s10 + $0xd80] sm:$0xff] }
 0x243   :  { %6092 = vmatpush1.bf16.msra.mxu0 %v13257_v41  ;;  %6178 = vmatpush1.bf16.msra.mxu1 %v13259_v60  ;;  %v3160_v60 = vld [vmem:[%s18279_s10 + $0x7c0] sm:$0xff] }
 0x244   :  { %6093 = vmatprep.subr.bf16.mxu0 %v13276_v17  ;;  %6179 = vmatprep.subr.bf16.mxu1 %v13285_v33  ;;  %v3328_v17 = vld [vmem:[%s18279_s10 + $0xd00] sm:$0xff] }
 0x247   :  { %6094 = vmatpush1.bf16.msra.mxu0 %v13281_v27  ;;  %6180 = vmatpush1.bf16.msra.mxu1 %v13283_v12  ;;  %v3144_v12 = vld [vmem:[%s18279_s10 + $0x740] sm:$0xff] }
 0x248   :  { %6095 = vmatprep.subr.bf16.mxu0 %v13300_v9  ;;  %6181 = vmatprep.subr.bf16.mxu1 %v13309_v57  ;;  %v13333_v57 = vcombine.high %v3121_v42, %v3129_v50  ;;  %v3145_v42 = vld [vmem:[%s18279_s10 + $0x748] sm:$0xff]  ;;  %v3312_v9 = vld [vmem:[%s18279_s10 + $0xc80] sm:$0xff] }
 0x249   :  { %v13357_v33 = vcombine.high %v3137_v54, %v3145_v42 }
 0x24a   :  { %18832 = vst [vmem:[#allocation56_spill] sm:$0xff] %v13333_v57 }
 0x24b   :  { %6096 = vmatpush1.bf16.msra.mxu0 %v13305_v18  ;;  %6182 = vmatpush1.bf16.msra.mxu1 %v13307_v34  ;;  %v3136_v34 = vld [vmem:[%s18279_s10 + $0x700] sm:$0xff]  ;;  %18836 = vst [vmem:[#allocation60_spill] sm:$0xff] %v13357_v33 }
 0x24c   :  { %6097 = vmatprep.subr.bf16.mxu0 %v13324_v15  ;;  %6183 = vmatprep.subr.bf16.mxu1 %v13333_v57  ;;  %v13348_v56 = vcombine.high %v3136_v34, %v3144_v12  ;;  %v13353_v50 = vcombine.low %v3136_v34, %v3144_v12  ;;  %v13355_v57 = vcombine.low %v3137_v54, %v3145_v42  ;;  %v3153_v12 = vld [vmem:[%s18279_s10 + $0x788] sm:$0xff]  ;;  %v3296_v15 = vld [vmem:[%s18279_s10 + $0xc00] sm:$0xff] }
 0x24d   :  { %v3161_v54 = vld [vmem:[%s18279_s10 + $0x7c8] sm:$0xff] }
 0x24e   :  { %18833 = vst [vmem:[#allocation57_spill] sm:$0xff] %v13348_v56  ;;  %18834 = vst [vmem:[#allocation58_spill] sm:$0xff] %v13353_v50  ;;  %v13381_v48 = vcombine.high %v3153_v12, %v3161_v54 }
 0x24f   :  { %6098 = vmatpush1.bf16.msra.mxu0 %v13329_v16  ;;  %6184 = vmatpush1.bf16.msra.mxu1 %v13331_v47  ;;  %18835 = vst [vmem:[#allocation59_spill] sm:$0xff] %v13355_v57  ;;  %v3152_v47 = vld [vmem:[%s18279_s10 + $0x780] sm:$0xff] }
 0x250   :  { %6099 = vmatprep.subr.bf16.mxu0 %v13348_v56  ;;  %6185 = vmatprep.subr.bf16.mxu1 %v13357_v33  ;;  %v13369_v34 = vcombine.high %v3152_v47, %v3160_v60  ;;  %v13377_v42 = vcombine.low %v3152_v47, %v3160_v60  ;;  %v13379_v33 = vcombine.low %v3153_v12, %v3161_v54  ;;  %v3169_v60 = vld [vmem:[%s18279_s10 + $0x808] sm:$0xff]  ;;  %v3280_v56 = vld [vmem:[%s18279_s10 + $0xb80] sm:$0xff] }
 0x251   :  { %18840 = vst [vmem:[#allocation64_spill] sm:$0xff] %v13381_v48  ;;  %v3177_v12 = vld [vmem:[%s18279_s10 + $0x848] sm:$0xff] }
 0x252   :  { %18837 = vst [vmem:[#allocation61_spill] sm:$0xff] %v13369_v34  ;;  %18838 = vst [vmem:[#allocation62_spill] sm:$0xff] %v13377_v42  ;;  %v13405_v26 = vcombine.high %v3169_v60, %v3177_v12 }
 0x253   :  { %6100 = vmatpush1.bf16.msra.mxu0 %v13353_v50  ;;  %6186 = vmatpush1.bf16.msra.mxu1 %v13355_v57  ;;  %18839 = vst [vmem:[#allocation63_spill] sm:$0xff] %v13379_v33  ;;  %v3168_v57 = vld [vmem:[%s18279_s10 + $0x800] sm:$0xff] }
 0x254   :  { %6101 = vmatprep.subr.bf16.mxu0 %v13369_v34  ;;  %6187 = vmatprep.subr.bf16.mxu1 %v13381_v48  ;;  %v13393_v47 = vcombine.high %v3168_v57, %v3176_v25  ;;  %v13401_v54 = vcombine.low %v3168_v57, %v3176_v25  ;;  %v13403_v48 = vcombine.low %v3169_v60, %v3177_v12  ;;  %v3264_v34 = vld [vmem:[%s18279_s10 + $0xb00] sm:$0xff] }
 0x255   :  { %18842 = vst [vmem:[#allocation66_spill] sm:$0xff] %v13405_v26 }
 0x256   :  { %18841 = vst [vmem:[#allocation65_spill] sm:$0xff] %v13403_v48 }
 0x257   :  { %6102 = vmatpush1.bf16.msra.mxu0 %v13377_v42  ;;  %6188 = vmatpush1.bf16.msra.mxu1 %v13379_v33  ;;  %v1987_v33 = vld [vmem:[%s18277_s8] sm:$0xf] }
 0x258   :  { %6114 = vmatprep.subr.bf16.mxu0 %v13393_v47  ;;  %6200 = vmatprep.subr.bf16.mxu1 %v13405_v26  ;;  %v1992_v8 = vrot.slane %v1987_v33, %v12721_v4  ;;  %v2000_v30 = vrot.slane %v1987_v33, %v12990_v63  ;;  %v1996_v40 = vrot.slane %v1987_v33, %v12729_v6 }
 0x259   :  { %v2004_v57 = vrot.slane %v1987_v33, %v12993_v0 }
 0x2ed   :  { %v2733_v25 = vpop.f32.mrb[4].mxu0  ;;  %v2819_v38 = vpop.f32.mrb[8].mxu1 }
 0x2ee   :  { %v10250_v60 = vadd.f32 %v2733_v25, %v1992_v8  ;;  %v10254_v12 = vadd.f32 %v2819_v38, %v2000_v30  ;;  %v2735_v35 = vpop.f32.mrb[5].mxu0  ;;  %v2821_v32 = vpop.f32.mrb[9].mxu1 }
 0x2ef   :  { %v10251_v29 = vadd.f32 %v2735_v35, %v1996_v40  ;;  %v10255_v23 = vadd.f32 %v2821_v32, %v2004_v57  ;;  %v2737_v20 = vpop.f32.mrb[6].mxu0  ;;  %v2823_v14 = vpop.f32.mrb[10].mxu1 }
 0x2f0   :  { %v9364_v11 = vmul.f32 -1.442695, %v10250_v60  ;;  %v9366_v7 = vmul.f32 -1.442695, %v10254_v12  ;;  %v10252_v1 = vadd.f32 %v2737_v20, %v1992_v8  ;;  %v10256_v59 = vadd.f32 %v2823_v14, %v2000_v30  ;;  %v2739_v45 = vpop.f32.mrb[7].mxu0  ;;  %v2825_v37 = vpop.f32.mrb[11].mxu1 }
 0x2f1   :  { %v9365_v53 = vmul.f32 -1.442695, %v10251_v29  ;;  %v9367_v26 = vmul.f32 -1.442695, %v10255_v23  ;;  %v10253_v62 = vadd.f32 %v2739_v45, %v1996_v40  ;;  %v10257_v33 = vadd.f32 %v2825_v37, %v2004_v57  ;;  %v2876_v60 = vld [vmem:[%s18271_s2] sm:$0xff] }
 0x2f2   :  { %11040 = vpow2.f32 %v9364_v11  ;;  %v9368_v42 = vmul.f32 -1.442695, %v10252_v1  ;;  %v9370_v38 = vmul.f32 -1.442695, %v10256_v59  ;;  %v2880_v12 = vld [vmem:[%s18271_s2 + $0x20] sm:$0xff] }
 0x2f3   :  { %11042 = vpow2.f32 %v9366_v7  ;;  %v9369_v25 = vmul.f32 -1.442695, %v10253_v62  ;;  %v9371_v32 = vmul.f32 -1.442695, %v10257_v33 }
 0x2f4   :  { %11044 = vpow2.f32 %v9365_v53 }
 0x2f5   :  { %11046 = vpow2.f32 %v9367_v26 }
 0x2f6   :  { %11048 = vpow2.f32 %v9368_v42 }
 0x2f7   :  { %11050 = vpow2.f32 %v9370_v38  ;;  %v2878_v38 = vld [vmem:[%s18271_s2 + $0x10] sm:$0xff] }
 0x2f8   :  { %11052 = vpow2.f32 %v9369_v25  ;;  %v2879_v25 = vld [vmem:[%s18271_s2 + $0x18] sm:$0xff] }
 0x2f9   :  { %11054 = vpow2.f32 %v9371_v32  ;;  %v2882_v32 = vld [vmem:[%s18271_s2 + $0x30] sm:$0xff] }
 0x2fc   :  { %v11041_v20 = vpop.eup %11040 }
 0x2fd   :  { %v11043_v14 = vpop.eup %11042  ;;  %v2852_v35 = vadd.f32 1.0, %v11041_v20 }
 0x2fe   :  { %v11045_v8 = vpop.eup %11044  ;;  %v2854_v29 = vadd.f32 1.0, %v11043_v14  ;;  %v2877_v14 = vld [vmem:[%s18271_s2 + $0x8] sm:$0xff] }
 0x2ff   :  { %v11047_v23 = vpop.eup %11046  ;;  %11056 = vrcp.f32 %v2852_v35  ;;  %v2853_v37 = vadd.f32 1.0, %v11045_v8  ;;  %v2881_v35 = vld [vmem:[%s18271_s2 + $0x28] sm:$0xff] }
 0x300   :  { %v11049_v45 = vpop.eup %11048  ;;  %11058 = vrcp.f32 %v2854_v29  ;;  %v2855_v1 = vadd.f32 1.0, %v11047_v23  ;;  %v2883_v29 = vld [vmem:[%s18271_s2 + $0x38] sm:$0xff]  ;;  %v3184_v23 = vld [vmem:[%s18279_s10 + $0x880] sm:$0xff] }
 0x301   :  { %v11051_v59 = vpop.eup %11050  ;;  %11060 = vrcp.f32 %v2853_v37  ;;  %v2856_v53 = vadd.f32 1.0, %v11049_v45  ;;  %v3192_v37 = vld [vmem:[%s18279_s10 + $0x8c0] sm:$0xff] }
 0x302   :  { %v11053_v62 = vpop.eup %11052  ;;  %11062 = vrcp.f32 %v2855_v1  ;;  %v2858_v7 = vadd.f32 1.0, %v11051_v59  ;;  %v3185_v59 = vld [vmem:[%s18279_s10 + $0x888] sm:$0xff] }
 0x303   :  { %v11055_v11 = vpop.eup %11054  ;;  %11064 = vrcp.f32 %v2856_v53  ;;  %v2857_v40 = vadd.f32 1.0, %v11053_v62  ;;  %v3193_v53 = vld [vmem:[%s18279_s10 + $0x8c8] sm:$0xff] }
 0x304   :  { %11066 = vrcp.f32 %v2858_v7  ;;  %v2859_v30 = vadd.f32 1.0, %v11055_v11  ;;  %v2975_v11 = vld [vmem:[%s18279_s10 + $0x1f8] sm:$0xff] }
 0x305   :  { %11068 = vrcp.f32 %v2857_v40  ;;  %v3200_v40 = vld [vmem:[%s18279_s10 + $0x900] sm:$0xff] }
 0x306   :  { %11070 = vrcp.f32 %v2859_v30  ;;  %v18849_v30 = vmov 0.0  }
 0x309   :  { %v11057_v26 = vpop.eup %11056 }
 0x30a   :  { %v11059_v42 = vpop.eup %11058  ;;  %vm2884_vm13 = vcmp.gt.f32.partialorder %v11057_v26, %v2876_v60  ;;  %v18850_v60 = vmov 1.0|1.0  }
 0x30b   :  { %v11061_v57 = vpop.eup %11060  ;;  %vm2886_vm15 = vcmp.gt.f32.partialorder %v11059_v42, %v2878_v38  ;;  %v3201_v38 = vld [vmem:[%s18279_s10 + $0x908] sm:$0xff] }
 0x30c   :  { %v11063_v33 = vpop.eup %11062  ;;  %vm2885_vm3 = vcmp.gt.f32.partialorder %v11061_v57, %v2877_v14  ;;  %v13475_v57 = vcombine.high %v3184_v23, %v3192_v37  ;;  %v13500_v14 = vcombine.low %v3185_v59, %v3193_v53 }
 0x30d   :  { %v11065_v20 = vpop.eup %11064  ;;  %vm2887_vm0 = vcmp.gt.f32.partialorder %v11063_v33, %v2879_v25  ;;  %v3208_v33 = vld [vmem:[%s18279_s10 + $0x940] sm:$0xff]  ;;  %v3209_v25 = vld [vmem:[%s18279_s10 + $0x948] sm:$0xff] }
 0x30e   :  { %v11067_v8 = vpop.eup %11066  ;;  %vm2888_vm14 = vcmp.gt.f32.partialorder %v11065_v20, %v2880_v12  ;;  %v9375_v26 = vsel %vm2887_vm0, 1.0, %v18849_v30  ;;  %v13477_v12 = vcombine.high %v3185_v59, %v3193_v53  ;;  %v13498_v20 = vcombine.low %v3184_v23, %v3192_v37  ;;  %18852 = vst [vmem:[#allocation68_spill] sm:$0xff] %v13500_v14  ;;  %v3224_v23 = vld [vmem:[%s18279_s10 + $0x9c0] sm:$0xff]  ;;  %v3217_v37 = vld [vmem:[%s18279_s10 + $0x988] sm:$0xff] }
 0x30f   :  { %v11069_v45 = vpop.eup %11068  ;;  %vm2890_vm1 = vcmp.gt.f32.partialorder %v11067_v8, %v2882_v32  ;;  %vm13446_vm2 = vmpackc.low %vm2888_vm14, %vm2884_vm13  ;;  %v13508_v8 = vcombine.high %v3201_v38, %v3209_v25  ;;  %v13526_v59 = vcombine.low %v3200_v40, %v3208_v33  ;;  %v13528_v53 = vcombine.low %v3201_v38, %v3209_v25 }
 0x310   :  { %v11071_v62 = vpop.eup %11070  ;;  %vm2889_vm4 = vcmp.gt.f32.partialorder %v11069_v45, %v2881_v35  ;;  %vm13456_vm5 = vmpackc.low %vm2890_vm1, %vm2886_vm15  ;;  %18851 = vst [vmem:[#allocation67_spill] sm:$0xff] %v13477_v12  ;;  %v13506_v35 = vcombine.high %v3200_v40, %v3208_v33  ;;  %v3225_v45 = vld [vmem:[%s18279_s10 + $0x9c8] sm:$0xff] }
 0x311   :  { %vm2891_vm7 = vcmp.gt.f32.partialorder %v11071_v62, %v2883_v29  ;;  %vm13460_vm8 = vmpackc.low %vm2889_vm4, %vm2885_vm3  ;;  %18853 = vst [vmem:[#allocation69_spill] sm:$0xff] %v13508_v8  ;;  %v3216_v29 = vld [vmem:[%s18279_s10 + $0x980] sm:$0xff]  ;;  %v3233_v40 = vld [vmem:[%s18279_s10 + $0xa08] sm:$0xff]  ;;  %v13552_v25 = vcombine.low %v3217_v37, %v3225_v45 }
 0x312   :  { %v9379_v42 = vsel %vm2891_vm7, 1.0, %v18849_v30  ;;  %9893 = vmatprep.mubr.msk.bf16.mxu0 %vm13460_vm8, %v18850_v60  ;;  %9901 = vmatprep.mubr.msk.bf16.mxu1 %vm13460_vm8, %v18850_v60  ;;  %18854 = vst [vmem:[#allocation70_spill] sm:$0xff] %v13528_v53  ;;  %v13532_v62 = vcombine.high %v3216_v29, %v3224_v23  ;;  %v3240_v30 = vld [vmem:[%s18279_s10 + $0xa40] sm:$0xff]  ;;  %v3241_v33 = vld [vmem:[%s18279_s10 + $0xa48] sm:$0xff]  ;;  %v13550_v38 = vcombine.low %v3216_v29, %v3224_v23 }
 0x313   :  { %v13488_v32 = vpack.c.bf16 %v9379_v42, %v9375_v26  ;;  %9895 = vmatmul.mubr.msk.bf16.vlgmr.msra.gmra.mrb[8].mxu0 %vm13446_vm2, %v18850_v60  ;;  %9903 = vmatmul.mubr.msk.bf16.vlgmr.msra.gmra.mrb[12].mxu1 %vm13446_vm2, %v18850_v60  ;;  %v13534_v26 = vcombine.high %v3217_v37, %v3225_v45  ;;  %v3232_v42 = vld [vmem:[%s18279_s10 + $0xa00] sm:$0xff]  ;;  %18856 = vst [vmem:[#allocation72_spill] sm:$0xff] %v13552_v25  ;;  %v3249_v29 = vld [vmem:[%s18279_s10 + $0xa88] sm:$0xff] }
 0x314   :  { %6115 = vmatpush1.bf16.msra.mxu0 %v13401_v54  ;;  %6201 = vmatpush1.bf16.msra.mxu1 %v13403_v48  ;;  %v3257_v23 = vld [vmem:[%s18279_s10 + $0xac8] sm:$0xff]  ;;  %v13574_v37 = vcombine.low %v3232_v42, %v3240_v30  ;;  %v13576_v45 = vcombine.low %v3233_v40, %v3241_v33 }
 0x315   :  { %9897 = vmatprep.mubr.msk.bf16.mxu0 %vm18776_vm12, %v13488_v32  ;;  %9905 = vmatprep.mubr.msk.bf16.mxu1 %vm18776_vm12, %v13488_v32  ;;  %18855 = vst [vmem:[#allocation71_spill] sm:$0xff] %v13534_v26  ;;  %v13582_v48 = vcombine.high %v3249_v29, %v3257_v23 }
 0x316   :  { %6116 = vmatprep.subr.bf16.mxu0 %v13475_v57  ;;  %6202 = vmatprep.subr.bf16.mxu1 %v13477_v12  ;;  %v3248_v12 = vld [vmem:[%s18279_s10 + $0xa80] sm:$0xff]  ;;  %18858 = vst [vmem:[#allocation74_spill] sm:$0xff] %v13576_v45 }
 0x317   :  { %18859 = vst [vmem:[#allocation75_spill] sm:$0xff] %v13582_v48 }
 0x318   :  { %6117 = vmatpush1.bf16.msra.mxu0 %v13498_v20  ;;  %6203 = vmatpush1.bf16.msra.mxu1 %v13500_v14  ;;  %v13558_v14 = vcombine.high %v3233_v40, %v3241_v33  ;;  %v13600_v33 = vcombine.low %v3249_v29, %v3257_v23 }
 0x319   :  { %6118 = vmatprep.subr.bf16.mxu0 %v13506_v35  ;;  %6204 = vmatprep.subr.bf16.mxu1 %v13508_v8  ;;  %v13556_v8 = vcombine.high %v3232_v42, %v3240_v30  ;;  %v3265_v30 = vld [vmem:[%s18279_s10 + $0xb08] sm:$0xff] }
 0x31a   :  { %18857 = vst [vmem:[#allocation73_spill] sm:$0xff] %v13558_v14  ;;  %v3273_v42 = vld [vmem:[%s18279_s10 + $0xb48] sm:$0xff]  ;;  %18860 = vst [vmem:[#allocation76_spill] sm:$0xff] %v13600_v33 }
 0x31b   :  { %v13606_v50 = vcombine.high %v3265_v30, %v3273_v42  ;;  %v13624_v23 = vcombine.low %v3265_v30, %v3273_v42 }
 0x31c   :  { %6119 = vmatpush1.bf16.msra.mxu0 %v13526_v59  ;;  %6205 = vmatpush1.bf16.msra.mxu1 %v13528_v53  ;;  %v3256_v53 = vld [vmem:[%s18279_s10 + $0xac0] sm:$0xff] }
 0x31d   :  { %6120 = vmatprep.subr.bf16.mxu0 %v13532_v62  ;;  %6206 = vmatprep.subr.bf16.mxu1 %v13534_v26  ;;  %v13580_v26 = vcombine.high %v3248_v12, %v3256_v53  ;;  %v13598_v40 = vcombine.low %v3248_v12, %v3256_v53  ;;  %18862 = vst [vmem:[#allocation78_spill] sm:$0xff] %v13606_v50  ;;  %v3281_v12 = vld [vmem:[%s18279_s10 + $0xb88] sm:$0xff]  ;;  %18864 = vst [vmem:[#allocation80_spill] sm:$0xff] %v13624_v23 }
 0x31e   :  { %v3289_v53 = vld [vmem:[%s18279_s10 + $0xbc8] sm:$0xff] }
 0x31f   :  { %v13630_v16 = vcombine.high %v3281_v12, %v3289_v53  ;;  %v13648_v42 = vcombine.low %v3281_v12, %v3289_v53 }
 0x320   :  { %6121 = vmatpush1.bf16.msra.mxu0 %v13550_v38  ;;  %6207 = vmatpush1.bf16.msra.mxu1 %v13552_v25  ;;  %v3272_v25 = vld [vmem:[%s18279_s10 + $0xb40] sm:$0xff] }
 0x321   :  { %6122 = vmatprep.subr.bf16.mxu0 %v13556_v8  ;;  %6208 = vmatprep.subr.bf16.mxu1 %v13558_v14  ;;  %v13604_v14 = vcombine.high %v3264_v34, %v3272_v25  ;;  %v13622_v29 = vcombine.low %v3264_v34, %v3272_v25  ;;  %18866 = vst [vmem:[#allocation82_spill] sm:$0xff] %v13630_v16  ;;  %v3297_v34 = vld [vmem:[%s18279_s10 + $0xc08] sm:$0xff]  ;;  %18868 = vst [vmem:[#allocation84_spill] sm:$0xff] %v13648_v42 }
 0x322   :  { %v3305_v25 = vld [vmem:[%s18279_s10 + $0xc48] sm:$0xff] }
 0x323   :  { %18861 = vst [vmem:[#allocation77_spill] sm:$0xff] %v13604_v14  ;;  %18863 = vst [vmem:[#allocation79_spill] sm:$0xff] %v13622_v29  ;;  %v13654_v18 = vcombine.high %v3297_v34, %v3305_v25  ;;  %v13672_v53 = vcombine.low %v3297_v34, %v3305_v25 }
 0x324   :  { %6123 = vmatpush1.bf16.msra.mxu0 %v13574_v37  ;;  %6209 = vmatpush1.bf16.msra.mxu1 %v13576_v45  ;;  %v3288_v45 = vld [vmem:[%s18279_s10 + $0xbc0] sm:$0xff] }
 0x325   :  { %6124 = vmatprep.subr.bf16.mxu0 %v13580_v26  ;;  %6210 = vmatprep.subr.bf16.mxu1 %v13582_v48  ;;  %v13628_v48 = vcombine.high %v3280_v56, %v3288_v45  ;;  %v13646_v30 = vcombine.low %v3280_v56, %v3288_v45  ;;  %18870 = vst [vmem:[#allocation86_spill] sm:$0xff] %v13654_v18  ;;  %v3313_v56 = vld [vmem:[%s18279_s10 + $0xc88] sm:$0xff]  ;;  %18872 = vst [vmem:[#allocation88_spill] sm:$0xff] %v13672_v53 }
 0x326   :  { %v3321_v45 = vld [vmem:[%s18279_s10 + $0xcc8] sm:$0xff] }
 0x327   :  { %18865 = vst [vmem:[#allocation81_spill] sm:$0xff] %v13628_v48  ;;  %18867 = vst [vmem:[#allocation83_spill] sm:$0xff] %v13646_v30  ;;  %v13678_v27 = vcombine.high %v3313_v56, %v3321_v45  ;;  %v13696_v25 = vcombine.low %v3313_v56, %v3321_v45 }
 0x328   :  { %6125 = vmatpush1.bf16.msra.mxu0 %v13598_v40  ;;  %6211 = vmatpush1.bf16.msra.mxu1 %v13600_v33  ;;  %v3304_v33 = vld [vmem:[%s18279_s10 + $0xc40] sm:$0xff] }
 0x329   :  { %6126 = vmatprep.subr.bf16.mxu0 %v13604_v14  ;;  %6212 = vmatprep.subr.bf16.mxu1 %v13606_v50  ;;  %v13652_v50 = vcombine.high %v3296_v15, %v3304_v33  ;;  %v13670_v12 = vcombine.low %v3296_v15, %v3304_v33  ;;  %18874 = vst [vmem:[#allocation90_spill] sm:$0xff] %v13678_v27  ;;  %v3329_v15 = vld [vmem:[%s18279_s10 + $0xd08] sm:$0xff]  ;;  %18876 = vst [vmem:[#allocation92_spill] sm:$0xff] %v13696_v25 }
 0x32a   :  { %v3337_v33 = vld [vmem:[%s18279_s10 + $0xd48] sm:$0xff] }
 0x32b   :  { %18869 = vst [vmem:[#allocation85_spill] sm:$0xff] %v13652_v50  ;;  %18871 = vst [vmem:[#allocation87_spill] sm:$0xff] %v13670_v12  ;;  %v13702_v41 = vcombine.high %v3329_v15, %v3337_v33  ;;  %v13720_v45 = vcombine.low %v3329_v15, %v3337_v33 }
 0x32c   :  { %6127 = vmatpush1.bf16.msra.mxu0 %v13622_v29  ;;  %6213 = vmatpush1.bf16.msra.mxu1 %v13624_v23  ;;  %v3320_v23 = vld [vmem:[%s18279_s10 + $0xcc0] sm:$0xff] }
 0x32d   :  { %6128 = vmatprep.subr.bf16.mxu0 %v13628_v48  ;;  %6214 = vmatprep.subr.bf16.mxu1 %v13630_v16  ;;  %v13676_v16 = vcombine.high %v3312_v9, %v3320_v23  ;;  %v13694_v34 = vcombine.low %v3312_v9, %v3320_v23  ;;  %18878 = vst [vmem:[#allocation94_spill] sm:$0xff] %v13702_v41  ;;  %v3345_v9 = vld [vmem:[%s18279_s10 + $0xd88] sm:$0xff]  ;;  %18880 = vst [vmem:[#allocation96_spill] sm:$0xff] %v13720_v45 }
 0x32e   :  { %v3353_v23 = vld [vmem:[%s18279_s10 + $0xdc8] sm:$0xff] }
 0x32f   :  { %18873 = vst [vmem:[#allocation89_spill] sm:$0xff] %v13676_v16  ;;  %18875 = vst [vmem:[#allocation91_spill] sm:$0xff] %v13694_v34  ;;  %v13726_v24 = vcombine.high %v3345_v9, %v3353_v23  ;;  %v13744_v33 = vcombine.low %v3345_v9, %v3353_v23 }
 0x330   :  { %6129 = vmatpush1.bf16.msra.mxu0 %v13646_v30  ;;  %6215 = vmatpush1.bf16.msra.mxu1 %v13648_v42  ;;  %v3336_v42 = vld [vmem:[%s18279_s10 + $0xd40] sm:$0xff] }
 0x331   :  { %6130 = vmatprep.subr.bf16.mxu0 %v13652_v50  ;;  %6216 = vmatprep.subr.bf16.mxu1 %v13654_v18  ;;  %v13700_v18 = vcombine.high %v3328_v17, %v3336_v42  ;;  %v13718_v56 = vcombine.low %v3328_v17, %v3336_v42  ;;  %18882 = vst [vmem:[#allocation98_spill] sm:$0xff] %v13726_v24  ;;  %v3361_v17 = vld [vmem:[%s18279_s10 + $0xe08] sm:$0xff]  ;;  %18884 = vst [vmem:[#allocation100_spill] sm:$0xff] %v13744_v33 }
 0x332   :  { %v3369_v42 = vld [vmem:[%s18279_s10 + $0xe48] sm:$0xff] }
 0x333   :  { %18877 = vst [vmem:[#allocation93_spill] sm:$0xff] %v13700_v18  ;;  %18879 = vst [vmem:[#allocation95_spill] sm:$0xff] %v13718_v56  ;;  %v13768_v23 = vcombine.low %v3361_v17, %v3369_v42 }
 0x334   :  { %6131 = vmatpush1.bf16.msra.mxu0 %v13670_v12  ;;  %6217 = vmatpush1.bf16.msra.mxu1 %v13672_v53  ;;  %v3352_v53 = vld [vmem:[%s18279_s10 + $0xdc0] sm:$0xff] }
 0x335   :  { %6132 = vmatprep.subr.bf16.mxu0 %v13676_v16  ;;  %6218 = vmatprep.subr.bf16.mxu1 %v13678_v27  ;;  %v13724_v27 = vcombine.high %v3344_v55, %v3352_v53  ;;  %v3360_v16 = vld [vmem:[%s18279_s10 + $0xe00] sm:$0xff]  ;;  %v13742_v15 = vcombine.low %v3344_v55, %v3352_v53  ;;  %v3377_v55 = vld [vmem:[%s18279_s10 + $0xe88] sm:$0xff]  ;;  %18888 = vst [vmem:[#allocation104_spill] sm:$0xff] %v13768_v23 }
 0x336   :  { %v3385_v53 = vld [vmem:[%s18279_s10 + $0xec8] sm:$0xff]  ;;  %v19303_v7 = vld [vmem:[#allocation91_spill] sm:$0xff] }
 0x337   :  { %18881 = vst [vmem:[#allocation97_spill] sm:$0xff] %v13724_v27  ;;  %18883 = vst [vmem:[#allocation99_spill] sm:$0xff] %v13742_v15 }
 0x338   :  { %6133 = vmatpush1.bf16.msra.mxu0 %v13694_v34  ;;  %6219 = vmatpush1.bf16.msra.mxu1 %v13696_v25  ;;  %v3368_v25 = vld [vmem:[%s18279_s10 + $0xe40] sm:$0xff] }
 0x339   :  { %6134 = vmatprep.subr.bf16.mxu0 %v13700_v18  ;;  %6220 = vmatprep.subr.bf16.mxu1 %v13702_v41  ;;  %v13748_v41 = vcombine.high %v3360_v16, %v3368_v25  ;;  %v13750_v18 = vcombine.high %v3361_v17, %v3369_v42  ;;  %v3376_v34 = vld [vmem:[%s18279_s10 + $0xe80] sm:$0xff]  ;;  %v13766_v9 = vcombine.low %v3360_v16, %v3368_v25  ;;  %v3393_v16 = vld [vmem:[%s18279_s10 + $0xf08] sm:$0xff] }
 0x33a   :  { %v3401_v25 = vld [vmem:[%s18279_s10 + $0xf48] sm:$0xff]  ;;  %v13792_v42 = vcombine.low %v3377_v55, %v3385_v53 }
 0x33b   :  { %18885 = vst [vmem:[#allocation101_spill] sm:$0xff] %v13748_v41  ;;  %18886 = vst [vmem:[#allocation102_spill] sm:$0xff] %v13750_v18 }
 0x33c   :  { %6135 = vmatpush1.bf16.msra.mxu0 %v13718_v56  ;;  %6221 = vmatpush1.bf16.msra.mxu1 %v13720_v45  ;;  %v3384_v45 = vld [vmem:[%s18279_s10 + $0xec0] sm:$0xff]  ;;  %18887 = vst [vmem:[#allocation103_spill] sm:$0xff] %v13766_v9  ;;  %18892 = vst [vmem:[#allocation108_spill] sm:$0xff] %v13792_v42 }
 0x33d   :  { %6136 = vmatprep.subr.bf16.mxu0 %v13724_v27  ;;  %6222 = vmatprep.subr.bf16.mxu1 %v13726_v24  ;;  %v13772_v24 = vcombine.high %v3376_v34, %v3384_v45  ;;  %v13774_v27 = vcombine.high %v3377_v55, %v3385_v53  ;;  %v3392_v56 = vld [vmem:[%s18279_s10 + $0xf00] sm:$0xff]  ;;  %v13790_v17 = vcombine.low %v3376_v34, %v3384_v45 }
 0x33e   :  { %v13810_v45 = vcombine.low %v3393_v16, %v3401_v25 }
 0x33f   :  { %18889 = vst [vmem:[#allocation105_spill] sm:$0xff] %v13772_v24  ;;  %18890 = vst [vmem:[#allocation106_spill] sm:$0xff] %v13774_v27 }
 0x340   :  { %6137 = vmatpush1.bf16.msra.mxu0 %v13742_v15  ;;  %6223 = vmatpush1.bf16.msra.mxu1 %v13744_v33  ;;  %v3400_v33 = vld [vmem:[%s18279_s10 + $0xf40] sm:$0xff]  ;;  %18891 = vst [vmem:[#allocation107_spill] sm:$0xff] %v13790_v17  ;;  %18896 = vst [vmem:[#allocation112_spill] sm:$0xff] %v13810_v45 }
 0x341   :  { %6138 = vmatprep.subr.bf16.mxu0 %v13748_v41  ;;  %6224 = vmatprep.subr.bf16.mxu1 %v13750_v18  ;;  %v13796_v18 = vcombine.high %v3392_v56, %v3400_v33  ;;  %v13798_v41 = vcombine.high %v3393_v16, %v3401_v25  ;;  %v3408_v15 = vld [vmem:[%s18279_s10 + $0xf80] sm:$0x33]  ;;  %v13808_v34 = vcombine.low %v3392_v56, %v3400_v33  ;;  %v2922_v56 = vld [vmem:[%s18279_s10 + $0x50] sm:$0xff]  ;;  %v2915_v33 = vld [vmem:[%s18279_s10 + $0x18] sm:$0xff] }
 0x342   :  { %v13812_v55 = vcombine.high %v3408_v15, %v3408_v15  ;;  %v2923_v16 = vld [vmem:[%s18279_s10 + $0x58] sm:$0xff] }
 0x343   :  { %18893 = vst [vmem:[#allocation109_spill] sm:$0xff] %v13796_v18  ;;  %18894 = vst [vmem:[#allocation110_spill] sm:$0xff] %v13798_v41 }
 0x344   :  { %6139 = vmatpush1.bf16.msra.mxu0 %v13766_v9  ;;  %6225 = vmatpush1.bf16.msra.mxu1 %v13768_v23  ;;  %v3409_v23 = vld [vmem:[%s18279_s10 + $0xf88] sm:$0x33]  ;;  %18895 = vst [vmem:[#allocation111_spill] sm:$0xff] %v13808_v34  ;;  %18897 = vst [vmem:[#allocation113_spill] sm:$0xff] %v13812_v55  ;;  %v2946_v9 = vld [vmem:[%s18279_s10 + $0x110] sm:$0xff] }
 0x345   :  { %6140 = vmatprep.subr.bf16.mxu0 %v13772_v24  ;;  %6226 = vmatprep.subr.bf16.mxu1 %v13774_v27  ;;  %v13816_v53 = vcombine.high %v3409_v23, %v3409_v23  ;;  %v13818_v27 = vcombine.low %v3408_v15, %v3408_v15  ;;  %v13820_v24 = vcombine.low %v3409_v23, %v3409_v23 }
 0x347   :  { %18898 = vst [vmem:[#allocation114_spill] sm:$0xff] %v13816_v53  ;;  %18899 = vst [vmem:[#allocation115_spill] sm:$0xff] %v13818_v27  ;;  %v6024_v15 = vsel %vm2643_vm6, %v13818_v27, 0  ;;  %v6030_v23 = vsel %vm2643_vm6, %v13820_v24, 0 }
 0x348   :  { %6141 = vmatpush1.bf16.msra.mxu0 %v13790_v17  ;;  %6227 = vmatpush1.bf16.msra.mxu1 %v13792_v42  ;;  %18900 = vst [vmem:[#allocation116_spill] sm:$0xff] %v13820_v24  ;;  %v2914_v42 = vld [vmem:[%s18279_s10 + $0x10] sm:$0xff]  ;;  %v2939_v24 = vld [vmem:[%s18279_s10 + $0xd8] sm:$0xff] }
 0x349   :  { %6142 = vmatprep.subr.bf16.mxu0 %v13796_v18  ;;  %6228 = vmatprep.subr.bf16.mxu1 %v13798_v41  ;;  %v13844_v25 = vcombine.high %v2914_v42, %v2922_v56  ;;  %v13846_v41 = vcombine.high %v2915_v33, %v2923_v16  ;;  %v13860_v27 = vcombine.low %v2914_v42, %v2922_v56  ;;  %v2947_v42 = vld [vmem:[%s18279_s10 + $0x118] sm:$0xff] }
 0x34a   :  { %v2955_v56 = vld [vmem:[%s18279_s10 + $0x158] sm:$0xff] }
 0x34b   :  { %18901 = vst [vmem:[#allocation117_spill] sm:$0xff] %v13844_v25  ;;  %18902 = vst [vmem:[#allocation118_spill] sm:$0xff] %v13846_v41 }
 0x34c   :  { %6143 = vmatpush1.bf16.msra.mxu0 %v13808_v34  ;;  %6229 = vmatpush1.bf16.msra.mxu1 %v13810_v45  ;;  %v2930_v45 = vld [vmem:[%s18279_s10 + $0x90] sm:$0xff]  ;;  %18903 = vst [vmem:[#allocation119_spill] sm:$0xff] %v13860_v27  ;;  %v13863_v34 = vcombine.low %v2915_v33, %v2923_v16 }
 0x34d   :  { %9896 = vmatprep.subr.msk.bf16.mxu0 %vm2643_vm6, %v13812_v55  ;;  %9904 = vmatprep.subr.msk.bf16.mxu1 %vm2643_vm6, %v13816_v53  ;;  %v2938_v55 = vld [vmem:[%s18279_s10 + $0xd0] sm:$0xff]  ;;  %v2931_v53 = vld [vmem:[%s18279_s10 + $0x98] sm:$0xff] }
 0x34e   :  { %18904 = vst [vmem:[#allocation120_spill] sm:$0xff] %v13863_v34  ;;  %v13866_v18 = vcombine.high %v2930_v45, %v2938_v55  ;;  %v13868_v17 = vcombine.high %v2931_v53, %v2939_v24  ;;  %v13892_v33 = vcombine.low %v2930_v45, %v2938_v55  ;;  %v13898_v16 = vcombine.low %v2931_v53, %v2939_v24  ;;  %v2962_v45 = vld [vmem:[%s18279_s10 + $0x190] sm:$0xff]  ;;  %v2963_v24 = vld [vmem:[%s18279_s10 + $0x198] sm:$0xff] }
 0x34f   :  { %v2970_v55 = vld [vmem:[%s18279_s10 + $0x1d0] sm:$0xff]  ;;  %v2971_v53 = vld [vmem:[%s18279_s10 + $0x1d8] sm:$0xff] }
 0x350   :  { %6145 = vmatpush1.bf16.msra.mxu0 %v6024_v15  ;;  %6231 = vmatpush1.bf16.msra.mxu1 %v6030_v23  ;;  %18905 = vst [vmem:[#allocation121_spill] sm:$0xff] %v13866_v18  ;;  %18906 = vst [vmem:[#allocation122_spill] sm:$0xff] %v13868_v17  ;;  %v2954_v15 = vld [vmem:[%s18279_s10 + $0x150] sm:$0xff] }
 0x351   :  { %6243 = vmatprep.subr.bf16.mxu0 %v13844_v25  ;;  %6329 = vmatprep.subr.bf16.mxu1 %v13846_v41  ;;  %18907 = vst [vmem:[#allocation123_spill] sm:$0xff] %v13892_v33  ;;  %18908 = vst [vmem:[#allocation124_spill] sm:$0xff] %v13898_v16  ;;  %v13900_v23 = vcombine.high %v2946_v9, %v2954_v15  ;;  %v13904_v41 = vcombine.high %v2947_v42, %v2955_v56  ;;  %v2978_v25 = vld [vmem:[%s18279_s10 + $0x210] sm:$0xff] }
 0x353   :  { %9899 = vmatmul.mubr.msk.bf16.vlgmr.msra.gmra.mrb[8].mxu0 %vm13456_vm5, %v18850_v60  ;;  %9907 = vmatmul.mubr.msk.bf16.vlgmr.msra.gmra.mrb[12].mxu1 %vm13456_vm5, %v18850_v60  ;;  %18909 = vst [vmem:[#allocation125_spill] sm:$0xff] %v13900_v23  ;;  %18910 = vst [vmem:[#allocation126_spill] sm:$0xff] %v13904_v41 }
 0x354   :  { %6244 = vmatpush1.bf16.msra.mxu0 %v13860_v27  ;;  %9909 = vmatprep.mubr.msk.bf16.mxu0 %vm13460_vm8, %v18850_v60  ;;  %v13928_v27 = vcombine.high %v2963_v24, %v2971_v53 }
 0x355   :  { %6330 = vmatpush1.bf16.msra.mxu1 %v13863_v34  ;;  %9917 = vmatprep.mubr.msk.bf16.mxu1 %vm13460_vm8, %v18850_v60  ;;  %v13923_v34 = vcombine.low %v2947_v42, %v2955_v56  ;;  %v2987_v42 = vld [vmem:[%s18279_s10 + $0x258] sm:$0xff]  ;;  %v13943_v56 = vcombine.low %v2962_v45, %v2970_v55 }
 0x356   :  { %6245 = vmatprep.subr.bf16.mxu0 %v13866_v18  ;;  %6331 = vmatprep.subr.bf16.mxu1 %v13868_v17  ;;  %v13919_v17 = vcombine.low %v2946_v9, %v2954_v15  ;;  %v13925_v18 = vcombine.high %v2962_v45, %v2970_v55  ;;  %18914 = vst [vmem:[#allocation130_spill] sm:$0xff] %v13928_v27  ;;  %v2986_v9 = vld [vmem:[%s18279_s10 + $0x250] sm:$0xff]  ;;  %v2979_v15 = vld [vmem:[%s18279_s10 + $0x218] sm:$0xff] }
 0x357   :  { %18912 = vst [vmem:[#allocation128_spill] sm:$0xff] %v13923_v34  ;;  %18915 = vst [vmem:[#allocation131_spill] sm:$0xff] %v13943_v56  ;;  %v3002_v45 = vld [vmem:[%s18279_s10 + $0x2d0] sm:$0xff]  ;;  %v2995_v55 = vld [vmem:[%s18279_s10 + $0x298] sm:$0xff] }
 0x358   :  { %6246 = vmatpush1.bf16.msra.mxu0 %v13892_v33  ;;  %18911 = vst [vmem:[#allocation127_spill] sm:$0xff] %v13919_v17  ;;  %18913 = vst [vmem:[#allocation129_spill] sm:$0xff] %v13925_v18  ;;  %v2994_v33 = vld [vmem:[%s18279_s10 + $0x290] sm:$0xff] }
 0x359   :  { %6332 = vmatpush1.bf16.msra.mxu1 %v13898_v16  ;;  %6247 = vmatprep.subr.bf16.mxu0 %v13900_v23  ;;  %v13949_v16 = vcombine.high %v2978_v25, %v2986_v9  ;;  %v13952_v23 = vcombine.high %v2979_v15, %v2987_v42 }
 0x35a   :  { %6333 = vmatprep.subr.bf16.mxu1 %v13904_v41  ;;  %v13947_v41 = vcombine.low %v2963_v24, %v2971_v53  ;;  %v3003_v24 = vld [vmem:[%s18279_s10 + $0x2d8] sm:$0xff]  ;;  %v13967_v53 = vcombine.low %v2978_v25, %v2986_v9  ;;  %v3018_v25 = vld [vmem:[%s18279_s10 + $0x350] sm:$0xff] }
 0x35b   :  { %18917 = vst [vmem:[#allocation133_spill] sm:$0xff] %v13949_v16  ;;  %18918 = vst [vmem:[#allocation134_spill] sm:$0xff] %v13952_v23  ;;  %v3011_v9 = vld [vmem:[%s18279_s10 + $0x318] sm:$0xff] }
 0x35c   :  { %6248 = vmatpush1.bf16.msra.mxu0 %v13919_v17  ;;  %18916 = vst [vmem:[#allocation132_spill] sm:$0xff] %v13947_v41  ;;  %18919 = vst [vmem:[#allocation135_spill] sm:$0xff] %v13967_v53  ;;  %v3010_v17 = vld [vmem:[%s18279_s10 + $0x310] sm:$0xff] }
 0x35d   :  { %6334 = vmatpush1.bf16.msra.mxu1 %v13923_v34  ;;  %6249 = vmatprep.subr.bf16.mxu0 %v13925_v18  ;;  %v13973_v34 = vcombine.high %v2994_v33, %v3002_v45  ;;  %v13976_v18 = vcombine.high %v2995_v55, %v3003_v24 }
 0x35e   :  { %6335 = vmatprep.subr.bf16.mxu1 %v13928_v27  ;;  %v13971_v27 = vcombine.low %v2979_v15, %v2987_v42  ;;  %v3019_v15 = vld [vmem:[%s18279_s10 + $0x358] sm:$0xff]  ;;  %v13991_v42 = vcombine.low %v2994_v33, %v3002_v45  ;;  %v3034_v33 = vld [vmem:[%s18279_s10 + $0x3d0] sm:$0xff] }
 0x35f   :  { %18921 = vst [vmem:[#allocation137_spill] sm:$0xff] %v13973_v34  ;;  %18922 = vst [vmem:[#allocation138_spill] sm:$0xff] %v13976_v18  ;;  %v3027_v45 = vld [vmem:[%s18279_s10 + $0x398] sm:$0xff] }
 0x360   :  { %6250 = vmatpush1.bf16.msra.mxu0 %v13943_v56  ;;  %18920 = vst [vmem:[#allocation136_spill] sm:$0xff] %v13971_v27  ;;  %18923 = vst [vmem:[#allocation139_spill] sm:$0xff] %v13991_v42  ;;  %v3026_v56 = vld [vmem:[%s18279_s10 + $0x390] sm:$0xff] }
 0x361   :  { %6336 = vmatpush1.bf16.msra.mxu1 %v13947_v41  ;;  %6251 = vmatprep.subr.bf16.mxu0 %v13949_v16  ;;  %v13997_v41 = vcombine.high %v3010_v17, %v3018_v25  ;;  %v14000_v16 = vcombine.high %v3011_v9, %v3019_v15 }
 0x362   :  { %6337 = vmatprep.subr.bf16.mxu1 %v13952_v23  ;;  %v13995_v23 = vcombine.low %v2995_v55, %v3003_v24  ;;  %v3035_v55 = vld [vmem:[%s18279_s10 + $0x3d8] sm:$0xff]  ;;  %v14015_v24 = vcombine.low %v3010_v17, %v3018_v25  ;;  %v3050_v17 = vld [vmem:[%s18279_s10 + $0x450] sm:$0xff] }
 0x363   :  { %18925 = vst [vmem:[#allocation141_spill] sm:$0xff] %v13997_v41  ;;  %18926 = vst [vmem:[#allocation142_spill] sm:$0xff] %v14000_v16  ;;  %v3043_v25 = vld [vmem:[%s18279_s10 + $0x418] sm:$0xff] }
 0x364   :  { %6252 = vmatpush1.bf16.msra.mxu0 %v13967_v53  ;;  %18924 = vst [vmem:[#allocation140_spill] sm:$0xff] %v13995_v23  ;;  %18927 = vst [vmem:[#allocation143_spill] sm:$0xff] %v14015_v24  ;;  %v3042_v53 = vld [vmem:[%s18279_s10 + $0x410] sm:$0xff] }
 0x365   :  { %6338 = vmatpush1.bf16.msra.mxu1 %v13971_v27  ;;  %6253 = vmatprep.subr.bf16.mxu0 %v13973_v34  ;;  %v14021_v27 = vcombine.high %v3026_v56, %v3034_v33  ;;  %v14024_v34 = vcombine.high %v3027_v45, %v3035_v55 }
 0x366   :  { %6339 = vmatprep.subr.bf16.mxu1 %v13976_v18  ;;  %v14019_v18 = vcombine.low %v3011_v9, %v3019_v15  ;;  %v3051_v9 = vld [vmem:[%s18279_s10 + $0x458] sm:$0xff]  ;;  %v14039_v15 = vcombine.low %v3026_v56, %v3034_v33  ;;  %v3066_v56 = vld [vmem:[%s18279_s10 + $0x4d0] sm:$0xff] }
 0x367   :  { %18929 = vst [vmem:[#allocation145_spill] sm:$0xff] %v14021_v27  ;;  %18930 = vst [vmem:[#allocation146_spill] sm:$0xff] %v14024_v34  ;;  %v3059_v33 = vld [vmem:[%s18279_s10 + $0x498] sm:$0xff] }
 0x368   :  { %6254 = vmatpush1.bf16.msra.mxu0 %v13991_v42  ;;  %18928 = vst [vmem:[#allocation144_spill] sm:$0xff] %v14019_v18  ;;  %18931 = vst [vmem:[#allocation147_spill] sm:$0xff] %v14039_v15  ;;  %v3058_v42 = vld [vmem:[%s18279_s10 + $0x490] sm:$0xff] }
 0x369   :  { %6340 = vmatpush1.bf16.msra.mxu1 %v13995_v23  ;;  %6255 = vmatprep.subr.bf16.mxu0 %v13997_v41  ;;  %v14045_v23 = vcombine.high %v3042_v53, %v3050_v17  ;;  %v14048_v41 = vcombine.high %v3043_v25, %v3051_v9 }
 0x36a   :  { %6341 = vmatprep.subr.bf16.mxu1 %v14000_v16  ;;  %v14043_v16 = vcombine.low %v3027_v45, %v3035_v55  ;;  %v3067_v45 = vld [vmem:[%s18279_s10 + $0x4d8] sm:$0xff]  ;;  %v14063_v55 = vcombine.low %v3042_v53, %v3050_v17  ;;  %v3082_v53 = vld [vmem:[%s18279_s10 + $0x550] sm:$0xff] }
 0x36b   :  { %18933 = vst [vmem:[#allocation149_spill] sm:$0xff] %v14045_v23  ;;  %18934 = vst [vmem:[#allocation150_spill] sm:$0xff] %v14048_v41  ;;  %v3075_v17 = vld [vmem:[%s18279_s10 + $0x518] sm:$0xff] }
 0x36c   :  { %6256 = vmatpush1.bf16.msra.mxu0 %v14015_v24  ;;  %18932 = vst [vmem:[#allocation148_spill] sm:$0xff] %v14043_v16  ;;  %18935 = vst [vmem:[#allocation151_spill] sm:$0xff] %v14063_v55  ;;  %v3074_v24 = vld [vmem:[%s18279_s10 + $0x510] sm:$0xff] }
 0x36d   :  { %6342 = vmatpush1.bf16.msra.mxu1 %v14019_v18  ;;  %6257 = vmatprep.subr.bf16.mxu0 %v14021_v27  ;;  %v14069_v18 = vcombine.high %v3058_v42, %v3066_v56  ;;  %v14072_v27 = vcombine.high %v3059_v33, %v3067_v45 }
 0x36e   :  { %6343 = vmatprep.subr.bf16.mxu1 %v14024_v34  ;;  %v14067_v34 = vcombine.low %v3043_v25, %v3051_v9  ;;  %v3083_v25 = vld [vmem:[%s18279_s10 + $0x558] sm:$0xff]  ;;  %v14087_v9 = vcombine.low %v3058_v42, %v3066_v56  ;;  %v3098_v42 = vld [vmem:[%s18279_s10 + $0x5d0] sm:$0xff] }
 0x36f   :  { %18937 = vst [vmem:[#allocation153_spill] sm:$0xff] %v14069_v18  ;;  %18938 = vst [vmem:[#allocation154_spill] sm:$0xff] %v14072_v27  ;;  %v3091_v56 = vld [vmem:[%s18279_s10 + $0x598] sm:$0xff] }
 0x370   :  { %6258 = vmatpush1.bf16.msra.mxu0 %v14039_v15  ;;  %18936 = vst [vmem:[#allocation152_spill] sm:$0xff] %v14067_v34  ;;  %18939 = vst [vmem:[#allocation155_spill] sm:$0xff] %v14087_v9  ;;  %v3090_v15 = vld [vmem:[%s18279_s10 + $0x590] sm:$0xff] }
 0x371   :  { %6344 = vmatpush1.bf16.msra.mxu1 %v14043_v16  ;;  %6259 = vmatprep.subr.bf16.mxu0 %v14045_v23  ;;  %v14093_v16 = vcombine.high %v3074_v24, %v3082_v53  ;;  %v14096_v23 = vcombine.high %v3075_v17, %v3083_v25 }
 0x372   :  { %6345 = vmatprep.subr.bf16.mxu1 %v14048_v41  ;;  %v14091_v41 = vcombine.low %v3059_v33, %v3067_v45  ;;  %v3099_v33 = vld [vmem:[%s18279_s10 + $0x5d8] sm:$0xff]  ;;  %v14111_v45 = vcombine.low %v3074_v24, %v3082_v53  ;;  %v3114_v24 = vld [vmem:[%s18279_s10 + $0x650] sm:$0xff] }
 0x373   :  { %18941 = vst [vmem:[#allocation157_spill] sm:$0xff] %v14093_v16  ;;  %18942 = vst [vmem:[#allocation158_spill] sm:$0xff] %v14096_v23  ;;  %v3107_v53 = vld [vmem:[%s18279_s10 + $0x618] sm:$0xff] }
 0x374   :  { %6260 = vmatpush1.bf16.msra.mxu0 %v14063_v55  ;;  %18940 = vst [vmem:[#allocation156_spill] sm:$0xff] %v14091_v41  ;;  %18943 = vst [vmem:[#allocation159_spill] sm:$0xff] %v14111_v45  ;;  %v3106_v55 = vld [vmem:[%s18279_s10 + $0x610] sm:$0xff] }
 0x375   :  { %6346 = vmatpush1.bf16.msra.mxu1 %v14067_v34  ;;  %6261 = vmatprep.subr.bf16.mxu0 %v14069_v18  ;;  %v14117_v34 = vcombine.high %v3090_v15, %v3098_v42  ;;  %v14120_v18 = vcombine.high %v3091_v56, %v3099_v33 }
 0x376   :  { %6347 = vmatprep.subr.bf16.mxu1 %v14072_v27  ;;  %v14115_v27 = vcombine.low %v3075_v17, %v3083_v25  ;;  %v3115_v17 = vld [vmem:[%s18279_s10 + $0x658] sm:$0xff]  ;;  %v14135_v25 = vcombine.low %v3090_v15, %v3098_v42  ;;  %v3130_v15 = vld [vmem:[%s18279_s10 + $0x6d0] sm:$0xff] }
 0x377   :  { %18945 = vst [vmem:[#allocation161_spill] sm:$0xff] %v14117_v34  ;;  %18946 = vst [vmem:[#allocation162_spill] sm:$0xff] %v14120_v18  ;;  %v3123_v42 = vld [vmem:[%s18279_s10 + $0x698] sm:$0xff] }
 0x378   :  { %6262 = vmatpush1.bf16.msra.mxu0 %v14087_v9  ;;  %18944 = vst [vmem:[#allocation160_spill] sm:$0xff] %v14115_v27  ;;  %18947 = vst [vmem:[#allocation163_spill] sm:$0xff] %v14135_v25  ;;  %v3122_v9 = vld [vmem:[%s18279_s10 + $0x690] sm:$0xff] }
 0x379   :  { %6348 = vmatpush1.bf16.msra.mxu1 %v14091_v41  ;;  %6263 = vmatprep.subr.bf16.mxu0 %v14093_v16  ;;  %v14141_v41 = vcombine.high %v3106_v55, %v3114_v24  ;;  %v14144_v16 = vcombine.high %v3107_v53, %v3115_v17 }
 0x37a   :  { %6349 = vmatprep.subr.bf16.mxu1 %v14096_v23  ;;  %v14139_v23 = vcombine.low %v3091_v56, %v3099_v33  ;;  %v3131_v56 = vld [vmem:[%s18279_s10 + $0x6d8] sm:$0xff]  ;;  %v14159_v33 = vcombine.low %v3106_v55, %v3114_v24  ;;  %v3146_v55 = vld [vmem:[%s18279_s10 + $0x750] sm:$0xff] }
 0x37b   :  { %18949 = vst [vmem:[#allocation165_spill] sm:$0xff] %v14141_v41  ;;  %18950 = vst [vmem:[#allocation166_spill] sm:$0xff] %v14144_v16  ;;  %v3139_v24 = vld [vmem:[%s18279_s10 + $0x718] sm:$0xff] }
 0x37c   :  { %6264 = vmatpush1.bf16.msra.mxu0 %v14111_v45  ;;  %18948 = vst [vmem:[#allocation164_spill] sm:$0xff] %v14139_v23  ;;  %18951 = vst [vmem:[#allocation167_spill] sm:$0xff] %v14159_v33  ;;  %v3138_v45 = vld [vmem:[%s18279_s10 + $0x710] sm:$0xff] }
 0x37d   :  { %6350 = vmatpush1.bf16.msra.mxu1 %v14115_v27  ;;  %6265 = vmatprep.subr.bf16.mxu0 %v14117_v34  ;;  %v14165_v27 = vcombine.high %v3122_v9, %v3130_v15  ;;  %v14168_v34 = vcombine.high %v3123_v42, %v3131_v56 }
 0x37e   :  { %6351 = vmatprep.subr.bf16.mxu1 %v14120_v18  ;;  %v14163_v18 = vcombine.low %v3107_v53, %v3115_v17  ;;  %v3147_v53 = vld [vmem:[%s18279_s10 + $0x758] sm:$0xff]  ;;  %v14183_v17 = vcombine.low %v3122_v9, %v3130_v15  ;;  %v3162_v9 = vld [vmem:[%s18279_s10 + $0x7d0] sm:$0xff] }
 0x37f   :  { %18953 = vst [vmem:[#allocation169_spill] sm:$0xff] %v14165_v27  ;;  %18954 = vst [vmem:[#allocation170_spill] sm:$0xff] %v14168_v34  ;;  %v3155_v15 = vld [vmem:[%s18279_s10 + $0x798] sm:$0xff] }
 0x380   :  { %6266 = vmatpush1.bf16.msra.mxu0 %v14135_v25  ;;  %18952 = vst [vmem:[#allocation168_spill] sm:$0xff] %v14163_v18  ;;  %18955 = vst [vmem:[#allocation171_spill] sm:$0xff] %v14183_v17  ;;  %v3154_v25 = vld [vmem:[%s18279_s10 + $0x790] sm:$0xff] }
 0x381   :  { %6352 = vmatpush1.bf16.msra.mxu1 %v14139_v23  ;;  %6267 = vmatprep.subr.bf16.mxu0 %v14141_v41  ;;  %v14189_v23 = vcombine.high %v3138_v45, %v3146_v55  ;;  %v14192_v41 = vcombine.high %v3139_v24, %v3147_v53 }
 0x382   :  { %6353 = vmatprep.subr.bf16.mxu1 %v14144_v16  ;;  %v14187_v16 = vcombine.low %v3123_v42, %v3131_v56  ;;  %v3163_v42 = vld [vmem:[%s18279_s10 + $0x7d8] sm:$0xff]  ;;  %v14207_v56 = vcombine.low %v3138_v45, %v3146_v55  ;;  %v3178_v45 = vld [vmem:[%s18279_s10 + $0x850] sm:$0xff] }
 0x383   :  { %18957 = vst [vmem:[#allocation173_spill] sm:$0xff] %v14189_v23  ;;  %18958 = vst [vmem:[#allocation174_spill] sm:$0xff] %v14192_v41  ;;  %v3171_v55 = vld [vmem:[%s18279_s10 + $0x818] sm:$0xff] }
 0x384   :  { %6268 = vmatpush1.bf16.msra.mxu0 %v14159_v33  ;;  %18956 = vst [vmem:[#allocation172_spill] sm:$0xff] %v14187_v16  ;;  %18959 = vst [vmem:[#allocation175_spill] sm:$0xff] %v14207_v56  ;;  %v3170_v33 = vld [vmem:[%s18279_s10 + $0x810] sm:$0xff] }
 0x385   :  { %6354 = vmatpush1.bf16.msra.mxu1 %v14163_v18  ;;  %6269 = vmatprep.subr.bf16.mxu0 %v14165_v27  ;;  %v14213_v18 = vcombine.high %v3154_v25, %v3162_v9  ;;  %v14216_v27 = vcombine.high %v3155_v15, %v3163_v42 }
 0x386   :  { %6355 = vmatprep.subr.bf16.mxu1 %v14168_v34  ;;  %v14211_v34 = vcombine.low %v3139_v24, %v3147_v53  ;;  %v3179_v24 = vld [vmem:[%s18279_s10 + $0x858] sm:$0xff]  ;;  %v14231_v53 = vcombine.low %v3154_v25, %v3162_v9  ;;  %v3194_v25 = vld [vmem:[%s18279_s10 + $0x8d0] sm:$0xff]  ;;  %v14249_v9 = vcombine.low %v3170_v33, %v3178_v45 }
 0x387   :  { %18961 = vst [vmem:[#allocation177_spill] sm:$0xff] %v14213_v18  ;;  %18962 = vst [vmem:[#allocation178_spill] sm:$0xff] %v14216_v27 }
 0x388   :  { %6270 = vmatpush1.bf16.msra.mxu0 %v14183_v17  ;;  %18960 = vst [vmem:[#allocation176_spill] sm:$0xff] %v14211_v34  ;;  %18963 = vst [vmem:[#allocation179_spill] sm:$0xff] %v14231_v53  ;;  %v3186_v17 = vld [vmem:[%s18279_s10 + $0x890] sm:$0xff] }
 0x389   :  { %6356 = vmatpush1.bf16.msra.mxu1 %v14187_v16  ;;  %6271 = vmatprep.subr.bf16.mxu0 %v14189_v23  ;;  %v14237_v16 = vcombine.high %v3170_v33, %v3178_v45  ;;  %v14240_v23 = vcombine.high %v3171_v55, %v3179_v24  ;;  %18967 = vst [vmem:[#allocation183_spill] sm:$0xff] %v14249_v9  ;;  %v3202_v33 = vld [vmem:[%s18279_s10 + $0x910] sm:$0xff] }
 0x38a   :  { %6357 = vmatprep.subr.bf16.mxu1 %v14192_v41  ;;  %v14235_v41 = vcombine.low %v3155_v15, %v3163_v42  ;;  %v3187_v15 = vld [vmem:[%s18279_s10 + $0x898] sm:$0xff]  ;;  %v3210_v45 = vld [vmem:[%s18279_s10 + $0x950] sm:$0xff] }
 0x38b   :  { %18965 = vst [vmem:[#allocation181_spill] sm:$0xff] %v14237_v16  ;;  %18966 = vst [vmem:[#allocation182_spill] sm:$0xff] %v14240_v23  ;;  %v3195_v42 = vld [vmem:[%s18279_s10 + $0x8d8] sm:$0xff] }
 0x38c   :  { %6272 = vmatpush1.bf16.msra.mxu0 %v14207_v56  ;;  %18964 = vst [vmem:[#allocation180_spill] sm:$0xff] %v14235_v41 }
 0x38d   :  { %6358 = vmatpush1.bf16.msra.mxu1 %v14211_v34  ;;  %6273 = vmatprep.subr.bf16.mxu0 %v14213_v18  ;;  %v14262_v34 = vcombine.high %v3186_v17, %v3194_v25  ;;  %v14292_v18 = vcombine.high %v3202_v33, %v3210_v45 }
 0x38e   :  { %6359 = vmatprep.subr.bf16.mxu1 %v14216_v27  ;;  %v14259_v27 = vcombine.low %v3171_v55, %v3179_v24  ;;  %v3203_v55 = vld [vmem:[%s18279_s10 + $0x918] sm:$0xff] }
 0x38f   :  { %18969 = vst [vmem:[#allocation185_spill] sm:$0xff] %v14262_v34  ;;  %v3211_v24 = vld [vmem:[%s18279_s10 + $0x958] sm:$0xff]  ;;  %18973 = vst [vmem:[#allocation189_spill] sm:$0xff] %v14292_v18 }
 0x390   :  { %6274 = vmatpush1.bf16.msra.mxu0 %v14231_v53  ;;  %18968 = vst [vmem:[#allocation184_spill] sm:$0xff] %v14259_v27  ;;  %v14290_v53 = vcombine.low %v3187_v15, %v3195_v42  ;;  %v14297_v56 = vcombine.high %v3203_v55, %v3211_v24 }
 0x391   :  { %6360 = vmatpush1.bf16.msra.mxu1 %v14235_v41  ;;  %6286 = vmatprep.subr.bf16.mxu0 %v14237_v16  ;;  %v14273_v41 = vcombine.high %v3187_v15, %v3195_v42  ;;  %v3219_v15 = vld [vmem:[%s18279_s10 + $0x998] sm:$0xff]  ;;  %v3234_v16 = vld [vmem:[%s18279_s10 + $0xa10] sm:$0xff] }
 0x392   :  { %6372 = vmatprep.subr.bf16.mxu1 %v14240_v23  ;;  %v14285_v23 = vcombine.low %v3186_v17, %v3194_v25  ;;  %18972 = vst [vmem:[#allocation188_spill] sm:$0xff] %v14290_v53  ;;  %18974 = vst [vmem:[#allocation190_spill] sm:$0xff] %v14297_v56  ;;  %v3218_v17 = vld [vmem:[%s18279_s10 + $0x990] sm:$0xff]  ;;  %v3227_v42 = vld [vmem:[%s18279_s10 + $0x9d8] sm:$0xff] }
 0x393   :  { %9911 = vmatmul.mubr.msk.bf16.vlgmr.msra.gmra.mrb[12].mxu0 %vm13446_vm2, %v18850_v60  ;;  %18970 = vst [vmem:[#allocation186_spill] sm:$0xff] %v14273_v41  ;;  %v3226_v25 = vld [vmem:[%s18279_s10 + $0x9d0] sm:$0xff] }
 0x394   :  { %9919 = vmatmul.mubr.msk.bf16.vlgmr.msra.gmra.mrb[16].mxu1 %vm13446_vm2, %v18850_v60  ;;  %6287 = vmatpush1.bf16.msra.mxu0 %v14249_v9  ;;  %18971 = vst [vmem:[#allocation187_spill] sm:$0xff] %v14285_v23  ;;  %v14319_v9 = vcombine.high %v3218_v17, %v3226_v25 }
 0x395   :  { %9913 = vmatprep.mubr.msk.bf16.mxu0 %vm18776_vm12, %v13488_v32  ;;  %6373 = vmatpush1.bf16.msra.mxu1 %v14259_v27  ;;  %v14313_v27 = vcombine.low %v3202_v33, %v3210_v45  ;;  %v3242_v33 = vld [vmem:[%s18279_s10 + $0xa50] sm:$0xff]  ;;  %v3235_v45 = vld [vmem:[%s18279_s10 + $0xa18] sm:$0xff] }
 0x396   :  { %9921 = vmatprep.mubr.msk.bf16.mxu1 %vm18776_vm12, %v13488_v32  ;;  %6288 = vmatprep.subr.bf16.mxu0 %v14262_v34  ;;  %v14317_v34 = vcombine.low %v3203_v55, %v3211_v24  ;;  %18977 = vst [vmem:[#allocation193_spill] sm:$0xff] %v14319_v9  ;;  %v3243_v55 = vld [vmem:[%s18279_s10 + $0xa58] sm:$0xff]  ;;  %v14337_v24 = vcombine.low %v3218_v17, %v3226_v25  ;;  %v3258_v17 = vld [vmem:[%s18279_s10 + $0xad0] sm:$0xff] }
 0x397   :  { %6374 = vmatprep.subr.bf16.mxu1 %v14273_v41  ;;  %18975 = vst [vmem:[#allocation191_spill] sm:$0xff] %v14313_v27  ;;  %v14322_v41 = vcombine.high %v3219_v15, %v3227_v42  ;;  %v3251_v25 = vld [vmem:[%s18279_s10 + $0xa98] sm:$0xff] }
 0x398   :  { %6289 = vmatpush1.bf16.msra.mxu0 %v14285_v23  ;;  %18976 = vst [vmem:[#allocation192_spill] sm:$0xff] %v14317_v34  ;;  %18979 = vst [vmem:[#allocation195_spill] sm:$0xff] %v14337_v24  ;;  %v3250_v23 = vld [vmem:[%s18279_s10 + $0xa90] sm:$0xff] }
 0x399   :  { %6375 = vmatpush1.bf16.msra.mxu1 %v14290_v53  ;;  %6290 = vmatprep.subr.bf16.mxu0 %v14292_v18  ;;  %18978 = vst [vmem:[#allocation194_spill] sm:$0xff] %v14322_v41  ;;  %v14343_v53 = vcombine.high %v3234_v16, %v3242_v33  ;;  %v14346_v18 = vcombine.high %v3235_v45, %v3243_v55 }
 0x39a   :  { %6376 = vmatprep.subr.bf16.mxu1 %v14297_v56  ;;  %v14341_v56 = vcombine.low %v3219_v15, %v3227_v42  ;;  %v3259_v15 = vld [vmem:[%s18279_s10 + $0xad8] sm:$0xff]  ;;  %v14361_v42 = vcombine.low %v3234_v16, %v3242_v33  ;;  %v3274_v16 = vld [vmem:[%s18279_s10 + $0xb50] sm:$0xff] }
 0x39b   :  { %18981 = vst [vmem:[#allocation197_spill] sm:$0xff] %v14343_v53  ;;  %18982 = vst [vmem:[#allocation198_spill] sm:$0xff] %v14346_v18  ;;  %v3267_v33 = vld [vmem:[%s18279_s10 + $0xb18] sm:$0xff] }
 0x39c   :  { %6291 = vmatpush1.bf16.msra.mxu0 %v14313_v27  ;;  %18980 = vst [vmem:[#allocation196_spill] sm:$0xff] %v14341_v56  ;;  %18983 = vst [vmem:[#allocation199_spill] sm:$0xff] %v14361_v42  ;;  %v3266_v27 = vld [vmem:[%s18279_s10 + $0xb10] sm:$0xff] }
 0x39d   :  { %6377 = vmatpush1.bf16.msra.mxu1 %v14317_v34  ;;  %6292 = vmatprep.subr.bf16.mxu0 %v14319_v9  ;;  %v14367_v34 = vcombine.high %v3250_v23, %v3258_v17  ;;  %v14370_v9 = vcombine.high %v3251_v25, %v3259_v15 }
 0x39e   :  { %6378 = vmatprep.subr.bf16.mxu1 %v14322_v41  ;;  %v14365_v41 = vcombine.low %v3235_v45, %v3243_v55  ;;  %v3275_v45 = vld [vmem:[%s18279_s10 + $0xb58] sm:$0xff]  ;;  %v14385_v55 = vcombine.low %v3250_v23, %v3258_v17  ;;  %v3290_v23 = vld [vmem:[%s18279_s10 + $0xbd0] sm:$0xff] }
 0x39f   :  { %18985 = vst [vmem:[#allocation201_spill] sm:$0xff] %v14367_v34  ;;  %18986 = vst [vmem:[#allocation202_spill] sm:$0xff] %v14370_v9  ;;  %v3283_v17 = vld [vmem:[%s18279_s10 + $0xb98] sm:$0xff] }
 0x3a0   :  { %6293 = vmatpush1.bf16.msra.mxu0 %v14337_v24  ;;  %18984 = vst [vmem:[#allocation200_spill] sm:$0xff] %v14365_v41  ;;  %18987 = vst [vmem:[#allocation203_spill] sm:$0xff] %v14385_v55  ;;  %v3282_v24 = vld [vmem:[%s18279_s10 + $0xb90] sm:$0xff] }
 0x3a1   :  { %6379 = vmatpush1.bf16.msra.mxu1 %v14341_v56  ;;  %6294 = vmatprep.subr.bf16.mxu0 %v14343_v53  ;;  %v14391_v56 = vcombine.high %v3266_v27, %v3274_v16  ;;  %v14394_v53 = vcombine.high %v3267_v33, %v3275_v45 }
 0x3a2   :  { %6380 = vmatprep.subr.bf16.mxu1 %v14346_v18  ;;  %v14389_v18 = vcombine.low %v3251_v25, %v3259_v15  ;;  %v3291_v25 = vld [vmem:[%s18279_s10 + $0xbd8] sm:$0xff]  ;;  %v14409_v15 = vcombine.low %v3266_v27, %v3274_v16  ;;  %v3306_v27 = vld [vmem:[%s18279_s10 + $0xc50] sm:$0xff] }
 0x3a3   :  { %18989 = vst [vmem:[#allocation205_spill] sm:$0xff] %v14391_v56  ;;  %18990 = vst [vmem:[#allocation206_spill] sm:$0xff] %v14394_v53  ;;  %v3299_v16 = vld [vmem:[%s18279_s10 + $0xc18] sm:$0xff] }
 0x3a4   :  { %6295 = vmatpush1.bf16.msra.mxu0 %v14361_v42  ;;  %18988 = vst [vmem:[#allocation204_spill] sm:$0xff] %v14389_v18  ;;  %18991 = vst [vmem:[#allocation207_spill] sm:$0xff] %v14409_v15  ;;  %v3298_v42 = vld [vmem:[%s18279_s10 + $0xc10] sm:$0xff] }
 0x3a5   :  { %6381 = vmatpush1.bf16.msra.mxu1 %v14365_v41  ;;  %6296 = vmatprep.subr.bf16.mxu0 %v14367_v34  ;;  %v14415_v41 = vcombine.high %v3282_v24, %v3290_v23  ;;  %v14418_v34 = vcombine.high %v3283_v17, %v3291_v25 }
 0x3a6   :  { %6382 = vmatprep.subr.bf16.mxu1 %v14370_v9  ;;  %v14413_v9 = vcombine.low %v3267_v33, %v3275_v45  ;;  %v3307_v33 = vld [vmem:[%s18279_s10 + $0xc58] sm:$0xff]  ;;  %v14433_v45 = vcombine.low %v3282_v24, %v3290_v23  ;;  %v3322_v24 = vld [vmem:[%s18279_s10 + $0xcd0] sm:$0xff] }
 0x3a7   :  { %18993 = vst [vmem:[#allocation209_spill] sm:$0xff] %v14415_v41  ;;  %18994 = vst [vmem:[#allocation210_spill] sm:$0xff] %v14418_v34  ;;  %v3315_v23 = vld [vmem:[%s18279_s10 + $0xc98] sm:$0xff] }
 0x3a8   :  { %6297 = vmatpush1.bf16.msra.mxu0 %v14385_v55  ;;  %18992 = vst [vmem:[#allocation208_spill] sm:$0xff] %v14413_v9  ;;  %18995 = vst [vmem:[#allocation211_spill] sm:$0xff] %v14433_v45  ;;  %v3314_v55 = vld [vmem:[%s18279_s10 + $0xc90] sm:$0xff] }
 0x3a9   :  { %6383 = vmatpush1.bf16.msra.mxu1 %v14389_v18  ;;  %6298 = vmatprep.subr.bf16.mxu0 %v14391_v56  ;;  %v14439_v18 = vcombine.high %v3298_v42, %v3306_v27  ;;  %v14442_v56 = vcombine.high %v3299_v16, %v3307_v33 }
 0x3aa   :  { %6384 = vmatprep.subr.bf16.mxu1 %v14394_v53  ;;  %v14437_v53 = vcombine.low %v3283_v17, %v3291_v25  ;;  %v3323_v17 = vld [vmem:[%s18279_s10 + $0xcd8] sm:$0xff]  ;;  %v14457_v25 = vcombine.low %v3298_v42, %v3306_v27  ;;  %v3338_v42 = vld [vmem:[%s18279_s10 + $0xd50] sm:$0xff] }
 0x3ab   :  { %18997 = vst [vmem:[#allocation213_spill] sm:$0xff] %v14439_v18  ;;  %18998 = vst [vmem:[#allocation214_spill] sm:$0xff] %v14442_v56  ;;  %v3331_v27 = vld [vmem:[%s18279_s10 + $0xd18] sm:$0xff] }
 0x3ac   :  { %6299 = vmatpush1.bf16.msra.mxu0 %v14409_v15  ;;  %18996 = vst [vmem:[#allocation212_spill] sm:$0xff] %v14437_v53  ;;  %18999 = vst [vmem:[#allocation215_spill] sm:$0xff] %v14457_v25  ;;  %v3330_v15 = vld [vmem:[%s18279_s10 + $0xd10] sm:$0xff] }
 0x3ad   :  { %6385 = vmatpush1.bf16.msra.mxu1 %v14413_v9  ;;  %6300 = vmatprep.subr.bf16.mxu0 %v14415_v41  ;;  %v14463_v9 = vcombine.high %v3314_v55, %v3322_v24  ;;  %v14466_v41 = vcombine.high %v3315_v23, %v3323_v17 }
 0x3ae   :  { %6386 = vmatprep.subr.bf16.mxu1 %v14418_v34  ;;  %v14461_v34 = vcombine.low %v3299_v16, %v3307_v33  ;;  %v3339_v16 = vld [vmem:[%s18279_s10 + $0xd58] sm:$0xff]  ;;  %v14481_v33 = vcombine.low %v3314_v55, %v3322_v24  ;;  %v3354_v55 = vld [vmem:[%s18279_s10 + $0xdd0] sm:$0xff] }
 0x3af   :  { %19001 = vst [vmem:[#allocation217_spill] sm:$0xff] %v14463_v9  ;;  %19002 = vst [vmem:[#allocation218_spill] sm:$0xff] %v14466_v41  ;;  %v3347_v24 = vld [vmem:[%s18279_s10 + $0xd98] sm:$0xff] }
 0x3b0   :  { %6301 = vmatpush1.bf16.msra.mxu0 %v14433_v45  ;;  %19000 = vst [vmem:[#allocation216_spill] sm:$0xff] %v14461_v34  ;;  %19003 = vst [vmem:[#allocation219_spill] sm:$0xff] %v14481_v33  ;;  %v3346_v45 = vld [vmem:[%s18279_s10 + $0xd90] sm:$0xff] }
 0x3b1   :  { %6387 = vmatpush1.bf16.msra.mxu1 %v14437_v53  ;;  %6302 = vmatprep.subr.bf16.mxu0 %v14439_v18  ;;  %v14487_v53 = vcombine.high %v3330_v15, %v3338_v42  ;;  %v14490_v18 = vcombine.high %v3331_v27, %v3339_v16 }
 0x3b2   :  { %6388 = vmatprep.subr.bf16.mxu1 %v14442_v56  ;;  %v14485_v56 = vcombine.low %v3315_v23, %v3323_v17  ;;  %v3355_v23 = vld [vmem:[%s18279_s10 + $0xdd8] sm:$0xff]  ;;  %v14505_v17 = vcombine.low %v3330_v15, %v3338_v42  ;;  %v3370_v15 = vld [vmem:[%s18279_s10 + $0xe50] sm:$0xff] }
 0x3b3   :  { %19005 = vst [vmem:[#allocation221_spill] sm:$0xff] %v14487_v53  ;;  %19006 = vst [vmem:[#allocation222_spill] sm:$0xff] %v14490_v18  ;;  %v3363_v42 = vld [vmem:[%s18279_s10 + $0xe18] sm:$0xff] }
 0x3b4   :  { %6303 = vmatpush1.bf16.msra.mxu0 %v14457_v25  ;;  %19004 = vst [vmem:[#allocation220_spill] sm:$0xff] %v14485_v56  ;;  %19007 = vst [vmem:[#allocation223_spill] sm:$0xff] %v14505_v17  ;;  %v3362_v25 = vld [vmem:[%s18279_s10 + $0xe10] sm:$0xff] }
 0x3b5   :  { %6389 = vmatpush1.bf16.msra.mxu1 %v14461_v34  ;;  %6304 = vmatprep.subr.bf16.mxu0 %v14463_v9  ;;  %v14511_v34 = vcombine.high %v3346_v45, %v3354_v55  ;;  %v14514_v9 = vcombine.high %v3347_v24, %v3355_v23 }
 0x3b6   :  { %6390 = vmatprep.subr.bf16.mxu1 %v14466_v41  ;;  %v14509_v41 = vcombine.low %v3331_v27, %v3339_v16  ;;  %v3371_v27 = vld [vmem:[%s18279_s10 + $0xe58] sm:$0xff]  ;;  %v14529_v16 = vcombine.low %v3346_v45, %v3354_v55  ;;  %v3386_v45 = vld [vmem:[%s18279_s10 + $0xed0] sm:$0xff] }
 0x3b7   :  { %19009 = vst [vmem:[#allocation225_spill] sm:$0xff] %v14511_v34  ;;  %19010 = vst [vmem:[#allocation226_spill] sm:$0xff] %v14514_v9  ;;  %v3379_v55 = vld [vmem:[%s18279_s10 + $0xe98] sm:$0xff] }
 0x3b8   :  { %6305 = vmatpush1.bf16.msra.mxu0 %v14481_v33  ;;  %19008 = vst [vmem:[#allocation224_spill] sm:$0xff] %v14509_v41  ;;  %19011 = vst [vmem:[#allocation227_spill] sm:$0xff] %v14529_v16  ;;  %v3378_v33 = vld [vmem:[%s18279_s10 + $0xe90] sm:$0xff] }
 0x3b9   :  { %6391 = vmatpush1.bf16.msra.mxu1 %v14485_v56  ;;  %6306 = vmatprep.subr.bf16.mxu0 %v14487_v53  ;;  %v14535_v56 = vcombine.high %v3362_v25, %v3370_v15  ;;  %v14538_v53 = vcombine.high %v3363_v42, %v3371_v27 }
 0x3ba   :  { %6392 = vmatprep.subr.bf16.mxu1 %v14490_v18  ;;  %v14533_v18 = vcombine.low %v3347_v24, %v3355_v23  ;;  %v3387_v24 = vld [vmem:[%s18279_s10 + $0xed8] sm:$0xff]  ;;  %v14553_v23 = vcombine.low %v3362_v25, %v3370_v15  ;;  %v3402_v25 = vld [vmem:[%s18279_s10 + $0xf50] sm:$0xff] }
 0x3bb   :  { %19013 = vst [vmem:[#allocation229_spill] sm:$0xff] %v14535_v56  ;;  %19014 = vst [vmem:[#allocation230_spill] sm:$0xff] %v14538_v53  ;;  %v3395_v15 = vld [vmem:[%s18279_s10 + $0xf18] sm:$0xff] }
 0x3bc   :  { %6307 = vmatpush1.bf16.msra.mxu0 %v14505_v17  ;;  %19012 = vst [vmem:[#allocation228_spill] sm:$0xff] %v14533_v18  ;;  %19015 = vst [vmem:[#allocation231_spill] sm:$0xff] %v14553_v23  ;;  %v3394_v17 = vld [vmem:[%s18279_s10 + $0xf10] sm:$0xff] }
 0x3bd   :  { %6393 = vmatpush1.bf16.msra.mxu1 %v14509_v41  ;;  %6308 = vmatprep.subr.bf16.mxu0 %v14511_v34  ;;  %v14559_v41 = vcombine.high %v3378_v33, %v3386_v45  ;;  %v14562_v34 = vcombine.high %v3379_v55, %v3387_v24 }
 0x3be   :  { %6394 = vmatprep.subr.bf16.mxu1 %v14514_v9  ;;  %v14557_v9 = vcombine.low %v3363_v42, %v3371_v27  ;;  %v3403_v42 = vld [vmem:[%s18279_s10 + $0xf58] sm:$0xff]  ;;  %v14577_v27 = vcombine.low %v3378_v33, %v3386_v45  ;;  %v14595_v45 = vcombine.low %v3394_v17, %v3402_v25 }
 0x3bf   :  { %19017 = vst [vmem:[#allocation233_spill] sm:$0xff] %v14559_v41  ;;  %19018 = vst [vmem:[#allocation234_spill] sm:$0xff] %v14562_v34  ;;  %v3411_v33 = vld [vmem:[%s18279_s10 + $0xf98] sm:$0x33] }
 0x3c0   :  { %6309 = vmatpush1.bf16.msra.mxu0 %v14529_v16  ;;  %19016 = vst [vmem:[#allocation232_spill] sm:$0xff] %v14557_v9  ;;  %19019 = vst [vmem:[#allocation235_spill] sm:$0xff] %v14577_v27  ;;  %v3410_v16 = vld [vmem:[%s18279_s10 + $0xf90] sm:$0x33] }
 0x3c1   :  { %6395 = vmatpush1.bf16.msra.mxu1 %v14533_v18  ;;  %6310 = vmatprep.subr.bf16.mxu0 %v14535_v56  ;;  %v14583_v18 = vcombine.high %v3394_v17, %v3402_v25  ;;  %v14586_v56 = vcombine.high %v3395_v15, %v3403_v42  ;;  %19023 = vst [vmem:[#allocation239_spill] sm:$0xff] %v14595_v45  ;;  %v2916_v17 = vld [vmem:[%s18279_s10 + $0x20] sm:$0xff] }
 0x3c2   :  { %6396 = vmatprep.subr.bf16.mxu1 %v14538_v53  ;;  %v14581_v53 = vcombine.low %v3379_v55, %v3387_v24  ;;  %v14599_v55 = vcombine.low %v3395_v15, %v3403_v42  ;;  %v14601_v24 = vcombine.high %v3410_v16, %v3410_v16  ;;  %v2924_v25 = vld [vmem:[%s18279_s10 + $0x60] sm:$0xff]  ;;  %v2917_v15 = vld [vmem:[%s18279_s10 + $0x28] sm:$0xff] }
 0x3c3   :  { %19021 = vst [vmem:[#allocation237_spill] sm:$0xff] %v14583_v18  ;;  %19022 = vst [vmem:[#allocation238_spill] sm:$0xff] %v14586_v56 }
 0x3c4   :  { %6311 = vmatpush1.bf16.msra.mxu0 %v14553_v23  ;;  %19020 = vst [vmem:[#allocation236_spill] sm:$0xff] %v14581_v53  ;;  %19024 = vst [vmem:[#allocation240_spill] sm:$0xff] %v14599_v55  ;;  %v2980_v23 = vld [vmem:[%s18279_s10 + $0x220] sm:$0xff] }
 0x3c5   :  { %6397 = vmatpush1.bf16.msra.mxu1 %v14557_v9  ;;  %6312 = vmatprep.subr.bf16.mxu0 %v14559_v41  ;;  %19025 = vst [vmem:[#allocation241_spill] sm:$0xff] %v14601_v24  ;;  %v14606_v9 = vcombine.high %v3411_v33, %v3411_v33  ;;  %v14608_v41 = vcombine.low %v3411_v33, %v3411_v33 }
 0x3c6   :  { %6398 = vmatprep.subr.bf16.mxu1 %v14562_v34  ;;  %v14603_v34 = vcombine.low %v3410_v16, %v3410_v16  ;;  %v2925_v16 = vld [vmem:[%s18279_s10 + $0x68] sm:$0xff]  ;;  %v14628_v33 = vcombine.high %v2916_v17, %v2924_v25 }
 0x3c7   :  { %19027 = vst [vmem:[#allocation243_spill] sm:$0xff] %v14606_v9  ;;  %19028 = vst [vmem:[#allocation244_spill] sm:$0xff] %v14608_v41 }
 0x3c8   :  { %6313 = vmatpush1.bf16.msra.mxu0 %v14577_v27  ;;  %19026 = vst [vmem:[#allocation242_spill] sm:$0xff] %v14603_v34  ;;  %v6036_v42 = vsel %vm2643_vm6, %v14603_v34, 0  ;;  %19029 = vst [vmem:[#allocation245_spill] sm:$0xff] %v14628_v33  ;;  %v14642_v34 = vcombine.low %v2916_v17, %v2924_v25  ;;  %v2948_v17 = vld [vmem:[%s18279_s10 + $0x120] sm:$0xff] }
 0x3c9   :  { %6399 = vmatpush1.bf16.msra.mxu1 %v14581_v53  ;;  %6314 = vmatprep.subr.bf16.mxu0 %v14583_v18  ;;  %v14634_v53 = vcombine.high %v2917_v15, %v2925_v16  ;;  %v2956_v25 = vld [vmem:[%s18279_s10 + $0x160] sm:$0xff] }
 0x3ca   :  { %6400 = vmatprep.subr.bf16.mxu1 %v14586_v56  ;;  %v6042_v56 = vsel %vm2643_vm6, %v14608_v41, 0  ;;  %19031 = vst [vmem:[#allocation247_spill] sm:$0xff] %v14642_v34  ;;  %v2941_v41 = vld [vmem:[%s18279_s10 + $0xe8] sm:$0xff] }
 0x3cb   :  { %19030 = vst [vmem:[#allocation246_spill] sm:$0xff] %v14634_v53 }
 0x3cc   :  { %6315 = vmatpush1.bf16.msra.mxu0 %v14595_v45  ;;  %v14651_v45 = vcombine.low %v2917_v15, %v2925_v16  ;;  %v2949_v15 = vld [vmem:[%s18279_s10 + $0x128] sm:$0xff] }
 0x3cd   :  { %6401 = vmatpush1.bf16.msra.mxu1 %v14599_v55  ;;  %9912 = vmatprep.subr.msk.bf16.mxu0 %vm2643_vm6, %v14601_v24  ;;  %v2932_v55 = vld [vmem:[%s18279_s10 + $0xa0] sm:$0xff]  ;;  %v2957_v16 = vld [vmem:[%s18279_s10 + $0x168] sm:$0xff] }
 0x3ce   :  { %9920 = vmatprep.subr.msk.bf16.mxu1 %vm2643_vm6, %v14606_v9  ;;  %v2940_v24 = vld [vmem:[%s18279_s10 + $0xe0] sm:$0xff]  ;;  %v2933_v9 = vld [vmem:[%s18279_s10 + $0xa8] sm:$0xff]  ;;  %19032 = vst [vmem:[#allocation248_spill] sm:$0xff] %v14651_v45  ;;  %v14691_v27 = vcombine.high %v2949_v15, %v2957_v16 }
 0x3cf   :  { %v14654_v18 = vcombine.high %v2932_v55, %v2940_v24 }
 0x3d0   :  { %6317 = vmatpush1.bf16.msra.mxu0 %v6036_v42  ;;  %v14677_v42 = vcombine.low %v2932_v55, %v2940_v24  ;;  %19038 = vst [vmem:[#allocation254_spill] sm:$0xff] %v14691_v27  ;;  %v2964_v55 = vld [vmem:[%s18279_s10 + $0x1a0] sm:$0xff] }
 0x3d1   :  { %6403 = vmatpush1.bf16.msra.mxu1 %v6042_v56  ;;  %6415 = vmatprep.subr.bf16.mxu0 %v14628_v33  ;;  %19033 = vst [vmem:[#allocation249_spill] sm:$0xff] %v14654_v18  ;;  %v14665_v56 = vcombine.high %v2933_v9, %v2941_v41  ;;  %v14685_v33 = vcombine.high %v2948_v17, %v2956_v25  ;;  %v2972_v24 = vld [vmem:[%s18279_s10 + $0x1e0] sm:$0xff] }
 0x3d2   :  { %6501 = vmatprep.subr.bf16.mxu1 %v14634_v53  ;;  %19035 = vst [vmem:[#allocation251_spill] sm:$0xff] %v14677_v42  ;;  %v14683_v53 = vcombine.low %v2933_v9, %v2941_v41  ;;  %v2965_v41 = vld [vmem:[%s18279_s10 + $0x1a8] sm:$0xff] }
 0x3d3   :  { %9915 = vmatmul.mubr.msk.bf16.vlgmr.msra.gmra.mrb[12].mxu0 %vm13456_vm5, %v18850_v60  ;;  %19034 = vst [vmem:[#allocation250_spill] sm:$0xff] %v14665_v56  ;;  %19037 = vst [vmem:[#allocation253_spill] sm:$0xff] %v14685_v33  ;;  %v2973_v9 = vld [vmem:[%s18279_s10 + $0x1e8] sm:$0xff] }
 0x3d4   :  { %9923 = vmatmul.mubr.msk.bf16.vlgmr.msra.gmra.mrb[16].mxu1 %vm13456_vm5, %v18850_v60  ;;  %6416 = vmatpush1.bf16.msra.mxu0 %v14642_v34  ;;  %19036 = vst [vmem:[#allocation252_spill] sm:$0xff] %v14683_v53  ;;  %v14713_v34 = vcombine.high %v2964_v55, %v2972_v24 }
 0x3d5   :  { %9925 = vmatprep.mubr.msk.bf16.mxu0 %vm13460_vm8, %v18850_v60  ;;  %6502 = vmatpush1.bf16.msra.mxu1 %v14651_v45  ;;  %v14707_v45 = vcombine.low %v2948_v17, %v2956_v25  ;;  %v2988_v17 = vld [vmem:[%s18279_s10 + $0x260] sm:$0xff]  ;;  %v2981_v25 = vld [vmem:[%s18279_s10 + $0x228] sm:$0xff] }
 0x3d6   :  { %9933 = vmatprep.mubr.msk.bf16.mxu1 %vm13460_vm8, %v18850_v60  ;;  %6417 = vmatprep.subr.bf16.mxu0 %v14654_v18  ;;  %v14711_v18 = vcombine.low %v2949_v15, %v2957_v16  ;;  %19041 = vst [vmem:[#allocation257_spill] sm:$0xff] %v14713_v34  ;;  %v2989_v15 = vld [vmem:[%s18279_s10 + $0x268] sm:$0xff]  ;;  %v14731_v16 = vcombine.low %v2964_v55, %v2972_v24  ;;  %v3004_v55 = vld [vmem:[%s18279_s10 + $0x2e0] sm:$0xff] }
 0x3d7   :  { %6503 = vmatprep.subr.bf16.mxu1 %v14665_v56  ;;  %19039 = vst [vmem:[#allocation255_spill] sm:$0xff] %v14707_v45  ;;  %v14716_v56 = vcombine.high %v2965_v41, %v2973_v9  ;;  %v2997_v24 = vld [vmem:[%s18279_s10 + $0x2a8] sm:$0xff] }
 0x3d8   :  { %6418 = vmatpush1.bf16.msra.mxu0 %v14677_v42  ;;  %19040 = vst [vmem:[#allocation256_spill] sm:$0xff] %v14711_v18  ;;  %19043 = vst [vmem:[#allocation259_spill] sm:$0xff] %v14731_v16  ;;  %v2996_v42 = vld [vmem:[%s18279_s10 + $0x2a0] sm:$0xff] }
 0x3d9   :  { %6504 = vmatpush1.bf16.msra.mxu1 %v14683_v53  ;;  %6419 = vmatprep.subr.bf16.mxu0 %v14685_v33  ;;  %19042 = vst [vmem:[#allocation258_spill] sm:$0xff] %v14716_v56  ;;  %v14737_v53 = vcombine.high %v2980_v23, %v2988_v17  ;;  %v14740_v33 = vcombine.high %v2981_v25, %v2989_v15 }
 0x3da   :  { %6505 = vmatprep.subr.bf16.mxu1 %v14691_v27  ;;  %v14735_v27 = vcombine.low %v2965_v41, %v2973_v9  ;;  %v3005_v41 = vld [vmem:[%s18279_s10 + $0x2e8] sm:$0xff]  ;;  %v14755_v9 = vcombine.low %v2980_v23, %v2988_v17  ;;  %v3020_v23 = vld [vmem:[%s18279_s10 + $0x360] sm:$0xff] }
 0x3db   :  { %19045 = vst [vmem:[#allocation261_spill] sm:$0xff] %v14737_v53  ;;  %19046 = vst [vmem:[#allocation262_spill] sm:$0xff] %v14740_v33  ;;  %v3013_v17 = vld [vmem:[%s18279_s10 + $0x328] sm:$0xff] }
 0x3dc   :  { %6420 = vmatpush1.bf16.msra.mxu0 %v14707_v45  ;;  %19044 = vst [vmem:[#allocation260_spill] sm:$0xff] %v14735_v27  ;;  %19047 = vst [vmem:[#allocation263_spill] sm:$0xff] %v14755_v9  ;;  %v3012_v45 = vld [vmem:[%s18279_s10 + $0x320] sm:$0xff] }
 0x3dd   :  { %6506 = vmatpush1.bf16.msra.mxu1 %v14711_v18  ;;  %6421 = vmatprep.subr.bf16.mxu0 %v14713_v34  ;;  %v14761_v18 = vcombine.high %v2996_v42, %v3004_v55  ;;  %v14764_v34 = vcombine.high %v2997_v24, %v3005_v41 }
 0x3de   :  { %6507 = vmatprep.subr.bf16.mxu1 %v14716_v56  ;;  %v14759_v56 = vcombine.low %v2981_v25, %v2989_v15  ;;  %v3021_v25 = vld [vmem:[%s18279_s10 + $0x368] sm:$0xff]  ;;  %v14779_v15 = vcombine.low %v2996_v42, %v3004_v55  ;;  %v3036_v42 = vld [vmem:[%s18279_s10 + $0x3e0] sm:$0xff] }
 0x3df   :  { %19049 = vst [vmem:[#allocation265_spill] sm:$0xff] %v14761_v18  ;;  %19050 = vst [vmem:[#allocation266_spill] sm:$0xff] %v14764_v34  ;;  %v3029_v55 = vld [vmem:[%s18279_s10 + $0x3a8] sm:$0xff] }
 0x3e0   :  { %6422 = vmatpush1.bf16.msra.mxu0 %v14731_v16  ;;  %19048 = vst [vmem:[#allocation264_spill] sm:$0xff] %v14759_v56  ;;  %19051 = vst [vmem:[#allocation267_spill] sm:$0xff] %v14779_v15  ;;  %v3028_v16 = vld [vmem:[%s18279_s10 + $0x3a0] sm:$0xff] }
 0x3e1   :  { %6508 = vmatpush1.bf16.msra.mxu1 %v14735_v27  ;;  %6423 = vmatprep.subr.bf16.mxu0 %v14737_v53  ;;  %v14785_v27 = vcombine.high %v3012_v45, %v3020_v23  ;;  %v14788_v53 = vcombine.high %v3013_v17, %v3021_v25 }
 0x3e2   :  { %6509 = vmatprep.subr.bf16.mxu1 %v14740_v33  ;;  %v14783_v33 = vcombine.low %v2997_v24, %v3005_v41  ;;  %v3037_v24 = vld [vmem:[%s18279_s10 + $0x3e8] sm:$0xff]  ;;  %v14803_v41 = vcombine.low %v3012_v45, %v3020_v23  ;;  %v3052_v45 = vld [vmem:[%s18279_s10 + $0x460] sm:$0xff] }
 0x3e3   :  { %19053 = vst [vmem:[#allocation269_spill] sm:$0xff] %v14785_v27  ;;  %19054 = vst [vmem:[#allocation270_spill] sm:$0xff] %v14788_v53  ;;  %v3045_v23 = vld [vmem:[%s18279_s10 + $0x428] sm:$0xff] }
 0x3e4   :  { %6424 = vmatpush1.bf16.msra.mxu0 %v14755_v9  ;;  %19052 = vst [vmem:[#allocation268_spill] sm:$0xff] %v14783_v33  ;;  %19055 = vst [vmem:[#allocation271_spill] sm:$0xff] %v14803_v41  ;;  %v3044_v9 = vld [vmem:[%s18279_s10 + $0x420] sm:$0xff] }
 0x3e5   :  { %6510 = vmatpush1.bf16.msra.mxu1 %v14759_v56  ;;  %6425 = vmatprep.subr.bf16.mxu0 %v14761_v18  ;;  %v14809_v56 = vcombine.high %v3028_v16, %v3036_v42  ;;  %v14812_v18 = vcombine.high %v3029_v55, %v3037_v24 }
 0x3e6   :  { %6511 = vmatprep.subr.bf16.mxu1 %v14764_v34  ;;  %v14807_v34 = vcombine.low %v3013_v17, %v3021_v25  ;;  %v3053_v17 = vld [vmem:[%s18279_s10 + $0x468] sm:$0xff]  ;;  %v14827_v25 = vcombine.low %v3028_v16, %v3036_v42  ;;  %v3068_v16 = vld [vmem:[%s18279_s10 + $0x4e0] sm:$0xff] }
 0x3e7   :  { %19057 = vst [vmem:[#allocation273_spill] sm:$0xff] %v14809_v56  ;;  %19058 = vst [vmem:[#allocation274_spill] sm:$0xff] %v14812_v18  ;;  %v3061_v42 = vld [vmem:[%s18279_s10 + $0x4a8] sm:$0xff] }
 0x3e8   :  { %6426 = vmatpush1.bf16.msra.mxu0 %v14779_v15  ;;  %19056 = vst [vmem:[#allocation272_spill] sm:$0xff] %v14807_v34  ;;  %19059 = vst [vmem:[#allocation275_spill] sm:$0xff] %v14827_v25  ;;  %v3060_v15 = vld [vmem:[%s18279_s10 + $0x4a0] sm:$0xff] }
 0x3e9   :  { %6512 = vmatpush1.bf16.msra.mxu1 %v14783_v33  ;;  %6427 = vmatprep.subr.bf16.mxu0 %v14785_v27  ;;  %v14833_v33 = vcombine.high %v3044_v9, %v3052_v45  ;;  %v14836_v27 = vcombine.high %v3045_v23, %v3053_v17 }
 0x3ea   :  { %6513 = vmatprep.subr.bf16.mxu1 %v14788_v53  ;;  %v14831_v53 = vcombine.low %v3029_v55, %v3037_v24  ;;  %v3069_v55 = vld [vmem:[%s18279_s10 + $0x4e8] sm:$0xff]  ;;  %v14851_v24 = vcombine.low %v3044_v9, %v3052_v45  ;;  %v3084_v9 = vld [vmem:[%s18279_s10 + $0x560] sm:$0xff] }
 0x3eb   :  { %19061 = vst [vmem:[#allocation277_spill] sm:$0xff] %v14833_v33  ;;  %19062 = vst [vmem:[#allocation278_spill] sm:$0xff] %v14836_v27  ;;  %v3077_v45 = vld [vmem:[%s18279_s10 + $0x528] sm:$0xff] }
 0x3ec   :  { %6428 = vmatpush1.bf16.msra.mxu0 %v14803_v41  ;;  %19060 = vst [vmem:[#allocation276_spill] sm:$0xff] %v14831_v53  ;;  %19063 = vst [vmem:[#allocation279_spill] sm:$0xff] %v14851_v24  ;;  %v3076_v41 = vld [vmem:[%s18279_s10 + $0x520] sm:$0xff] }
 0x3ed   :  { %6514 = vmatpush1.bf16.msra.mxu1 %v14807_v34  ;;  %6429 = vmatprep.subr.bf16.mxu0 %v14809_v56  ;;  %v14857_v34 = vcombine.high %v3060_v15, %v3068_v16  ;;  %v14860_v56 = vcombine.high %v3061_v42, %v3069_v55 }
 0x3ee   :  { %6515 = vmatprep.subr.bf16.mxu1 %v14812_v18  ;;  %v14855_v18 = vcombine.low %v3045_v23, %v3053_v17  ;;  %v3085_v23 = vld [vmem:[%s18279_s10 + $0x568] sm:$0xff]  ;;  %v14875_v17 = vcombine.low %v3060_v15, %v3068_v16  ;;  %v3100_v15 = vld [vmem:[%s18279_s10 + $0x5e0] sm:$0xff] }
 0x3ef   :  { %19065 = vst [vmem:[#allocation281_spill] sm:$0xff] %v14857_v34  ;;  %19066 = vst [vmem:[#allocation282_spill] sm:$0xff] %v14860_v56  ;;  %v3093_v16 = vld [vmem:[%s18279_s10 + $0x5a8] sm:$0xff] }
 0x3f0   :  { %6430 = vmatpush1.bf16.msra.mxu0 %v14827_v25  ;;  %19064 = vst [vmem:[#allocation280_spill] sm:$0xff] %v14855_v18  ;;  %19067 = vst [vmem:[#allocation283_spill] sm:$0xff] %v14875_v17  ;;  %v3092_v25 = vld [vmem:[%s18279_s10 + $0x5a0] sm:$0xff] }
 0x3f1   :  { %6516 = vmatpush1.bf16.msra.mxu1 %v14831_v53  ;;  %6431 = vmatprep.subr.bf16.mxu0 %v14833_v33  ;;  %v14881_v53 = vcombine.high %v3076_v41, %v3084_v9  ;;  %v14884_v33 = vcombine.high %v3077_v45, %v3085_v23 }
 0x3f2   :  { %6517 = vmatprep.subr.bf16.mxu1 %v14836_v27  ;;  %v14879_v27 = vcombine.low %v3061_v42, %v3069_v55  ;;  %v3101_v42 = vld [vmem:[%s18279_s10 + $0x5e8] sm:$0xff]  ;;  %v14899_v55 = vcombine.low %v3076_v41, %v3084_v9  ;;  %v3116_v41 = vld [vmem:[%s18279_s10 + $0x660] sm:$0xff] }
 0x3f3   :  { %19069 = vst [vmem:[#allocation285_spill] sm:$0xff] %v14881_v53  ;;  %19070 = vst [vmem:[#allocation286_spill] sm:$0xff] %v14884_v33  ;;  %v3109_v9 = vld [vmem:[%s18279_s10 + $0x628] sm:$0xff] }
 0x3f4   :  { %6432 = vmatpush1.bf16.msra.mxu0 %v14851_v24  ;;  %19068 = vst [vmem:[#allocation284_spill] sm:$0xff] %v14879_v27  ;;  %19071 = vst [vmem:[#allocation287_spill] sm:$0xff] %v14899_v55  ;;  %v3108_v24 = vld [vmem:[%s18279_s10 + $0x620] sm:$0xff] }
 0x3f5   :  { %6518 = vmatpush1.bf16.msra.mxu1 %v14855_v18  ;;  %6433 = vmatprep.subr.bf16.mxu0 %v14857_v34  ;;  %v14905_v18 = vcombine.high %v3092_v25, %v3100_v15  ;;  %v14908_v34 = vcombine.high %v3093_v16, %v3101_v42 }
 0x3f6   :  { %6519 = vmatprep.subr.bf16.mxu1 %v14860_v56  ;;  %v14903_v56 = vcombine.low %v3077_v45, %v3085_v23  ;;  %v3117_v45 = vld [vmem:[%s18279_s10 + $0x668] sm:$0xff]  ;;  %v14923_v23 = vcombine.low %v3092_v25, %v3100_v15  ;;  %v3132_v25 = vld [vmem:[%s18279_s10 + $0x6e0] sm:$0xff] }
 0x3f7   :  { %19073 = vst [vmem:[#allocation289_spill] sm:$0xff] %v14905_v18  ;;  %19074 = vst [vmem:[#allocation290_spill] sm:$0xff] %v14908_v34  ;;  %v3125_v15 = vld [vmem:[%s18279_s10 + $0x6a8] sm:$0xff] }
 0x3f8   :  { %6434 = vmatpush1.bf16.msra.mxu0 %v14875_v17  ;;  %19072 = vst [vmem:[#allocation288_spill] sm:$0xff] %v14903_v56  ;;  %19075 = vst [vmem:[#allocation291_spill] sm:$0xff] %v14923_v23  ;;  %v3124_v17 = vld [vmem:[%s18279_s10 + $0x6a0] sm:$0xff] }
 0x3f9   :  { %6520 = vmatpush1.bf16.msra.mxu1 %v14879_v27  ;;  %6435 = vmatprep.subr.bf16.mxu0 %v14881_v53  ;;  %v14929_v27 = vcombine.high %v3108_v24, %v3116_v41  ;;  %v14932_v53 = vcombine.high %v3109_v9, %v3117_v45 }
 0x3fa   :  { %6521 = vmatprep.subr.bf16.mxu1 %v14884_v33  ;;  %v14927_v33 = vcombine.low %v3093_v16, %v3101_v42  ;;  %v3133_v16 = vld [vmem:[%s18279_s10 + $0x6e8] sm:$0xff]  ;;  %v14947_v42 = vcombine.low %v3108_v24, %v3116_v41  ;;  %v3148_v24 = vld [vmem:[%s18279_s10 + $0x760] sm:$0xff] }
 0x3fb   :  { %19077 = vst [vmem:[#allocation293_spill] sm:$0xff] %v14929_v27  ;;  %19078 = vst [vmem:[#allocation294_spill] sm:$0xff] %v14932_v53  ;;  %v3141_v41 = vld [vmem:[%s18279_s10 + $0x728] sm:$0xff] }
 0x3fc   :  { %6436 = vmatpush1.bf16.msra.mxu0 %v14899_v55  ;;  %19076 = vst [vmem:[#allocation292_spill] sm:$0xff] %v14927_v33  ;;  %19079 = vst [vmem:[#allocation295_spill] sm:$0xff] %v14947_v42  ;;  %v3140_v55 = vld [vmem:[%s18279_s10 + $0x720] sm:$0xff] }
 0x3fd   :  { %6522 = vmatpush1.bf16.msra.mxu1 %v14903_v56  ;;  %6437 = vmatprep.subr.bf16.mxu0 %v14905_v18  ;;  %v14953_v56 = vcombine.high %v3124_v17, %v3132_v25  ;;  %v14956_v18 = vcombine.high %v3125_v15, %v3133_v16 }
 0x3fe   :  { %6523 = vmatprep.subr.bf16.mxu1 %v14908_v34  ;;  %v14951_v34 = vcombine.low %v3109_v9, %v3117_v45  ;;  %v3149_v9 = vld [vmem:[%s18279_s10 + $0x768] sm:$0xff]  ;;  %v14971_v45 = vcombine.low %v3124_v17, %v3132_v25  ;;  %v3164_v17 = vld [vmem:[%s18279_s10 + $0x7e0] sm:$0xff] }
 0x3ff   :  { %19081 = vst [vmem:[#allocation297_spill] sm:$0xff] %v14953_v56  ;;  %19082 = vst [vmem:[#allocation298_spill] sm:$0xff] %v14956_v18  ;;  %v3157_v25 = vld [vmem:[%s18279_s10 + $0x7a8] sm:$0xff] }
 0x400   :  { %6438 = vmatpush1.bf16.msra.mxu0 %v14923_v23  ;;  %19080 = vst [vmem:[#allocation296_spill] sm:$0xff] %v14951_v34  ;;  %19083 = vst [vmem:[#allocation299_spill] sm:$0xff] %v14971_v45  ;;  %v3156_v23 = vld [vmem:[%s18279_s10 + $0x7a0] sm:$0xff] }
 0x401   :  { %6524 = vmatpush1.bf16.msra.mxu1 %v14927_v33  ;;  %6439 = vmatprep.subr.bf16.mxu0 %v14929_v27  ;;  %v14977_v33 = vcombine.high %v3140_v55, %v3148_v24  ;;  %v14980_v27 = vcombine.high %v3141_v41, %v3149_v9 }
 0x402   :  { %6525 = vmatprep.subr.bf16.mxu1 %v14932_v53  ;;  %v14975_v53 = vcombine.low %v3125_v15, %v3133_v16  ;;  %v3165_v15 = vld [vmem:[%s18279_s10 + $0x7e8] sm:$0xff]  ;;  %v14995_v16 = vcombine.low %v3140_v55, %v3148_v24  ;;  %v3180_v55 = vld [vmem:[%s18279_s10 + $0x860] sm:$0xff] }
 0x403   :  { %19085 = vst [vmem:[#allocation301_spill] sm:$0xff] %v14977_v33  ;;  %19086 = vst [vmem:[#allocation302_spill] sm:$0xff] %v14980_v27  ;;  %v3173_v24 = vld [vmem:[%s18279_s10 + $0x828] sm:$0xff] }
 0x404   :  { %6440 = vmatpush1.bf16.msra.mxu0 %v14947_v42  ;;  %19084 = vst [vmem:[#allocation300_spill] sm:$0xff] %v14975_v53  ;;  %19087 = vst [vmem:[#allocation303_spill] sm:$0xff] %v14995_v16  ;;  %v3172_v42 = vld [vmem:[%s18279_s10 + $0x820] sm:$0xff] }
 0x405   :  { %6526 = vmatpush1.bf16.msra.mxu1 %v14951_v34  ;;  %6441 = vmatprep.subr.bf16.mxu0 %v14953_v56  ;;  %v15001_v34 = vcombine.high %v3156_v23, %v3164_v17  ;;  %v15004_v56 = vcombine.high %v3157_v25, %v3165_v15 }
 0x406   :  { %6527 = vmatprep.subr.bf16.mxu1 %v14956_v18  ;;  %v14999_v18 = vcombine.low %v3141_v41, %v3149_v9  ;;  %v3181_v41 = vld [vmem:[%s18279_s10 + $0x868] sm:$0xff]  ;;  %v15019_v9 = vcombine.low %v3156_v23, %v3164_v17  ;;  %v3196_v23 = vld [vmem:[%s18279_s10 + $0x8e0] sm:$0xff]  ;;  %v15037_v17 = vcombine.low %v3172_v42, %v3180_v55 }
 0x407   :  { %19089 = vst [vmem:[#allocation305_spill] sm:$0xff] %v15001_v34  ;;  %19090 = vst [vmem:[#allocation306_spill] sm:$0xff] %v15004_v56 }
 0x408   :  { %6442 = vmatpush1.bf16.msra.mxu0 %v14971_v45  ;;  %19088 = vst [vmem:[#allocation304_spill] sm:$0xff] %v14999_v18  ;;  %19091 = vst [vmem:[#allocation307_spill] sm:$0xff] %v15019_v9  ;;  %v3188_v45 = vld [vmem:[%s18279_s10 + $0x8a0] sm:$0xff] }
 0x409   :  { %6528 = vmatpush1.bf16.msra.mxu1 %v14975_v53  ;;  %6443 = vmatprep.subr.bf16.mxu0 %v14977_v33  ;;  %v15025_v53 = vcombine.high %v3172_v42, %v3180_v55  ;;  %v15028_v33 = vcombine.high %v3173_v24, %v3181_v41  ;;  %19095 = vst [vmem:[#allocation311_spill] sm:$0xff] %v15037_v17  ;;  %v3204_v42 = vld [vmem:[%s18279_s10 + $0x920] sm:$0xff] }
 0x40a   :  { %6529 = vmatprep.subr.bf16.mxu1 %v14980_v27  ;;  %v15023_v27 = vcombine.low %v3157_v25, %v3165_v15  ;;  %v3189_v25 = vld [vmem:[%s18279_s10 + $0x8a8] sm:$0xff]  ;;  %v3212_v55 = vld [vmem:[%s18279_s10 + $0x960] sm:$0xff] }
 0x40b   :  { %19093 = vst [vmem:[#allocation309_spill] sm:$0xff] %v15025_v53  ;;  %19094 = vst [vmem:[#allocation310_spill] sm:$0xff] %v15028_v33  ;;  %v3197_v15 = vld [vmem:[%s18279_s10 + $0x8e8] sm:$0xff] }
 0x40c   :  { %6444 = vmatpush1.bf16.msra.mxu0 %v14995_v16  ;;  %19092 = vst [vmem:[#allocation308_spill] sm:$0xff] %v15023_v27 }
 0x40d   :  { %6530 = vmatpush1.bf16.msra.mxu1 %v14999_v18  ;;  %6445 = vmatprep.subr.bf16.mxu0 %v15001_v34  ;;  %v15050_v18 = vcombine.high %v3188_v45, %v3196_v23  ;;  %v15080_v34 = vcombine.high %v3204_v42, %v3212_v55 }
 0x40e   :  { %6531 = vmatprep.subr.bf16.mxu1 %v15004_v56  ;;  %v15047_v56 = vcombine.low %v3173_v24, %v3181_v41  ;;  %v3205_v24 = vld [vmem:[%s18279_s10 + $0x928] sm:$0xff] }
 0x40f   :  { %19097 = vst [vmem:[#allocation313_spill] sm:$0xff] %v15050_v18  ;;  %v3213_v41 = vld [vmem:[%s18279_s10 + $0x968] sm:$0xff]  ;;  %19101 = vst [vmem:[#allocation317_spill] sm:$0xff] %v15080_v34 }
 0x410   :  { %6446 = vmatpush1.bf16.msra.mxu0 %v15019_v9  ;;  %19096 = vst [vmem:[#allocation312_spill] sm:$0xff] %v15047_v56  ;;  %v15078_v9 = vcombine.low %v3189_v25, %v3197_v15  ;;  %v15085_v16 = vcombine.high %v3205_v24, %v3213_v41 }
 0x411   :  { %6532 = vmatpush1.bf16.msra.mxu1 %v15023_v27  ;;  %6458 = vmatprep.subr.bf16.mxu0 %v15025_v53  ;;  %v15061_v27 = vcombine.high %v3189_v25, %v3197_v15  ;;  %v3221_v25 = vld [vmem:[%s18279_s10 + $0x9a8] sm:$0xff]  ;;  %v3236_v53 = vld [vmem:[%s18279_s10 + $0xa20] sm:$0xff] }
 0x412   :  { %6544 = vmatprep.subr.bf16.mxu1 %v15028_v33  ;;  %v15073_v33 = vcombine.low %v3188_v45, %v3196_v23  ;;  %19100 = vst [vmem:[#allocation316_spill] sm:$0xff] %v15078_v9  ;;  %19102 = vst [vmem:[#allocation318_spill] sm:$0xff] %v15085_v16  ;;  %v3220_v45 = vld [vmem:[%s18279_s10 + $0x9a0] sm:$0xff]  ;;  %v3229_v15 = vld [vmem:[%s18279_s10 + $0x9e8] sm:$0xff] }
 0x413   :  { %9927 = vmatmul.mubr.msk.bf16.vlgmr.msra.gmra.mrb[16].mxu0 %vm13446_vm2, %v18850_v60  ;;  %19098 = vst [vmem:[#allocation314_spill] sm:$0xff] %v15061_v27  ;;  %v3228_v23 = vld [vmem:[%s18279_s10 + $0x9e0] sm:$0xff] }
 0x414   :  { %9935 = vmatmul.mubr.msk.bf16.vlgmr.msra.gmra.mrb[20].mxu1 %vm13446_vm2, %v18850_v60  ;;  %6459 = vmatpush1.bf16.msra.mxu0 %v15037_v17  ;;  %19099 = vst [vmem:[#allocation315_spill] sm:$0xff] %v15073_v33  ;;  %v15107_v17 = vcombine.high %v3220_v45, %v3228_v23 }
 0x415   :  { %9929 = vmatprep.mubr.msk.bf16.mxu0 %vm18776_vm12, %v13488_v32  ;;  %6545 = vmatpush1.bf16.msra.mxu1 %v15047_v56  ;;  %v15101_v56 = vcombine.low %v3204_v42, %v3212_v55  ;;  %v3244_v42 = vld [vmem:[%s18279_s10 + $0xa60] sm:$0xff]  ;;  %v3237_v55 = vld [vmem:[%s18279_s10 + $0xa28] sm:$0xff] }
 0x416   :  { %9937 = vmatprep.mubr.msk.bf16.mxu1 %vm18776_vm12, %v13488_v32  ;;  %6460 = vmatprep.subr.bf16.mxu0 %v15050_v18  ;;  %v15105_v18 = vcombine.low %v3205_v24, %v3213_v41  ;;  %19105 = vst [vmem:[#allocation321_spill] sm:$0xff] %v15107_v17  ;;  %v3245_v24 = vld [vmem:[%s18279_s10 + $0xa68] sm:$0xff]  ;;  %v15125_v41 = vcombine.low %v3220_v45, %v3228_v23  ;;  %v3260_v45 = vld [vmem:[%s18279_s10 + $0xae0] sm:$0xff] }
 0x417   :  { %6546 = vmatprep.subr.bf16.mxu1 %v15061_v27  ;;  %19103 = vst [vmem:[#allocation319_spill] sm:$0xff] %v15101_v56  ;;  %v15110_v27 = vcombine.high %v3221_v25, %v3229_v15  ;;  %v3253_v23 = vld [vmem:[%s18279_s10 + $0xaa8] sm:$0xff] }
 0x418   :  { %6461 = vmatpush1.bf16.msra.mxu0 %v15073_v33  ;;  %19104 = vst [vmem:[#allocation320_spill] sm:$0xff] %v15105_v18  ;;  %19107 = vst [vmem:[#allocation323_spill] sm:$0xff] %v15125_v41  ;;  %v3252_v33 = vld [vmem:[%s18279_s10 + $0xaa0] sm:$0xff] }
 0x419   :  { %6547 = vmatpush1.bf16.msra.mxu1 %v15078_v9  ;;  %6462 = vmatprep.subr.bf16.mxu0 %v15080_v34  ;;  %19106 = vst [vmem:[#allocation322_spill] sm:$0xff] %v15110_v27  ;;  %v15131_v9 = vcombine.high %v3236_v53, %v3244_v42  ;;  %v15134_v34 = vcombine.high %v3237_v55, %v3245_v24 }
 0x41a   :  { %6548 = vmatprep.subr.bf16.mxu1 %v15085_v16  ;;  %v15129_v16 = vcombine.low %v3221_v25, %v3229_v15  ;;  %v3261_v25 = vld [vmem:[%s18279_s10 + $0xae8] sm:$0xff]  ;;  %v15149_v15 = vcombine.low %v3236_v53, %v3244_v42  ;;  %v3268_v53 = vld [vmem:[%s18279_s10 + $0xb20] sm:$0xff] }
 0x41b   :  { %19109 = vst [vmem:[#allocation325_spill] sm:$0xff] %v15131_v9  ;;  %19110 = vst [vmem:[#allocation326_spill] sm:$0xff] %v15134_v34  ;;  %v3276_v42 = vld [vmem:[%s18279_s10 + $0xb60] sm:$0xff]  ;;  %v15193_v5 = vcombine.low %v3253_v23, %v3261_v25 }
 0x41c   :  { %6463 = vmatpush1.bf16.msra.mxu0 %v15101_v56  ;;  %19108 = vst [vmem:[#allocation324_spill] sm:$0xff] %v15129_v16  ;;  %19111 = vst [vmem:[#allocation327_spill] sm:$0xff] %v15149_v15  ;;  %v15163_v56 = vcombine.high %v3253_v23, %v3261_v25  ;;  %v15195_v12 = vcombine.high %v3268_v53, %v3276_v42  ;;  %v15209_v50 = vcombine.low %v3268_v53, %v3276_v42 }
 0x41d   :  { %6549 = vmatpush1.bf16.msra.mxu1 %v15105_v18  ;;  %6464 = vmatprep.subr.bf16.mxu0 %v15107_v17  ;;  %v15158_v18 = vcombine.low %v3237_v55, %v3245_v24  ;;  %v15160_v17 = vcombine.high %v3252_v33, %v3260_v45  ;;  %v3269_v24 = vld [vmem:[%s18279_s10 + $0xb28] sm:$0xff]  ;;  %19116 = vst [vmem:[#allocation332_spill] sm:$0xff] %v15193_v5 }
 0x41e   :  { %6550 = vmatprep.subr.bf16.mxu1 %v15110_v27  ;;  %v15154_v27 = vld [vmem:[%s18280_s11] sm:$0xff]  ;;  %19114 = vst [vmem:[#allocation330_spill] sm:$0xff] %v15163_v56  ;;  %19117 = vst [vmem:[#allocation333_spill] sm:$0xff] %v15195_v12 }
 0x41f   :  { %19112 = vst [vmem:[#allocation328_spill] sm:$0xff] %v15158_v18  ;;  %19113 = vst [vmem:[#allocation329_spill] sm:$0xff] %v15160_v17  ;;  %v3431_v55 = vrot.slane %v15154_v27, %v12990_v63  ;;  %v3284_v63 = vld [vmem:[%s18279_s10 + $0xba0] sm:$0xff] }
 0x420   :  { %6465 = vmatpush1.bf16.msra.mxu0 %v15125_v41  ;;  %v3435_v41 = vrot.slane %v15154_v27, %v12993_v0  ;;  %19119 = vst [vmem:[#allocation335_spill] sm:$0xff] %v15209_v50 }
 0x421   :  { %6551 = vmatpush1.bf16.msra.mxu1 %v15129_v16  ;;  %6466 = vmatprep.subr.bf16.mxu0 %v15131_v9  ;;  %v3423_v16 = vrot.slane %v15154_v27, %v12721_v4  ;;  %v3427_v9 = vrot.slane %v15154_v27, %v12729_v6  ;;  %v15186_v4 = vcombine.low %v3252_v33, %v3260_v45  ;;  %v3285_v33 = vld [vmem:[%s18279_s10 + $0xba8] sm:$0xff] }
 0x422   :  { %6552 = vmatprep.subr.bf16.mxu1 %v15134_v34  ;;  %v3277_v34 = vld [vmem:[%s18279_s10 + $0xb68] sm:$0xff] }
 0x423   :  { %19115 = vst [vmem:[#allocation331_spill] sm:$0xff] %v15186_v4  ;;  %v3293_v45 = vld [vmem:[%s18279_s10 + $0xbe8] sm:$0xff]  ;;  %v15207_v23 = vcombine.high %v3269_v24, %v3277_v34  ;;  %v15211_v49 = vcombine.low %v3269_v24, %v3277_v34 }
 0x424   :  { %6467 = vmatpush1.bf16.msra.mxu0 %v15149_v15  ;;  %v3292_v15 = vld [vmem:[%s18279_s10 + $0xbe0] sm:$0xff]  ;;  %v15216_v44 = vcombine.high %v3285_v33, %v3293_v45 }
 0x425   :  { %6553 = vmatpush1.bf16.msra.mxu1 %v15158_v18  ;;  %6468 = vmatprep.subr.bf16.mxu0 %v15160_v17  ;;  %19118 = vst [vmem:[#allocation334_spill] sm:$0xff] %v15207_v23  ;;  %19120 = vst [vmem:[#allocation336_spill] sm:$0xff] %v15211_v49  ;;  %v15214_v29 = vcombine.high %v3284_v63, %v3292_v15 }
 0x426   :  { %v6148_v0 = vpop.f32.mrb[8].mxu0  ;;  %v6234_v18 = vpop.f32.mrb[12].mxu1  ;;  %6554 = vmatprep.subr.bf16.mxu1 %v15163_v56  ;;  %19122 = vst [vmem:[#allocation338_spill] sm:$0xff] %v15216_v44 }
 0x427   :  { %v10258_v25 = vadd.f32 %v6148_v0, %v3423_v16  ;;  %v10262_v17 = vadd.f32 %v6234_v18, %v3431_v55  ;;  %v6150_v6 = vpop.f32.mrb[9].mxu0  ;;  %v6236_v22 = vpop.f32.mrb[13].mxu1  ;;  %19121 = vst [vmem:[#allocation337_spill] sm:$0xff] %v15214_v29 }
 0x428   :  { %v10259_v30 = vadd.f32 %v6150_v6, %v3427_v9  ;;  %v10263_v39 = vadd.f32 %v6236_v22, %v3435_v41  ;;  %v6152_v48 = vpop.f32.mrb[10].mxu0  ;;  %v6238_v36 = vpop.f32.mrb[14].mxu1  ;;  %6469 = vmatpush1.bf16.msra.mxu0 %v15186_v4  ;;  %v3300_v4 = vld [vmem:[%s18279_s10 + $0xc20] sm:$0xff] }
 0x429   :  { %v9956_v56 = vmul.f32 -1.442695, %v10258_v25  ;;  %v9958_v14 = vmul.f32 -1.442695, %v10262_v17  ;;  %v10260_v0 = vadd.f32 %v6152_v48, %v3423_v16  ;;  %v10264_v18 = vadd.f32 %v6238_v36, %v3431_v55  ;;  %6555 = vmatpush1.bf16.msra.mxu1 %v15193_v5  ;;  %v6154_v53 = vpop.f32.mrb[11].mxu0  ;;  %v6240_v42 = vpop.f32.mrb[15].mxu1  ;;  %6470 = vmatprep.subr.bf16.mxu0 %v15195_v12 }
 0x42a   :  { %v9957_v6 = vmul.f32 -1.442695, %v10259_v30  ;;  %v9959_v22 = vmul.f32 -1.442695, %v10263_v39  ;;  %v10261_v34 = vadd.f32 %v6154_v53, %v3427_v9  ;;  %v10265_v24 = vadd.f32 %v6240_v42, %v3435_v41  ;;  %6556 = vmatprep.subr.bf16.mxu1 %v15207_v23  ;;  %v3308_v36 = vld [vmem:[%s18279_s10 + $0xc60] sm:$0xff]  ;;  %v3301_v16 = vld [vmem:[%s18279_s10 + $0xc28] sm:$0xff] }
 0x42b   :  { %11072 = vpow2.f32 %v9956_v56  ;;  %v9972_v48 = vmul.f32 -1.442695, %v10260_v0  ;;  %v3309_v39 = vld [vmem:[%s18279_s10 + $0xc68] sm:$0xff]  ;;  %v9974_v30 = vmul.f32 -1.442695, %v10264_v18  ;;  %v15234_v9 = vcombine.low %v3284_v63, %v3292_v15  ;;  %v3316_v63 = vld [vmem:[%s18279_s10 + $0xca0] sm:$0xff] }
 0x42c   :  { %11074 = vpow2.f32 %v9958_v14  ;;  %6471 = vmatpush1.bf16.msra.mxu0 %v15209_v50  ;;  %v9973_v17 = vmul.f32 -1.442695, %v10261_v34  ;;  %v15238_v56 = vcombine.low %v3285_v33, %v3293_v45  ;;  %v15240_v41 = vcombine.high %v3300_v4, %v3308_v36  ;;  %v3324_v15 = vld [vmem:[%s18279_s10 + $0xce0] sm:$0xff]  ;;  %v3317_v33 = vld [vmem:[%s18279_s10 + $0xca8] sm:$0xff] }
 0x42d   :  { %19123 = vst [vmem:[#allocation339_spill] sm:$0xff] %v15234_v9  ;;  %11076 = vpow2.f32 %v9957_v6  ;;  %6557 = vmatpush1.bf16.msra.mxu1 %v15211_v49  ;;  %6472 = vmatprep.subr.bf16.mxu0 %v15214_v29  ;;  %v9975_v55 = vmul.f32 -1.442695, %v10265_v24  ;;  %v15243_v14 = vcombine.high %v3301_v16, %v3309_v39  ;;  %v3325_v45 = vld [vmem:[%s18279_s10 + $0xce8] sm:$0xff]  ;;  %v15258_v25 = vcombine.low %v3300_v4, %v3308_v36  ;;  %v3332_v42 = vld [vmem:[%s18279_s10 + $0xd20] sm:$0xff] }
 0x42e   :  { %19124 = vst [vmem:[#allocation340_spill] sm:$0xff] %v15238_v56  ;;  %19125 = vst [vmem:[#allocation341_spill] sm:$0xff] %v15240_v41  ;;  %11078 = vpow2.f32 %v9959_v22  ;;  %6558 = vmatprep.subr.bf16.mxu1 %v15216_v44  ;;  %v15262_v0 = vcombine.low %v3301_v16, %v3309_v39  ;;  %v15264_v18 = vcombine.high %v3316_v63, %v3324_v15  ;;  %v3340_v4 = vld [vmem:[%s18279_s10 + $0xd60] sm:$0xff]  ;;  %v3333_v6 = vld [vmem:[%s18279_s10 + $0xd28] sm:$0xff] }
 0x42f   :  { %19126 = vst [vmem:[#allocation342_spill] sm:$0xff] %v15243_v14  ;;  %11080 = vpow2.f32 %v9972_v48  ;;  %19127 = vst [vmem:[#allocation343_spill] sm:$0xff] %v15258_v25  ;;  %v15267_v53 = vcombine.high %v3317_v33, %v3325_v45  ;;  %v3341_v22 = vld [vmem:[%s18279_s10 + $0xd68] sm:$0xff]  ;;  %v15282_v34 = vcombine.low %v3316_v63, %v3324_v15  ;;  %v15286_v36 = vcombine.low %v3317_v33, %v3325_v45 }
 0x430   :  { %11082 = vpow2.f32 %v9974_v30  ;;  %6473 = vmatpush1.bf16.msra.mxu0 %v15234_v9  ;;  %19128 = vst [vmem:[#allocation344_spill] sm:$0xff] %v15262_v0  ;;  %19129 = vst [vmem:[#allocation345_spill] sm:$0xff] %v15264_v18  ;;  %v15288_v48 = vcombine.high %v3332_v42, %v3340_v4  ;;  %v15291_v30 = vcombine.high %v3333_v6, %v3341_v22  ;;  %v3349_v33 = vld [vmem:[%s18279_s10 + $0xda8] sm:$0xff] }
 0x431   :  { %11084 = vpow2.f32 %v9973_v17  ;;  %6559 = vmatpush1.bf16.msra.mxu1 %v15238_v56  ;;  %6474 = vmatprep.subr.bf16.mxu0 %v15240_v41  ;;  %19130 = vst [vmem:[#allocation346_spill] sm:$0xff] %v15267_v53  ;;  %19131 = vst [vmem:[#allocation347_spill] sm:$0xff] %v15282_v34  ;;  %v3348_v17 = vld [vmem:[%s18279_s10 + $0xda0] sm:$0xff]  ;;  %v3357_v45 = vld [vmem:[%s18279_s10 + $0xde8] sm:$0xff] }
 0x432   :  { %11086 = vpow2.f32 %v9975_v55  ;;  %6560 = vmatprep.subr.bf16.mxu1 %v15243_v14  ;;  %19132 = vst [vmem:[#allocation348_spill] sm:$0xff] %v15286_v36  ;;  %19133 = vst [vmem:[#allocation349_spill] sm:$0xff] %v15288_v48  ;;  %v3356_v55 = vld [vmem:[%s18279_s10 + $0xde0] sm:$0xff] }
 0x433   :  { %19134 = vst [vmem:[#allocation350_spill] sm:$0xff] %v15291_v30  ;;  %v15312_v44 = vcombine.high %v3348_v17, %v3356_v55 }
 0x434   :  { %6475 = vmatpush1.bf16.msra.mxu0 %v15258_v25 }
 0x435   :  { %v11073_v24 = vpop.eup %11072  ;;  %6561 = vmatpush1.bf16.msra.mxu1 %v15262_v0  ;;  %6476 = vmatprep.subr.bf16.mxu0 %v15264_v18  ;;  %v15306_v0 = vcombine.low %v3332_v42, %v3340_v4  ;;  %19137 = vst [vmem:[#allocation353_spill] sm:$0xff] %v15312_v44  ;;  %v3364_v42 = vld [vmem:[%s18279_s10 + $0xe20] sm:$0xff] }
 0x436   :  { %v11075_v16 = vpop.eup %11074  ;;  %v6855_v39 = vadd.f32 1.0, %v11073_v24  ;;  %6562 = vmatprep.subr.bf16.mxu1 %v15267_v53  ;;  %v3372_v4 = vld [vmem:[%s18279_s10 + $0xe60] sm:$0xff] }
 0x437   :  { %v11077_v63 = vpop.eup %11076  ;;  %v6857_v15 = vadd.f32 1.0, %v11075_v16  ;;  %19135 = vst [vmem:[#allocation351_spill] sm:$0xff] %v15306_v0  ;;  %v15310_v16 = vcombine.low %v3333_v6, %v3341_v22 }
 0x438   :  { %v11079_v24 = vpop.eup %11078  ;;  %11088 = vrcp.f32 %v6855_v39  ;;  %v6856_v53 = vadd.f32 1.0, %v11077_v63  ;;  %6477 = vmatpush1.bf16.msra.mxu0 %v15282_v34  ;;  %v15315_v39 = vcombine.high %v3349_v33, %v3357_v45 }
 0x439   :  { %v11081_v14 = vpop.eup %11080  ;;  %11090 = vrcp.f32 %v6857_v15  ;;  %v6858_v56 = vadd.f32 1.0, %v11079_v24  ;;  %6563 = vmatpush1.bf16.msra.mxu1 %v15286_v36  ;;  %6478 = vmatprep.subr.bf16.mxu0 %v15288_v48  ;;  %19136 = vst [vmem:[#allocation352_spill] sm:$0xff] %v15310_v16  ;;  %v15330_v24 = vcombine.low %v3348_v17, %v3356_v55  ;;  %v3388_v17 = vld [vmem:[%s18279_s10 + $0xee0] sm:$0xff]  ;;  %v3381_v55 = vld [vmem:[%s18279_s10 + $0xea8] sm:$0xff] }
 0x43a   :  { %v11083_v49 = vpop.eup %11082  ;;  %11092 = vrcp.f32 %v6856_v53  ;;  %v6871_v23 = vadd.f32 1.0, %v11081_v14  ;;  %6564 = vmatprep.subr.bf16.mxu1 %v15291_v30  ;;  %19138 = vst [vmem:[#allocation354_spill] sm:$0xff] %v15315_v39  ;;  %v3365_v53 = vld [vmem:[%s18279_s10 + $0xe28] sm:$0xff] }
 0x43b   :  { %v11085_v63 = vpop.eup %11084  ;;  %11094 = vrcp.f32 %v6858_v56  ;;  %v6873_v6 = vadd.f32 1.0, %v11083_v49  ;;  %v3373_v14 = vld [vmem:[%s18279_s10 + $0xe68] sm:$0xff]  ;;  %19139 = vst [vmem:[#allocation355_spill] sm:$0xff] %v15330_v24  ;;  %v15334_v49 = vcombine.low %v3349_v33, %v3357_v45  ;;  %v15336_v56 = vcombine.high %v3364_v42, %v3372_v4 }
 0x43c   :  { %v11087_v22 = vpop.eup %11086  ;;  %11096 = vrcp.f32 %v6871_v23  ;;  %v6872_v15 = vadd.f32 1.0, %v11085_v63  ;;  %6479 = vmatpush1.bf16.msra.mxu0 %v15306_v0  ;;  %v15339_v36 = vcombine.high %v3365_v53, %v3373_v14  ;;  %v3380_v23 = vld [vmem:[%s18279_s10 + $0xea0] sm:$0xff]  ;;  %v3389_v33 = vld [vmem:[%s18279_s10 + $0xee8] sm:$0xff]  ;;  %v15354_v45 = vcombine.low %v3364_v42, %v3372_v4  ;;  %v6970_v0 = vld [vmem:[%s18272_s3 + $0x98] sm:$0xff] }
 0x43d   :  { %11098 = vrcp.f32 %v6873_v6  ;;  %v6874_v30 = vadd.f32 1.0, %v11087_v22  ;;  %6565 = vmatpush1.bf16.msra.mxu1 %v15310_v16  ;;  %6480 = vmatprep.subr.bf16.mxu0 %v15312_v44  ;;  %19140 = vst [vmem:[#allocation356_spill] sm:$0xff] %v15334_v49  ;;  %19141 = vst [vmem:[#allocation357_spill] sm:$0xff] %v15336_v56  ;;  %v15358_v63 = vcombine.low %v3365_v53, %v3373_v14  ;;  %v3404_v42 = vld [vmem:[%s18279_s10 + $0xf60] sm:$0xff]  ;;  %v3397_v53 = vld [vmem:[%s18279_s10 + $0xf28] sm:$0xff] }
 0x43e   :  { %11100 = vrcp.f32 %v6872_v15  ;;  %6566 = vmatprep.subr.bf16.mxu1 %v15315_v39  ;;  %19142 = vst [vmem:[#allocation358_spill] sm:$0xff] %v15339_v36  ;;  %19143 = vst [vmem:[#allocation359_spill] sm:$0xff] %v15354_v45  ;;  %v15360_v6 = vcombine.high %v3380_v23, %v3388_v17  ;;  %v15363_v22 = vcombine.high %v3381_v55, %v3389_v33  ;;  %v3396_v15 = vld [vmem:[%s18279_s10 + $0xf20] sm:$0xff]  ;;  %v3405_v14 = vld [vmem:[%s18279_s10 + $0xf68] sm:$0xff] }
 0x43f   :  { %11102 = vrcp.f32 %v6874_v30  ;;  %19144 = vst [vmem:[#allocation360_spill] sm:$0xff] %v15358_v63  ;;  %v6951_v39 = vld [vmem:[%s18272_s3] sm:$0xff]  ;;  %v6952_v44 = vld [vmem:[%s18272_s3 + $0x8] sm:$0xff]  ;;  %v15417_v34 = vcombine.low %v3396_v15, %v3404_v42  ;;  %v15419_v18 = vcombine.low %v3397_v53, %v3405_v14 }
 0x440   :  { %6481 = vmatpush1.bf16.msra.mxu0 %v15330_v24  ;;  %19145 = vst [vmem:[#allocation361_spill] sm:$0xff] %v15360_v6  ;;  %19146 = vst [vmem:[#allocation362_spill] sm:$0xff] %v15363_v22  ;;  %v6967_v16 = vld [vmem:[%s18272_s3 + $0x80] sm:$0xff]  ;;  %v15390_v24 = vcombine.high %v3396_v15, %v3404_v42 }
 0x441   :  { %6567 = vmatpush1.bf16.msra.mxu1 %v15334_v49  ;;  %6482 = vmatprep.subr.bf16.mxu0 %v15336_v56  ;;  %v15378_v49 = vcombine.low %v3380_v23, %v3388_v17  ;;  %v15388_v56 = vcombine.low %v3381_v55, %v3389_v33  ;;  %v3412_v23 = vld [vmem:[%s18279_s10 + $0xfa0] sm:$0x33]  ;;  %v6968_v55 = vld [vmem:[%s18272_s3 + $0x88] sm:$0xff]  ;;  %v6969_v33 = vld [vmem:[%s18272_s3 + $0x90] sm:$0xff]  ;;  %19151 = vst [vmem:[#allocation367_spill] sm:$0xff] %v15417_v34 }
 0x442   :  { %v11089_v30 = vpop.eup %11088  ;;  %6568 = vmatprep.subr.bf16.mxu1 %v15339_v36  ;;  %19149 = vst [vmem:[#allocation365_spill] sm:$0xff] %v15390_v24  ;;  %19152 = vst [vmem:[#allocation368_spill] sm:$0xff] %v15419_v18  ;;  %v15421_v25 = vcombine.high %v3412_v23, %v3412_v23  ;;  %v15423_v41 = vcombine.low %v3412_v23, %v3412_v23 }
 0x443   :  { %v11091_v4 = vpop.eup %11090  ;;  %19147 = vst [vmem:[#allocation363_spill] sm:$0xff] %v15378_v49  ;;  %19148 = vst [vmem:[#allocation364_spill] sm:$0xff] %v15388_v56  ;;  %vm6983_vm9 = vcmp.gt.f32.partialorder %v11089_v30, %v6951_v39  ;;  %v6953_v39 = vld [vmem:[%s18272_s3 + $0x10] sm:$0xff] }
 0x444   :  { %v11093_v36 = vpop.eup %11092  ;;  %6483 = vmatpush1.bf16.msra.mxu0 %v15354_v45  ;;  %v15396_v45 = vcombine.high %v3397_v53, %v3405_v14  ;;  %19153 = vst [vmem:[#allocation369_spill] sm:$0xff] %v15421_v25  ;;  %19154 = vst [vmem:[#allocation370_spill] sm:$0xff] %v15423_v41  ;;  %v2918_v53 = vld [vmem:[%s18279_s10 + $0x30] sm:$0xff]  ;;  %vm6985_vm7 = vcmp.gt.f32.partialorder %v11091_v4, %v6953_v39  ;;  %v2943_v39 = vld [vmem:[%s18279_s10 + $0xf8] sm:$0xff] }
 0x445   :  { %v11095_v5 = vpop.eup %11094  ;;  %6569 = vmatpush1.bf16.msra.mxu1 %v15358_v63  ;;  %6484 = vmatprep.subr.bf16.mxu0 %v15360_v6  ;;  %v3413_v6 = vld [vmem:[%s18279_s10 + $0xfa8] sm:$0x33]  ;;  %vm6984_vm13 = vcmp.gt.f32.partialorder %v11093_v36, %v6952_v44  ;;  %v2926_v14 = vld [vmem:[%s18279_s10 + $0x70] sm:$0xff]  ;;  %v2919_v44 = vld [vmem:[%s18279_s10 + $0x38] sm:$0xff] }
 0x446   :  { %v11097_v17 = vpop.eup %11096  ;;  %6570 = vmatprep.subr.bf16.mxu1 %v15363_v22  ;;  %19150 = vst [vmem:[#allocation366_spill] sm:$0xff] %v15396_v45  ;;  %v6954_v22 = vld [vmem:[%s18272_s3 + $0x18] sm:$0xff]  ;;  %v15435_v15 = vcombine.high %v3413_v6, %v3413_v6  ;;  %v15437_v42 = vcombine.low %v3413_v6, %v3413_v6  ;;  %v2934_v4 = vld [vmem:[%s18279_s10 + $0xb0] sm:$0xff] }
 0x447   :  { %v11099_v63 = vpop.eup %11098  ;;  %vm6999_vm10 = vcmp.gt.f32.partialorder %v11097_v17, %v6967_v16  ;;  %vm6986_vm1 = vcmp.gt.f32.partialorder %v11095_v5, %v6954_v22  ;;  %v2927_v36 = vld [vmem:[%s18279_s10 + $0x78] sm:$0xff]  ;;  %v6048_v5 = vsel %vm2643_vm6, %v15423_v41, 0  ;;  %v2942_v17 = vld [vmem:[%s18279_s10 + $0xf0] sm:$0xff]  ;;  %v19347_v16 = vld [vmem:[#allocation68_spill] sm:$0xff] }
 0x448   :  { %v11101_v48 = vpop.eup %11100  ;;  %6485 = vmatpush1.bf16.msra.mxu0 %v15378_v49  ;;  %vm15425_vm11 = vmpackc.low %vm6999_vm10, %vm6983_vm9  ;;  %vm7001_vm15 = vcmp.gt.f32.partialorder %v11099_v63, %v6969_v33  ;;  %19157 = vst [vmem:[#allocation371_spill] sm:$0xff] %v15435_v15  ;;  %v19163_v63 = vmov 0  ;;  %v6054_v6 = vsel %vm2643_vm6, %v15437_v42, 0  ;;  %v15475_v22 = vcombine.high %v2919_v44, %v2927_v36  ;;  %v2935_v33 = vld [vmem:[%s18279_s10 + $0xb8] sm:$0xff] }
 0x449   :  { %v11103_v30 = vpop.eup %11102  ;;  %6571 = vmatpush1.bf16.msra.mxu1 %v15388_v56  ;;  %6486 = vmatprep.subr.bf16.mxu0 %v15390_v24  ;;  %vm7000_vm14 = vcmp.gt.f32.partialorder %v11101_v48, %v6968_v55  ;;  %19158 = vst [vmem:[#allocation372_spill] sm:$0xff] %v15437_v42  ;;  %vm15460_vm9 = vmpackc.low %vm7001_vm15, %vm6985_vm7  ;;  %v15483_v55 = vcombine.low %v2918_v53, %v2926_v14  ;;  %v19353_v48 = vld [vmem:[#allocation71_spill] sm:$0xff] }
 0x44a   :  { %6572 = vmatprep.subr.bf16.mxu1 %v15396_v45  ;;  %vm15445_vm0 = vmpackc.low %vm7000_vm14, %vm6984_vm13  ;;  %vm7002_vm3 = vcmp.gt.f32.partialorder %v11103_v30, %v6970_v0  ;;  %v19164_v63 = vsel %vm15460_vm9, 4294967295, %v19163_v63  ;;  %v15469_v0 = vcombine.high %v2918_v53, %v2926_v14  ;;  %19167 = vst [vmem:[#allocation375_spill] sm:$0xff] %v15475_v22  ;;  %v15492_v30 = vcombine.low %v2919_v44, %v2927_v36  ;;  %v2950_v53 = vld [vmem:[%s18279_s10 + $0x130] sm:$0xff]  ;;  %v2951_v44 = vld [vmem:[%s18279_s10 + $0x138] sm:$0xff] }
 0x44b   :  { %vm15455_vm4 = vmpackc.low %vm7002_vm3, %vm6986_vm1  ;;  %19165 = vst [vmem:[#allocation373_spill] sm:$0xff] %v19164_v63  ;;  %v15495_v42 = vcombine.high %v2934_v4, %v2942_v17  ;;  %v2958_v14 = vld [vmem:[%s18279_s10 + $0x170] sm:$0xff]  ;;  %v2959_v36 = vld [vmem:[%s18279_s10 + $0x178] sm:$0xff] }
 0x44c   :  { %6487 = vmatpush1.bf16.msra.mxu0 %v15417_v34  ;;  %19166 = vst [vmem:[#allocation374_spill] sm:$0xff] %v15469_v0  ;;  %19168 = vst [vmem:[#allocation376_spill] sm:$0xff] %v15483_v55 }
 0x44d   :  { %6573 = vmatpush1.bf16.msra.mxu1 %v15419_v18  ;;  %9928 = vmatprep.subr.msk.bf16.mxu0 %vm2643_vm6, %v15421_v25  ;;  %19169 = vst [vmem:[#allocation377_spill] sm:$0xff] %v15492_v30  ;;  %19170 = vst [vmem:[#allocation378_spill] sm:$0xff] %v15495_v42  ;;  %v19253_v18 = vsub.s32 7, %v12718_v3 }
 0x44e   :  { %9936 = vmatprep.subr.msk.bf16.mxu1 %vm2643_vm6, %v15435_v15  ;;  %v15532_v15 = vcombine.high %v2951_v44, %v2959_v36 }
 0x44f   :  { %v3451_v45 = vrot.slane %v15154_v27, %v19253_v18  ;;  %v3295_v18 = vld [vmem:[%s18279_s10 + $0xbf8] sm:$0xff] }
 0x450   :  { %6489 = vmatpush1.bf16.msra.mxu0 %v6048_v5  ;;  %v15506_v5 = vcombine.high %v2935_v33, %v2943_v39  ;;  %19175 = vst [vmem:[#allocation383_spill] sm:$0xff] %v15532_v15 }
 0x451   :  { %6575 = vmatpush1.bf16.msra.mxu1 %v6054_v6  ;;  %6587 = vmatprep.subr.bf16.mxu0 %v15469_v0  ;;  %v15518_v6 = vcombine.low %v2934_v4, %v2942_v17  ;;  %v15526_v0 = vcombine.high %v2950_v53, %v2958_v14  ;;  %v2966_v4 = vld [vmem:[%s18279_s10 + $0x1b0] sm:$0xff] }
 0x452   :  { %6673 = vmatprep.subr.bf16.mxu1 %v15475_v22  ;;  %19171 = vst [vmem:[#allocation379_spill] sm:$0xff] %v15506_v5  ;;  %v15524_v22 = vcombine.low %v2935_v33, %v2943_v39  ;;  %v2974_v17 = vld [vmem:[%s18279_s10 + $0x1f0] sm:$0xff]  ;;  %v2967_v33 = vld [vmem:[%s18279_s10 + $0x1b8] sm:$0xff]  ;;  %v15548_v39 = vcombine.low %v2950_v53, %v2958_v14 }
 0x453   :  { %9931 = vmatmul.mubr.msk.bf16.vlgmr.msra.gmra.mrb[16].mxu0 %vm13456_vm5, %v18850_v60  ;;  %19172 = vst [vmem:[#allocation380_spill] sm:$0xff] %v15518_v6  ;;  %19174 = vst [vmem:[#allocation382_spill] sm:$0xff] %v15526_v0  ;;  %v2990_v53 = vld [vmem:[%s18279_s10 + $0x270] sm:$0xff]  ;;  %v2983_v14 = vld [vmem:[%s18279_s10 + $0x238] sm:$0xff] }
 0x454   :  { %9939 = vmatmul.mubr.msk.bf16.vlgmr.msra.gmra.mrb[20].mxu1 %vm13456_vm5, %v18850_v60  ;;  %6588 = vmatpush1.bf16.msra.mxu0 %v15483_v55  ;;  %19173 = vst [vmem:[#allocation381_spill] sm:$0xff] %v15524_v22  ;;  %19176 = vst [vmem:[#allocation384_spill] sm:$0xff] %v15548_v39  ;;  %v2982_v55 = vld [vmem:[%s18279_s10 + $0x230] sm:$0xff] }
 0x455   :  { %9941 = vmatprep.mubr.msk.bf16.mxu0 %vm13460_vm8, %v18850_v60  ;;  %6674 = vmatpush1.bf16.msra.mxu1 %v15492_v30  ;;  %v15552_v30 = vcombine.low %v2951_v44, %v2959_v36  ;;  %v2991_v44 = vld [vmem:[%s18279_s10 + $0x278] sm:$0xff]  ;;  %v15572_v36 = vcombine.low %v2966_v4, %v2974_v17 }
 0x456   :  { %9949 = vmatprep.mubr.msk.bf16.mxu1 %vm13460_vm8, %v18850_v60  ;;  %6589 = vmatprep.subr.bf16.mxu0 %v15495_v42  ;;  %v15554_v42 = vcombine.high %v2966_v4, %v2974_v17  ;;  %v3006_v4 = vld [vmem:[%s18279_s10 + $0x2f0] sm:$0xff]  ;;  %v2999_v17 = vld [vmem:[%s18279_s10 + $0x2b8] sm:$0xff] }
 0x457   :  { %6675 = vmatprep.subr.bf16.mxu1 %v15506_v5  ;;  %19177 = vst [vmem:[#allocation385_spill] sm:$0xff] %v15552_v30  ;;  %v15557_v5 = vcombine.high %v2967_v33, %v2975_v11  ;;  %19180 = vst [vmem:[#allocation388_spill] sm:$0xff] %v15572_v36 }
 0x458   :  { %6590 = vmatpush1.bf16.msra.mxu0 %v15518_v6  ;;  %19178 = vst [vmem:[#allocation386_spill] sm:$0xff] %v15554_v42  ;;  %v2998_v6 = vld [vmem:[%s18279_s10 + $0x2b0] sm:$0xff] }
 0x459   :  { %6676 = vmatpush1.bf16.msra.mxu1 %v15524_v22  ;;  %6591 = vmatprep.subr.bf16.mxu0 %v15526_v0  ;;  %19179 = vst [vmem:[#allocation387_spill] sm:$0xff] %v15557_v5  ;;  %v15578_v22 = vcombine.high %v2982_v55, %v2990_v53  ;;  %v15581_v0 = vcombine.high %v2983_v14, %v2991_v44 }
 0x45a   :  { %6677 = vmatprep.subr.bf16.mxu1 %v15532_v15  ;;  %v15576_v15 = vcombine.low %v2967_v33, %v2975_v11  ;;  %v3007_v33 = vld [vmem:[%s18279_s10 + $0x2f8] sm:$0xff]  ;;  %v15596_v11 = vcombine.low %v2982_v55, %v2990_v53  ;;  %v3022_v55 = vld [vmem:[%s18279_s10 + $0x370] sm:$0xff] }
 0x45b   :  { %19182 = vst [vmem:[#allocation390_spill] sm:$0xff] %v15578_v22  ;;  %19183 = vst [vmem:[#allocation391_spill] sm:$0xff] %v15581_v0  ;;  %v3015_v53 = vld [vmem:[%s18279_s10 + $0x338] sm:$0xff] }
 0x45c   :  { %6592 = vmatpush1.bf16.msra.mxu0 %v15548_v39  ;;  %19181 = vst [vmem:[#allocation389_spill] sm:$0xff] %v15576_v15  ;;  %19184 = vst [vmem:[#allocation392_spill] sm:$0xff] %v15596_v11  ;;  %v3014_v39 = vld [vmem:[%s18279_s10 + $0x330] sm:$0xff] }
 0x45d   :  { %6678 = vmatpush1.bf16.msra.mxu1 %v15552_v30  ;;  %6593 = vmatprep.subr.bf16.mxu0 %v15554_v42  ;;  %v15602_v30 = vcombine.high %v2998_v6, %v3006_v4  ;;  %v15605_v42 = vcombine.high %v2999_v17, %v3007_v33 }
 0x45e   :  { %6679 = vmatprep.subr.bf16.mxu1 %v15557_v5  ;;  %v15600_v5 = vcombine.low %v2983_v14, %v2991_v44  ;;  %v3023_v14 = vld [vmem:[%s18279_s10 + $0x378] sm:$0xff]  ;;  %v15620_v44 = vcombine.low %v2998_v6, %v3006_v4  ;;  %v3038_v6 = vld [vmem:[%s18279_s10 + $0x3f0] sm:$0xff] }
 0x45f   :  { %19186 = vst [vmem:[#allocation394_spill] sm:$0xff] %v15602_v30  ;;  %19187 = vst [vmem:[#allocation395_spill] sm:$0xff] %v15605_v42  ;;  %v3031_v4 = vld [vmem:[%s18279_s10 + $0x3b8] sm:$0xff] }
 0x460   :  { %6594 = vmatpush1.bf16.msra.mxu0 %v15572_v36  ;;  %19185 = vst [vmem:[#allocation393_spill] sm:$0xff] %v15600_v5  ;;  %19188 = vst [vmem:[#allocation396_spill] sm:$0xff] %v15620_v44  ;;  %v3030_v36 = vld [vmem:[%s18279_s10 + $0x3b0] sm:$0xff] }
 0x461   :  { %6680 = vmatpush1.bf16.msra.mxu1 %v15576_v15  ;;  %6595 = vmatprep.subr.bf16.mxu0 %v15578_v22  ;;  %v15626_v15 = vcombine.high %v3014_v39, %v3022_v55  ;;  %v15629_v22 = vcombine.high %v3015_v53, %v3023_v14 }
 0x462   :  { %6681 = vmatprep.subr.bf16.mxu1 %v15581_v0  ;;  %v15624_v0 = vcombine.low %v2999_v17, %v3007_v33  ;;  %v3039_v17 = vld [vmem:[%s18279_s10 + $0x3f8] sm:$0xff]  ;;  %v15644_v33 = vcombine.low %v3014_v39, %v3022_v55  ;;  %v3054_v39 = vld [vmem:[%s18279_s10 + $0x470] sm:$0xff] }
 0x463   :  { %19190 = vst [vmem:[#allocation398_spill] sm:$0xff] %v15626_v15  ;;  %19191 = vst [vmem:[#allocation399_spill] sm:$0xff] %v15629_v22  ;;  %v3047_v55 = vld [vmem:[%s18279_s10 + $0x438] sm:$0xff] }
 0x464   :  { %6596 = vmatpush1.bf16.msra.mxu0 %v15596_v11  ;;  %19189 = vst [vmem:[#allocation397_spill] sm:$0xff] %v15624_v0  ;;  %19192 = vst [vmem:[#allocation400_spill] sm:$0xff] %v15644_v33  ;;  %v3046_v11 = vld [vmem:[%s18279_s10 + $0x430] sm:$0xff] }
 0x465   :  { %6682 = vmatpush1.bf16.msra.mxu1 %v15600_v5  ;;  %6597 = vmatprep.subr.bf16.mxu0 %v15602_v30  ;;  %v15650_v5 = vcombine.high %v3030_v36, %v3038_v6  ;;  %v15653_v30 = vcombine.high %v3031_v4, %v3039_v17 }
 0x466   :  { %6683 = vmatprep.subr.bf16.mxu1 %v15605_v42  ;;  %v15648_v42 = vcombine.low %v3015_v53, %v3023_v14  ;;  %v3055_v53 = vld [vmem:[%s18279_s10 + $0x478] sm:$0xff]  ;;  %v15668_v14 = vcombine.low %v3030_v36, %v3038_v6  ;;  %v3070_v36 = vld [vmem:[%s18279_s10 + $0x4f0] sm:$0xff] }
 0x467   :  { %19194 = vst [vmem:[#allocation402_spill] sm:$0xff] %v15650_v5  ;;  %19195 = vst [vmem:[#allocation403_spill] sm:$0xff] %v15653_v30  ;;  %v3063_v6 = vld [vmem:[%s18279_s10 + $0x4b8] sm:$0xff] }
 0x468   :  { %6598 = vmatpush1.bf16.msra.mxu0 %v15620_v44  ;;  %19193 = vst [vmem:[#allocation401_spill] sm:$0xff] %v15648_v42  ;;  %19196 = vst [vmem:[#allocation404_spill] sm:$0xff] %v15668_v14  ;;  %v3062_v44 = vld [vmem:[%s18279_s10 + $0x4b0] sm:$0xff] }
 0x469   :  { %6684 = vmatpush1.bf16.msra.mxu1 %v15624_v0  ;;  %6599 = vmatprep.subr.bf16.mxu0 %v15626_v15  ;;  %v15674_v0 = vcombine.high %v3046_v11, %v3054_v39  ;;  %v15677_v15 = vcombine.high %v3047_v55, %v3055_v53 }
 0x46a   :  { %6685 = vmatprep.subr.bf16.mxu1 %v15629_v22  ;;  %v15672_v22 = vcombine.low %v3031_v4, %v3039_v17  ;;  %v3071_v4 = vld [vmem:[%s18279_s10 + $0x4f8] sm:$0xff]  ;;  %v15692_v17 = vcombine.low %v3046_v11, %v3054_v39  ;;  %v3086_v11 = vld [vmem:[%s18279_s10 + $0x570] sm:$0xff] }
 0x46b   :  { %19198 = vst [vmem:[#allocation406_spill] sm:$0xff] %v15674_v0  ;;  %19199 = vst [vmem:[#allocation407_spill] sm:$0xff] %v15677_v15  ;;  %v3079_v39 = vld [vmem:[%s18279_s10 + $0x538] sm:$0xff] }
 0x46c   :  { %6600 = vmatpush1.bf16.msra.mxu0 %v15644_v33  ;;  %19197 = vst [vmem:[#allocation405_spill] sm:$0xff] %v15672_v22  ;;  %19200 = vst [vmem:[#allocation408_spill] sm:$0xff] %v15692_v17  ;;  %v3078_v33 = vld [vmem:[%s18279_s10 + $0x530] sm:$0xff] }
 0x46d   :  { %6686 = vmatpush1.bf16.msra.mxu1 %v15648_v42  ;;  %6601 = vmatprep.subr.bf16.mxu0 %v15650_v5  ;;  %v15698_v42 = vcombine.high %v3062_v44, %v3070_v36  ;;  %v15701_v5 = vcombine.high %v3063_v6, %v3071_v4 }
 0x46e   :  { %6687 = vmatprep.subr.bf16.mxu1 %v15653_v30  ;;  %v15696_v30 = vcombine.low %v3047_v55, %v3055_v53  ;;  %v3087_v55 = vld [vmem:[%s18279_s10 + $0x578] sm:$0xff]  ;;  %v15716_v53 = vcombine.low %v3062_v44, %v3070_v36  ;;  %v3102_v44 = vld [vmem:[%s18279_s10 + $0x5f0] sm:$0xff] }
 0x46f   :  { %19202 = vst [vmem:[#allocation410_spill] sm:$0xff] %v15698_v42  ;;  %19203 = vst [vmem:[#allocation411_spill] sm:$0xff] %v15701_v5  ;;  %v3095_v36 = vld [vmem:[%s18279_s10 + $0x5b8] sm:$0xff] }
 0x470   :  { %6602 = vmatpush1.bf16.msra.mxu0 %v15668_v14  ;;  %19201 = vst [vmem:[#allocation409_spill] sm:$0xff] %v15696_v30  ;;  %19204 = vst [vmem:[#allocation412_spill] sm:$0xff] %v15716_v53  ;;  %v3094_v14 = vld [vmem:[%s18279_s10 + $0x5b0] sm:$0xff] }
 0x471   :  { %6688 = vmatpush1.bf16.msra.mxu1 %v15672_v22  ;;  %6603 = vmatprep.subr.bf16.mxu0 %v15674_v0  ;;  %v15722_v22 = vcombine.high %v3078_v33, %v3086_v11  ;;  %v15725_v0 = vcombine.high %v3079_v39, %v3087_v55 }
 0x472   :  { %6689 = vmatprep.subr.bf16.mxu1 %v15677_v15  ;;  %v15720_v15 = vcombine.low %v3063_v6, %v3071_v4  ;;  %v3103_v6 = vld [vmem:[%s18279_s10 + $0x5f8] sm:$0xff]  ;;  %v15740_v4 = vcombine.low %v3078_v33, %v3086_v11  ;;  %v3118_v33 = vld [vmem:[%s18279_s10 + $0x670] sm:$0xff] }
 0x473   :  { %19206 = vst [vmem:[#allocation414_spill] sm:$0xff] %v15722_v22  ;;  %19207 = vst [vmem:[#allocation415_spill] sm:$0xff] %v15725_v0  ;;  %v3111_v11 = vld [vmem:[%s18279_s10 + $0x638] sm:$0xff] }
 0x474   :  { %6604 = vmatpush1.bf16.msra.mxu0 %v15692_v17  ;;  %19205 = vst [vmem:[#allocation413_spill] sm:$0xff] %v15720_v15  ;;  %19208 = vst [vmem:[#allocation416_spill] sm:$0xff] %v15740_v4  ;;  %v3110_v17 = vld [vmem:[%s18279_s10 + $0x630] sm:$0xff] }
 0x475   :  { %6690 = vmatpush1.bf16.msra.mxu1 %v15696_v30  ;;  %6605 = vmatprep.subr.bf16.mxu0 %v15698_v42  ;;  %v15746_v30 = vcombine.high %v3094_v14, %v3102_v44  ;;  %v15749_v42 = vcombine.high %v3095_v36, %v3103_v6 }
 0x476   :  { %6691 = vmatprep.subr.bf16.mxu1 %v15701_v5  ;;  %v15744_v5 = vcombine.low %v3079_v39, %v3087_v55  ;;  %v3119_v39 = vld [vmem:[%s18279_s10 + $0x678] sm:$0xff]  ;;  %v15764_v55 = vcombine.low %v3094_v14, %v3102_v44  ;;  %v3134_v14 = vld [vmem:[%s18279_s10 + $0x6f0] sm:$0xff] }
 0x477   :  { %19210 = vst [vmem:[#allocation418_spill] sm:$0xff] %v15746_v30  ;;  %19211 = vst [vmem:[#allocation419_spill] sm:$0xff] %v15749_v42  ;;  %v3127_v44 = vld [vmem:[%s18279_s10 + $0x6b8] sm:$0xff] }
 0x478   :  { %6606 = vmatpush1.bf16.msra.mxu0 %v15716_v53  ;;  %19209 = vst [vmem:[#allocation417_spill] sm:$0xff] %v15744_v5  ;;  %19212 = vst [vmem:[#allocation420_spill] sm:$0xff] %v15764_v55  ;;  %v3126_v53 = vld [vmem:[%s18279_s10 + $0x6b0] sm:$0xff] }
 0x479   :  { %6692 = vmatpush1.bf16.msra.mxu1 %v15720_v15  ;;  %6607 = vmatprep.subr.bf16.mxu0 %v15722_v22  ;;  %v15770_v15 = vcombine.high %v3110_v17, %v3118_v33  ;;  %v15773_v22 = vcombine.high %v3111_v11, %v3119_v39 }
 0x47a   :  { %6693 = vmatprep.subr.bf16.mxu1 %v15725_v0  ;;  %v15768_v0 = vcombine.low %v3095_v36, %v3103_v6  ;;  %v3135_v36 = vld [vmem:[%s18279_s10 + $0x6f8] sm:$0xff]  ;;  %v15788_v6 = vcombine.low %v3110_v17, %v3118_v33  ;;  %v3150_v17 = vld [vmem:[%s18279_s10 + $0x770] sm:$0xff] }
 0x47b   :  { %19214 = vst [vmem:[#allocation422_spill] sm:$0xff] %v15770_v15  ;;  %19215 = vst [vmem:[#allocation423_spill] sm:$0xff] %v15773_v22  ;;  %v3143_v33 = vld [vmem:[%s18279_s10 + $0x738] sm:$0xff] }
 0x47c   :  { %6608 = vmatpush1.bf16.msra.mxu0 %v15740_v4  ;;  %19213 = vst [vmem:[#allocation421_spill] sm:$0xff] %v15768_v0  ;;  %19216 = vst [vmem:[#allocation424_spill] sm:$0xff] %v15788_v6  ;;  %v3142_v4 = vld [vmem:[%s18279_s10 + $0x730] sm:$0xff] }
 0x47d   :  { %6694 = vmatpush1.bf16.msra.mxu1 %v15744_v5  ;;  %6609 = vmatprep.subr.bf16.mxu0 %v15746_v30  ;;  %v15794_v5 = vcombine.high %v3126_v53, %v3134_v14  ;;  %v15797_v30 = vcombine.high %v3127_v44, %v3135_v36 }
 0x47e   :  { %6695 = vmatprep.subr.bf16.mxu1 %v15749_v42  ;;  %v15792_v42 = vcombine.low %v3111_v11, %v3119_v39  ;;  %v3151_v11 = vld [vmem:[%s18279_s10 + $0x778] sm:$0xff]  ;;  %v15812_v39 = vcombine.low %v3126_v53, %v3134_v14  ;;  %v3166_v53 = vld [vmem:[%s18279_s10 + $0x7f0] sm:$0xff] }
 0x47f   :  { %19218 = vst [vmem:[#allocation426_spill] sm:$0xff] %v15794_v5  ;;  %19219 = vst [vmem:[#allocation427_spill] sm:$0xff] %v15797_v30  ;;  %v3159_v14 = vld [vmem:[%s18279_s10 + $0x7b8] sm:$0xff] }
 0x480   :  { %6610 = vmatpush1.bf16.msra.mxu0 %v15764_v55  ;;  %19217 = vst [vmem:[#allocation425_spill] sm:$0xff] %v15792_v42  ;;  %19220 = vst [vmem:[#allocation428_spill] sm:$0xff] %v15812_v39  ;;  %v3158_v55 = vld [vmem:[%s18279_s10 + $0x7b0] sm:$0xff] }
 0x481   :  { %6696 = vmatpush1.bf16.msra.mxu1 %v15768_v0  ;;  %6611 = vmatprep.subr.bf16.mxu0 %v15770_v15  ;;  %v15818_v0 = vcombine.high %v3142_v4, %v3150_v17  ;;  %v15821_v15 = vcombine.high %v3143_v33, %v3151_v11 }
 0x482   :  { %6697 = vmatprep.subr.bf16.mxu1 %v15773_v22  ;;  %v15816_v22 = vcombine.low %v3127_v44, %v3135_v36  ;;  %v3167_v44 = vld [vmem:[%s18279_s10 + $0x7f8] sm:$0xff]  ;;  %v15836_v36 = vcombine.low %v3142_v4, %v3150_v17  ;;  %v3182_v4 = vld [vmem:[%s18279_s10 + $0x870] sm:$0xff] }
 0x483   :  { %19222 = vst [vmem:[#allocation430_spill] sm:$0xff] %v15818_v0  ;;  %19223 = vst [vmem:[#allocation431_spill] sm:$0xff] %v15821_v15  ;;  %v3175_v17 = vld [vmem:[%s18279_s10 + $0x838] sm:$0xff] }
 0x484   :  { %6612 = vmatpush1.bf16.msra.mxu0 %v15788_v6  ;;  %19221 = vst [vmem:[#allocation429_spill] sm:$0xff] %v15816_v22  ;;  %19224 = vst [vmem:[#allocation432_spill] sm:$0xff] %v15836_v36  ;;  %v3174_v6 = vld [vmem:[%s18279_s10 + $0x830] sm:$0xff] }
 0x485   :  { %6698 = vmatpush1.bf16.msra.mxu1 %v15792_v42  ;;  %6613 = vmatprep.subr.bf16.mxu0 %v15794_v5  ;;  %v15842_v42 = vcombine.high %v3158_v55, %v3166_v53  ;;  %v15845_v5 = vcombine.high %v3159_v14, %v3167_v44 }
 0x486   :  { %6699 = vmatprep.subr.bf16.mxu1 %v15797_v30  ;;  %v15840_v30 = vcombine.low %v3143_v33, %v3151_v11  ;;  %v3183_v33 = vld [vmem:[%s18279_s10 + $0x878] sm:$0xff]  ;;  %v15860_v11 = vcombine.low %v3158_v55, %v3166_v53  ;;  %v3198_v55 = vld [vmem:[%s18279_s10 + $0x8f0] sm:$0xff]  ;;  %v15878_v53 = vcombine.low %v3174_v6, %v3182_v4 }
 0x487   :  { %19226 = vst [vmem:[#allocation434_spill] sm:$0xff] %v15842_v42  ;;  %19227 = vst [vmem:[#allocation435_spill] sm:$0xff] %v15845_v5 }
 0x488   :  { %6614 = vmatpush1.bf16.msra.mxu0 %v15812_v39  ;;  %19225 = vst [vmem:[#allocation433_spill] sm:$0xff] %v15840_v30  ;;  %19228 = vst [vmem:[#allocation436_spill] sm:$0xff] %v15860_v11  ;;  %v3190_v39 = vld [vmem:[%s18279_s10 + $0x8b0] sm:$0xff] }
 0x489   :  { %6700 = vmatpush1.bf16.msra.mxu1 %v15816_v22  ;;  %6615 = vmatprep.subr.bf16.mxu0 %v15818_v0  ;;  %v15866_v22 = vcombine.high %v3174_v6, %v3182_v4  ;;  %v15869_v0 = vcombine.high %v3175_v17, %v3183_v33  ;;  %19232 = vst [vmem:[#allocation440_spill] sm:$0xff] %v15878_v53  ;;  %v3206_v6 = vld [vmem:[%s18279_s10 + $0x930] sm:$0xff] }
 0x48a   :  { %6701 = vmatprep.subr.bf16.mxu1 %v15821_v15  ;;  %v15864_v15 = vcombine.low %v3159_v14, %v3167_v44  ;;  %v3191_v14 = vld [vmem:[%s18279_s10 + $0x8b8] sm:$0xff]  ;;  %v3214_v4 = vld [vmem:[%s18279_s10 + $0x970] sm:$0xff] }
 0x48b   :  { %19230 = vst [vmem:[#allocation438_spill] sm:$0xff] %v15866_v22  ;;  %19231 = vst [vmem:[#allocation439_spill] sm:$0xff] %v15869_v0  ;;  %v3199_v44 = vld [vmem:[%s18279_s10 + $0x8f8] sm:$0xff] }
 0x48c   :  { %6616 = vmatpush1.bf16.msra.mxu0 %v15836_v36  ;;  %19229 = vst [vmem:[#allocation437_spill] sm:$0xff] %v15864_v15 }
 0x48d   :  { %6702 = vmatpush1.bf16.msra.mxu1 %v15840_v30  ;;  %6617 = vmatprep.subr.bf16.mxu0 %v15842_v42  ;;  %v15891_v30 = vcombine.high %v3190_v39, %v3198_v55  ;;  %v15921_v42 = vcombine.high %v3206_v6, %v3214_v4 }
 0x48e   :  { %6703 = vmatprep.subr.bf16.mxu1 %v15845_v5  ;;  %v15888_v5 = vcombine.low %v3175_v17, %v3183_v33  ;;  %v3207_v17 = vld [vmem:[%s18279_s10 + $0x938] sm:$0xff] }
 0x48f   :  { %19234 = vst [vmem:[#allocation442_spill] sm:$0xff] %v15891_v30  ;;  %v3215_v33 = vld [vmem:[%s18279_s10 + $0x978] sm:$0xff]  ;;  %19238 = vst [vmem:[#allocation446_spill] sm:$0xff] %v15921_v42 }
 0x490   :  { %6618 = vmatpush1.bf16.msra.mxu0 %v15860_v11  ;;  %19233 = vst [vmem:[#allocation441_spill] sm:$0xff] %v15888_v5  ;;  %v15919_v11 = vcombine.low %v3191_v14, %v3199_v44  ;;  %v15926_v1 = vcombine.high %v3207_v17, %v3215_v33 }
 0x491   :  { %6704 = vmatpush1.bf16.msra.mxu1 %v15864_v15  ;;  %6630 = vmatprep.subr.bf16.mxu0 %v15866_v22  ;;  %v15902_v15 = vcombine.high %v3191_v14, %v3199_v44  ;;  %v3223_v14 = vld [vmem:[%s18279_s10 + $0x9b8] sm:$0xff]  ;;  %v15942_v44 = vcombine.low %v3206_v6, %v3214_v4  ;;  %v3246_v6 = vld [vmem:[%s18279_s10 + $0xa70] sm:$0xff] }
 0x492   :  { %6716 = vmatprep.subr.bf16.mxu1 %v15869_v0  ;;  %v15914_v0 = vcombine.low %v3190_v39, %v3198_v55  ;;  %19237 = vst [vmem:[#allocation445_spill] sm:$0xff] %v15919_v11  ;;  %19239 = vst [vmem:[#allocation447_spill] sm:$0xff] %v15926_v1  ;;  %v3222_v39 = vld [vmem:[%s18279_s10 + $0x9b0] sm:$0xff]  ;;  %v3239_v4 = vld [vmem:[%s18279_s10 + $0xa38] sm:$0xff] }
 0x493   :  { %9943 = vmatmul.mubr.msk.bf16.vlgmr.msra.gmra.mrb[20].mxu0 %vm13446_vm2, %v18850_v60  ;;  %19235 = vst [vmem:[#allocation443_spill] sm:$0xff] %v15902_v15  ;;  %v3230_v55 = vld [vmem:[%s18279_s10 + $0x9f0] sm:$0xff]  ;;  %19240 = vst [vmem:[#allocation448_spill] sm:$0xff] %v15942_v44 }
 0x494   :  { %9951 = vmatmul.mubr.msk.bf16.vlgmr.msra.gmra.mrb[24].mxu1 %vm13446_vm2, %v18850_v60  ;;  %6631 = vmatpush1.bf16.msra.mxu0 %v15878_v53  ;;  %19236 = vst [vmem:[#allocation444_spill] sm:$0xff] %v15914_v0  ;;  %v15948_v36 = vcombine.high %v3222_v39, %v3230_v55  ;;  %v3279_v53 = vld [vmem:[%s18279_s10 + $0xb78] sm:$0xff] }
 0x495   :  { %9945 = vmatprep.mubr.msk.bf16.mxu0 %vm18776_vm12, %v13488_v32  ;;  %6717 = vmatpush1.bf16.msra.mxu1 %v15888_v5  ;;  %v15946_v5 = vcombine.low %v3207_v17, %v3215_v33  ;;  %v3247_v17 = vld [vmem:[%s18279_s10 + $0xa78] sm:$0xff]  ;;  %v15966_v33 = vcombine.low %v3222_v39, %v3230_v55  ;;  %v3262_v39 = vld [vmem:[%s18279_s10 + $0xaf0] sm:$0xff]  ;;  %v15984_v55 = vsub.s32 4, %v12718_v3 }
 0x496   :  { %9953 = vmatprep.mubr.msk.bf16.mxu1 %vm18776_vm12, %v13488_v32  ;;  %6632 = vmatprep.subr.bf16.mxu0 %v15891_v30  ;;  %v3231_v32 = vld [vmem:[%s18279_s10 + $0x9f8] sm:$0xff]  ;;  %19242 = vst [vmem:[#allocation450_spill] sm:$0xff] %v15948_v36  ;;  %v3238_v30 = vld [vmem:[%s18279_s10 + $0xa30] sm:$0xff] }
 0x497   :  { %6718 = vmatprep.subr.bf16.mxu1 %v15902_v15  ;;  %19241 = vst [vmem:[#allocation449_spill] sm:$0xff] %v15946_v5  ;;  %v15951_v15 = vcombine.high %v3223_v14, %v3231_v32  ;;  %19244 = vst [vmem:[#allocation452_spill] sm:$0xff] %v15966_v33 }
 0x498   :  { %6633 = vmatpush1.bf16.msra.mxu0 %v15914_v0  ;;  %v3254_v0 = vld [vmem:[%s18279_s10 + $0xab0] sm:$0xff] }
 0x499   :  { %6719 = vmatpush1.bf16.msra.mxu1 %v15919_v11  ;;  %6634 = vmatprep.subr.bf16.mxu0 %v15921_v42  ;;  %19243 = vst [vmem:[#allocation451_spill] sm:$0xff] %v15951_v15  ;;  %v15972_v11 = vcombine.high %v3238_v30, %v3246_v6  ;;  %v15975_v42 = vcombine.high %v3239_v4, %v3247_v17 }
 0x49a   :  { %6720 = vmatprep.subr.bf16.mxu1 %v15926_v1  ;;  %v15970_v1 = vcombine.low %v3223_v14, %v3231_v32  ;;  %v3255_v14 = vld [vmem:[%s18279_s10 + $0xab8] sm:$0xff]  ;;  %v16006_v22 = vcombine.high %v3254_v0, %v3262_v39 }
 0x49b   :  { %19246 = vst [vmem:[#allocation454_spill] sm:$0xff] %v15972_v11  ;;  %19247 = vst [vmem:[#allocation455_spill] sm:$0xff] %v15975_v42  ;;  %v3263_v32 = vld [vmem:[%s18279_s10 + $0xaf8] sm:$0xff] }
 0x49c   :  { %6635 = vmatpush1.bf16.msra.mxu0 %v15942_v44  ;;  %19245 = vst [vmem:[#allocation453_spill] sm:$0xff] %v15970_v1  ;;  %v16003_v44 = vcombine.low %v3239_v4, %v3247_v17  ;;  %19250 = vst [vmem:[#allocation458_spill] sm:$0xff] %v16006_v22  ;;  %v3439_v4 = vrot.slane %v15154_v27, %v15984_v55  ;;  %v3271_v17 = vld [vmem:[%s18279_s10 + $0xb38] sm:$0xff]  ;;  %v16037_v56 = vcombine.low %v3255_v14, %v3263_v32 }
 0x49d   :  { %6721 = vmatpush1.bf16.msra.mxu1 %v15946_v5  ;;  %6636 = vmatprep.subr.bf16.mxu0 %v15948_v36  ;;  %v15996_v5 = vsub.s32 6, %v12718_v3  ;;  %v15999_v36 = vsub.s32 5, %v12718_v3 }
 0x49e   :  { %6722 = vmatprep.subr.bf16.mxu1 %v15951_v15  ;;  %v15993_v15 = vcombine.low %v3238_v30, %v3246_v6  ;;  %19249 = vst [vmem:[#allocation457_spill] sm:$0xff] %v16003_v44  ;;  %v16009_v30 = vcombine.high %v3255_v14, %v3263_v32  ;;  %v3270_v6 = vld [vmem:[%s18279_s10 + $0xb30] sm:$0xff]  ;;  %19254 = vst [vmem:[#allocation461_spill] sm:$0xff] %v16037_v56 }
 0x4a0   :  { %6637 = vmatpush1.bf16.msra.mxu0 %v15966_v33  ;;  %19248 = vst [vmem:[#allocation456_spill] sm:$0xff] %v15993_v15  ;;  %19251 = vst [vmem:[#allocation459_spill] sm:$0xff] %v16009_v30  ;;  %v16030_v33 = vcombine.low %v3254_v0, %v3262_v39  ;;  %v3294_v0 = vld [vmem:[%s18279_s10 + $0xbf0] sm:$0xff] }
 0x4a1   :  { %6723 = vmatpush1.bf16.msra.mxu1 %v15970_v1  ;;  %6638 = vmatprep.subr.bf16.mxu0 %v15972_v11  ;;  %v3278_v1 = vld [vmem:[%s18279_s10 + $0xb70] sm:$0xff]  ;;  %v3443_v11 = vrot.slane %v15154_v27, %v15999_v36 }
 0x4a2   :  { %6724 = vmatprep.subr.bf16.mxu1 %v15975_v42  ;;  %v3447_v42 = vrot.slane %v15154_v27, %v15996_v5  ;;  %19252 = vst [vmem:[#allocation460_spill] sm:$0xff] %v16030_v33  ;;  %v16039_v41 = vcombine.high %v3270_v6, %v3278_v1  ;;  %v3287_v27 = vld [vmem:[%s18279_s10 + $0xbb8] sm:$0xff]  ;;  %v16056_v25 = vcombine.low %v3270_v6, %v3278_v1 }
 0x4a3   :  { %v16065_v1 = vcombine.high %v3287_v27, %v3295_v18 }
 0x4a4   :  { %6639 = vmatpush1.bf16.msra.mxu0 %v15993_v15  ;;  %v3286_v15 = vld [vmem:[%s18279_s10 + $0xbb0] sm:$0xff] }
 0x4a5   :  { %6725 = vmatpush1.bf16.msra.mxu1 %v16003_v44  ;;  %6640 = vmatprep.subr.bf16.mxu0 %v16006_v22  ;;  %v16048_v44 = vcombine.high %v3271_v17, %v3279_v53  ;;  %v16061_v29 = vcombine.high %v3286_v15, %v3294_v0  ;;  %19257 = vst [vmem:[#allocation464_spill] sm:$0xff] %v16065_v1 }
 0x4a6   :  { %v6320_v39 = vpop.f32.mrb[12].mxu0  ;;  %6726 = vmatprep.subr.bf16.mxu1 %v16009_v30  ;;  %v16059_v30 = vcombine.low %v3271_v17, %v3279_v53 }
 0x4a7   :  { %19255 = vst [vmem:[#allocation462_spill] sm:$0xff] %v16048_v44  ;;  %v10266_v14 = vadd.f32 %v6320_v39, %v3439_v4  ;;  %v6406_v32 = vpop.f32.mrb[16].mxu1  ;;  %v6322_v22 = vpop.f32.mrb[13].mxu0 }
 0x4a8   :  { %v10270_v34 = vadd.f32 %v6406_v32, %v3447_v42  ;;  %v10267_v24 = vadd.f32 %v6322_v22, %v3443_v11  ;;  %v6408_v49 = vpop.f32.mrb[17].mxu1  ;;  %v6324_v9 = vpop.f32.mrb[14].mxu0  ;;  %6641 = vmatpush1.bf16.msra.mxu0 %v16030_v33  ;;  %19256 = vst [vmem:[#allocation463_spill] sm:$0xff] %v16059_v30  ;;  %v3302_v22 = vld [vmem:[%s18279_s10 + $0xc30] sm:$0xff] }
 0x4a9   :  { %v9960_v50 = vmul.f32 -1.442695, %v10266_v14  ;;  %v10271_v12 = vadd.f32 %v6408_v49, %v3451_v45  ;;  %v10268_v63 = vadd.f32 %v6324_v9, %v3439_v4  ;;  %v6410_v3 = vpop.f32.mrb[18].mxu1  ;;  %6727 = vmatpush1.bf16.msra.mxu1 %v16037_v56  ;;  %v6326_v39 = vpop.f32.mrb[15].mxu0  ;;  %6642 = vmatprep.subr.bf16.mxu0 %v16039_v41  ;;  %v3310_v9 = vld [vmem:[%s18279_s10 + $0xc70] sm:$0xff]  ;;  %v3303_v56 = vld [vmem:[%s18279_s10 + $0xc38] sm:$0xff] }
 0x4aa   :  { %v9962_v6 = vmul.f32 -1.442695, %v10270_v34  ;;  %v9961_v53 = vmul.f32 -1.442695, %v10267_v24  ;;  %v10272_v17 = vadd.f32 %v6410_v3, %v3447_v42  ;;  %v10269_v32 = vadd.f32 %v6326_v39, %v3443_v11  ;;  %v6412_v33 = vpop.f32.mrb[19].mxu1  ;;  %6728 = vmatprep.subr.bf16.mxu1 %v16048_v44  ;;  %v3311_v3 = vld [vmem:[%s18279_s10 + $0xc78] sm:$0xff] }
 0x4ab   :  { %11104 = vpow2.f32 %v9960_v50  ;;  %v9963_v49 = vmul.f32 -1.442695, %v10271_v12  ;;  %v9976_v4 = vmul.f32 -1.442695, %v10268_v63  ;;  %v10273_v14 = vadd.f32 %v6412_v33, %v3451_v45  ;;  %v3326_v11 = vld [vmem:[%s18279_s10 + $0xcf0] sm:$0xff]  ;;  %v3319_v33 = vld [vmem:[%s18279_s10 + $0xcb8] sm:$0xff] }
 0x4ac   :  { %11106 = vpow2.f32 %v9962_v6  ;;  %v9978_v34 = vmul.f32 -1.442695, %v10272_v17  ;;  %6643 = vmatpush1.bf16.msra.mxu0 %v16056_v25  ;;  %v16081_v24 = vcombine.low %v3286_v15, %v3294_v0  ;;  %v9977_v42 = vmul.f32 -1.442695, %v10269_v32  ;;  %v3318_v15 = vld [vmem:[%s18279_s10 + $0xcb0] sm:$0xff]  ;;  %v3327_v0 = vld [vmem:[%s18279_s10 + $0xcf8] sm:$0xff] }
 0x4ad   :  { %11108 = vpow2.f32 %v9961_v53  ;;  %6729 = vmatpush1.bf16.msra.mxu1 %v16059_v30  ;;  %6644 = vmatprep.subr.bf16.mxu0 %v16061_v29  ;;  %v16085_v50 = vcombine.low %v3287_v27, %v3295_v18  ;;  %v16087_v12 = vcombine.high %v3302_v22, %v3310_v9  ;;  %v9979_v45 = vmul.f32 -1.442695, %v10273_v14  ;;  %v3334_v53 = vld [vmem:[%s18279_s10 + $0xd30] sm:$0xff]  ;;  %v3343_v17 = vld [vmem:[%s18279_s10 + $0xd78] sm:$0xff] }
 0x4ae   :  { %11110 = vpow2.f32 %v9963_v49  ;;  %6730 = vmatprep.subr.bf16.mxu1 %v16065_v1  ;;  %v16090_v63 = vcombine.high %v3303_v56, %v3311_v3  ;;  %v16105_v27 = vcombine.low %v3302_v22, %v3310_v9  ;;  %v16109_v18 = vcombine.low %v3303_v56, %v3311_v3  ;;  %v3342_v22 = vld [vmem:[%s18279_s10 + $0xd70] sm:$0xff]  ;;  %v3335_v56 = vld [vmem:[%s18279_s10 + $0xd38] sm:$0xff] }
 0x4af   :  { %19258 = vst [vmem:[#allocation465_spill] sm:$0xff] %v16085_v50  ;;  %19259 = vst [vmem:[#allocation466_spill] sm:$0xff] %v16087_v12  ;;  %11112 = vpow2.f32 %v9976_v4  ;;  %v16111_v39 = vcombine.high %v3318_v15, %v3326_v11  ;;  %v16114_v6 = vcombine.high %v3319_v33, %v3327_v0  ;;  %v16129_v32 = vcombine.low %v3318_v15, %v3326_v11 }
 0x4b0   :  { %19260 = vst [vmem:[#allocation467_spill] sm:$0xff] %v16090_v63  ;;  %11114 = vpow2.f32 %v9978_v34  ;;  %6645 = vmatpush1.bf16.msra.mxu0 %v16081_v24  ;;  %19261 = vst [vmem:[#allocation468_spill] sm:$0xff] %v16105_v27  ;;  %v16133_v49 = vcombine.low %v3319_v33, %v3327_v0  ;;  %v16135_v4 = vcombine.high %v3334_v53, %v3342_v22  ;;  %v3351_v33 = vld [vmem:[%s18279_s10 + $0xdb8] sm:$0xff] }
 0x4b1   :  { %11116 = vpow2.f32 %v9977_v42  ;;  %6731 = vmatpush1.bf16.msra.mxu1 %v16085_v50  ;;  %6646 = vmatprep.subr.bf16.mxu0 %v16087_v12  ;;  %19262 = vst [vmem:[#allocation469_spill] sm:$0xff] %v16109_v18  ;;  %19263 = vst [vmem:[#allocation470_spill] sm:$0xff] %v16111_v39  ;;  %v16138_v34 = vcombine.high %v3335_v56, %v3343_v17  ;;  %v3350_v42 = vld [vmem:[%s18279_s10 + $0xdb0] sm:$0xff]  ;;  %v3359_v0 = vld [vmem:[%s18279_s10 + $0xdf8] sm:$0xff] }
 0x4b2   :  { %11118 = vpow2.f32 %v9979_v45  ;;  %6732 = vmatprep.subr.bf16.mxu1 %v16090_v63  ;;  %19264 = vst [vmem:[#allocation471_spill] sm:$0xff] %v16114_v6  ;;  %19265 = vst [vmem:[#allocation472_spill] sm:$0xff] %v16129_v32  ;;  %v3358_v45 = vld [vmem:[%s18279_s10 + $0xdf0] sm:$0xff] }
 0x4b3   :  { %19266 = vst [vmem:[#allocation473_spill] sm:$0xff] %v16133_v49  ;;  %19267 = vst [vmem:[#allocation474_spill] sm:$0xff] %v16135_v4  ;;  %v16159_v1 = vcombine.high %v3350_v42, %v3358_v45 }
 0x4b4   :  { %6647 = vmatpush1.bf16.msra.mxu0 %v16105_v27  ;;  %19268 = vst [vmem:[#allocation475_spill] sm:$0xff] %v16138_v34 }
 0x4b5   :  { %v11105_v9 = vpop.eup %11104  ;;  %6733 = vmatpush1.bf16.msra.mxu1 %v16109_v18  ;;  %6648 = vmatprep.subr.bf16.mxu0 %v16111_v39  ;;  %v16153_v18 = vcombine.low %v3334_v53, %v3342_v22  ;;  %19271 = vst [vmem:[#allocation478_spill] sm:$0xff] %v16159_v1  ;;  %v3366_v53 = vld [vmem:[%s18279_s10 + $0xe30] sm:$0xff]  ;;  %v6974_v39 = vld [vmem:[%s18272_s3 + $0xb8] sm:$0xff] }
 0x4b6   :  { %v11107_v14 = vpop.eup %11106  ;;  %v6859_v3 = vadd.f32 1.0, %v11105_v9  ;;  %6734 = vmatprep.subr.bf16.mxu1 %v16114_v6  ;;  %v3374_v22 = vld [vmem:[%s18279_s10 + $0xe70] sm:$0xff] }
 0x4b7   :  { %v11109_v15 = vpop.eup %11108  ;;  %v6861_v11 = vadd.f32 1.0, %v11107_v14  ;;  %19269 = vst [vmem:[#allocation476_spill] sm:$0xff] %v16153_v18  ;;  %v16157_v14 = vcombine.low %v3335_v56, %v3343_v17 }
 0x4b8   :  { %v11111_v9 = vpop.eup %11110  ;;  %11120 = vrcp.f32 %v6859_v3  ;;  %v6860_v6 = vadd.f32 1.0, %v11109_v15  ;;  %6649 = vmatpush1.bf16.msra.mxu0 %v16129_v32  ;;  %v16162_v3 = vcombine.high %v3351_v33, %v3359_v0  ;;  %v3415_v32 = vld [vmem:[%s18279_s10 + $0xfb8] sm:$0x33] }
 0x4b9   :  { %v11113_v63 = vpop.eup %11112  ;;  %11122 = vrcp.f32 %v6861_v11  ;;  %v6862_v50 = vadd.f32 1.0, %v11111_v9  ;;  %6735 = vmatpush1.bf16.msra.mxu1 %v16133_v49  ;;  %6650 = vmatprep.subr.bf16.mxu0 %v16135_v4  ;;  %19270 = vst [vmem:[#allocation477_spill] sm:$0xff] %v16157_v14  ;;  %v16177_v9 = vcombine.low %v3350_v42, %v3358_v45  ;;  %v3390_v42 = vld [vmem:[%s18279_s10 + $0xef0] sm:$0xff]  ;;  %v3383_v45 = vld [vmem:[%s18279_s10 + $0xeb8] sm:$0xff] }
 0x4ba   :  { %v11115_v30 = vpop.eup %11114  ;;  %11124 = vrcp.f32 %v6860_v6  ;;  %v6875_v44 = vadd.f32 1.0, %v11113_v63  ;;  %6736 = vmatprep.subr.bf16.mxu1 %v16138_v34  ;;  %19272 = vst [vmem:[#allocation479_spill] sm:$0xff] %v16162_v3  ;;  %v3367_v6 = vld [vmem:[%s18279_s10 + $0xe38] sm:$0xff] }
 0x4bb   :  { %v11117_v15 = vpop.eup %11116  ;;  %11126 = vrcp.f32 %v6862_v50  ;;  %v6877_v56 = vadd.f32 1.0, %v11115_v30  ;;  %v3375_v63 = vld [vmem:[%s18279_s10 + $0xe78] sm:$0xff]  ;;  %19273 = vst [vmem:[#allocation480_spill] sm:$0xff] %v16177_v9  ;;  %v16181_v30 = vcombine.low %v3351_v33, %v3359_v0  ;;  %v16183_v50 = vcombine.high %v3366_v53, %v3374_v22 }
 0x4bc   :  { %v11119_v17 = vpop.eup %11118  ;;  %11128 = vrcp.f32 %v6875_v44  ;;  %v6876_v11 = vadd.f32 1.0, %v11117_v15  ;;  %6651 = vmatpush1.bf16.msra.mxu0 %v16153_v18  ;;  %v16186_v49 = vcombine.high %v3367_v6, %v3375_v63  ;;  %v3382_v44 = vld [vmem:[%s18279_s10 + $0xeb0] sm:$0xff]  ;;  %v3391_v33 = vld [vmem:[%s18279_s10 + $0xef8] sm:$0xff]  ;;  %v16201_v0 = vcombine.low %v3366_v53, %v3374_v22 }
 0x4bd   :  { %11130 = vrcp.f32 %v6877_v56  ;;  %v6878_v34 = vadd.f32 1.0, %v11119_v17  ;;  %6737 = vmatpush1.bf16.msra.mxu1 %v16157_v14  ;;  %6652 = vmatprep.subr.bf16.mxu0 %v16159_v1  ;;  %19274 = vst [vmem:[#allocation481_spill] sm:$0xff] %v16181_v30  ;;  %19275 = vst [vmem:[#allocation482_spill] sm:$0xff] %v16183_v50  ;;  %v16205_v15 = vcombine.low %v3367_v6, %v3375_v63  ;;  %v3406_v53 = vld [vmem:[%s18279_s10 + $0xf70] sm:$0xff]  ;;  %v3399_v6 = vld [vmem:[%s18279_s10 + $0xf38] sm:$0xff] }
 0x4be   :  { %11132 = vrcp.f32 %v6876_v11  ;;  %6738 = vmatprep.subr.bf16.mxu1 %v16162_v3  ;;  %19276 = vst [vmem:[#allocation483_spill] sm:$0xff] %v16186_v49  ;;  %19277 = vst [vmem:[#allocation484_spill] sm:$0xff] %v16201_v0  ;;  %v16207_v56 = vcombine.high %v3382_v44, %v3390_v42  ;;  %v16210_v17 = vcombine.high %v3383_v45, %v3391_v33  ;;  %v3398_v11 = vld [vmem:[%s18279_s10 + $0xf30] sm:$0xff]  ;;  %v3407_v63 = vld [vmem:[%s18279_s10 + $0xf78] sm:$0xff] }
 0x4bf   :  { %11134 = vrcp.f32 %v6878_v34  ;;  %19278 = vst [vmem:[#allocation485_spill] sm:$0xff] %v16205_v15  ;;  %v6955_v3 = vld [vmem:[%s18272_s3 + $0x20] sm:$0xff]  ;;  %v16237_v1 = vcombine.high %v3398_v11, %v3406_v53  ;;  %v16257_v4 = vcombine.low %v3398_v11, %v3406_v53  ;;  %v16269_v12 = vcombine.low %v3399_v6, %v3407_v63  ;;  %v19485_v53 = vld [vmem:[#allocation188_spill] sm:$0xff] }
 0x4c0   :  { %6653 = vmatpush1.bf16.msra.mxu0 %v16177_v9  ;;  %19279 = vst [vmem:[#allocation486_spill] sm:$0xff] %v16207_v56  ;;  %19280 = vst [vmem:[#allocation487_spill] sm:$0xff] %v16210_v17  ;;  %v6971_v14 = vld [vmem:[%s18272_s3 + $0xa0] sm:$0xff]  ;;  %v16235_v9 = vcombine.low %v3383_v45, %v3391_v33  ;;  %v6956_v45 = vld [vmem:[%s18272_s3 + $0x28] sm:$0xff] }
 0x4c1   :  { %6739 = vmatpush1.bf16.msra.mxu1 %v16181_v30  ;;  %6654 = vmatprep.subr.bf16.mxu0 %v16183_v50  ;;  %v16225_v30 = vcombine.low %v3382_v44, %v3390_v42  ;;  %v3414_v44 = vld [vmem:[%s18279_s10 + $0xfb0] sm:$0x33]  ;;  %v6972_v33 = vld [vmem:[%s18272_s3 + $0xa8] sm:$0xff] }
 0x4c2   :  { %v11121_v34 = vpop.eup %11120  ;;  %6740 = vmatprep.subr.bf16.mxu1 %v16186_v49  ;;  %v6957_v42 = vld [vmem:[%s18272_s3 + $0x30] sm:$0xff]  ;;  %v16271_v11 = vcombine.high %v3414_v44, %v3414_v44 }
 0x4c3   :  { %v11123_v22 = vpop.eup %11122  ;;  %vm6987_vm2 = vcmp.gt.f32.partialorder %v11121_v34, %v6955_v3  ;;  %v16286_v34 = vcombine.high %v3415_v32, %v3415_v32  ;;  %v19549_v3 = vld [vmem:[#allocation315_spill] sm:$0xff] }
 0x4c4   :  { %v11125_v49 = vpop.eup %11124  ;;  %6655 = vmatpush1.bf16.msra.mxu0 %v16201_v0  ;;  %v6973_v0 = vld [vmem:[%s18272_s3 + $0xb0] sm:$0xff]  ;;  %vm6989_vm13 = vcmp.gt.f32.partialorder %v11123_v22, %v6957_v42 }
 0x4c5   :  { %v11127_v50 = vpop.eup %11126  ;;  %6741 = vmatpush1.bf16.msra.mxu1 %v16205_v15  ;;  %6656 = vmatprep.subr.bf16.mxu0 %v16207_v56  ;;  %v16249_v15 = vcombine.high %v3399_v6, %v3407_v63  ;;  %vm6988_vm15 = vcmp.gt.f32.partialorder %v11125_v49, %v6956_v45  ;;  %v16288_v6 = vcombine.low %v3415_v32, %v3415_v32 }
 0x4c6   :  { %v11129_v18 = vpop.eup %11128  ;;  %6742 = vmatprep.subr.bf16.mxu1 %v16210_v17  ;;  %v6958_v17 = vld [vmem:[%s18272_s3 + $0x38] sm:$0xff] }
 0x4c7   :  { %v11131_v56 = vpop.eup %11130  ;;  %vm7003_vm8 = vcmp.gt.f32.partialorder %v11129_v18, %v6971_v14  ;;  %v16279_v14 = vcombine.low %v3414_v44, %v3414_v44 }
 0x4c8   :  { %v11133_v27 = vpop.eup %11132  ;;  %6657 = vmatpush1.bf16.msra.mxu0 %v16225_v30  ;;  %vm16273_vm10 = vmpackc.low %vm7003_vm8, %vm6987_vm2  ;;  %vm7005_vm14 = vcmp.gt.f32.partialorder %v11131_v56, %v6973_v0  ;;  %vm6990_vm2 = vcmp.gt.f32.partialorder %v11127_v50, %v6958_v17  ;;  %v19427_v0 = vld [vmem:[#allocation193_spill] sm:$0xff]  ;;  %v19491_v56 = vld [vmem:[#allocation194_spill] sm:$0xff] }
 0x4c9   :  { %v11135_v18 = vpop.eup %11134  ;;  %6743 = vmatpush1.bf16.msra.mxu1 %v16235_v9  ;;  %6658 = vmatprep.subr.bf16.mxu0 %v16237_v1  ;;  %vm7004_vm1 = vcmp.gt.f32.partialorder %v11133_v27, %v6972_v33  ;;  %vm16281_vm3 = vmpackc.low %vm7005_vm14, %vm6989_vm13  ;;  %v6060_v27 = vsel %vm2643_vm6, %v16279_v14, 0 }
 0x4ca   :  { %6744 = vmatprep.subr.bf16.mxu1 %v16249_v15  ;;  %vm16290_vm7 = vmpackc.low %vm7004_vm1, %vm6988_vm15  ;;  %vm7006_vm8 = vcmp.gt.f32.partialorder %v11135_v18, %v6974_v39  ;;  %v6066_v39 = vsel %vm2643_vm6, %v16288_v6, 0 }
 0x4cb   :  { %vm16294_vm12 = vmpackc.low %vm7006_vm8, %vm6990_vm2 }
 0x4cc   :  { %6659 = vmatpush1.bf16.msra.mxu0 %v16257_v4 }
 0x4cd   :  { %6745 = vmatpush1.bf16.msra.mxu1 %v16269_v12  ;;  %9944 = vmatprep.subr.msk.bf16.mxu0 %vm2643_vm6, %v16271_v11 }
 0x4ce   :  { %9952 = vmatprep.subr.msk.bf16.mxu1 %vm2643_vm6, %v16286_v34 }
 0x4d0   :  { %6661 = vmatpush1.bf16.msra.mxu0 %v6060_v27 }
 0x4d1   :  { %6747 = vmatpush1.bf16.msra.mxu1 %v6066_v39  ;;  %7231 = vmatprep.subr.bf16.mxu0 %v12981_v61  ;;  %v19290_v61 = vld [vmem:[#allocation27_spill] sm:$0xff]  ;;  %v19310_v39 = vld [vmem:[#allocation42_spill] sm:$0xff] }
 0x4d2   :  { %7575 = vmatprep.subr.bf16.mxu1 %v13393_v47  ;;  %v16361_v47 = vld [vmem:[%s18280_s11 + $0x8] sm:$0xff] }
 0x4d3   :  { %9947 = vmatmul.mubr.msk.bf16.vlgmr.msra.gmra.mrb[20].mxu0 %vm13456_vm5, %v18850_v60 }
 0x4d4   :  { %9955 = vmatmul.mubr.msk.bf16.vlgmr.msra.gmra.mrb[24].mxu1 %vm13456_vm5, %v18850_v60  ;;  %10021 = vmatprep.mubr.msk.bf16.mxu0 %vm15445_vm0, %v18850_v60 }
 0x4d5   :  { %10068 = vmatprep.mubr.msk.bf16.mxu1 %vm15445_vm0, %v18850_v60 }
 0x4d9   :  { %7232 = vmatpush1.bf16.xpose.msra.mxu0 %v12796_v51  ;;  %v19289_v51 = vld [vmem:[#allocation77_spill] sm:$0xff] }
 0x4da   :  { %7576 = vmatpush1.bf16.xpose.msra.mxu1 %v13401_v54  ;;  %7233 = vmatprep.subr.bf16.mxu0 %v13029_v58  ;;  %v19291_v58 = vld [vmem:[#allocation79_spill] sm:$0xff]  ;;  %v19302_v54 = vld [vmem:[#allocation38_spill] sm:$0xff] }
 0x4db   :  { %7577 = vmatprep.subr.bf16.mxu1 %v13475_v57  ;;  %v19304_v57 = vld [vmem:[#allocation41_spill] sm:$0xff] }
 0x4e1   :  { %7234 = vmatpush1.bf16.xpose.msra.mxu0 %v13055_v43  ;;  %v19292_v43 = vld [vmem:[#allocation29_spill] sm:$0xff] }
 0x4e2   :  { %7578 = vmatpush1.bf16.xpose.msra.mxu1 %v13498_v20  ;;  %7235 = vmatprep.subr.bf16.mxu0 %v13061_v46  ;;  %v19293_v46 = vld [vmem:[#allocation81_spill] sm:$0xff]  ;;  %v19305_v20 = vld [vmem:[#allocation6_spill] sm:$0xff] }
 0x4e3   :  { %7579 = vmatprep.subr.bf16.mxu1 %v13506_v35  ;;  %v3455_v35 = vrot.slane %v16361_v47, %v19305_v20 }
 0x4e9   :  { %7236 = vmatpush1.bf16.xpose.msra.mxu0 %v13079_v52  ;;  %v19294_v52 = vld [vmem:[#allocation31_spill] sm:$0xff] }
 0x4ea   :  { %7580 = vmatpush1.bf16.xpose.msra.mxu1 %v13526_v59  ;;  %7237 = vmatprep.subr.bf16.mxu0 %v13085_v2  ;;  %v19295_v2 = vld [vmem:[#allocation83_spill] sm:$0xff]  ;;  %v19307_v59 = vld [vmem:[#allocation14_spill] sm:$0xff] }
 0x4eb   :  { %7581 = vmatprep.subr.bf16.mxu1 %v13532_v62  ;;  %v3463_v62 = vrot.slane %v16361_v47, %v19307_v59 }
 0x4f1   :  { %7238 = vmatpush1.bf16.xpose.msra.mxu0 %v13103_v10  ;;  %v19296_v10 = vld [vmem:[#allocation33_spill] sm:$0xff] }
 0x4f2   :  { %7582 = vmatpush1.bf16.xpose.msra.mxu1 %v13550_v38  ;;  %7239 = vmatprep.subr.bf16.mxu0 %v13109_v13  ;;  %v19297_v13 = vld [vmem:[#allocation85_spill] sm:$0xff] }
 0x4f3   :  { %7583 = vmatprep.subr.bf16.mxu1 %v13556_v8  ;;  %v19306_v8 = vld [vmem:[#allocation93_spill] sm:$0xff] }
 0x4f9   :  { %7240 = vmatpush1.bf16.xpose.msra.mxu0 %v13127_v19  ;;  %v19298_v19 = vld [vmem:[#allocation34_spill] sm:$0xff] }
 0x4fa   :  { %7584 = vmatpush1.bf16.xpose.msra.mxu1 %v13574_v37  ;;  %7241 = vmatprep.subr.bf16.mxu0 %v13133_v21  ;;  %v19299_v21 = vld [vmem:[#allocation87_spill] sm:$0xff] }
 0x4fb   :  { %7585 = vmatprep.subr.bf16.mxu1 %v13580_v26  ;;  %v19308_v26 = vld [vmem:[#allocation7_spill] sm:$0xff] }
 0x4fc   :  { %v3459_v38 = vrot.slane %v16361_v47, %v19308_v26  ;;  %v19309_v37 = vld [vmem:[#allocation15_spill] sm:$0xff] }
 0x501   :  { %7242 = vmatpush1.bf16.xpose.msra.mxu0 %v13151_v28  ;;  %v19300_v28 = vld [vmem:[#allocation37_spill] sm:$0xff] }
 0x502   :  { %7586 = vmatpush1.bf16.xpose.msra.mxu1 %v13598_v40  ;;  %7243 = vmatprep.subr.bf16.mxu0 %v13157_v31  ;;  %v19301_v31 = vld [vmem:[#allocation89_spill] sm:$0xff]  ;;  %v3467_v40 = vrot.slane %v16361_v47, %v19309_v37 }
 0x503   :  { %7587 = vmatprep.subr.bf16.mxu1 %v19289_v51 }
 0x509   :  { %7244 = vmatpush1.bf16.xpose.msra.mxu0 %v19290_v61 }
 0x50a   :  { %7588 = vmatpush1.bf16.xpose.msra.mxu1 %v19291_v58  ;;  %7245 = vmatprep.subr.bf16.mxu0 %v19292_v43 }
 0x50b   :  { %7589 = vmatprep.subr.bf16.mxu1 %v19293_v46 }
 0x511   :  { %7246 = vmatpush1.bf16.xpose.msra.mxu0 %v19294_v52  ;;  %v19311_v52 = vld [vmem:[#allocation95_spill] sm:$0xff] }
 0x512   :  { %7590 = vmatpush1.bf16.xpose.msra.mxu1 %v19295_v2  ;;  %7247 = vmatprep.subr.bf16.mxu0 %v19296_v10  ;;  %v19312_v2 = vld [vmem:[#allocation45_spill] sm:$0xff] }
 0x513   :  { %7591 = vmatprep.subr.bf16.mxu1 %v19297_v13 }
 0x519   :  { %7248 = vmatpush1.bf16.xpose.msra.mxu0 %v19298_v19 }
 0x51a   :  { %7592 = vmatpush1.bf16.xpose.msra.mxu1 %v19299_v21  ;;  %7249 = vmatprep.subr.bf16.mxu0 %v19300_v28  ;;  %v19313_v21 = vld [vmem:[#allocation97_spill] sm:$0xff] }
 0x51b   :  { %7593 = vmatprep.subr.bf16.mxu1 %v19301_v31 }
 0x521   :  { %7250 = vmatpush1.bf16.xpose.msra.mxu0 %v19302_v54 }
 0x522   :  { %7594 = vmatpush1.bf16.xpose.msra.mxu1 %v19303_v7  ;;  %7251 = vmatprep.subr.bf16.mxu0 %v19304_v57  ;;  %v19314_v7 = vld [vmem:[#allocation46_spill] sm:$0xff]  ;;  %v19315_v57 = vld [vmem:[#allocation99_spill] sm:$0xff] }
 0x523   :  { %7595 = vmatprep.subr.bf16.mxu1 %v19306_v8  ;;  %v19317_v8 = vld [vmem:[#allocation101_spill] sm:$0xff] }
 0x526   :  { %v6492_v23 = vpop.f32.mrb[16].mxu0 }
 0x527   :  { %v10274_v32 = vadd.f32 %v6492_v23, %v3455_v35  ;;  %v6578_v49 = vpop.f32.mrb[20].mxu1  ;;  %v6494_v50 = vpop.f32.mrb[17].mxu0 }
 0x528   :  { %v10278_v17 = vadd.f32 %v6578_v49, %v3463_v62  ;;  %v10275_v22 = vadd.f32 %v6494_v50, %v3459_v38  ;;  %v6580_v63 = vpop.f32.mrb[21].mxu1  ;;  %v6496_v44 = vpop.f32.mrb[18].mxu0 }
 0x529   :  { %v9964_v42 = vmul.f32 -1.442695, %v10274_v32  ;;  %v10279_v45 = vadd.f32 %v6580_v63, %v3467_v40  ;;  %v10276_v33 = vadd.f32 %v6496_v44, %v3455_v35  ;;  %v6582_v18 = vpop.f32.mrb[22].mxu1  ;;  %v6498_v27 = vpop.f32.mrb[19].mxu0  ;;  %7252 = vmatpush1.bf16.xpose.msra.mxu0 %v19310_v39  ;;  %v19316_v35 = vld [vmem:[#allocation49_spill] sm:$0xff]  ;;  %v19318_v63 = vld [vmem:[#allocation50_spill] sm:$0xff] }
 0x52a   :  { %v9966_v51 = vmul.f32 -1.442695, %v10278_v17  ;;  %v9965_v61 = vmul.f32 -1.442695, %v10275_v22  ;;  %v10280_v58 = vadd.f32 %v6582_v18, %v3463_v62  ;;  %v10277_v43 = vadd.f32 %v6498_v27, %v3459_v38  ;;  %v6584_v46 = vpop.f32.mrb[23].mxu1  ;;  %7596 = vmatpush1.bf16.xpose.msra.mxu1 %v19311_v52  ;;  %7253 = vmatprep.subr.bf16.mxu0 %v19312_v2  ;;  %v19321_v39 = vld [vmem:[#allocation105_spill] sm:$0xff] }
 0x52b   :  { %11136 = vpow2.f32 %v9964_v42  ;;  %v9967_v10 = vmul.f32 -1.442695, %v10279_v45  ;;  %v9980_v13 = vmul.f32 -1.442695, %v10276_v33  ;;  %v10281_v19 = vadd.f32 %v6584_v46, %v3467_v40  ;;  %7597 = vmatprep.subr.bf16.mxu1 %v19313_v21  ;;  %v19319_v45 = vld [vmem:[#allocation103_spill] sm:$0xff]  ;;  %v19320_v33 = vld [vmem:[#allocation53_spill] sm:$0xff] }
 0x52c   :  { %11138 = vpow2.f32 %v9966_v51  ;;  %v9982_v28 = vmul.f32 -1.442695, %v10280_v58  ;;  %v9981_v31 = vmul.f32 -1.442695, %v10277_v43  ;;  %v19322_v43 = vld [vmem:[#allocation54_spill] sm:$0xff]  ;;  %v19323_v52 = vld [vmem:[#allocation107_spill] sm:$0xff] }
 0x52d   :  { %11140 = vpow2.f32 %v9965_v61  ;;  %v9983_v54 = vmul.f32 -1.442695, %v10281_v19  ;;  %v19324_v2 = vld [vmem:[#allocation57_spill] sm:$0xff]  ;;  %v6959_v21 = vld [vmem:[%s18272_s3 + $0x40] sm:$0xff] }
 0x52e   :  { %11142 = vpow2.f32 %v9967_v10 }
 0x52f   :  { %11144 = vpow2.f32 %v9980_v13  ;;  %v19325_v13 = vld [vmem:[#allocation109_spill] sm:$0xff] }
 0x530   :  { %11146 = vpow2.f32 %v9982_v28  ;;  %v6975_v28 = vld [vmem:[%s18272_s3 + $0xc0] sm:$0xff] }
 0x531   :  { %11148 = vpow2.f32 %v9981_v31  ;;  %7254 = vmatpush1.bf16.xpose.msra.mxu0 %v19314_v7  ;;  %v6977_v7 = vld [vmem:[%s18272_s3 + $0xd0] sm:$0xff] }
 0x532   :  { %11150 = vpow2.f32 %v9983_v54  ;;  %7598 = vmatpush1.bf16.xpose.msra.mxu1 %v19315_v57  ;;  %7255 = vmatprep.subr.bf16.mxu0 %v19316_v35  ;;  %v6961_v54 = vld [vmem:[%s18272_s3 + $0x50] sm:$0xff]  ;;  %v6960_v35 = vld [vmem:[%s18272_s3 + $0x48] sm:$0xff] }
 0x533   :  { %7599 = vmatprep.subr.bf16.mxu1 %v19317_v8  ;;  %v6976_v8 = vld [vmem:[%s18272_s3 + $0xc8] sm:$0xff] }
 0x535   :  { %v11137_v62 = vpop.eup %11136 }
 0x536   :  { %v11139_v38 = vpop.eup %11138  ;;  %v6863_v40 = vadd.f32 1.0, %v11137_v62 }
 0x537   :  { %v11141_v23 = vpop.eup %11140  ;;  %v6865_v32 = vadd.f32 1.0, %v11139_v38  ;;  %v6962_v38 = vld [vmem:[%s18272_s3 + $0x58] sm:$0xff] }
 0x538   :  { %v11143_v49 = vpop.eup %11142  ;;  %11152 = vrcp.f32 %v6863_v40  ;;  %v6864_v50 = vadd.f32 1.0, %v11141_v23  ;;  %v6978_v40 = vld [vmem:[%s18272_s3 + $0xd8] sm:$0xff] }
 0x539   :  { %v11145_v17 = vpop.eup %11144  ;;  %11154 = vrcp.f32 %v6865_v32  ;;  %v6866_v22 = vadd.f32 1.0, %v11143_v49  ;;  %7256 = vmatpush1.bf16.xpose.msra.mxu0 %v19318_v63  ;;  %v19326_v32 = vmov 0  ;;  %v19332_v63 = vld [vmem:[#allocation61_spill] sm:$0xff] }
 0x53a   :  { %v11147_v44 = vpop.eup %11146  ;;  %11156 = vrcp.f32 %v6864_v50  ;;  %v6879_v42 = vadd.f32 1.0, %v11145_v17  ;;  %7600 = vmatpush1.bf16.xpose.msra.mxu1 %v19319_v45  ;;  %7257 = vmatprep.subr.bf16.mxu0 %v19320_v33  ;;  %v19328_v50 = vld [vmem:[#allocation58_spill] sm:$0xff]  ;;  %v19329_v17 = vmov 0 }
 0x53b   :  { %v11149_v18 = vpop.eup %11148  ;;  %11158 = vrcp.f32 %v6866_v22  ;;  %v6881_v27 = vadd.f32 1.0, %v11147_v44  ;;  %7601 = vmatprep.subr.bf16.mxu1 %v19321_v39  ;;  %v19331_v22 = vld [vmem:[#allocation111_spill] sm:$0xff]  ;;  %v19338_v33 = vld [vmem:[#allocation62_spill] sm:$0xff]  ;;  %v19555_v44 = vld [vmem:[#allocation321_spill] sm:$0xff] }
 0x53c   :  { %v11151_v51 = vpop.eup %11150  ;;  %11160 = vrcp.f32 %v6879_v42  ;;  %v6880_v61 = vadd.f32 1.0, %v11149_v18  ;;  %v19335_v42 = vld [vmem:[#allocation113_spill] sm:$0xff]  ;;  %v19339_v18 = vld [vmem:[#allocation115_spill] sm:$0xff]  ;;  %v19341_v39 = vld [vmem:[#allocation66_spill] sm:$0xff] }
 0x53d   :  { %11162 = vrcp.f32 %v6881_v27  ;;  %v6882_v58 = vadd.f32 1.0, %v11151_v51  ;;  %v19340_v27 = vld [vmem:[#allocation13_spill] sm:$0xff]  ;;  %v19342_v51 = vld [vmem:[#allocation8_spill] sm:$0xff]  ;;  %v19620_v45 = vld [vmem:[#allocation322_spill] sm:$0xff] }
 0x53e   :  { %11164 = vrcp.f32 %v6880_v61  ;;  %v19343_v61 = vld [vmem:[#allocation65_spill] sm:$0xff] }
 0x53f   :  { %11166 = vrcp.f32 %v6882_v58  ;;  %v19344_v58 = vld [vmem:[#allocation16_spill] sm:$0xff] }
 0x541   :  { %7258 = vmatpush1.bf16.xpose.msra.mxu0 %v19322_v43  ;;  %v19345_v43 = vld [vmem:[#allocation67_spill] sm:$0xff] }
 0x542   :  { %v11153_v46 = vpop.eup %11152  ;;  %7602 = vmatpush1.bf16.xpose.msra.mxu1 %v19323_v52  ;;  %7259 = vmatprep.subr.bf16.mxu0 %v19324_v2  ;;  %v19348_v52 = vld [vmem:[#allocation18_spill] sm:$0xff]  ;;  %v19349_v2 = vld [vmem:[#allocation69_spill] sm:$0xff] }
 0x543   :  { %v11155_v10 = vpop.eup %11154  ;;  %7603 = vmatprep.subr.bf16.mxu1 %v19325_v13  ;;  %vm6991_vm6 = vcmp.gt.f32.partialorder %v11153_v46, %v6959_v21  ;;  %v19346_v46 = vld [vmem:[#allocation17_spill] sm:$0xff]  ;;  %v19351_v13 = vld [vmem:[#allocation70_spill] sm:$0xff] }
 0x544   :  { %v11157_v19 = vpop.eup %11156  ;;  %vm6993_vm13 = vcmp.gt.f32.partialorder %v11155_v10, %v6961_v54  ;;  %v19350_v10 = vld [vmem:[#allocation19_spill] sm:$0xff]  ;;  %v19354_v21 = vld [vmem:[#allocation21_spill] sm:$0xff] }
 0x545   :  { %v11159_v31 = vpop.eup %11158  ;;  %vm6992_vm15 = vcmp.gt.f32.partialorder %v11157_v19, %v6960_v35  ;;  %v19352_v19 = vld [vmem:[#allocation20_spill] sm:$0xff]  ;;  %v19357_v54 = vld [vmem:[#allocation73_spill] sm:$0xff] }
 0x546   :  { %v11161_v57 = vpop.eup %11160  ;;  %v19360_v35 = vld [vmem:[#allocation24_spill] sm:$0xff] }
 0x547   :  { %v11163_v62 = vpop.eup %11162  ;;  %vm7007_vm5 = vcmp.gt.f32.partialorder %v11161_v57, %v6975_v28  ;;  %v19355_v28 = vld [vmem:[#allocation72_spill] sm:$0xff]  ;;  %v19359_v57 = vld [vmem:[#allocation74_spill] sm:$0xff] }
 0x548   :  { %v11165_v23 = vpop.eup %11164  ;;  %vm16415_vm0 = vmpackc.low %vm7007_vm5, %vm6991_vm6  ;;  %vm7009_vm14 = vcmp.gt.f32.partialorder %v11163_v62, %v6977_v7  ;;  %vm6994_vm6 = vcmp.gt.f32.partialorder %v11159_v31, %v6962_v38  ;;  %v19356_v31 = vld [vmem:[#allocation22_spill] sm:$0xff]  ;;  %v19358_v7 = vld [vmem:[#allocation23_spill] sm:$0xff] }
 0x549   :  { %v19327_v32 = vsel %vm16415_vm0, 4294967295, %v19326_v32  ;;  %v11167_v49 = vpop.eup %11166  ;;  %7260 = vmatpush1.bf16.xpose.msra.mxu0 %v19328_v50  ;;  %vm7008_vm1 = vcmp.gt.f32.partialorder %v11165_v23, %v6976_v8  ;;  %vm16420_vm2 = vmpackc.low %vm7009_vm14, %vm6993_vm13  ;;  %v19361_v8 = vld [vmem:[#allocation75_spill] sm:$0xff]  ;;  %v19362_v62 = vld [vmem:[#allocation25_spill] sm:$0xff] }
 0x54a   :  { %v19330_v17 = vsel %vm16420_vm2, 4294967295, %v19329_v17  ;;  %7604 = vmatpush1.bf16.xpose.msra.mxu1 %v19331_v22  ;;  %7261 = vmatprep.subr.bf16.mxu0 %v19332_v63  ;;  %vm16426_vm8 = vmpackc.low %vm7008_vm1, %vm6992_vm15  ;;  %vm7010_vm5 = vcmp.gt.f32.partialorder %v11167_v49, %v6978_v40  ;;  %v19363_v38 = vld [vmem:[#allocation76_spill] sm:$0xff]  ;;  %v19364_v40 = vld [vmem:[#allocation26_spill] sm:$0xff] }
 0x54b   :  { %7605 = vmatprep.subr.bf16.mxu1 %v19335_v42  ;;  %vm16431_vm0 = vmpackc.low %vm7010_vm5, %vm6994_vm6  ;;  %v19365_v23 = vld [vmem:[#allocation78_spill] sm:$0xff]  ;;  %v19366_v49 = vld [vmem:[#allocation28_spill] sm:$0xff] }
 0x54c   :  { %v19367_v50 = vld [vmem:[#allocation80_spill] sm:$0xff]  ;;  %v19368_v22 = vld [vmem:[#allocation30_spill] sm:$0xff] }
 0x54d   :  { %v19369_v63 = vld [vmem:[#allocation82_spill] sm:$0xff]  ;;  %v19370_v42 = vld [vmem:[#allocation32_spill] sm:$0xff] }
 0x551   :  { %7262 = vmatpush1.bf16.xpose.msra.mxu0 %v19338_v33  ;;  %v19371_v33 = vld [vmem:[#allocation84_spill] sm:$0xff] }
 0x552   :  { %7606 = vmatpush1.bf16.xpose.msra.mxu1 %v19339_v18  ;;  %7274 = vmatprep.subr.bf16.mxu0 %v19340_v27  ;;  %v19372_v18 = vld [vmem:[#allocation36_spill] sm:$0xff]  ;;  %v19373_v27 = vld [vmem:[#allocation86_spill] sm:$0xff] }
 0x553   :  { %7618 = vmatprep.subr.bf16.mxu1 %v19341_v39  ;;  %v19374_v39 = vld [vmem:[#allocation35_spill] sm:$0xff] }
 0x558   :  { %10023 = vmatmul.mubr.msk.bf16.vlgmr.msra.gmra.mrb[24].mxu0 %vm15425_vm11, %v18850_v60 }
 0x559   :  { %10070 = vmatmul.mubr.msk.bf16.vlgmr.msra.gmra.mrb[28].mxu1 %vm15425_vm11, %v18850_v60  ;;  %7275 = vmatpush1.bf16.xpose.msra.mxu0 %v19342_v51  ;;  %v19375_v51 = vld [vmem:[#allocation88_spill] sm:$0xff] }
 0x55a   :  { %10025 = vmatprep.mubr.msk.bf16.mxu0 %vm15455_vm4, %v18850_v60  ;;  %7619 = vmatpush1.bf16.xpose.msra.mxu1 %v19343_v61  ;;  %v19376_v61 = vld [vmem:[#allocation40_spill] sm:$0xff] }
 0x55b   :  { %10072 = vmatprep.mubr.msk.bf16.mxu1 %vm15455_vm4, %v18850_v60  ;;  %7276 = vmatprep.subr.bf16.mxu0 %v19344_v58  ;;  %v19377_v58 = vld [vmem:[#allocation90_spill] sm:$0xff] }
 0x55c   :  { %7620 = vmatprep.subr.bf16.mxu1 %v19345_v43  ;;  %v19378_v43 = vld [vmem:[#allocation39_spill] sm:$0xff] }
 0x561   :  { %7277 = vmatpush1.bf16.xpose.msra.mxu0 %v19346_v46  ;;  %v19379_v46 = vld [vmem:[#allocation92_spill] sm:$0xff] }
 0x562   :  { %7621 = vmatpush1.bf16.xpose.msra.mxu1 %v19347_v16  ;;  %7278 = vmatprep.subr.bf16.mxu0 %v19348_v52  ;;  %v19380_v16 = vld [vmem:[#allocation44_spill] sm:$0xff]  ;;  %v3471_v52 = vrot.slane %v16361_v47, %v15984_v55 }
 0x563   :  { %7622 = vmatprep.subr.bf16.mxu1 %v19349_v2  ;;  %v19381_v2 = vld [vmem:[#allocation94_spill] sm:$0xff] }
 0x569   :  { %7279 = vmatpush1.bf16.xpose.msra.mxu0 %v19350_v10  ;;  %v3479_v10 = vrot.slane %v16361_v47, %v15996_v5 }
 0x56a   :  { %7623 = vmatpush1.bf16.xpose.msra.mxu1 %v19351_v13  ;;  %7280 = vmatprep.subr.bf16.mxu0 %v19352_v19  ;;  %v3475_v13 = vrot.slane %v16361_v47, %v15999_v36  ;;  %v19382_v19 = vld [vmem:[#allocation5_spill] sm:$0xff] }
 0x56b   :  { %7624 = vmatprep.subr.bf16.mxu1 %v19353_v48  ;;  %v19383_v48 = vsub.s32 7, %v19382_v19  ;;  %v19391_v19 = vld [vmem:[#allocation102_spill] sm:$0xff] }
 0x571   :  { %7281 = vmatpush1.bf16.xpose.msra.mxu0 %v19354_v21  ;;  %v3483_v21 = vrot.slane %v16361_v47, %v19383_v48 }
 0x572   :  { %7625 = vmatpush1.bf16.xpose.msra.mxu1 %v19355_v28  ;;  %7282 = vmatprep.subr.bf16.mxu0 %v19356_v31 }
 0x573   :  { %7626 = vmatprep.subr.bf16.mxu1 %v19357_v54 }
 0x579   :  { %7283 = vmatpush1.bf16.xpose.msra.mxu0 %v19358_v7 }
 0x57a   :  { %7627 = vmatpush1.bf16.xpose.msra.mxu1 %v19359_v57  ;;  %7284 = vmatprep.subr.bf16.mxu0 %v19360_v35 }
 0x57b   :  { %7628 = vmatprep.subr.bf16.mxu1 %v19361_v8 }
 0x581   :  { %7285 = vmatpush1.bf16.xpose.msra.mxu0 %v19362_v62 }
 0x582   :  { %7629 = vmatpush1.bf16.xpose.msra.mxu1 %v19363_v38  ;;  %7286 = vmatprep.subr.bf16.mxu0 %v19364_v40 }
 0x583   :  { %7630 = vmatprep.subr.bf16.mxu1 %v19365_v23 }
 0x589   :  { %7287 = vmatpush1.bf16.xpose.msra.mxu0 %v19366_v49 }
 0x58a   :  { %7631 = vmatpush1.bf16.xpose.msra.mxu1 %v19367_v50  ;;  %7288 = vmatprep.subr.bf16.mxu0 %v19368_v22  ;;  %v19384_v22 = vld [vmem:[#allocation43_spill] sm:$0xff] }
 0x58b   :  { %7632 = vmatprep.subr.bf16.mxu1 %v19369_v63 }
 0x591   :  { %7289 = vmatpush1.bf16.xpose.msra.mxu0 %v19370_v42 }
 0x592   :  { %7633 = vmatpush1.bf16.xpose.msra.mxu1 %v19371_v33  ;;  %7290 = vmatprep.subr.bf16.mxu0 %v19372_v18 }
 0x593   :  { %7634 = vmatprep.subr.bf16.mxu1 %v19373_v27  ;;  %v19385_v27 = vld [vmem:[#allocation96_spill] sm:$0xff] }
 0x599   :  { %7291 = vmatpush1.bf16.xpose.msra.mxu0 %v19374_v39  ;;  %v19386_v39 = vld [vmem:[#allocation48_spill] sm:$0xff] }
 0x59a   :  { %7635 = vmatpush1.bf16.xpose.msra.mxu1 %v19375_v51  ;;  %7292 = vmatprep.subr.bf16.mxu0 %v19376_v61 }
 0x59b   :  { %7636 = vmatprep.subr.bf16.mxu1 %v19377_v58 }
 0x5a1   :  { %7293 = vmatpush1.bf16.xpose.msra.mxu0 %v19378_v43  ;;  %v19387_v43 = vld [vmem:[#allocation98_spill] sm:$0xff] }
 0x5a2   :  { %7637 = vmatpush1.bf16.xpose.msra.mxu1 %v19379_v46  ;;  %7294 = vmatprep.subr.bf16.mxu0 %v19380_v16 }
 0x5a3   :  { %7638 = vmatprep.subr.bf16.mxu1 %v19381_v2  ;;  %v19388_v2 = vld [vmem:[#allocation47_spill] sm:$0xff] }
 0x5a6   :  { %v6664_v28 = vpop.f32.mrb[20].mxu0 }
 0x5a7   :  { %v10282_v31 = vadd.f32 %v6664_v28, %v3471_v52  ;;  %v6750_v54 = vpop.f32.mrb[24].mxu1  ;;  %v6666_v7 = vpop.f32.mrb[21].mxu0 }
 0x5a8   :  { %v10286_v57 = vadd.f32 %v6750_v54, %v3479_v10  ;;  %v10283_v35 = vadd.f32 %v6666_v7, %v3475_v13  ;;  %v6752_v8 = vpop.f32.mrb[25].mxu1  ;;  %v6668_v62 = vpop.f32.mrb[22].mxu0 }
 0x5a9   :  { %v9968_v38 = vmul.f32 -1.442695, %v10282_v31  ;;  %v10287_v40 = vadd.f32 %v6752_v8, %v3483_v21  ;;  %v10284_v23 = vadd.f32 %v6668_v62, %v3471_v52  ;;  %v6754_v49 = vpop.f32.mrb[26].mxu1  ;;  %v6670_v50 = vpop.f32.mrb[23].mxu0  ;;  %7295 = vmatpush1.bf16.xpose.msra.mxu0 %v19384_v22  ;;  %v19392_v62 = vld [vmem:[#allocation51_spill] sm:$0xff] }
 0x5aa   :  { %v9970_v63 = vmul.f32 -1.442695, %v10286_v57  ;;  %v9969_v42 = vmul.f32 -1.442695, %v10283_v35  ;;  %v10288_v33 = vadd.f32 %v6754_v49, %v3479_v10  ;;  %v10285_v18 = vadd.f32 %v6670_v50, %v3475_v13  ;;  %v6756_v47 = vpop.f32.mrb[27].mxu1  ;;  %7639 = vmatpush1.bf16.xpose.msra.mxu1 %v19385_v27  ;;  %7296 = vmatprep.subr.bf16.mxu0 %v19386_v39  ;;  %v19389_v10 = vld [vmem:[#allocation100_spill] sm:$0xff] }
 0x5ab   :  { %11168 = vpow2.f32 %v9968_v38  ;;  %v9971_v51 = vmul.f32 -1.442695, %v10287_v40  ;;  %v9984_v61 = vmul.f32 -1.442695, %v10284_v23  ;;  %v10289_v58 = vadd.f32 %v6756_v47, %v3483_v21  ;;  %7640 = vmatprep.subr.bf16.mxu1 %v19387_v43  ;;  %v19390_v13 = vld [vmem:[#allocation52_spill] sm:$0xff]  ;;  %v19396_v47 = vld [vmem:[#allocation55_spill] sm:$0xff] }
 0x5ac   :  { %11170 = vpow2.f32 %v9970_v63  ;;  %v9986_v46 = vmul.f32 -1.442695, %v10288_v33  ;;  %v9985_v16 = vmul.f32 -1.442695, %v10285_v18  ;;  %v19393_v23 = vld [vmem:[#allocation104_spill] sm:$0xff]  ;;  %v19395_v63 = vld [vmem:[#allocation106_spill] sm:$0xff] }
 0x5ad   :  { %11172 = vpow2.f32 %v9969_v42  ;;  %v9987_v52 = vmul.f32 -1.442695, %v10289_v58  ;;  %v19394_v49 = vld [vmem:[#allocation56_spill] sm:$0xff]  ;;  %v19399_v58 = vld [vmem:[#allocation110_spill] sm:$0xff] }
 0x5ae   :  { %11174 = vpow2.f32 %v9971_v51  ;;  %v19397_v39 = vld [vmem:[#allocation108_spill] sm:$0xff] }
 0x5af   :  { %11176 = vpow2.f32 %v9984_v61  ;;  %v19398_v51 = vld [vmem:[#allocation60_spill] sm:$0xff] }
 0x5b0   :  { %11178 = vpow2.f32 %v9986_v46  ;;  %v6963_v46 = vld [vmem:[%s18272_s3 + $0x60] sm:$0xff] }
 0x5b1   :  { %11180 = vpow2.f32 %v9985_v16  ;;  %7297 = vmatpush1.bf16.xpose.msra.mxu0 %v19388_v2  ;;  %v6979_v16 = vld [vmem:[%s18272_s3 + $0xe0] sm:$0xff]  ;;  %v6966_v2 = vld [vmem:[%s18272_s3 + $0x78] sm:$0xff] }
 0x5b2   :  { %11182 = vpow2.f32 %v9987_v52  ;;  %7641 = vmatpush1.bf16.xpose.msra.mxu1 %v19389_v10  ;;  %7298 = vmatprep.subr.bf16.mxu0 %v19390_v13  ;;  %v6965_v10 = vld [vmem:[%s18272_s3 + $0x70] sm:$0xff] }
 0x5b3   :  { %7642 = vmatprep.subr.bf16.mxu1 %v19391_v19  ;;  %v6981_v13 = vld [vmem:[%s18272_s3 + $0xf0] sm:$0xff] }
 0x5b5   :  { %v11169_v48 = vpop.eup %11168 }
 0x5b6   :  { %v11171_v21 = vpop.eup %11170  ;;  %v6867_v28 = vadd.f32 1.0, %v11169_v48  ;;  %v6964_v48 = vld [vmem:[%s18272_s3 + $0x68] sm:$0xff] }
 0x5b7   :  { %v11173_v31 = vpop.eup %11172  ;;  %v6869_v54 = vadd.f32 1.0, %v11171_v21  ;;  %v6980_v21 = vld [vmem:[%s18272_s3 + $0xe8] sm:$0xff] }
 0x5b8   :  { %v11175_v7 = vpop.eup %11174  ;;  %11184 = vrcp.f32 %v6867_v28  ;;  %v6868_v57 = vadd.f32 1.0, %v11173_v31  ;;  %v6982_v31 = vld [vmem:[%s18272_s3 + $0xf8] sm:$0xff] }
 0x5b9   :  { %v11177_v35 = vpop.eup %11176  ;;  %11186 = vrcp.f32 %v6869_v54  ;;  %v6870_v8 = vadd.f32 1.0, %v11175_v7  ;;  %7299 = vmatpush1.bf16.xpose.msra.mxu0 %v19392_v62  ;;  %v19405_v62 = vld [vmem:[#allocation112_spill] sm:$0xff]  ;;  %v19734_v7 = vld [vmem:[#allocation445_spill] sm:$0xff] }
 0x5ba   :  { %v11179_v38 = vpop.eup %11178  ;;  %11188 = vrcp.f32 %v6868_v57  ;;  %v6883_v40 = vadd.f32 1.0, %v11177_v35  ;;  %7643 = vmatpush1.bf16.xpose.msra.mxu1 %v19393_v23  ;;  %7300 = vmatprep.subr.bf16.mxu0 %v19394_v49  ;;  %v19402_v35 = vld [vmem:[#allocation59_spill] sm:$0xff]  ;;  %v19409_v23 = vld [vmem:[#allocation114_spill] sm:$0xff]  ;;  %v19410_v49 = vmov 0.0  }
 0x5bb   :  { %v11181_v50 = vpop.eup %11180  ;;  %11190 = vrcp.f32 %v6870_v8  ;;  %v6885_v22 = vadd.f32 1.0, %v11179_v38  ;;  %7644 = vmatprep.subr.bf16.mxu1 %v19395_v63  ;;  %v19406_v38 = vld [vmem:[#allocation64_spill] sm:$0xff]  ;;  %v11325_v8 = vld [vmem:[%s18276_s7 + $0x224] ss:$16 sps:$4 sm:$0xff]  }
 0x5bc   :  { %v11183_v42 = vpop.eup %11182  ;;  %11192 = vrcp.f32 %v6883_v40  ;;  %v6884_v33 = vadd.f32 1.0, %v11181_v50  ;;  %v19685_v40 = vld [vmem:[#allocation450_spill] sm:$0xff] }
 0x5bd   :  { %11194 = vrcp.f32 %v6885_v22  ;;  %v6886_v18 = vadd.f32 1.0, %v11183_v42  ;;  %v19411_v42 = vld [vmem:[#allocation63_spill] sm:$0xff] }
 0x5be   :  { %11196 = vrcp.f32 %v6884_v33  ;;  %v19412_v33 = vld [vmem:[#allocation116_spill] sm:$0xff] }
 0x5bf   :  { %11198 = vrcp.f32 %v6886_v18  ;;  %v19413_v18 = vld [vmem:[#allocation117_spill] sm:$0xff] }
 0x5c1   :  { %7301 = vmatpush1.bf16.xpose.msra.mxu0 %v19396_v47  ;;  %v19414_v47 = vld [vmem:[#allocation181_spill] sm:$0xff] }
 0x5c2   :  { %v11185_v27 = vpop.eup %11184  ;;  %7645 = vmatpush1.bf16.xpose.msra.mxu1 %v19397_v39  ;;  %7302 = vmatprep.subr.bf16.mxu0 %v19398_v51  ;;  %v19416_v39 = vld [vmem:[#allocation119_spill] sm:$0xff] }
 0x5c3   :  { %v11187_v61 = vpop.eup %11186  ;;  %7646 = vmatprep.subr.bf16.mxu1 %v19399_v58  ;;  %vm6995_vm11 = vcmp.gt.f32.partialorder %v11185_v27, %v6963_v46  ;;  %v19417_v51 = vld [vmem:[#allocation183_spill] sm:$0xff]  ;;  %v19419_v58 = vld [vmem:[#allocation185_spill] sm:$0xff] }
 0x5c4   :  { %v11189_v43 = vpop.eup %11188  ;;  %vm6997_vm15 = vcmp.gt.f32.partialorder %v11187_v61, %v6965_v10  ;;  %v19418_v61 = vld [vmem:[#allocation121_spill] sm:$0xff]  ;;  %v19421_v46 = vld [vmem:[#allocation187_spill] sm:$0xff] }
 0x5c5   :  { %v11191_v52 = vpop.eup %11190  ;;  %vm6996_vm6 = vcmp.gt.f32.partialorder %v11189_v43, %v6964_v48  ;;  %v19420_v43 = vld [vmem:[#allocation123_spill] sm:$0xff]  ;;  %v19446_v27 = vld [vmem:[#allocation149_spill] sm:$0xff] }
 0x5c6   :  { %v11193_v19 = vpop.eup %11192  ;;  %vm6998_vm14 = vcmp.gt.f32.partialorder %v11191_v52, %v6966_v2  ;;  %v19423_v52 = vld [vmem:[#allocation189_spill] sm:$0xff]  ;;  %v19424_v2 = vld [vmem:[#allocation127_spill] sm:$0xff] }
 0x5c7   :  { %v11195_v28 = vpop.eup %11194  ;;  %vm7011_vm4 = vcmp.gt.f32.partialorder %v11193_v19, %v6979_v16  ;;  %v10003_v50 = vsel %vm6998_vm14, 1.0, %v19410_v49  ;;  %v19422_v16 = vld [vmem:[#allocation125_spill] sm:$0xff]  ;;  %v19425_v10 = vld [vmem:[#allocation191_spill] sm:$0xff] }
 0x5c8   :  { %v11197_v54 = vpop.eup %11196  ;;  %vm16540_vm13 = vmpackc.low %vm7011_vm4, %vm6995_vm11  ;;  %vm7013_vm1 = vcmp.gt.f32.partialorder %v11195_v28, %v6981_v13  ;;  %v19426_v13 = vld [vmem:[#allocation129_spill] sm:$0xff]  ;;  %v19428_v19 = vld [vmem:[#allocation131_spill] sm:$0xff] }
 0x5c9   :  { %v11199_v57 = vpop.eup %11198  ;;  %7303 = vmatpush1.bf16.xpose.msra.mxu0 %v19402_v35  ;;  %vm7012_vm5 = vcmp.gt.f32.partialorder %v11197_v54, %v6980_v21  ;;  %vm16545_vm2 = vmpackc.low %vm7013_vm1, %vm6997_vm15  ;;  %v19429_v48 = vld [vmem:[#allocation195_spill] sm:$0xff]  ;;  %v19430_v21 = vld [vmem:[#allocation133_spill] sm:$0xff] }
 0x5ca   :  { %7647 = vmatpush1.bf16.xpose.msra.mxu1 %v19405_v62  ;;  %7304 = vmatprep.subr.bf16.mxu0 %v19406_v38  ;;  %vm16551_vm11 = vmpackc.low %vm7012_vm5, %vm6996_vm6  ;;  %vm7014_vm4 = vcmp.gt.f32.partialorder %v11199_v57, %v6982_v31  ;;  %v19431_v28 = vld [vmem:[#allocation197_spill] sm:$0xff]  ;;  %v19432_v31 = vld [vmem:[#allocation135_spill] sm:$0xff] }
 0x5cb   :  { %7648 = vmatprep.subr.bf16.mxu1 %v19409_v23  ;;  %v10019_v22 = vsel %vm7014_vm4, 1.0, %v19410_v49  ;;  %v19433_v54 = vld [vmem:[#allocation199_spill] sm:$0xff]  ;;  %v19434_v57 = vld [vmem:[#allocation137_spill] sm:$0xff] }
 0x5cc   :  { %v16558_v63 = vpack.c.bf16 %v10019_v22, %v10003_v50  ;;  %v19435_v35 = vld [vmem:[#allocation201_spill] sm:$0xff]  ;;  %v19436_v62 = vld [vmem:[#allocation139_spill] sm:$0xff] }
 0x5cd   :  { %v19437_v38 = vld [vmem:[#allocation203_spill] sm:$0xff]  ;;  %v19438_v23 = vld [vmem:[#allocation141_spill] sm:$0xff] }
 0x5ce   :  { %v19439_v49 = vld [vmem:[#allocation205_spill] sm:$0xff]  ;;  %v19440_v50 = vld [vmem:[#allocation143_spill] sm:$0xff] }
 0x5cf   :  { %v19441_v22 = vld [vmem:[#allocation207_spill] sm:$0xff] }
 0x5d1   :  { %7305 = vmatpush1.bf16.xpose.msra.mxu0 %v19411_v42  ;;  %v19442_v42 = vld [vmem:[#allocation145_spill] sm:$0xff] }
 0x5d2   :  { %7649 = vmatpush1.bf16.xpose.msra.mxu1 %v19412_v33  ;;  %7317 = vmatprep.subr.bf16.mxu0 %v19413_v18  ;;  %v19443_v33 = vld [vmem:[#allocation209_spill] sm:$0xff]  ;;  %v19444_v18 = vld [vmem:[#allocation147_spill] sm:$0xff] }
 0x5d3   :  { %7661 = vmatprep.subr.bf16.mxu1 %v19414_v47  ;;  %v19445_v47 = vld [vmem:[#allocation211_spill] sm:$0xff] }
 0x5d8   :  { %10027 = vmatmul.mubr.msk.bf16.vlgmr.msra.gmra.mrb[24].mxu0 %vm15460_vm9, %v18850_v60 }
 0x5d9   :  { %10074 = vmatmul.mubr.msk.bf16.vlgmr.msra.gmra.mrb[28].mxu1 %vm15460_vm9, %v18850_v60  ;;  %7318 = vmatpush1.bf16.xpose.msra.mxu0 %v19416_v39  ;;  %v19447_v39 = vld [vmem:[#allocation213_spill] sm:$0xff]  ;;  %vm19673_vm9 = vnez %v19330_v17  ;;  %v19679_v17 = vld [vmem:[#allocation444_spill] sm:$0xff] }
 0x5da   :  { %10029 = vmatprep.mubr.msk.bf16.mxu0 %vm16290_vm7, %v18850_v60  ;;  %7662 = vmatpush1.bf16.xpose.msra.mxu1 %v19417_v51  ;;  %v19448_v51 = vld [vmem:[#allocation151_spill] sm:$0xff] }
 0x5db   :  { %10076 = vmatprep.mubr.msk.bf16.mxu1 %vm16290_vm7, %v18850_v60  ;;  %7319 = vmatprep.subr.bf16.mxu0 %v19418_v61  ;;  %v19449_v61 = vld [vmem:[#allocation215_spill] sm:$0xff] }
 0x5dc   :  { %7663 = vmatprep.subr.bf16.mxu1 %v19419_v58  ;;  %v19450_v58 = vld [vmem:[#allocation153_spill] sm:$0xff] }
 0x5e1   :  { %7320 = vmatpush1.bf16.xpose.msra.mxu0 %v19420_v43  ;;  %v19451_v43 = vld [vmem:[#allocation217_spill] sm:$0xff] }
 0x5e2   :  { %7664 = vmatpush1.bf16.xpose.msra.mxu1 %v19421_v46  ;;  %7321 = vmatprep.subr.bf16.mxu0 %v19422_v16  ;;  %v19452_v46 = vld [vmem:[#allocation155_spill] sm:$0xff] }
 0x5e3   :  { %7665 = vmatprep.subr.bf16.mxu1 %v19423_v52  ;;  %v19453_v16 = vld [vmem:[#allocation219_spill] sm:$0xff]  ;;  %v19454_v52 = vld [vmem:[#allocation157_spill] sm:$0xff] }
 0x5e9   :  { %7322 = vmatpush1.bf16.xpose.msra.mxu0 %v19424_v2  ;;  %v19455_v2 = vld [vmem:[#allocation221_spill] sm:$0xff] }
 0x5ea   :  { %7666 = vmatpush1.bf16.xpose.msra.mxu1 %v19425_v10  ;;  %7323 = vmatprep.subr.bf16.mxu0 %v19426_v13  ;;  %v19456_v10 = vld [vmem:[#allocation159_spill] sm:$0xff] }
 0x5eb   :  { %7667 = vmatprep.subr.bf16.mxu1 %v19427_v0  ;;  %v19457_v13 = vld [vmem:[#allocation223_spill] sm:$0xff]  ;;  %v19458_v0 = vld [vmem:[#allocation161_spill] sm:$0xff] }
 0x5f1   :  { %7324 = vmatpush1.bf16.xpose.msra.mxu0 %v19428_v19  ;;  %v19459_v19 = vld [vmem:[#allocation225_spill] sm:$0xff] }
 0x5f2   :  { %7668 = vmatpush1.bf16.xpose.msra.mxu1 %v19429_v48  ;;  %7325 = vmatprep.subr.bf16.mxu0 %v19430_v21  ;;  %v19460_v48 = vld [vmem:[#allocation163_spill] sm:$0xff] }
 0x5f3   :  { %7669 = vmatprep.subr.bf16.mxu1 %v19431_v28  ;;  %v19461_v21 = vld [vmem:[#allocation227_spill] sm:$0xff]  ;;  %v19462_v28 = vld [vmem:[#allocation165_spill] sm:$0xff] }
 0x5f9   :  { %7326 = vmatpush1.bf16.xpose.msra.mxu0 %v19432_v31  ;;  %v19463_v31 = vld [vmem:[#allocation229_spill] sm:$0xff] }
 0x5fa   :  { %7670 = vmatpush1.bf16.xpose.msra.mxu1 %v19433_v54  ;;  %7327 = vmatprep.subr.bf16.mxu0 %v19434_v57  ;;  %v19464_v54 = vld [vmem:[#allocation167_spill] sm:$0xff] }
 0x5fb   :  { %7671 = vmatprep.subr.bf16.mxu1 %v19435_v35  ;;  %v19465_v57 = vld [vmem:[#allocation231_spill] sm:$0xff]  ;;  %v19466_v35 = vld [vmem:[#allocation169_spill] sm:$0xff] }
 0x601   :  { %7328 = vmatpush1.bf16.xpose.msra.mxu0 %v19436_v62  ;;  %v19467_v62 = vld [vmem:[#allocation233_spill] sm:$0xff] }
 0x602   :  { %7672 = vmatpush1.bf16.xpose.msra.mxu1 %v19437_v38  ;;  %7329 = vmatprep.subr.bf16.mxu0 %v19438_v23  ;;  %v19468_v38 = vld [vmem:[#allocation171_spill] sm:$0xff] }
 0x603   :  { %7673 = vmatprep.subr.bf16.mxu1 %v19439_v49  ;;  %v19469_v23 = vld [vmem:[#allocation235_spill] sm:$0xff]  ;;  %v19470_v49 = vld [vmem:[#allocation173_spill] sm:$0xff] }
 0x609   :  { %7330 = vmatpush1.bf16.xpose.msra.mxu0 %v19440_v50  ;;  %v19471_v50 = vld [vmem:[#allocation237_spill] sm:$0xff] }
 0x60a   :  { %7674 = vmatpush1.bf16.xpose.msra.mxu1 %v19441_v22  ;;  %7331 = vmatprep.subr.bf16.mxu0 %v19442_v42  ;;  %v19472_v22 = vld [vmem:[#allocation175_spill] sm:$0xff] }
 0x60b   :  { %7675 = vmatprep.subr.bf16.mxu1 %v19443_v33  ;;  %v19473_v42 = vld [vmem:[#allocation239_spill] sm:$0xff]  ;;  %v19474_v33 = vld [vmem:[#allocation177_spill] sm:$0xff] }
 0x611   :  { %7332 = vmatpush1.bf16.xpose.msra.mxu0 %v19444_v18  ;;  %v19475_v18 = vld [vmem:[#allocation241_spill] sm:$0xff] }
 0x612   :  { %7676 = vmatpush1.bf16.xpose.msra.mxu1 %v19445_v47  ;;  %7333 = vmatprep.subr.bf16.mxu0 %v19446_v27  ;;  %v19476_v47 = vld [vmem:[#allocation179_spill] sm:$0xff]  ;;  %v19477_v27 = vld [vmem:[#allocation242_spill] sm:$0xff] }
 0x613   :  { %7677 = vmatprep.subr.bf16.mxu1 %v19447_v39  ;;  %v19478_v39 = vld [vmem:[#allocation118_spill] sm:$0xff] }
 0x619   :  { %7334 = vmatpush1.bf16.xpose.msra.mxu0 %v19448_v51  ;;  %v19479_v51 = vld [vmem:[#allocation182_spill] sm:$0xff] }
 0x61a   :  { %7678 = vmatpush1.bf16.xpose.msra.mxu1 %v19449_v61  ;;  %7335 = vmatprep.subr.bf16.mxu0 %v19450_v58  ;;  %v19480_v61 = vld [vmem:[#allocation120_spill] sm:$0xff] }
 0x61b   :  { %7679 = vmatprep.subr.bf16.mxu1 %v19451_v43  ;;  %v19481_v58 = vld [vmem:[#allocation184_spill] sm:$0xff]  ;;  %v19482_v43 = vld [vmem:[#allocation122_spill] sm:$0xff] }
 0x621   :  { %7336 = vmatpush1.bf16.xpose.msra.mxu0 %v19452_v46  ;;  %v19483_v46 = vld [vmem:[#allocation186_spill] sm:$0xff] }
 0x622   :  { %7680 = vmatpush1.bf16.xpose.msra.mxu1 %v19453_v16  ;;  %7337 = vmatprep.subr.bf16.mxu0 %v19454_v52  ;;  %v19484_v16 = vld [vmem:[#allocation124_spill] sm:$0xff]  ;;  %v19486_v52 = vld [vmem:[#allocation126_spill] sm:$0xff] }
 0x623   :  { %7681 = vmatprep.subr.bf16.mxu1 %v19455_v2  ;;  %v19487_v2 = vld [vmem:[#allocation190_spill] sm:$0xff] }
 0x629   :  { %7338 = vmatpush1.bf16.xpose.msra.mxu0 %v19456_v10  ;;  %v19488_v10 = vld [vmem:[#allocation128_spill] sm:$0xff] }
 0x62a   :  { %7682 = vmatpush1.bf16.xpose.msra.mxu1 %v19457_v13  ;;  %7339 = vmatprep.subr.bf16.mxu0 %v19458_v0  ;;  %v19489_v13 = vld [vmem:[#allocation192_spill] sm:$0xff]  ;;  %v19490_v0 = vld [vmem:[#allocation130_spill] sm:$0xff] }
 0x62b   :  { %7683 = vmatprep.subr.bf16.mxu1 %v19459_v19  ;;  %v19492_v19 = vld [vmem:[#allocation132_spill] sm:$0xff] }
 0x631   :  { %7340 = vmatpush1.bf16.xpose.msra.mxu0 %v19460_v48  ;;  %v19493_v48 = vld [vmem:[#allocation196_spill] sm:$0xff] }
 0x632   :  { %7684 = vmatpush1.bf16.xpose.msra.mxu1 %v19461_v21  ;;  %7341 = vmatprep.subr.bf16.mxu0 %v19462_v28  ;;  %v19494_v21 = vld [vmem:[#allocation134_spill] sm:$0xff] }
 0x633   :  { %7685 = vmatprep.subr.bf16.mxu1 %v19463_v31  ;;  %v19495_v28 = vld [vmem:[#allocation198_spill] sm:$0xff]  ;;  %v19496_v31 = vld [vmem:[#allocation136_spill] sm:$0xff] }
 0x639   :  { %7342 = vmatpush1.bf16.xpose.msra.mxu0 %v19464_v54  ;;  %v19497_v54 = vld [vmem:[#allocation200_spill] sm:$0xff] }
 0x63a   :  { %7686 = vmatpush1.bf16.xpose.msra.mxu1 %v19465_v57  ;;  %7343 = vmatprep.subr.bf16.mxu0 %v19466_v35  ;;  %v19498_v57 = vld [vmem:[#allocation138_spill] sm:$0xff] }
 0x63b   :  { %7687 = vmatprep.subr.bf16.mxu1 %v19467_v62  ;;  %v19499_v35 = vld [vmem:[#allocation202_spill] sm:$0xff]  ;;  %v19500_v62 = vld [vmem:[#allocation140_spill] sm:$0xff] }
 0x641   :  { %7344 = vmatpush1.bf16.xpose.msra.mxu0 %v19468_v38  ;;  %v19501_v38 = vld [vmem:[#allocation204_spill] sm:$0xff] }
 0x642   :  { %7688 = vmatpush1.bf16.xpose.msra.mxu1 %v19469_v23  ;;  %7345 = vmatprep.subr.bf16.mxu0 %v19470_v49  ;;  %v19502_v23 = vld [vmem:[#allocation142_spill] sm:$0xff] }
 0x643   :  { %7689 = vmatprep.subr.bf16.mxu1 %v19471_v50  ;;  %v19503_v49 = vld [vmem:[#allocation206_spill] sm:$0xff]  ;;  %v19504_v50 = vld [vmem:[#allocation144_spill] sm:$0xff] }
 0x649   :  { %7346 = vmatpush1.bf16.xpose.msra.mxu0 %v19472_v22  ;;  %v19505_v22 = vld [vmem:[#allocation208_spill] sm:$0xff] }
 0x64a   :  { %7690 = vmatpush1.bf16.xpose.msra.mxu1 %v19473_v42  ;;  %7347 = vmatprep.subr.bf16.mxu0 %v19474_v33  ;;  %v19506_v42 = vld [vmem:[#allocation146_spill] sm:$0xff] }
 0x64b   :  { %7691 = vmatprep.subr.bf16.mxu1 %v19475_v18  ;;  %v19507_v33 = vld [vmem:[#allocation210_spill] sm:$0xff]  ;;  %v19508_v18 = vld [vmem:[#allocation148_spill] sm:$0xff] }
 0x651   :  { %7348 = vmatpush1.bf16.xpose.msra.mxu0 %v19476_v47  ;;  %v19509_v47 = vld [vmem:[#allocation212_spill] sm:$0xff] }
 0x652   :  { %7692 = vmatpush1.bf16.xpose.msra.mxu1 %v19477_v27  ;;  %7360 = vmatprep.subr.bf16.mxu0 %v19478_v39  ;;  %v19510_v27 = vld [vmem:[#allocation150_spill] sm:$0xff] }
 0x653   :  { %7704 = vmatprep.subr.bf16.mxu1 %v19479_v51  ;;  %v19511_v39 = vld [vmem:[#allocation214_spill] sm:$0xff]  ;;  %v19512_v51 = vld [vmem:[#allocation152_spill] sm:$0xff] }
 0x658   :  { %10031 = vmatmul.mubr.msk.bf16.vlgmr.msra.gmra.mrb[24].mxu0 %vm16273_vm10, %v18850_v60 }
 0x659   :  { %10078 = vmatmul.mubr.msk.bf16.vlgmr.msra.gmra.mrb[28].mxu1 %vm16273_vm10, %v18850_v60  ;;  %7361 = vmatpush1.bf16.xpose.msra.mxu0 %v19480_v61  ;;  %v19513_v61 = vld [vmem:[#allocation216_spill] sm:$0xff]  ;;  %vm7132_vm10 = vcmask 654336  }
 0x65a   :  { %10033 = vmatprep.mubr.msk.bf16.mxu0 %vm16294_vm12, %v18850_v60  ;;  %7705 = vmatpush1.bf16.xpose.msra.mxu1 %v19481_v58  ;;  %v19514_v58 = vld [vmem:[#allocation154_spill] sm:$0xff] }
 0x65b   :  { %10080 = vmatprep.mubr.msk.bf16.mxu1 %vm16294_vm12, %v18850_v60  ;;  %7362 = vmatprep.subr.bf16.mxu0 %v19482_v43  ;;  %v19515_v43 = vld [vmem:[#allocation218_spill] sm:$0xff]  ;;  %vm19608_vm12 = vnez %v19327_v32  ;;  %v19614_v32 = vld [vmem:[#allocation316_spill] sm:$0xff] }
 0x65c   :  { %7706 = vmatprep.subr.bf16.mxu1 %v19483_v46  ;;  %v19516_v46 = vld [vmem:[#allocation156_spill] sm:$0xff] }
 0x661   :  { %7363 = vmatpush1.bf16.xpose.msra.mxu0 %v19484_v16  ;;  %v19517_v16 = vld [vmem:[#allocation220_spill] sm:$0xff] }
 0x662   :  { %7707 = vmatpush1.bf16.xpose.msra.mxu1 %v19485_v53  ;;  %7364 = vmatprep.subr.bf16.mxu0 %v19486_v52  ;;  %v19518_v53 = vld [vmem:[#allocation158_spill] sm:$0xff] }
 0x663   :  { %7708 = vmatprep.subr.bf16.mxu1 %v19487_v2  ;;  %v19519_v52 = vld [vmem:[#allocation222_spill] sm:$0xff]  ;;  %v19520_v2 = vld [vmem:[#allocation160_spill] sm:$0xff] }
 0x669   :  { %7365 = vmatpush1.bf16.xpose.msra.mxu0 %v19488_v10  ;;  %v19521_v10 = vld [vmem:[#allocation224_spill] sm:$0xff] }
 0x66a   :  { %7709 = vmatpush1.bf16.xpose.msra.mxu1 %v19489_v13  ;;  %7366 = vmatprep.subr.bf16.mxu0 %v19490_v0  ;;  %v19522_v13 = vld [vmem:[#allocation162_spill] sm:$0xff] }
 0x66b   :  { %7710 = vmatprep.subr.bf16.mxu1 %v19491_v56  ;;  %v19523_v0 = vld [vmem:[#allocation226_spill] sm:$0xff]  ;;  %v19524_v56 = vld [vmem:[#allocation164_spill] sm:$0xff] }
 0x671   :  { %7367 = vmatpush1.bf16.xpose.msra.mxu0 %v19492_v19  ;;  %v19525_v19 = vld [vmem:[#allocation228_spill] sm:$0xff] }
 0x672   :  { %7711 = vmatpush1.bf16.xpose.msra.mxu1 %v19493_v48  ;;  %7368 = vmatprep.subr.bf16.mxu0 %v19494_v21  ;;  %v19526_v48 = vld [vmem:[#allocation166_spill] sm:$0xff] }
 0x673   :  { %7712 = vmatprep.subr.bf16.mxu1 %v19495_v28  ;;  %v19527_v21 = vld [vmem:[#allocation230_spill] sm:$0xff]  ;;  %v19528_v28 = vld [vmem:[#allocation168_spill] sm:$0xff] }
 0x679   :  { %7369 = vmatpush1.bf16.xpose.msra.mxu0 %v19496_v31  ;;  %v19529_v31 = vld [vmem:[#allocation232_spill] sm:$0xff] }
 0x67a   :  { %7713 = vmatpush1.bf16.xpose.msra.mxu1 %v19497_v54  ;;  %7370 = vmatprep.subr.bf16.mxu0 %v19498_v57  ;;  %v19530_v54 = vld [vmem:[#allocation170_spill] sm:$0xff] }
 0x67b   :  { %7714 = vmatprep.subr.bf16.mxu1 %v19499_v35  ;;  %v19531_v57 = vld [vmem:[#allocation234_spill] sm:$0xff]  ;;  %v19532_v35 = vld [vmem:[#allocation172_spill] sm:$0xff] }
 0x681   :  { %7371 = vmatpush1.bf16.xpose.msra.mxu0 %v19500_v62  ;;  %v19533_v62 = vld [vmem:[#allocation236_spill] sm:$0xff] }
 0x682   :  { %7715 = vmatpush1.bf16.xpose.msra.mxu1 %v19501_v38  ;;  %7372 = vmatprep.subr.bf16.mxu0 %v19502_v23  ;;  %v19534_v38 = vld [vmem:[#allocation174_spill] sm:$0xff] }
 0x683   :  { %7716 = vmatprep.subr.bf16.mxu1 %v19503_v49  ;;  %v19535_v23 = vld [vmem:[#allocation238_spill] sm:$0xff]  ;;  %v19536_v49 = vld [vmem:[#allocation176_spill] sm:$0xff] }
 0x689   :  { %7373 = vmatpush1.bf16.xpose.msra.mxu0 %v19504_v50  ;;  %v19537_v50 = vld [vmem:[#allocation240_spill] sm:$0xff] }
 0x68a   :  { %7717 = vmatpush1.bf16.xpose.msra.mxu1 %v19505_v22  ;;  %7374 = vmatprep.subr.bf16.mxu0 %v19506_v42  ;;  %v19538_v22 = vld [vmem:[#allocation178_spill] sm:$0xff]  ;;  %v19539_v42 = vld [vmem:[#allocation243_spill] sm:$0xff] }
 0x68b   :  { %7718 = vmatprep.subr.bf16.mxu1 %v19507_v33  ;;  %v19540_v33 = vld [vmem:[#allocation180_spill] sm:$0xff] }
 0x691   :  { %7375 = vmatpush1.bf16.xpose.msra.mxu0 %v19508_v18  ;;  %v19541_v18 = vld [vmem:[#allocation244_spill] sm:$0xff] }
 0x692   :  { %7719 = vmatpush1.bf16.xpose.msra.mxu1 %v19509_v47  ;;  %7376 = vmatprep.subr.bf16.mxu0 %v19510_v27  ;;  %v19542_v47 = vld [vmem:[#allocation245_spill] sm:$0xff] }
 0x693   :  { %7720 = vmatprep.subr.bf16.mxu1 %v19511_v39  ;;  %v19543_v27 = vld [vmem:[#allocation309_spill] sm:$0xff]  ;;  %v19544_v39 = vld [vmem:[#allocation247_spill] sm:$0xff] }
 0x699   :  { %7377 = vmatpush1.bf16.xpose.msra.mxu0 %v19512_v51  ;;  %v19545_v51 = vld [vmem:[#allocation311_spill] sm:$0xff] }
 0x69a   :  { %7721 = vmatpush1.bf16.xpose.msra.mxu1 %v19513_v61  ;;  %7378 = vmatprep.subr.bf16.mxu0 %v19514_v58  ;;  %v19546_v61 = vld [vmem:[#allocation249_spill] sm:$0xff] }
 0x69b   :  { %7722 = vmatprep.subr.bf16.mxu1 %v19515_v43  ;;  %v19547_v58 = vld [vmem:[#allocation313_spill] sm:$0xff]  ;;  %v19548_v43 = vld [vmem:[#allocation251_spill] sm:$0xff] }
 0x6a1   :  { %7379 = vmatpush1.bf16.xpose.msra.mxu0 %v19516_v46  ;;  %v19550_v46 = vld [vmem:[#allocation253_spill] sm:$0xff] }
 0x6a2   :  { %7723 = vmatpush1.bf16.xpose.msra.mxu1 %v19517_v16  ;;  %7380 = vmatprep.subr.bf16.mxu0 %v19518_v53  ;;  %v19551_v16 = vld [vmem:[#allocation317_spill] sm:$0xff]  ;;  %v19552_v53 = vld [vmem:[#allocation255_spill] sm:$0xff] }
 0x6a3   :  { %7724 = vmatprep.subr.bf16.mxu1 %v19519_v52  ;;  %v19553_v52 = vld [vmem:[#allocation319_spill] sm:$0xff] }
 0x6a9   :  { %7381 = vmatpush1.bf16.xpose.msra.mxu0 %v19520_v2  ;;  %v19554_v2 = vld [vmem:[#allocation257_spill] sm:$0xff] }
 0x6aa   :  { %7725 = vmatpush1.bf16.xpose.msra.mxu1 %v19521_v10  ;;  %7382 = vmatprep.subr.bf16.mxu0 %v19522_v13  ;;  %v19556_v10 = vld [vmem:[#allocation259_spill] sm:$0xff] }
 0x6ab   :  { %7726 = vmatprep.subr.bf16.mxu1 %v19523_v0  ;;  %v19557_v13 = vld [vmem:[#allocation323_spill] sm:$0xff]  ;;  %v19558_v0 = vld [vmem:[#allocation261_spill] sm:$0xff] }
 0x6b1   :  { %7383 = vmatpush1.bf16.xpose.msra.mxu0 %v19524_v56  ;;  %v19559_v56 = vld [vmem:[#allocation325_spill] sm:$0xff] }
 0x6b2   :  { %7727 = vmatpush1.bf16.xpose.msra.mxu1 %v19525_v19  ;;  %7384 = vmatprep.subr.bf16.mxu0 %v19526_v48  ;;  %v19560_v19 = vld [vmem:[#allocation263_spill] sm:$0xff] }
 0x6b3   :  { %7728 = vmatprep.subr.bf16.mxu1 %v19527_v21  ;;  %v19561_v48 = vld [vmem:[#allocation327_spill] sm:$0xff]  ;;  %v19562_v21 = vld [vmem:[#allocation265_spill] sm:$0xff] }
 0x6b9   :  { %7385 = vmatpush1.bf16.xpose.msra.mxu0 %v19528_v28  ;;  %v19563_v28 = vld [vmem:[#allocation329_spill] sm:$0xff] }
 0x6ba   :  { %7729 = vmatpush1.bf16.xpose.msra.mxu1 %v19529_v31  ;;  %7386 = vmatprep.subr.bf16.mxu0 %v19530_v54  ;;  %v19564_v31 = vld [vmem:[#allocation267_spill] sm:$0xff] }
 0x6bb   :  { %7730 = vmatprep.subr.bf16.mxu1 %v19531_v57  ;;  %v19565_v54 = vld [vmem:[#allocation331_spill] sm:$0xff]  ;;  %v19566_v57 = vld [vmem:[#allocation269_spill] sm:$0xff] }
 0x6c1   :  { %7387 = vmatpush1.bf16.xpose.msra.mxu0 %v19532_v35  ;;  %v19567_v35 = vld [vmem:[#allocation333_spill] sm:$0xff] }
 0x6c2   :  { %7731 = vmatpush1.bf16.xpose.msra.mxu1 %v19533_v62  ;;  %7388 = vmatprep.subr.bf16.mxu0 %v19534_v38  ;;  %v19568_v62 = vld [vmem:[#allocation271_spill] sm:$0xff] }
 0x6c3   :  { %7732 = vmatprep.subr.bf16.mxu1 %v19535_v23  ;;  %v19569_v38 = vld [vmem:[#allocation335_spill] sm:$0xff]  ;;  %v19570_v23 = vld [vmem:[#allocation273_spill] sm:$0xff] }
 0x6c9   :  { %7389 = vmatpush1.bf16.xpose.msra.mxu0 %v19536_v49  ;;  %v19571_v49 = vld [vmem:[#allocation337_spill] sm:$0xff] }
 0x6ca   :  { %7733 = vmatpush1.bf16.xpose.msra.mxu1 %v19537_v50  ;;  %7390 = vmatprep.subr.bf16.mxu0 %v19538_v22  ;;  %v19572_v50 = vld [vmem:[#allocation275_spill] sm:$0xff] }
 0x6cb   :  { %7734 = vmatprep.subr.bf16.mxu1 %v19539_v42  ;;  %v19573_v22 = vld [vmem:[#allocation339_spill] sm:$0xff]  ;;  %v19574_v42 = vld [vmem:[#allocation277_spill] sm:$0xff] }
 0x6d1   :  { %7391 = vmatpush1.bf16.xpose.msra.mxu0 %v19540_v33  ;;  %v19575_v33 = vld [vmem:[#allocation341_spill] sm:$0xff] }
 0x6d2   :  { %7735 = vmatpush1.bf16.xpose.msra.mxu1 %v19541_v18  ;;  %7403 = vmatprep.subr.bf16.mxu0 %v19542_v47  ;;  %v19576_v18 = vld [vmem:[#allocation279_spill] sm:$0xff] }
 0x6d3   :  { %7747 = vmatprep.subr.bf16.mxu1 %v19543_v27  ;;  %v19577_v47 = vld [vmem:[#allocation343_spill] sm:$0xff]  ;;  %v19578_v27 = vld [vmem:[#allocation281_spill] sm:$0xff] }
 0x6d8   :  { %10035 = vmatmul.mubr.msk.bf16.vlgmr.msra.gmra.mrb[24].mxu0 %vm16281_vm3, %v18850_v60 }
 0x6d9   :  { %10082 = vmatmul.mubr.msk.bf16.vlgmr.msra.gmra.mrb[28].mxu1 %vm16281_vm3, %v18850_v60  ;;  %7404 = vmatpush1.bf16.xpose.msra.mxu0 %v19544_v39  ;;  %v19579_v39 = vld [vmem:[#allocation345_spill] sm:$0xff]  ;;  %vm19788_vm3 = vcmask 949248  }
 0x6da   :  { %10037 = vmatprep.mubr.msk.bf16.mxu0 %vm16426_vm8, %v18850_v60  ;;  %7748 = vmatpush1.bf16.xpose.msra.mxu1 %v19545_v51  ;;  %v19580_v51 = vld [vmem:[#allocation283_spill] sm:$0xff]  ;;  %vm19789_vm7 = vmmov %vm19788_vm3 }
 0x6db   :  { %10084 = vmatprep.mubr.msk.bf16.mxu1 %vm16426_vm8, %v18850_v60  ;;  %7405 = vmatprep.subr.bf16.mxu0 %v19546_v61  ;;  %v19581_v61 = vld [vmem:[#allocation347_spill] sm:$0xff] }
 0x6dc   :  { %7749 = vmatprep.subr.bf16.mxu1 %v19547_v58  ;;  %v19582_v58 = vld [vmem:[#allocation285_spill] sm:$0xff] }
 0x6e1   :  { %7406 = vmatpush1.bf16.xpose.msra.mxu0 %v19548_v43  ;;  %v19583_v43 = vld [vmem:[#allocation349_spill] sm:$0xff] }
 0x6e2   :  { %7750 = vmatpush1.bf16.xpose.msra.mxu1 %v19549_v3  ;;  %7407 = vmatprep.subr.bf16.mxu0 %v19550_v46  ;;  %v19584_v3 = vld [vmem:[#allocation287_spill] sm:$0xff] }
 0x6e3   :  { %7751 = vmatprep.subr.bf16.mxu1 %v19551_v16  ;;  %v19585_v46 = vld [vmem:[#allocation351_spill] sm:$0xff]  ;;  %v19586_v16 = vld [vmem:[#allocation289_spill] sm:$0xff] }
 0x6e9   :  { %7408 = vmatpush1.bf16.xpose.msra.mxu0 %v19552_v53  ;;  %v19587_v53 = vld [vmem:[#allocation353_spill] sm:$0xff] }
 0x6ea   :  { %7752 = vmatpush1.bf16.xpose.msra.mxu1 %v19553_v52  ;;  %7409 = vmatprep.subr.bf16.mxu0 %v19554_v2  ;;  %v19588_v52 = vld [vmem:[#allocation291_spill] sm:$0xff] }
 0x6eb   :  { %7753 = vmatprep.subr.bf16.mxu1 %v19555_v44  ;;  %v19589_v2 = vld [vmem:[#allocation355_spill] sm:$0xff]  ;;  %v19590_v44 = vld [vmem:[#allocation293_spill] sm:$0xff] }
 0x6f1   :  { %7410 = vmatpush1.bf16.xpose.msra.mxu0 %v19556_v10  ;;  %v19591_v10 = vld [vmem:[#allocation357_spill] sm:$0xff] }
 0x6f2   :  { %7754 = vmatpush1.bf16.xpose.msra.mxu1 %v19557_v13  ;;  %7411 = vmatprep.subr.bf16.mxu0 %v19558_v0  ;;  %v19592_v13 = vld [vmem:[#allocation295_spill] sm:$0xff] }
 0x6f3   :  { %7755 = vmatprep.subr.bf16.mxu1 %v19559_v56  ;;  %v19593_v0 = vld [vmem:[#allocation359_spill] sm:$0xff]  ;;  %v19594_v56 = vld [vmem:[#allocation297_spill] sm:$0xff] }
 0x6f9   :  { %7412 = vmatpush1.bf16.xpose.msra.mxu0 %v19560_v19  ;;  %v19595_v19 = vld [vmem:[#allocation361_spill] sm:$0xff] }
 0x6fa   :  { %7756 = vmatpush1.bf16.xpose.msra.mxu1 %v19561_v48  ;;  %7413 = vmatprep.subr.bf16.mxu0 %v19562_v21  ;;  %v19596_v48 = vld [vmem:[#allocation299_spill] sm:$0xff] }
 0x6fb   :  { %7757 = vmatprep.subr.bf16.mxu1 %v19563_v28  ;;  %v19597_v21 = vld [vmem:[#allocation363_spill] sm:$0xff]  ;;  %v19598_v28 = vld [vmem:[#allocation301_spill] sm:$0xff] }
 0x701   :  { %7414 = vmatpush1.bf16.xpose.msra.mxu0 %v19564_v31  ;;  %v19599_v31 = vld [vmem:[#allocation365_spill] sm:$0xff] }
 0x702   :  { %7758 = vmatpush1.bf16.xpose.msra.mxu1 %v19565_v54  ;;  %7415 = vmatprep.subr.bf16.mxu0 %v19566_v57  ;;  %v19600_v54 = vld [vmem:[#allocation303_spill] sm:$0xff] }
 0x703   :  { %7759 = vmatprep.subr.bf16.mxu1 %v19567_v35  ;;  %v19601_v57 = vld [vmem:[#allocation367_spill] sm:$0xff]  ;;  %v19602_v35 = vld [vmem:[#allocation305_spill] sm:$0xff] }
 0x709   :  { %7416 = vmatpush1.bf16.xpose.msra.mxu0 %v19568_v62  ;;  %v19603_v62 = vld [vmem:[#allocation369_spill] sm:$0xff] }
 0x70a   :  { %7760 = vmatpush1.bf16.xpose.msra.mxu1 %v19569_v38  ;;  %7417 = vmatprep.subr.bf16.mxu0 %v19570_v23  ;;  %v19604_v38 = vld [vmem:[#allocation307_spill] sm:$0xff]  ;;  %v19605_v23 = vld [vmem:[#allocation370_spill] sm:$0xff] }
 0x70b   :  { %7761 = vmatprep.subr.bf16.mxu1 %v19571_v49  ;;  %v19606_v49 = vld [vmem:[#allocation246_spill] sm:$0xff] }
 0x711   :  { %7418 = vmatpush1.bf16.xpose.msra.mxu0 %v19572_v50  ;;  %v19607_v50 = vld [vmem:[#allocation310_spill] sm:$0xff] }
 0x712   :  { %7762 = vmatpush1.bf16.xpose.msra.mxu1 %v19573_v22  ;;  %7419 = vmatprep.subr.bf16.mxu0 %v19574_v42  ;;  %v19609_v22 = vld [vmem:[#allocation248_spill] sm:$0xff] }
 0x713   :  { %7763 = vmatprep.subr.bf16.mxu1 %v19575_v33  ;;  %v19610_v42 = vld [vmem:[#allocation312_spill] sm:$0xff]  ;;  %v19611_v33 = vld [vmem:[#allocation250_spill] sm:$0xff] }
 0x719   :  { %7420 = vmatpush1.bf16.xpose.msra.mxu0 %v19576_v18  ;;  %v19612_v18 = vld [vmem:[#allocation314_spill] sm:$0xff] }
 0x71a   :  { %7764 = vmatpush1.bf16.xpose.msra.mxu1 %v19577_v47  ;;  %7421 = vmatprep.subr.bf16.mxu0 %v19578_v27  ;;  %v19613_v47 = vld [vmem:[#allocation252_spill] sm:$0xff]  ;;  %v19615_v27 = vld [vmem:[#allocation254_spill] sm:$0xff] }
 0x71b   :  { %7765 = vmatprep.subr.bf16.mxu1 %v19579_v39  ;;  %v19616_v39 = vld [vmem:[#allocation318_spill] sm:$0xff] }
 0x721   :  { %7422 = vmatpush1.bf16.xpose.msra.mxu0 %v19580_v51  ;;  %v19617_v51 = vld [vmem:[#allocation256_spill] sm:$0xff] }
 0x722   :  { %7766 = vmatpush1.bf16.xpose.msra.mxu1 %v19581_v61  ;;  %7423 = vmatprep.subr.bf16.mxu0 %v19582_v58  ;;  %v19618_v61 = vld [vmem:[#allocation320_spill] sm:$0xff]  ;;  %v19619_v58 = vld [vmem:[#allocation258_spill] sm:$0xff] }
 0x723   :  { %7767 = vmatprep.subr.bf16.mxu1 %v19583_v43  ;;  %v19621_v43 = vld [vmem:[#allocation260_spill] sm:$0xff] }
 0x729   :  { %7424 = vmatpush1.bf16.xpose.msra.mxu0 %v19584_v3  ;;  %v19622_v3 = vld [vmem:[#allocation324_spill] sm:$0xff] }
 0x72a   :  { %7768 = vmatpush1.bf16.xpose.msra.mxu1 %v19585_v46  ;;  %7425 = vmatprep.subr.bf16.mxu0 %v19586_v16  ;;  %v19623_v46 = vld [vmem:[#allocation262_spill] sm:$0xff] }
 0x72b   :  { %7769 = vmatprep.subr.bf16.mxu1 %v19587_v53  ;;  %v19624_v16 = vld [vmem:[#allocation326_spill] sm:$0xff]  ;;  %v19625_v53 = vld [vmem:[#allocation264_spill] sm:$0xff] }
 0x731   :  { %7426 = vmatpush1.bf16.xpose.msra.mxu0 %v19588_v52  ;;  %v19626_v52 = vld [vmem:[#allocation328_spill] sm:$0xff] }
 0x732   :  { %7770 = vmatpush1.bf16.xpose.msra.mxu1 %v19589_v2  ;;  %7427 = vmatprep.subr.bf16.mxu0 %v19590_v44  ;;  %v19627_v2 = vld [vmem:[#allocation266_spill] sm:$0xff] }
 0x733   :  { %7771 = vmatprep.subr.bf16.mxu1 %v19591_v10  ;;  %v19628_v44 = vld [vmem:[#allocation330_spill] sm:$0xff]  ;;  %v19629_v10 = vld [vmem:[#allocation268_spill] sm:$0xff] }
 0x739   :  { %7428 = vmatpush1.bf16.xpose.msra.mxu0 %v19592_v13  ;;  %v19630_v13 = vld [vmem:[#allocation332_spill] sm:$0xff] }
 0x73a   :  { %7772 = vmatpush1.bf16.xpose.msra.mxu1 %v19593_v0  ;;  %7429 = vmatprep.subr.bf16.mxu0 %v19594_v56  ;;  %v19631_v0 = vld [vmem:[#allocation270_spill] sm:$0xff] }
 0x73b   :  { %7773 = vmatprep.subr.bf16.mxu1 %v19595_v19  ;;  %v19632_v56 = vld [vmem:[#allocation334_spill] sm:$0xff]  ;;  %v19633_v19 = vld [vmem:[#allocation272_spill] sm:$0xff] }
 0x741   :  { %7430 = vmatpush1.bf16.xpose.msra.mxu0 %v19596_v48  ;;  %v19634_v48 = vld [vmem:[#allocation336_spill] sm:$0xff] }
 0x742   :  { %7774 = vmatpush1.bf16.xpose.msra.mxu1 %v19597_v21  ;;  %7431 = vmatprep.subr.bf16.mxu0 %v19598_v28  ;;  %v19635_v21 = vld [vmem:[#allocation274_spill] sm:$0xff] }
 0x743   :  { %7775 = vmatprep.subr.bf16.mxu1 %v19599_v31  ;;  %v19636_v28 = vld [vmem:[#allocation338_spill] sm:$0xff]  ;;  %v19637_v31 = vld [vmem:[#allocation276_spill] sm:$0xff] }
 0x749   :  { %7432 = vmatpush1.bf16.xpose.msra.mxu0 %v19600_v54  ;;  %v19638_v54 = vld [vmem:[#allocation340_spill] sm:$0xff] }
 0x74a   :  { %7776 = vmatpush1.bf16.xpose.msra.mxu1 %v19601_v57  ;;  %7433 = vmatprep.subr.bf16.mxu0 %v19602_v35  ;;  %v19639_v57 = vld [vmem:[#allocation278_spill] sm:$0xff] }
 0x74b   :  { %7777 = vmatprep.subr.bf16.mxu1 %v19603_v62  ;;  %v19640_v35 = vld [vmem:[#allocation342_spill] sm:$0xff]  ;;  %v19641_v62 = vld [vmem:[#allocation280_spill] sm:$0xff] }
 0x751   :  { %7434 = vmatpush1.bf16.xpose.msra.mxu0 %v19604_v38  ;;  %v19642_v38 = vld [vmem:[#allocation344_spill] sm:$0xff] }
 0x752   :  { %7778 = vmatpush1.bf16.xpose.msra.mxu1 %v19605_v23  ;;  %7446 = vmatprep.subr.bf16.mxu0 %v19606_v49  ;;  %v19643_v23 = vld [vmem:[#allocation282_spill] sm:$0xff] }
 0x753   :  { %7790 = vmatprep.subr.bf16.mxu1 %v19607_v50  ;;  %v19644_v49 = vld [vmem:[#allocation346_spill] sm:$0xff]  ;;  %v19645_v50 = vld [vmem:[#allocation284_spill] sm:$0xff] }
 0x758   :  { %10039 = vmatmul.mubr.msk.bf16.vlgmr.msra.gmra.mrb[24].mxu0 %vm19608_vm12, %v18850_v60 }
 0x759   :  { %10086 = vmatmul.mubr.msk.bf16.vlgmr.msra.gmra.mrb[28].mxu1 %vm19608_vm12, %v18850_v60  ;;  %7447 = vmatpush1.bf16.xpose.msra.mxu0 %v19609_v22  ;;  %v19646_v22 = vld [vmem:[#allocation348_spill] sm:$0xff] }
 0x75a   :  { %10041 = vmatprep.mubr.msk.bf16.mxu0 %vm16431_vm0, %v18850_v60  ;;  %7791 = vmatpush1.bf16.xpose.msra.mxu1 %v19610_v42  ;;  %v19647_v42 = vld [vmem:[#allocation286_spill] sm:$0xff] }
 0x75b   :  { %10088 = vmatprep.mubr.msk.bf16.mxu1 %vm16431_vm0, %v18850_v60  ;;  %7448 = vmatprep.subr.bf16.mxu0 %v19611_v33  ;;  %v19648_v33 = vld [vmem:[#allocation350_spill] sm:$0xff]  ;;  %vm19790_vm0 = vmmov %vm19788_vm3 }
 0x75c   :  { %7792 = vmatprep.subr.bf16.mxu1 %v19612_v18  ;;  %v19649_v18 = vld [vmem:[#allocation288_spill] sm:$0xff]  ;;  %vm19792_vm8 = vmmov %vm19790_vm0 }
 0x75d   :  { %vm19794_vm14 = vmmov %vm19790_vm0 }
 0x75e   :  { %vm19795_vm15 = vmmov %vm19790_vm0 }
 0x75f   :  { %vm19796_vm1 = vmmov %vm19790_vm0 }
 0x760   :  { %vm19797_vm6 = vmmov %vm19790_vm0 }
 0x761   :  { %7449 = vmatpush1.bf16.xpose.msra.mxu0 %v19613_v47  ;;  %v19650_v47 = vld [vmem:[#allocation352_spill] sm:$0xff]  ;;  %vm19798_vm5 = vmmov %vm19790_vm0 }
 0x762   :  { %7793 = vmatpush1.bf16.xpose.msra.mxu1 %v19614_v32  ;;  %7450 = vmatprep.subr.bf16.mxu0 %v19615_v27  ;;  %v19651_v32 = vld [vmem:[#allocation290_spill] sm:$0xff]  ;;  %vm19800_vm4 = vmmov %vm19790_vm0 }
 0x763   :  { %7794 = vmatprep.subr.bf16.mxu1 %v19616_v39  ;;  %v19652_v27 = vld [vmem:[#allocation354_spill] sm:$0xff]  ;;  %v19653_v39 = vld [vmem:[#allocation292_spill] sm:$0xff]  ;;  %vm19801_vm12 = vmmov %vm19790_vm0 }
 0x769   :  { %7451 = vmatpush1.bf16.xpose.msra.mxu0 %v19617_v51  ;;  %v19654_v51 = vld [vmem:[#allocation356_spill] sm:$0xff] }
 0x76a   :  { %7795 = vmatpush1.bf16.xpose.msra.mxu1 %v19618_v61  ;;  %7452 = vmatprep.subr.bf16.mxu0 %v19619_v58  ;;  %v19655_v61 = vld [vmem:[#allocation294_spill] sm:$0xff] }
 0x76b   :  { %7796 = vmatprep.subr.bf16.mxu1 %v19620_v45  ;;  %v19656_v58 = vld [vmem:[#allocation358_spill] sm:$0xff]  ;;  %v19657_v45 = vld [vmem:[#allocation296_spill] sm:$0xff] }
 0x771   :  { %7453 = vmatpush1.bf16.xpose.msra.mxu0 %v19621_v43  ;;  %v19658_v43 = vld [vmem:[#allocation360_spill] sm:$0xff] }
 0x772   :  { %7797 = vmatpush1.bf16.xpose.msra.mxu1 %v19622_v3  ;;  %7454 = vmatprep.subr.bf16.mxu0 %v19623_v46  ;;  %v19659_v3 = vld [vmem:[#allocation298_spill] sm:$0xff] }
 0x773   :  { %7798 = vmatprep.subr.bf16.mxu1 %v19624_v16  ;;  %v19660_v46 = vld [vmem:[#allocation362_spill] sm:$0xff]  ;;  %v19661_v16 = vld [vmem:[#allocation300_spill] sm:$0xff] }
 0x779   :  { %7455 = vmatpush1.bf16.xpose.msra.mxu0 %v19625_v53  ;;  %v19662_v53 = vld [vmem:[#allocation364_spill] sm:$0xff] }
 0x77a   :  { %7799 = vmatpush1.bf16.xpose.msra.mxu1 %v19626_v52  ;;  %7456 = vmatprep.subr.bf16.mxu0 %v19627_v2  ;;  %v19663_v52 = vld [vmem:[#allocation302_spill] sm:$0xff] }
 0x77b   :  { %7800 = vmatprep.subr.bf16.mxu1 %v19628_v44  ;;  %v19664_v2 = vld [vmem:[#allocation366_spill] sm:$0xff]  ;;  %v19665_v44 = vld [vmem:[#allocation304_spill] sm:$0xff] }
 0x781   :  { %7457 = vmatpush1.bf16.xpose.msra.mxu0 %v19629_v10  ;;  %v19666_v10 = vld [vmem:[#allocation368_spill] sm:$0xff] }
 0x782   :  { %7801 = vmatpush1.bf16.xpose.msra.mxu1 %v19630_v13  ;;  %7458 = vmatprep.subr.bf16.mxu0 %v19631_v0  ;;  %v19667_v13 = vld [vmem:[#allocation306_spill] sm:$0xff]  ;;  %v19668_v0 = vld [vmem:[#allocation371_spill] sm:$0xff] }
 0x783   :  { %7802 = vmatprep.subr.bf16.mxu1 %v19632_v56  ;;  %v19669_v56 = vld [vmem:[#allocation308_spill] sm:$0xff] }
 0x789   :  { %7459 = vmatpush1.bf16.xpose.msra.mxu0 %v19633_v19  ;;  %v19670_v19 = vld [vmem:[#allocation372_spill] sm:$0xff] }
 0x78a   :  { %7803 = vmatpush1.bf16.xpose.msra.mxu1 %v19634_v48  ;;  %7460 = vmatprep.subr.bf16.mxu0 %v19635_v21  ;;  %v19671_v48 = vld [vmem:[#allocation374_spill] sm:$0xff] }
 0x78b   :  { %7804 = vmatprep.subr.bf16.mxu1 %v19636_v28  ;;  %v19672_v21 = vld [vmem:[#allocation438_spill] sm:$0xff]  ;;  %v19674_v28 = vld [vmem:[#allocation376_spill] sm:$0xff] }
 0x791   :  { %7461 = vmatpush1.bf16.xpose.msra.mxu0 %v19637_v31  ;;  %v19675_v31 = vld [vmem:[#allocation440_spill] sm:$0xff] }
 0x792   :  { %7805 = vmatpush1.bf16.xpose.msra.mxu1 %v19638_v54  ;;  %7462 = vmatprep.subr.bf16.mxu0 %v19639_v57  ;;  %v19676_v54 = vld [vmem:[#allocation378_spill] sm:$0xff] }
 0x793   :  { %7806 = vmatprep.subr.bf16.mxu1 %v19640_v35  ;;  %v19677_v57 = vld [vmem:[#allocation442_spill] sm:$0xff]  ;;  %v19678_v35 = vld [vmem:[#allocation380_spill] sm:$0xff] }
 0x799   :  { %7463 = vmatpush1.bf16.xpose.msra.mxu0 %v19641_v62  ;;  %v19680_v62 = vld [vmem:[#allocation382_spill] sm:$0xff] }
 0x79a   :  { %7807 = vmatpush1.bf16.xpose.msra.mxu1 %v19642_v38  ;;  %7464 = vmatprep.subr.bf16.mxu0 %v19643_v23  ;;  %v19681_v38 = vld [vmem:[#allocation446_spill] sm:$0xff]  ;;  %v19682_v23 = vld [vmem:[#allocation384_spill] sm:$0xff] }
 0x79b   :  { %7808 = vmatprep.subr.bf16.mxu1 %v19644_v49  ;;  %v19683_v49 = vld [vmem:[#allocation448_spill] sm:$0xff] }
 0x7a1   :  { %7465 = vmatpush1.bf16.xpose.msra.mxu0 %v19645_v50  ;;  %v19684_v50 = vld [vmem:[#allocation386_spill] sm:$0xff] }
 0x7a2   :  { %7809 = vmatpush1.bf16.xpose.msra.mxu1 %v19646_v22  ;;  %7466 = vmatprep.subr.bf16.mxu0 %v19647_v42  ;;  %v19686_v22 = vld [vmem:[#allocation388_spill] sm:$0xff] }
 0x7a3   :  { %7810 = vmatprep.subr.bf16.mxu1 %v19648_v33  ;;  %v19687_v42 = vld [vmem:[#allocation452_spill] sm:$0xff]  ;;  %v19688_v33 = vld [vmem:[#allocation390_spill] sm:$0xff] }
 0x7a9   :  { %7467 = vmatpush1.bf16.xpose.msra.mxu0 %v19649_v18  ;;  %v19689_v18 = vld [vmem:[#allocation454_spill] sm:$0xff] }
 0x7aa   :  { %7811 = vmatpush1.bf16.xpose.msra.mxu1 %v19650_v47  ;;  %7468 = vmatprep.subr.bf16.mxu0 %v19651_v32  ;;  %v19690_v47 = vld [vmem:[#allocation392_spill] sm:$0xff] }
 0x7ab   :  { %7812 = vmatprep.subr.bf16.mxu1 %v19652_v27  ;;  %v19691_v32 = vld [vmem:[#allocation456_spill] sm:$0xff]  ;;  %v19692_v27 = vld [vmem:[#allocation394_spill] sm:$0xff] }
 0x7b1   :  { %7469 = vmatpush1.bf16.xpose.msra.mxu0 %v19653_v39  ;;  %v19693_v39 = vld [vmem:[#allocation458_spill] sm:$0xff] }
 0x7b2   :  { %7813 = vmatpush1.bf16.xpose.msra.mxu1 %v19654_v51  ;;  %7470 = vmatprep.subr.bf16.mxu0 %v19655_v61  ;;  %v19694_v51 = vld [vmem:[#allocation396_spill] sm:$0xff] }
 0x7b3   :  { %7814 = vmatprep.subr.bf16.mxu1 %v19656_v58  ;;  %v19695_v61 = vld [vmem:[#allocation460_spill] sm:$0xff]  ;;  %v19696_v58 = vld [vmem:[#allocation398_spill] sm:$0xff] }
 0x7b9   :  { %7471 = vmatpush1.bf16.xpose.msra.mxu0 %v19657_v45  ;;  %v19697_v45 = vld [vmem:[#allocation400_spill] sm:$0xff] }
 0x7ba   :  { %7815 = vmatpush1.bf16.xpose.msra.mxu1 %v19658_v43  ;;  %7472 = vmatprep.subr.bf16.mxu0 %v19659_v3  ;;  %v19698_v43 = vld [vmem:[#allocation402_spill] sm:$0xff]  ;;  %v19699_v3 = vld [vmem:[#allocation404_spill] sm:$0xff] }
 0x7bb   :  { %7816 = vmatprep.subr.bf16.mxu1 %v19660_v46  ;;  %v19700_v46 = vld [vmem:[#allocation406_spill] sm:$0xff] }
 0x7c1   :  { %7473 = vmatpush1.bf16.xpose.msra.mxu0 %v19661_v16  ;;  %v19701_v16 = vld [vmem:[#allocation466_spill] sm:$0xff] }
 0x7c2   :  { %7817 = vmatpush1.bf16.xpose.msra.mxu1 %v19662_v53  ;;  %7474 = vmatprep.subr.bf16.mxu0 %v19663_v52  ;;  %v19702_v53 = vld [vmem:[#allocation408_spill] sm:$0xff] }
 0x7c3   :  { %7818 = vmatprep.subr.bf16.mxu1 %v19664_v2  ;;  %v19703_v52 = vld [vmem:[#allocation468_spill] sm:$0xff]  ;;  %v19705_v2 = vld [vmem:[#allocation470_spill] sm:$0xff] }
 0x7c9   :  { %7475 = vmatpush1.bf16.xpose.msra.mxu0 %v19665_v44  ;;  %v19707_v44 = vld [vmem:[#allocation472_spill] sm:$0xff] }
 0x7ca   :  { %7819 = vmatpush1.bf16.xpose.msra.mxu1 %v19666_v10  ;;  %7476 = vmatprep.subr.bf16.mxu0 %v19667_v13  ;;  %v19709_v10 = vld [vmem:[#allocation474_spill] sm:$0xff]  ;;  %v19711_v13 = vld [vmem:[#allocation476_spill] sm:$0xff] }
 0x7cb   :  { %7820 = vmatprep.subr.bf16.mxu1 %v19668_v0  ;;  %v19712_v0 = vld [vmem:[#allocation418_spill] sm:$0xff] }
 0x7d1   :  { %7477 = vmatpush1.bf16.xpose.msra.mxu0 %v19669_v56  ;;  %v19713_v56 = vld [vmem:[#allocation478_spill] sm:$0xff] }
 0x7d2   :  { %7821 = vmatpush1.bf16.xpose.msra.mxu1 %v19670_v19  ;;  %7489 = vmatprep.subr.bf16.mxu0 %v19671_v48  ;;  %v19714_v19 = vld [vmem:[#allocation420_spill] sm:$0xff] }
 0x7d3   :  { %7833 = vmatprep.subr.bf16.mxu1 %v19672_v21  ;;  %v19715_v48 = vld [vmem:[#allocation480_spill] sm:$0xff]  ;;  %v19716_v21 = vld [vmem:[#allocation422_spill] sm:$0xff] }
 0x7d8   :  { %10043 = vmatmul.mubr.msk.bf16.vlgmr.msra.gmra.mrb[24].mxu0 %vm19673_vm9, %v18850_v60 }
 0x7d9   :  { %10090 = vmatmul.mubr.msk.bf16.vlgmr.msra.gmra.mrb[28].mxu1 %vm19673_vm9, %v18850_v60  ;;  %7490 = vmatpush1.bf16.xpose.msra.mxu0 %v19674_v28  ;;  %v19717_v28 = vld [vmem:[#allocation482_spill] sm:$0xff]  ;;  %vm19802_vm9 = vmmov %vm19790_vm0 }
 0x7da   :  { %10045 = vmatprep.mubr.msk.bf16.mxu0 %vm16551_vm11, %v18850_v60  ;;  %7834 = vmatpush1.bf16.xpose.msra.mxu1 %v19675_v31  ;;  %v19718_v31 = vld [vmem:[#allocation424_spill] sm:$0xff] }
 0x7db   :  { %10092 = vmatprep.mubr.msk.bf16.mxu1 %vm16551_vm11, %v18850_v60  ;;  %7491 = vmatprep.subr.bf16.mxu0 %v19676_v54  ;;  %v19719_v54 = vld [vmem:[#allocation484_spill] sm:$0xff]  ;;  %vm19799_vm11 = vmmov %vm19790_vm0 }
 0x7dc   :  { %7835 = vmatprep.subr.bf16.mxu1 %v19677_v57  ;;  %v19720_v57 = vld [vmem:[#allocation426_spill] sm:$0xff] }
 0x7e1   :  { %7492 = vmatpush1.bf16.xpose.msra.mxu0 %v19678_v35  ;;  %v19721_v35 = vld [vmem:[#allocation486_spill] sm:$0xff] }
 0x7e2   :  { %7836 = vmatpush1.bf16.xpose.msra.mxu1 %v19679_v17  ;;  %7493 = vmatprep.subr.bf16.mxu0 %v19680_v62  ;;  %v19722_v17 = vld [vmem:[#allocation428_spill] sm:$0xff]  ;;  %v19723_v62 = vld [vmem:[#allocation430_spill] sm:$0xff] }
 0x7e3   :  { %7837 = vmatprep.subr.bf16.mxu1 %v19681_v38  ;;  %v19724_v38 = vld [vmem:[#allocation432_spill] sm:$0xff] }
 0x7e9   :  { %7494 = vmatpush1.bf16.xpose.msra.mxu0 %v19682_v23  ;;  %v19725_v23 = vld [vmem:[#allocation434_spill] sm:$0xff] }
 0x7ea   :  { %7838 = vmatpush1.bf16.xpose.msra.mxu1 %v19683_v49  ;;  %7495 = vmatprep.subr.bf16.mxu0 %v19684_v50  ;;  %v19726_v49 = vld [vmem:[#allocation436_spill] sm:$0xff]  ;;  %v19727_v50 = vld [vmem:[#allocation375_spill] sm:$0xff] }
 0x7eb   :  { %7839 = vmatprep.subr.bf16.mxu1 %v19685_v40  ;;  %v19733_v40 = vld [vmem:[#allocation381_spill] sm:$0xff] }
 0x7f1   :  { %7496 = vmatpush1.bf16.xpose.msra.mxu0 %v19686_v22  ;;  %v19735_v22 = vld [vmem:[#allocation383_spill] sm:$0xff] }
 0x7f2   :  { %7840 = vmatpush1.bf16.xpose.msra.mxu1 %v19687_v42  ;;  %7497 = vmatprep.subr.bf16.mxu0 %v19688_v33  ;;  %v19736_v42 = vld [vmem:[#allocation447_spill] sm:$0xff]  ;;  %v19737_v33 = vld [vmem:[#allocation385_spill] sm:$0xff] }
 0x7f3   :  { %7841 = vmatprep.subr.bf16.mxu1 %v19689_v18  ;;  %v19738_v18 = vld [vmem:[#allocation449_spill] sm:$0xff] }
 0x7f9   :  { %7498 = vmatpush1.bf16.xpose.msra.mxu0 %v19690_v47  ;;  %v19740_v47 = vld [vmem:[#allocation451_spill] sm:$0xff] }
 0x7fa   :  { %7842 = vmatpush1.bf16.xpose.msra.mxu1 %v19691_v32  ;;  %7499 = vmatprep.subr.bf16.mxu0 %v19692_v27  ;;  %v19741_v32 = vld [vmem:[#allocation389_spill] sm:$0xff] }
 0x7fb   :  { %7843 = vmatprep.subr.bf16.mxu1 %v19693_v39  ;;  %v19742_v27 = vld [vmem:[#allocation453_spill] sm:$0xff]  ;;  %v19743_v39 = vld [vmem:[#allocation391_spill] sm:$0xff] }
 0x801   :  { %7500 = vmatpush1.bf16.xpose.msra.mxu0 %v19694_v51  ;;  %v19744_v51 = vld [vmem:[#allocation455_spill] sm:$0xff] }
 0x802   :  { %7844 = vmatpush1.bf16.xpose.msra.mxu1 %v19695_v61  ;;  %7501 = vmatprep.subr.bf16.mxu0 %v19696_v58  ;;  %v19745_v61 = vld [vmem:[#allocation393_spill] sm:$0xff] }
 0x803   :  { %7845 = vmatprep.subr.bf16.mxu1 %v16039_v41  ;;  %v19704_v41 = vld [vmem:[#allocation410_spill] sm:$0xff]  ;;  %v19746_v58 = vld [vmem:[#allocation457_spill] sm:$0xff] }
 0x809   :  { %7502 = vmatpush1.bf16.xpose.msra.mxu0 %v19697_v45  ;;  %v19747_v45 = vld [vmem:[#allocation395_spill] sm:$0xff] }
 0x80a   :  { %7846 = vmatpush1.bf16.xpose.msra.mxu1 %v16056_v25  ;;  %7503 = vmatprep.subr.bf16.mxu0 %v19698_v43  ;;  %v19706_v25 = vld [vmem:[#allocation412_spill] sm:$0xff]  ;;  %v19748_v43 = vld [vmem:[#allocation459_spill] sm:$0xff] }
 0x80b   :  { %7847 = vmatprep.subr.bf16.mxu1 %v16061_v29  ;;  %v19708_v29 = vld [vmem:[#allocation414_spill] sm:$0xff] }
 0x811   :  { %7504 = vmatpush1.bf16.xpose.msra.mxu0 %v19699_v3  ;;  %v19749_v3 = vld [vmem:[#allocation397_spill] sm:$0xff] }
 0x812   :  { %7848 = vmatpush1.bf16.xpose.msra.mxu1 %v16081_v24  ;;  %7505 = vmatprep.subr.bf16.mxu0 %v19700_v46  ;;  %v19710_v24 = vld [vmem:[#allocation416_spill] sm:$0xff]  ;;  %v19750_v46 = vld [vmem:[#allocation461_spill] sm:$0xff] }
 0x813   :  { %7849 = vmatprep.subr.bf16.mxu1 %v19701_v16  ;;  %v19751_v16 = vld [vmem:[#allocation399_spill] sm:$0xff] }
 0x819   :  { %7506 = vmatpush1.bf16.xpose.msra.mxu0 %v19702_v53  ;;  %v19752_v53 = vld [vmem:[#allocation462_spill] sm:$0xff] }
 0x81a   :  { %7850 = vmatpush1.bf16.xpose.msra.mxu1 %v19703_v52  ;;  %7507 = vmatprep.subr.bf16.mxu0 %v19704_v41  ;;  %v19753_v52 = vld [vmem:[#allocation401_spill] sm:$0xff]  ;;  %v19754_v41 = vld [vmem:[#allocation463_spill] sm:$0xff] }
 0x81b   :  { %7851 = vmatprep.subr.bf16.mxu1 %v19705_v2  ;;  %v19755_v2 = vld [vmem:[#allocation403_spill] sm:$0xff] }
 0x821   :  { %7508 = vmatpush1.bf16.xpose.msra.mxu0 %v19706_v25  ;;  %v19756_v25 = vld [vmem:[#allocation464_spill] sm:$0xff] }
 0x822   :  { %7852 = vmatpush1.bf16.xpose.msra.mxu1 %v19707_v44  ;;  %7509 = vmatprep.subr.bf16.mxu0 %v19708_v29  ;;  %v19757_v44 = vld [vmem:[#allocation405_spill] sm:$0xff] }
 0x823   :  { %7853 = vmatprep.subr.bf16.mxu1 %v19709_v10  ;;  %v19758_v29 = vld [vmem:[#allocation465_spill] sm:$0xff]  ;;  %v19759_v10 = vld [vmem:[#allocation407_spill] sm:$0xff] }
 0x829   :  { %7510 = vmatpush1.bf16.xpose.msra.mxu0 %v19710_v24  ;;  %v19760_v24 = vld [vmem:[#allocation467_spill] sm:$0xff] }
 0x82a   :  { %7854 = vmatpush1.bf16.xpose.msra.mxu1 %v19711_v13  ;;  %7511 = vmatprep.subr.bf16.mxu0 %v19712_v0  ;;  %v19761_v13 = vld [vmem:[#allocation409_spill] sm:$0xff] }
 0x82b   :  { %7855 = vmatprep.subr.bf16.mxu1 %v19713_v56  ;;  %v19762_v0 = vld [vmem:[#allocation469_spill] sm:$0xff]  ;;  %v19763_v56 = vld [vmem:[#allocation411_spill] sm:$0xff] }
 0x831   :  { %7512 = vmatpush1.bf16.xpose.msra.mxu0 %v19714_v19  ;;  %v19764_v19 = vld [vmem:[#allocation471_spill] sm:$0xff] }
 0x832   :  { %7856 = vmatpush1.bf16.xpose.msra.mxu1 %v19715_v48  ;;  %7513 = vmatprep.subr.bf16.mxu0 %v19716_v21  ;;  %v19765_v48 = vld [vmem:[#allocation413_spill] sm:$0xff] }
 0x833   :  { %7857 = vmatprep.subr.bf16.mxu1 %v19717_v28  ;;  %v19766_v21 = vld [vmem:[#allocation473_spill] sm:$0xff]  ;;  %v19767_v28 = vld [vmem:[#allocation415_spill] sm:$0xff] }
 0x839   :  { %7514 = vmatpush1.bf16.xpose.msra.mxu0 %v19718_v31  ;;  %v19768_v31 = vld [vmem:[#allocation475_spill] sm:$0xff] }
 0x83a   :  { %7858 = vmatpush1.bf16.xpose.msra.mxu1 %v19719_v54  ;;  %7515 = vmatprep.subr.bf16.mxu0 %v19720_v57  ;;  %v19769_v54 = vld [vmem:[#allocation417_spill] sm:$0xff] }
 0x83b   :  { %7859 = vmatprep.subr.bf16.mxu1 %v19721_v35  ;;  %v19770_v57 = vld [vmem:[#allocation477_spill] sm:$0xff]  ;;  %v19771_v35 = vld [vmem:[#allocation419_spill] sm:$0xff] }
 0x841   :  { %7516 = vmatpush1.bf16.xpose.msra.mxu0 %v19722_v17  ;;  %v19772_v17 = vld [vmem:[#allocation479_spill] sm:$0xff] }
 0x842   :  { %7860 = vmatpush1.bf16.xpose.msra.mxu1 %v16225_v30  ;;  %7517 = vmatprep.subr.bf16.mxu0 %v19723_v62  ;;  %v19728_v30 = vld [vmem:[#allocation439_spill] sm:$0xff]  ;;  %v19773_v62 = vld [vmem:[#allocation421_spill] sm:$0xff] }
 0x843   :  { %7861 = vmatprep.subr.bf16.mxu1 %v16237_v1  ;;  %v19729_v1 = vld [vmem:[#allocation377_spill] sm:$0xff] }
 0x849   :  { %7518 = vmatpush1.bf16.xpose.msra.mxu0 %v19724_v38  ;;  %v19774_v38 = vld [vmem:[#allocation481_spill] sm:$0xff] }
 0x84a   :  { %7862 = vmatpush1.bf16.xpose.msra.mxu1 %v16257_v4  ;;  %7519 = vmatprep.subr.bf16.mxu0 %v19725_v23  ;;  %v19730_v4 = vld [vmem:[#allocation441_spill] sm:$0xff]  ;;  %v19775_v23 = vld [vmem:[#allocation423_spill] sm:$0xff] }
 0x84b   :  { %7863 = vmatprep.subr.bf16.mxu1 %v16271_v11  ;;  %v19731_v11 = vld [vmem:[#allocation379_spill] sm:$0xff] }
 0x851   :  { %7520 = vmatpush1.bf16.xpose.msra.mxu0 %v19726_v49  ;;  %v19776_v49 = vld [vmem:[#allocation483_spill] sm:$0xff] }
 0x852   :  { %7864 = vmatpush1.bf16.xpose.msra.mxu1 %v16279_v14  ;;  %10048 = vmatprep.subr.msk.bf16.mxu0 %vm7132_vm10, %v19727_v50  ;;  %v19732_v14 = vld [vmem:[#allocation443_spill] sm:$0xff]  ;;  %v19777_v50 = vld [vmem:[#allocation425_spill] sm:$0xff] }
 0x853   :  { %10095 = vmatprep.subr.msk.bf16.mxu1 %vm7132_vm10, %v19728_v30  ;;  %v19778_v30 = vld [vmem:[#allocation485_spill] sm:$0xff] }
 0x858   :  { %10047 = vmatmul.mubr.msk.bf16.vlgmr.msra.gmra.mrb[24].mxu0 %vm16540_vm13, %v18850_v60 }
 0x859   :  { %10094 = vmatmul.mubr.msk.bf16.vlgmr.msra.gmra.mrb[28].mxu1 %vm16540_vm13, %v18850_v60  ;;  %7533 = vmatpush1.bf16.xpose.msra.mxu0 %v19729_v1  ;;  %v19779_v1 = vld [vmem:[#allocation427_spill] sm:$0xff]  ;;  %vm19793_vm13 = vmmov %vm19790_vm0 }
 0x85a   :  { %10064 = vmatprep.mubr.msk.bf16.mxu0 %vm7132_vm10, %v16558_v63  ;;  %7877 = vmatpush1.bf16.xpose.msra.mxu1 %v19730_v4  ;;  %v19780_v4 = vld [vmem:[#allocation487_spill] sm:$0xff] }
 0x85b   :  { %10111 = vmatprep.mubr.msk.bf16.mxu1 %vm7132_vm10, %v16558_v63  ;;  %10049 = vmatprep.subr.msk.bf16.mxu0 %vm7132_vm10, %v19731_v11  ;;  %v19739_v63 = vld [vmem:[#allocation387_spill] sm:$0xff]  ;;  %v19781_v11 = vld [vmem:[#allocation429_spill] sm:$0xff] }
 0x85c   :  { %10096 = vmatprep.subr.msk.bf16.mxu1 %vm7132_vm10, %v19732_v14  ;;  %v19782_v14 = vld [vmem:[#allocation431_spill] sm:$0xff] }
 0x861   :  { %7535 = vmatpush1.bf16.xpose.msra.mxu0 %v19733_v40  ;;  %v19783_v40 = vld [vmem:[#allocation433_spill] sm:$0xff] }
 0x862   :  { %7879 = vmatpush1.bf16.xpose.msra.mxu1 %v19734_v7  ;;  %10050 = vmatprep.subr.msk.bf16.mxu0 %vm7132_vm10, %v19735_v22  ;;  %v19784_v7 = vld [vmem:[#allocation435_spill] sm:$0xff]  ;;  %v19785_v22 = vld [vmem:[#allocation437_spill] sm:$0xff] }
 0x863   :  { %10097 = vmatprep.subr.msk.bf16.mxu1 %vm7132_vm10, %v19736_v42  ;;  %v11327_v42 = vld [vmem:[%s18276_s7 + $0x220] ss:$16 sps:$4 sm:$0xff]  }
 0x869   :  { %7537 = vmatpush1.bf16.xpose.msra.mxu0 %v19737_v33  ;;  %v11328_v33 = vld [vmem:[%s18276_s7 + $0x44] ss:$16 sps:$4 sm:$0xff]  }
 0x86a   :  { %7881 = vmatpush1.bf16.xpose.msra.mxu1 %v19738_v18  ;;  %10051 = vmatprep.subr.msk.bf16.mxu0 %vm7132_vm10, %v19739_v63  ;;  %v11329_v18 = vld [vmem:[%s18276_s7 + $0x244] ss:$16 sps:$4 sm:$0xff]   ;;  %v11330_v63 = vld [vmem:[%s18276_s7 + $0x40] ss:$16 sps:$4 sm:$0xff]  }
 0x86b   :  { %10098 = vmatprep.subr.msk.bf16.mxu1 %vm7132_vm10, %v19740_v47  ;;  %v11331_v47 = vld [vmem:[%s18276_s7 + $0x240] ss:$16 sps:$4 sm:$0xff]  }
 0x871   :  { %7539 = vmatpush1.bf16.xpose.msra.mxu0 %v19741_v32  ;;  %v11332_v32 = vld [vmem:[%s18276_s7 + $0x64] ss:$16 sps:$4 sm:$0xff]  }
 0x872   :  { %7883 = vmatpush1.bf16.xpose.msra.mxu1 %v19742_v27  ;;  %10052 = vmatprep.subr.msk.bf16.mxu0 %vm7132_vm10, %v19743_v39  ;;  %v11333_v27 = vld [vmem:[%s18276_s7 + $0x264] ss:$16 sps:$4 sm:$0xff]   ;;  %v11334_v39 = vld [vmem:[%s18276_s7 + $0x60] ss:$16 sps:$4 sm:$0xff]  }
 0x873   :  { %10099 = vmatprep.subr.msk.bf16.mxu1 %vm7132_vm10, %v19744_v51  ;;  %v11335_v51 = vld [vmem:[%s18276_s7 + $0x260] ss:$16 sps:$4 sm:$0xff]  }
 0x879   :  { %7541 = vmatpush1.bf16.xpose.msra.mxu0 %v19745_v61  ;;  %v11336_v61 = vld [vmem:[%s18276_s7 + $0x84] ss:$16 sps:$4 sm:$0xff]  }
 0x87a   :  { %7885 = vmatpush1.bf16.xpose.msra.mxu1 %v19746_v58  ;;  %10053 = vmatprep.subr.msk.bf16.mxu0 %vm7132_vm10, %v19747_v45  ;;  %v11337_v58 = vld [vmem:[%s18276_s7 + $0x284] ss:$16 sps:$4 sm:$0xff]   ;;  %v11338_v45 = vld [vmem:[%s18276_s7 + $0x80] ss:$16 sps:$4 sm:$0xff]  }
 0x87b   :  { %10100 = vmatprep.subr.msk.bf16.mxu1 %vm7132_vm10, %v19748_v43  ;;  %v11339_v43 = vld [vmem:[%s18276_s7 + $0x280] ss:$16 sps:$4 sm:$0xff]  }
 0x881   :  { %7543 = vmatpush1.bf16.xpose.msra.mxu0 %v19749_v3  ;;  %v11340_v3 = vld [vmem:[%s18276_s7 + $0xa4] ss:$16 sps:$4 sm:$0xff]  }
 0x882   :  { %7887 = vmatpush1.bf16.xpose.msra.mxu1 %v19750_v46  ;;  %10054 = vmatprep.subr.msk.bf16.mxu0 %vm7132_vm10, %v19751_v16  ;;  %v11341_v46 = vld [vmem:[%s18276_s7 + $0x2a4] ss:$16 sps:$4 sm:$0xff]   ;;  %v11342_v16 = vld [vmem:[%s18276_s7 + $0xa0] ss:$16 sps:$4 sm:$0xff]  }
 0x883   :  { %10101 = vmatprep.subr.msk.bf16.mxu1 %vm7132_vm10, %v19752_v53  ;;  %v11343_v53 = vld [vmem:[%s18276_s7 + $0x2a0] ss:$16 sps:$4 sm:$0xff]  }
 0x889   :  { %7545 = vmatpush1.bf16.xpose.msra.mxu0 %v19753_v52  ;;  %v11344_v52 = vld [vmem:[%s18276_s7 + $0xc4] ss:$16 sps:$4 sm:$0xff]  }
 0x88a   :  { %7889 = vmatpush1.bf16.xpose.msra.mxu1 %v19754_v41  ;;  %10055 = vmatprep.subr.msk.bf16.mxu0 %vm7132_vm10, %v19755_v2  ;;  %v11345_v41 = vld [vmem:[%s18276_s7 + $0x2c4] ss:$16 sps:$4 sm:$0xff]   ;;  %v11346_v2 = vld [vmem:[%s18276_s7 + $0xc0] ss:$16 sps:$4 sm:$0xff]  }
 0x88b   :  { %10102 = vmatprep.subr.msk.bf16.mxu1 %vm7132_vm10, %v19756_v25  ;;  %v11347_v25 = vld [vmem:[%s18276_s7 + $0x2c0] ss:$16 sps:$4 sm:$0xff]  }
 0x891   :  { %7547 = vmatpush1.bf16.xpose.msra.mxu0 %v19757_v44  ;;  %v11348_v44 = vld [vmem:[%s18276_s7 + $0xe4] ss:$16 sps:$4 sm:$0xff]  }
 0x892   :  { %7891 = vmatpush1.bf16.xpose.msra.mxu1 %v19758_v29  ;;  %10056 = vmatprep.subr.msk.bf16.mxu0 %vm7132_vm10, %v19759_v10  ;;  %v11349_v29 = vld [vmem:[%s18276_s7 + $0x2e4] ss:$16 sps:$4 sm:$0xff]   ;;  %v11350_v10 = vld [vmem:[%s18276_s7 + $0xe0] ss:$16 sps:$4 sm:$0xff]  }
 0x893   :  { %10103 = vmatprep.subr.msk.bf16.mxu1 %vm7132_vm10, %v19760_v24  ;;  %v11351_v24 = vld [vmem:[%s18276_s7 + $0x2e0] ss:$16 sps:$4 sm:$0xff]  }
 0x899   :  { %7549 = vmatpush1.bf16.xpose.msra.mxu0 %v19761_v13  ;;  %v11352_v13 = vld [vmem:[%s18276_s7 + $0x104] ss:$16 sps:$4 sm:$0xff]  }
 0x89a   :  { %7893 = vmatpush1.bf16.xpose.msra.mxu1 %v19762_v0  ;;  %10057 = vmatprep.subr.msk.bf16.mxu0 %vm7132_vm10, %v19763_v56  ;;  %v11353_v0 = vld [vmem:[%s18276_s7 + $0x304] ss:$16 sps:$4 sm:$0xff]   ;;  %v11354_v56 = vld [vmem:[%s18276_s7 + $0x100] ss:$16 sps:$4 sm:$0xff]  }
 0x89b   :  { %10104 = vmatprep.subr.msk.bf16.mxu1 %vm7132_vm10, %v19764_v19  ;;  %v11355_v19 = vld [vmem:[%s18276_s7 + $0x300] ss:$16 sps:$4 sm:$0xff]  }
 0x8a1   :  { %7551 = vmatpush1.bf16.xpose.msra.mxu0 %v19765_v48  ;;  %v11356_v48 = vld [vmem:[%s18276_s7 + $0x124] ss:$16 sps:$4 sm:$0xff]  }
 0x8a2   :  { %7895 = vmatpush1.bf16.xpose.msra.mxu1 %v19766_v21  ;;  %10058 = vmatprep.subr.msk.bf16.mxu0 %vm7132_vm10, %v19767_v28  ;;  %v11357_v21 = vld [vmem:[%s18276_s7 + $0x324] ss:$16 sps:$4 sm:$0xff]   ;;  %v11358_v28 = vld [vmem:[%s18276_s7 + $0x120] ss:$16 sps:$4 sm:$0xff]  }
 0x8a3   :  { %10105 = vmatprep.subr.msk.bf16.mxu1 %vm7132_vm10, %v19768_v31  ;;  %v11359_v31 = vld [vmem:[%s18276_s7 + $0x320] ss:$16 sps:$4 sm:$0xff]  }
 0x8a9   :  { %7553 = vmatpush1.bf16.xpose.msra.mxu0 %v19769_v54  ;;  %v11360_v54 = vld [vmem:[%s18276_s7 + $0x144] ss:$16 sps:$4 sm:$0xff]  }
 0x8aa   :  { %7897 = vmatpush1.bf16.xpose.msra.mxu1 %v19770_v57  ;;  %10059 = vmatprep.subr.msk.bf16.mxu0 %vm7132_vm10, %v19771_v35  ;;  %v11361_v57 = vld [vmem:[%s18276_s7 + $0x344] ss:$16 sps:$4 sm:$0xff]   ;;  %v11362_v35 = vld [vmem:[%s18276_s7 + $0x140] ss:$16 sps:$4 sm:$0xff]  }
 0x8ab   :  { %10106 = vmatprep.subr.msk.bf16.mxu1 %vm7132_vm10, %v19772_v17  ;;  %v11363_v17 = vld [vmem:[%s18276_s7 + $0x340] ss:$16 sps:$4 sm:$0xff]  }
 0x8b1   :  { %7555 = vmatpush1.bf16.xpose.msra.mxu0 %v19773_v62  ;;  %v11364_v62 = vld [vmem:[%s18276_s7 + $0x164] ss:$16 sps:$4 sm:$0xff]  }
 0x8b2   :  { %7899 = vmatpush1.bf16.xpose.msra.mxu1 %v19774_v38  ;;  %10060 = vmatprep.subr.msk.bf16.mxu0 %vm7132_vm10, %v19775_v23  ;;  %v11365_v38 = vld [vmem:[%s18276_s7 + $0x364] ss:$16 sps:$4 sm:$0xff]   ;;  %v11366_v23 = vld [vmem:[%s18276_s7 + $0x160] ss:$16 sps:$4 sm:$0xff]  }
 0x8b3   :  { %10107 = vmatprep.subr.msk.bf16.mxu1 %vm7132_vm10, %v19776_v49  ;;  %v11367_v49 = vld [vmem:[%s18276_s7 + $0x360] ss:$16 sps:$4 sm:$0xff]  }
 0x8b9   :  { %7557 = vmatpush1.bf16.xpose.msra.mxu0 %v19777_v50  ;;  %v11368_v50 = vld [vmem:[%s18276_s7 + $0x184] ss:$16 sps:$4 sm:$0xff]  }
 0x8ba   :  { %7901 = vmatpush1.bf16.xpose.msra.mxu1 %v19778_v30  ;;  %10061 = vmatprep.subr.msk.bf16.mxu0 %vm7132_vm10, %v19779_v1  ;;  %v11369_v30 = vld [vmem:[%s18276_s7 + $0x384] ss:$16 sps:$4 sm:$0xff]   ;;  %v11370_v1 = vld [vmem:[%s18276_s7 + $0x180] ss:$16 sps:$4 sm:$0xff]  }
 0x8bb   :  { %10108 = vmatprep.subr.msk.bf16.mxu1 %vm7132_vm10, %v19780_v4  ;;  %v11371_v4 = vld [vmem:[%s18276_s7 + $0x380] ss:$16 sps:$4 sm:$0xff]  }
 0x8c1   :  { %7559 = vmatpush1.bf16.xpose.msra.mxu0 %v19781_v11  ;;  %v11372_v11 = vld [vmem:[%s18276_s7 + $0x1a4] ss:$16 sps:$4 sm:$0xff]  }
 0x8c2   :  { %7903 = vmatpush1.bf16.xpose.msra.mxu1 %v16235_v9  ;;  %10062 = vmatprep.subr.msk.bf16.mxu0 %vm7132_vm10, %v19782_v14  ;;  %v11320_v9 = vld [vmem:[%s18276_s7 + $0x4] ss:$16 sps:$4 sm:$0xff]  }
 0x8c3   :  { %10109 = vmatprep.subr.msk.bf16.mxu1 %vm7132_vm10, %v16249_v15  ;;  %v11321_v15 = vld [vmem:[%s18276_s7 + $0x204] ss:$16 sps:$4 sm:$0xff]  }
 0x8c4   :  { %v11373_v14 = vld [vmem:[%s18276_s7 + $0x3a4] ss:$16 sps:$4 sm:$0xff]  }
 0x8c9   :  { %7561 = vmatpush1.bf16.xpose.msra.mxu0 %v19783_v40  ;;  %v11374_v40 = vld [vmem:[%s18276_s7 + $0x1a0] ss:$16 sps:$4 sm:$0xff]  }
 0x8ca   :  { %7905 = vmatpush1.bf16.xpose.msra.mxu1 %v16269_v12  ;;  %10063 = vmatprep.subr.msk.bf16.mxu0 %vm7132_vm10, %v19784_v7  ;;  %v11322_v12 = vld [vmem:[%s18276_s7] ss:$16 sps:$4 sm:$0xff]  }
 0x8cb   :  { %10110 = vmatprep.subr.msk.bf16.mxu1 %vm7132_vm10, %v16286_v34  ;;  %v11323_v34 = vld [vmem:[%s18276_s7 + $0x200] ss:$16 sps:$4 sm:$0xff]   ;;  %vm19803_vm10 = vmmov %vm19790_vm0 }
 0x8cc   :  { %v11375_v7 = vld [vmem:[%s18276_s7 + $0x3a0] ss:$16 sps:$4 sm:$0xff]  }
 0x8d1   :  { %7563 = vmatpush1.bf16.xpose.msra.mxu0 %v19785_v22  ;;  %v11376_v22 = vld [vmem:[%s18276_s7 + $0x1c4] ss:$16 sps:$4 sm:$0xff]  }
 0x8d2   :  { %7907 = vmatpush1.bf16.xpose.msra.mxu1 %v16288_v6  ;;  %8094 = vmatprep.subr.bf16.mxu0 %v11320_v9  ;;  %v11324_v6 = vld [vmem:[%s18276_s7 + $0x24] ss:$16 sps:$4 sm:$0xff]  }
 0x8d3   :  { %8180 = vmatprep.subr.bf16.mxu1 %v11321_v15  ;;  %v11377_v9 = vld [vmem:[%s18276_s7 + $0x3c4] ss:$16 sps:$4 sm:$0xff]   ;;  %v11378_v15 = vld [vmem:[%s18276_s7 + $0x1c0] ss:$16 sps:$4 sm:$0xff]  }
 0x8d8   :  { %10066 = vmatmul.mubr.msk.bf16.vlgmr.msra.gmra.mrb[24].mxu0 %vm16545_vm2, %v18850_v60 }
 0x8d9   :  { %10113 = vmatmul.mubr.msk.bf16.vlgmr.msra.gmra.mrb[28].mxu1 %vm16545_vm2, %v18850_v60  ;;  %8095 = vmatpush1.bf16.xpose.msra.mxu0 %v11322_v12  ;;  %v11326_v60 = vld [vmem:[%s18276_s7 + $0x20] ss:$16 sps:$4 sm:$0xff]   ;;  %vm19791_vm2 = vmmov %vm19790_vm0 }
 0x8da   :  { %8181 = vmatpush1.bf16.xpose.msra.mxu1 %v11323_v34  ;;  %8096 = vmatprep.subr.bf16.mxu0 %v11324_v6  ;;  %v11379_v12 = vld [vmem:[%s18276_s7 + $0x3c0] ss:$16 sps:$4 sm:$0xff]   ;;  %v11380_v34 = vld [vmem:[%s18276_s7 + $0x1e4] ss:$16 sps:$4 sm:$0xff]  }
 0x8db   :  { %8182 = vmatprep.subr.bf16.mxu1 %v11325_v8  ;;  %v19786_v6 = vld [vmem:[#allocation9_spill] sm:$0xff] }
 0x8dc   :  { %v11381_v8 = vld [vmem:[%s18276_s7 + $0x1e0] ss:$16 sps:$4 sm:$0xff]  }
 0x8e1   :  { %8097 = vmatpush1.bf16.xpose.msra.mxu0 %v11326_v60  ;;  %v19787_v60 = vld [vmem:[#allocation11_spill] sm:$0xff] }
 0x8e2   :  { %8183 = vmatpush1.bf16.xpose.msra.mxu1 %v11327_v42  ;;  %8098 = vmatprep.subr.bf16.mxu0 %v11328_v33  ;;  %v11382_v42 = vld [vmem:[%s18276_s7 + $0xc] ss:$16 sps:$4 sm:$0xff]  }
 0x8e3   :  { %8184 = vmatprep.subr.bf16.mxu1 %v11329_v18  ;;  %v11383_v33 = vld [vmem:[%s18276_s7 + $0x20c] ss:$16 sps:$4 sm:$0xff]   ;;  %v7095_v18 = vld [vmem:[%s18281_s12] sm:$0xf] }
 0x8e9   :  { %8099 = vmatpush1.bf16.xpose.msra.mxu0 %v11330_v63  ;;  %v7100_v63 = vrot.slane %v7095_v18, %v19305_v20 }
 0x8ea   :  { %8185 = vmatpush1.bf16.xpose.msra.mxu1 %v11331_v47  ;;  %8100 = vmatprep.subr.bf16.mxu0 %v11332_v32  ;;  %v7108_v47 = vrot.slane %v7095_v18, %v19307_v59  ;;  %v7104_v32 = vrot.slane %v7095_v18, %v19308_v26 }
 0x8eb   :  { %8186 = vmatprep.subr.bf16.mxu1 %v11333_v27  ;;  %v7112_v27 = vrot.slane %v7095_v18, %v19309_v37  ;;  %v11384_v18 = vld [vmem:[%s18276_s7 + $0x8] ss:$16 sps:$4 sm:$0xff]  }
 0x8f1   :  { %8101 = vmatpush1.bf16.xpose.msra.mxu0 %v11334_v39 }
 0x8f2   :  { %8187 = vmatpush1.bf16.xpose.msra.mxu1 %v11335_v51  ;;  %8102 = vmatprep.subr.bf16.mxu0 %v11336_v61 }
 0x8f3   :  { %8188 = vmatprep.subr.bf16.mxu1 %v11337_v58 }
 0x8f9   :  { %8103 = vmatpush1.bf16.xpose.msra.mxu0 %v11338_v45 }
 0x8fa   :  { %8189 = vmatpush1.bf16.xpose.msra.mxu1 %v11339_v43  ;;  %8104 = vmatprep.subr.bf16.mxu0 %v11340_v3 }
 0x8fb   :  { %8190 = vmatprep.subr.bf16.mxu1 %v11341_v46 }
 0x901   :  { %8105 = vmatpush1.bf16.xpose.msra.mxu0 %v11342_v16 }
 0x902   :  { %8191 = vmatpush1.bf16.xpose.msra.mxu1 %v11343_v53  ;;  %8106 = vmatprep.subr.bf16.mxu0 %v11344_v52 }
 0x903   :  { %8192 = vmatprep.subr.bf16.mxu1 %v11345_v41 }
 0x909   :  { %8107 = vmatpush1.bf16.xpose.msra.mxu0 %v11346_v2 }
 0x90a   :  { %8193 = vmatpush1.bf16.xpose.msra.mxu1 %v11347_v25  ;;  %8108 = vmatprep.subr.bf16.mxu0 %v11348_v44 }
 0x90b   :  { %8194 = vmatprep.subr.bf16.mxu1 %v11349_v29 }
 0x911   :  { %8109 = vmatpush1.bf16.xpose.msra.mxu0 %v11350_v10 }
 0x912   :  { %8195 = vmatpush1.bf16.xpose.msra.mxu1 %v11351_v24  ;;  %8110 = vmatprep.subr.bf16.mxu0 %v11352_v13 }
 0x913   :  { %8196 = vmatprep.subr.bf16.mxu1 %v11353_v0 }
 0x919   :  { %8111 = vmatpush1.bf16.xpose.msra.mxu0 %v11354_v56 }
 0x91a   :  { %8197 = vmatpush1.bf16.xpose.msra.mxu1 %v11355_v19  ;;  %8112 = vmatprep.subr.bf16.mxu0 %v11356_v48 }
 0x91b   :  { %8198 = vmatprep.subr.bf16.mxu1 %v11357_v21 }
 0x921   :  { %8113 = vmatpush1.bf16.xpose.msra.mxu0 %v11358_v28 }
 0x922   :  { %8199 = vmatpush1.bf16.xpose.msra.mxu1 %v11359_v31  ;;  %8114 = vmatprep.subr.bf16.mxu0 %v11360_v54 }
 0x923   :  { %8200 = vmatprep.subr.bf16.mxu1 %v11361_v57 }
 0x929   :  { %8115 = vmatpush1.bf16.xpose.msra.mxu0 %v11362_v35 }
 0x92a   :  { %8201 = vmatpush1.bf16.xpose.msra.mxu1 %v11363_v17  ;;  %8116 = vmatprep.subr.bf16.mxu0 %v11364_v62 }
 0x92b   :  { %8202 = vmatprep.subr.bf16.mxu1 %v11365_v38 }
 0x931   :  { %8117 = vmatpush1.bf16.xpose.msra.mxu0 %v11366_v23 }
 0x932   :  { %8203 = vmatpush1.bf16.xpose.msra.mxu1 %v11367_v49  ;;  %8118 = vmatprep.subr.bf16.mxu0 %v11368_v50 }
 0x933   :  { %8204 = vmatprep.subr.bf16.mxu1 %v11369_v30 }
 0x939   :  { %8119 = vmatpush1.bf16.xpose.msra.mxu0 %v11370_v1 }
 0x93a   :  { %8205 = vmatpush1.bf16.xpose.msra.mxu1 %v11371_v4  ;;  %8120 = vmatprep.subr.bf16.mxu0 %v11372_v11 }
 0x93b   :  { %8206 = vmatprep.subr.bf16.mxu1 %v11373_v14 }
 0x941   :  { %8121 = vmatpush1.bf16.xpose.msra.mxu0 %v11374_v40 }
 0x942   :  { %8207 = vmatpush1.bf16.xpose.msra.mxu1 %v11375_v7  ;;  %8122 = vmatprep.subr.bf16.mxu0 %v11376_v22 }
 0x943   :  { %8208 = vmatprep.subr.bf16.mxu1 %v11377_v9 }
 0x949   :  { %8123 = vmatpush1.bf16.xpose.msra.mxu0 %v11378_v15 }
 0x94a   :  { %8209 = vmatpush1.bf16.xpose.msra.mxu1 %v11379_v12  ;;  %8124 = vmatprep.subr.bf16.mxu0 %v11380_v34 }
 0x94b   :  { %8210 = vmatprep.subr.bf16.mxu1 %v19786_v6 }
 0x951   :  { %8125 = vmatpush1.bf16.xpose.msra.mxu0 %v11381_v8 }
 0x952   :  { %8211 = vmatpush1.bf16.xpose.msra.mxu1 %v19787_v60  ;;  %10122 = vmatprep.subr.msk.bf16.mxu0 %vm19788_vm3, %v11382_v42  ;;  %vm19804_vm3 = vmmov %vm19790_vm0 }
 0x953   :  { %10139 = vmatprep.subr.msk.bf16.mxu1 %vm19789_vm7, %v11383_v33  ;;  %vm19805_vm7 = vmmov %vm19790_vm0 }
 0x9ab   :  { %v7566_v39 = vpop.f32.mrb[24].mxu0 }
 0x9ac   :  { %v10290_v51 = vadd.f32 %v7566_v39, %v7100_v63  ;;  %v7910_v61 = vpop.f32.mrb[28].mxu1  ;;  %v7568_v58 = vpop.f32.mrb[25].mxu0  ;;  %v11389_v39 = vld [vmem:[%s18276_s7 + $0x228] ss:$16 sps:$4 sm:$0xff]  }
 0x9ad   :  { %v10294_v45 = vadd.f32 %v7910_v61, %v7108_v47  ;;  %v10291_v43 = vadd.f32 %v7568_v58, %v7104_v32  ;;  %v7912_v3 = vpop.f32.mrb[29].mxu1  ;;  %v7570_v46 = vpop.f32.mrb[26].mxu0  ;;  %v11391_v61 = vld [vmem:[%s18276_s7 + $0x24c] ss:$16 sps:$4 sm:$0xff]   ;;  %v11392_v58 = vld [vmem:[%s18276_s7 + $0x48] ss:$16 sps:$4 sm:$0xff]  }
 0x9ae   :  { %v10114_v16 = vmul.f32 -1.442695, %v10290_v51  ;;  %v10295_v53 = vadd.f32 %v7912_v3, %v7112_v27  ;;  %v10292_v52 = vadd.f32 %v7570_v46, %v7100_v63  ;;  %v7914_v41 = vpop.f32.mrb[30].mxu1  ;;  %v7572_v2 = vpop.f32.mrb[27].mxu0  ;;  %v11385_v63 = vld [vmem:[%s18276_s7 + $0x208] ss:$16 sps:$4 sm:$0xff]  }
 0x9af   :  { %v10116_v25 = vmul.f32 -1.442695, %v10294_v45  ;;  %v10115_v44 = vmul.f32 -1.442695, %v10291_v43  ;;  %v10296_v29 = vadd.f32 %v7914_v41, %v7108_v47  ;;  %v10293_v10 = vadd.f32 %v7572_v2, %v7104_v32  ;;  %v7916_v24 = vpop.f32.mrb[31].mxu1 }
 0x9b0   :  { %11200 = vpow2.f32 %v10114_v16  ;;  %v10117_v13 = vmul.f32 -1.442695, %v10295_v53  ;;  %v10118_v0 = vmul.f32 -1.442695, %v10292_v52  ;;  %v10297_v56 = vadd.f32 %v7916_v24, %v7112_v27  ;;  %v11386_v47 = vld [vmem:[%s18276_s7 + $0x2c] ss:$16 sps:$4 sm:$0xff]  }
 0x9b1   :  { %11202 = vpow2.f32 %v10116_v25  ;;  %v10120_v19 = vmul.f32 -1.442695, %v10296_v29  ;;  %v10119_v48 = vmul.f32 -1.442695, %v10293_v10  ;;  %v11387_v32 = vld [vmem:[%s18276_s7 + $0x22c] ss:$16 sps:$4 sm:$0xff]  }
 0x9b2   :  { %11204 = vpow2.f32 %v10115_v44  ;;  %v10121_v21 = vmul.f32 -1.442695, %v10297_v56  ;;  %v11388_v27 = vld [vmem:[%s18276_s7 + $0x28] ss:$16 sps:$4 sm:$0xff]   ;;  %v11390_v51 = vld [vmem:[%s18276_s7 + $0x4c] ss:$16 sps:$4 sm:$0xff]  }
 0x9b3   :  { %11206 = vpow2.f32 %v10117_v13  ;;  %v11393_v45 = vld [vmem:[%s18276_s7 + $0x248] ss:$16 sps:$4 sm:$0xff]   ;;  %v11394_v43 = vld [vmem:[%s18276_s7 + $0x6c] ss:$16 sps:$4 sm:$0xff]  }
 0x9b4   :  { %11208 = vpow2.f32 %v10118_v0  ;;  %v11395_v3 = vld [vmem:[%s18276_s7 + $0x26c] ss:$16 sps:$4 sm:$0xff]   ;;  %v11396_v46 = vld [vmem:[%s18276_s7 + $0x68] ss:$16 sps:$4 sm:$0xff]  }
 0x9b5   :  { %11210 = vpow2.f32 %v10120_v19  ;;  %v11397_v16 = vld [vmem:[%s18276_s7 + $0x268] ss:$16 sps:$4 sm:$0xff]   ;;  %v11398_v53 = vld [vmem:[%s18276_s7 + $0x8c] ss:$16 sps:$4 sm:$0xff]  }
 0x9b6   :  { %11212 = vpow2.f32 %v10119_v48  ;;  %v11399_v52 = vld [vmem:[%s18276_s7 + $0x28c] ss:$16 sps:$4 sm:$0xff]   ;;  %v11400_v41 = vld [vmem:[%s18276_s7 + $0x88] ss:$16 sps:$4 sm:$0xff]  }
 0x9b7   :  { %11214 = vpow2.f32 %v10121_v21  ;;  %v11401_v2 = vld [vmem:[%s18276_s7 + $0x288] ss:$16 sps:$4 sm:$0xff]   ;;  %v11402_v25 = vld [vmem:[%s18276_s7 + $0xac] ss:$16 sps:$4 sm:$0xff]  }
 0x9b8   :  { %v11403_v44 = vld [vmem:[%s18276_s7 + $0x2ac] ss:$16 sps:$4 sm:$0xff]   ;;  %v11404_v29 = vld [vmem:[%s18276_s7 + $0xa8] ss:$16 sps:$4 sm:$0xff]  }
 0x9b9   :  { %v11405_v10 = vld [vmem:[%s18276_s7 + $0x2a8] ss:$16 sps:$4 sm:$0xff]   ;;  %v11406_v24 = vld [vmem:[%s18276_s7 + $0xcc] ss:$16 sps:$4 sm:$0xff]  }
 0x9ba   :  { %v11201_v28 = vpop.eup %11200  ;;  %v11407_v13 = vld [vmem:[%s18276_s7 + $0x2cc] ss:$16 sps:$4 sm:$0xff]   ;;  %v11408_v0 = vld [vmem:[%s18276_s7 + $0xc8] ss:$16 sps:$4 sm:$0xff]  }
 0x9bb   :  { %v11203_v31 = vpop.eup %11202  ;;  %v7943_v54 = vadd.f32 1.0, %v11201_v28  ;;  %v11409_v56 = vld [vmem:[%s18276_s7 + $0x2c8] ss:$16 sps:$4 sm:$0xff]   ;;  %v11410_v19 = vld [vmem:[%s18276_s7 + $0xec] ss:$16 sps:$4 sm:$0xff]  }
 0x9bc   :  { %v11205_v57 = vpop.eup %11204  ;;  %v7945_v35 = vadd.f32 1.0, %v11203_v31  ;;  %v11411_v48 = vld [vmem:[%s18276_s7 + $0x2ec] ss:$16 sps:$4 sm:$0xff]   ;;  %v11412_v21 = vld [vmem:[%s18276_s7 + $0xe8] ss:$16 sps:$4 sm:$0xff]  }
 0x9bd   :  { %v11207_v17 = vpop.eup %11206  ;;  %11216 = vrcp.f32 %v7943_v54  ;;  %v7944_v62 = vadd.f32 1.0, %v11205_v57  ;;  %v11413_v28 = vld [vmem:[%s18276_s7 + $0x2e8] ss:$16 sps:$4 sm:$0xff]   ;;  %v11414_v31 = vld [vmem:[%s18276_s7 + $0x10c] ss:$16 sps:$4 sm:$0xff]  }
 0x9be   :  { %v11209_v38 = vpop.eup %11208  ;;  %11218 = vrcp.f32 %v7945_v35  ;;  %v7946_v23 = vadd.f32 1.0, %v11207_v17  ;;  %v11415_v54 = vld [vmem:[%s18276_s7 + $0x30c] ss:$16 sps:$4 sm:$0xff]   ;;  %v11416_v57 = vld [vmem:[%s18276_s7 + $0x108] ss:$16 sps:$4 sm:$0xff]  }
 0x9bf   :  { %v11211_v49 = vpop.eup %11210  ;;  %11220 = vrcp.f32 %v7944_v62  ;;  %v7947_v50 = vadd.f32 1.0, %v11209_v38  ;;  %v11417_v35 = vld [vmem:[%s18276_s7 + $0x308] ss:$16 sps:$4 sm:$0xff]   ;;  %v11418_v17 = vld [vmem:[%s18276_s7 + $0x12c] ss:$16 sps:$4 sm:$0xff]  }
 0x9c0   :  { %v11213_v30 = vpop.eup %11212  ;;  %11222 = vrcp.f32 %v7946_v23  ;;  %v7949_v1 = vadd.f32 1.0, %v11211_v49  ;;  %v11419_v62 = vld [vmem:[%s18276_s7 + $0x32c] ss:$16 sps:$4 sm:$0xff]   ;;  %v11420_v38 = vld [vmem:[%s18276_s7 + $0x128] ss:$16 sps:$4 sm:$0xff]  }
 0x9c1   :  { %v11215_v4 = vpop.eup %11214  ;;  %11224 = vrcp.f32 %v7947_v50  ;;  %v7948_v11 = vadd.f32 1.0, %v11213_v30  ;;  %v11421_v23 = vld [vmem:[%s18276_s7 + $0x328] ss:$16 sps:$4 sm:$0xff]   ;;  %v11422_v49 = vld [vmem:[%s18276_s7 + $0x14c] ss:$16 sps:$4 sm:$0xff]  }
 0x9c2   :  { %11226 = vrcp.f32 %v7949_v1  ;;  %v7950_v14 = vadd.f32 1.0, %v11215_v4  ;;  %v11423_v50 = vld [vmem:[%s18276_s7 + $0x34c] ss:$16 sps:$4 sm:$0xff]   ;;  %v11424_v30 = vld [vmem:[%s18276_s7 + $0x148] ss:$16 sps:$4 sm:$0xff]  }
 0x9c3   :  { %11228 = vrcp.f32 %v7948_v11  ;;  %v11425_v1 = vld [vmem:[%s18276_s7 + $0x348] ss:$16 sps:$4 sm:$0xff]   ;;  %v11426_v4 = vld [vmem:[%s18276_s7 + $0x16c] ss:$16 sps:$4 sm:$0xff]  }
 0x9c4   :  { %11230 = vrcp.f32 %v7950_v14  ;;  %v11427_v11 = vld [vmem:[%s18276_s7 + $0x36c] ss:$16 sps:$4 sm:$0xff]   ;;  %v11428_v14 = vld [vmem:[%s18276_s7 + $0x168] ss:$16 sps:$4 sm:$0xff]  }
 0x9c7   :  { %v11217_v40 = vpop.eup %11216 }
 0x9c8   :  { %v11219_v7 = vpop.eup %11218 }
 0x9c9   :  { %v11221_v22 = vpop.eup %11220 }
 0x9ca   :  { %v11223_v9 = vpop.eup %11222 }
 0x9cb   :  { %v11225_v15 = vpop.eup %11224 }
 0x9cc   :  { %v11227_v12 = vpop.eup %11226  ;;  %v7967_v34 = vpack.c.bf16 %v11225_v15, %v11217_v40  ;;  %v11429_v40 = vld [vmem:[%s18276_s7 + $0x368] ss:$16 sps:$4 sm:$0xff]  }
 0x9cd   :  { %v11229_v6 = vpop.eup %11228  ;;  %v17257_v8 = vpack.c.bf16 %v11227_v12, %v11219_v7  ;;  %v11430_v7 = vld [vmem:[%s18276_s7 + $0x18c] ss:$16 sps:$4 sm:$0xff]   ;;  %v11433_v15 = vld [vmem:[%s18276_s7 + $0x388] ss:$16 sps:$4 sm:$0xff]  }
 0x9ce   :  { %v11231_v60 = vpop.eup %11230  ;;  %v7968_v42 = vpack.c.bf16 %v11229_v6, %v11221_v22  ;;  %v11431_v22 = vld [vmem:[%s18276_s7 + $0x38c] ss:$16 sps:$4 sm:$0xff]   ;;  %v11436_v6 = vld [vmem:[%s18276_s7 + $0x1a8] ss:$16 sps:$4 sm:$0xff]  }
 0x9cf   :  { %v7970_v33 = vpack.c.bf16 %v11231_v60, %v11223_v9  ;;  %v11432_v9 = vld [vmem:[%s18276_s7 + $0x188] ss:$16 sps:$4 sm:$0xff]   ;;  %v11434_v12 = vld [vmem:[%s18276_s7 + $0x1ac] ss:$16 sps:$4 sm:$0xff]  }
 0x9d0   :  { %8126 = vmatprep.mubr.bf16.mxu0 %v7968_v42  ;;  %8212 = vmatprep.mubr.bf16.mxu1 %v7968_v42  ;;  %v11437_v60 = vld [vmem:[%s18276_s7 + $0x3a8] ss:$16 sps:$4 sm:$0xff]   ;;  %v11438_v42 = vld [vmem:[%s18276_s7 + $0x1cc] ss:$16 sps:$4 sm:$0xff]  }
 0x9d1   :  { %8127 = vmatmul.mubr.bf16.vlgmr.msra.gmra.mrb[28].mxu0 %v7967_v34  ;;  %8213 = vmatmul.mubr.bf16.vlgmr.msra.gmra.mrb[32].mxu1 %v7967_v34  ;;  %v11435_v34 = vld [vmem:[%s18276_s7 + $0x3ac] ss:$16 sps:$4 sm:$0xff]  }
 0x9d2   :  { %8138 = vmatpush1.bf16.xpose.msra.mxu0 %v11384_v18  ;;  %8224 = vmatpush1.bf16.xpose.msra.mxu1 %v11385_v63  ;;  %v11440_v18 = vld [vmem:[%s18276_s7 + $0x1c8] ss:$16 sps:$4 sm:$0xff]  }
 0x9d3   :  { %10138 = vmatprep.mubr.msk.bf16.mxu0 %vm19790_vm0, %v7970_v33  ;;  %10155 = vmatprep.mubr.msk.bf16.mxu1 %vm19791_vm2, %v7970_v33  ;;  %vm19806_vm2 = vmmov %vm19790_vm0  ;;  %v11439_v33 = vld [vmem:[%s18276_s7 + $0x3cc] ss:$16 sps:$4 sm:$0xff]   ;;  %v11441_v63 = vld [vmem:[%s18276_s7 + $0x3c8] ss:$16 sps:$4 sm:$0xff]  }
 0x9d4   :  { %10123 = vmatprep.subr.msk.bf16.mxu0 %vm19792_vm8, %v11386_v47  ;;  %10140 = vmatprep.subr.msk.bf16.mxu1 %vm19793_vm13, %v11387_v32  ;;  %vm19807_vm8 = vmmov %vm19790_vm0  ;;  %v11442_v47 = vld [vmem:[%s18276_s7 + $0x1ec] ss:$16 sps:$4 sm:$0xff]  }
 0x9d5   :  { %vm19808_vm13 = vmmov %vm19790_vm0  ;;  %v19820_v32 = vld [vmem:[#allocation10_spill] sm:$0xff] }
 0x9da   :  { %8140 = vmatpush1.bf16.xpose.msra.mxu0 %v11388_v27  ;;  %8226 = vmatpush1.bf16.xpose.msra.mxu1 %v11389_v39  ;;  %v11443_v27 = vld [vmem:[%s18276_s7 + $0x1e8] ss:$16 sps:$4 sm:$0xff]  }
 0x9db   :  { %10124 = vmatprep.subr.msk.bf16.mxu0 %vm19794_vm14, %v11390_v51  ;;  %10141 = vmatprep.subr.msk.bf16.mxu1 %vm19795_vm15, %v11391_v61  ;;  %vm19809_vm14 = vmmov %vm19790_vm0  ;;  %v19822_v39 = vld [vmem:[#allocation12_spill] sm:$0xff]  ;;  %v11444_v51 = vld [vmem:[%s18273_s4 + $0x4] ss:$16 sps:$4 sm:$0xff]  }
 0x9dc   :  { %vm19810_vm15 = vmmov %vm19790_vm0  ;;  %v11445_v61 = vld [vmem:[%s18273_s4 + $0x204] ss:$16 sps:$4 sm:$0xff]  }
 0x9e2   :  { %8142 = vmatpush1.bf16.xpose.msra.mxu0 %v11392_v58  ;;  %8228 = vmatpush1.bf16.xpose.msra.mxu1 %v11393_v45  ;;  %v11446_v58 = vld [vmem:[%s18273_s4] ss:$16 sps:$4 sm:$0xff]  }
 0x9e3   :  { %10125 = vmatprep.subr.msk.bf16.mxu0 %vm19796_vm1, %v11394_v43  ;;  %10142 = vmatprep.subr.msk.bf16.mxu1 %vm19797_vm6, %v11395_v3  ;;  %vm19811_vm1 = vmmov %vm19790_vm0  ;;  %v11447_v45 = vld [vmem:[%s18273_s4 + $0x200] ss:$16 sps:$4 sm:$0xff]   ;;  %v11448_v43 = vld [vmem:[%s18273_s4 + $0x24] ss:$16 sps:$4 sm:$0xff]  }
 0x9e4   :  { %vm19812_vm6 = vmmov %vm19790_vm0  ;;  %v11449_v3 = vld [vmem:[%s18273_s4 + $0x224] ss:$16 sps:$4 sm:$0xff]  }
 0x9ea   :  { %8144 = vmatpush1.bf16.xpose.msra.mxu0 %v11396_v46  ;;  %8230 = vmatpush1.bf16.xpose.msra.mxu1 %v11397_v16  ;;  %v11451_v46 = vld [vmem:[%s18273_s4 + $0x220] ss:$16 sps:$4 sm:$0xff]   ;;  %v11452_v16 = vld [vmem:[%s18273_s4 + $0x44] ss:$16 sps:$4 sm:$0xff]  }
 0x9eb   :  { %10126 = vmatprep.subr.msk.bf16.mxu0 %vm19798_vm5, %v11398_v53  ;;  %10143 = vmatprep.subr.msk.bf16.mxu1 %vm19799_vm11, %v11399_v52  ;;  %vm19813_vm5 = vmmov %vm19790_vm0  ;;  %v11453_v53 = vld [vmem:[%s18273_s4 + $0x244] ss:$16 sps:$4 sm:$0xff]   ;;  %v11454_v52 = vld [vmem:[%s18273_s4 + $0x40] ss:$16 sps:$4 sm:$0xff]  }
 0x9ec   :  { %vm19814_vm11 = vmmov %vm19790_vm0 }
 0x9f2   :  { %8146 = vmatpush1.bf16.xpose.msra.mxu0 %v11400_v41  ;;  %8232 = vmatpush1.bf16.xpose.msra.mxu1 %v11401_v2  ;;  %v11455_v41 = vld [vmem:[%s18273_s4 + $0x240] ss:$16 sps:$4 sm:$0xff]   ;;  %v11456_v2 = vld [vmem:[%s18273_s4 + $0x64] ss:$16 sps:$4 sm:$0xff]  }
 0x9f3   :  { %10127 = vmatprep.subr.msk.bf16.mxu0 %vm19800_vm4, %v11402_v25  ;;  %10144 = vmatprep.subr.msk.bf16.mxu1 %vm19801_vm12, %v11403_v44  ;;  %vm19815_vm4 = vmmov %vm19790_vm0  ;;  %v11457_v25 = vld [vmem:[%s18273_s4 + $0x264] ss:$16 sps:$4 sm:$0xff]   ;;  %v11458_v44 = vld [vmem:[%s18273_s4 + $0x60] ss:$16 sps:$4 sm:$0xff]  }
 0x9f4   :  { %vm19816_vm12 = vmmov %vm19790_vm0 }
 0x9fa   :  { %8148 = vmatpush1.bf16.xpose.msra.mxu0 %v11404_v29  ;;  %8234 = vmatpush1.bf16.xpose.msra.mxu1 %v11405_v10  ;;  %v11459_v29 = vld [vmem:[%s18273_s4 + $0x260] ss:$16 sps:$4 sm:$0xff]   ;;  %v11460_v10 = vld [vmem:[%s18273_s4 + $0x84] ss:$16 sps:$4 sm:$0xff]  }
 0x9fb   :  { %10128 = vmatprep.subr.msk.bf16.mxu0 %vm19802_vm9, %v11406_v24  ;;  %10145 = vmatprep.subr.msk.bf16.mxu1 %vm19803_vm10, %v11407_v13  ;;  %vm19817_vm9 = vmmov %vm19790_vm0  ;;  %v11461_v24 = vld [vmem:[%s18273_s4 + $0x284] ss:$16 sps:$4 sm:$0xff]   ;;  %v11462_v13 = vld [vmem:[%s18273_s4 + $0x80] ss:$16 sps:$4 sm:$0xff]  }
 0x9fc   :  { %vm19818_vm10 = vmmov %vm19790_vm0 }
 0xa02   :  { %8150 = vmatpush1.bf16.xpose.msra.mxu0 %v11408_v0  ;;  %8236 = vmatpush1.bf16.xpose.msra.mxu1 %v11409_v56  ;;  %v11463_v0 = vld [vmem:[%s18273_s4 + $0x280] ss:$16 sps:$4 sm:$0xff]   ;;  %v11464_v56 = vld [vmem:[%s18273_s4 + $0xa4] ss:$16 sps:$4 sm:$0xff]  }
 0xa03   :  { %10129 = vmatprep.subr.msk.bf16.mxu0 %vm19804_vm3, %v11410_v19  ;;  %10146 = vmatprep.subr.msk.bf16.mxu1 %vm19805_vm7, %v11411_v48  ;;  %vm19819_vm3 = vmmov %vm19790_vm0  ;;  %v11465_v19 = vld [vmem:[%s18273_s4 + $0x2a4] ss:$16 sps:$4 sm:$0xff]   ;;  %v11466_v48 = vld [vmem:[%s18273_s4 + $0xa0] ss:$16 sps:$4 sm:$0xff]  }
 0xa04   :  { %vm19821_vm7 = vmmov %vm19790_vm0 }
 0xa0a   :  { %8152 = vmatpush1.bf16.xpose.msra.mxu0 %v11412_v21  ;;  %8238 = vmatpush1.bf16.xpose.msra.mxu1 %v11413_v28  ;;  %v11467_v21 = vld [vmem:[%s18273_s4 + $0x2a0] ss:$16 sps:$4 sm:$0xff]   ;;  %v11468_v28 = vld [vmem:[%s18273_s4 + $0xc4] ss:$16 sps:$4 sm:$0xff]  }
 0xa0b   :  { %10130 = vmatprep.subr.msk.bf16.mxu0 %vm19790_vm0, %v11414_v31  ;;  %10147 = vmatprep.subr.msk.bf16.mxu1 %vm19806_vm2, %v11415_v54  ;;  %v11469_v31 = vld [vmem:[%s18273_s4 + $0x2c4] ss:$16 sps:$4 sm:$0xff]   ;;  %v11470_v54 = vld [vmem:[%s18273_s4 + $0xc0] ss:$16 sps:$4 sm:$0xff]   ;;  %vm19823_vm2 = vmmov %vm19790_vm0 }
 0xa12   :  { %8154 = vmatpush1.bf16.xpose.msra.mxu0 %v11416_v57  ;;  %8240 = vmatpush1.bf16.xpose.msra.mxu1 %v11417_v35  ;;  %v11471_v57 = vld [vmem:[%s18273_s4 + $0x2c0] ss:$16 sps:$4 sm:$0xff]   ;;  %v11472_v35 = vld [vmem:[%s18273_s4 + $0xe4] ss:$16 sps:$4 sm:$0xff]  }
 0xa13   :  { %10131 = vmatprep.subr.msk.bf16.mxu0 %vm19807_vm8, %v11418_v17  ;;  %10148 = vmatprep.subr.msk.bf16.mxu1 %vm19808_vm13, %v11419_v62  ;;  %v11473_v17 = vld [vmem:[%s18273_s4 + $0x2e4] ss:$16 sps:$4 sm:$0xff]   ;;  %v11474_v62 = vld [vmem:[%s18273_s4 + $0xe0] ss:$16 sps:$4 sm:$0xff]   ;;  %vm19824_vm8 = vmmov %vm19790_vm0 }
 0xa14   :  { %vm19825_vm13 = vmmov %vm19790_vm0 }
 0xa1a   :  { %8156 = vmatpush1.bf16.xpose.msra.mxu0 %v11420_v38  ;;  %8242 = vmatpush1.bf16.xpose.msra.mxu1 %v11421_v23  ;;  %v11475_v38 = vld [vmem:[%s18273_s4 + $0x2e0] ss:$16 sps:$4 sm:$0xff]   ;;  %v11476_v23 = vld [vmem:[%s18273_s4 + $0x104] ss:$16 sps:$4 sm:$0xff]  }
 0xa1b   :  { %10132 = vmatprep.subr.msk.bf16.mxu0 %vm19809_vm14, %v11422_v49  ;;  %10149 = vmatprep.subr.msk.bf16.mxu1 %vm19810_vm15, %v11423_v50  ;;  %v11477_v49 = vld [vmem:[%s18273_s4 + $0x304] ss:$16 sps:$4 sm:$0xff]   ;;  %v11478_v50 = vld [vmem:[%s18273_s4 + $0x100] ss:$16 sps:$4 sm:$0xff]   ;;  %vm19826_vm14 = vmmov %vm19790_vm0 }
 0xa1c   :  { %vm19827_vm15 = vmmov %vm19790_vm0 }
 0xa22   :  { %8158 = vmatpush1.bf16.xpose.msra.mxu0 %v11424_v30  ;;  %8244 = vmatpush1.bf16.xpose.msra.mxu1 %v11425_v1  ;;  %v11479_v30 = vld [vmem:[%s18273_s4 + $0x300] ss:$16 sps:$4 sm:$0xff]   ;;  %v11480_v1 = vld [vmem:[%s18273_s4 + $0x124] ss:$16 sps:$4 sm:$0xff]  }
 0xa23   :  { %10133 = vmatprep.subr.msk.bf16.mxu0 %vm19811_vm1, %v11426_v4  ;;  %10150 = vmatprep.subr.msk.bf16.mxu1 %vm19812_vm6, %v11427_v11  ;;  %v11481_v4 = vld [vmem:[%s18273_s4 + $0x324] ss:$16 sps:$4 sm:$0xff]   ;;  %v11482_v11 = vld [vmem:[%s18273_s4 + $0x120] ss:$16 sps:$4 sm:$0xff]   ;;  %vm19828_vm1 = vmmov %vm19790_vm0 }
 0xa24   :  { %vm19829_vm6 = vmmov %vm19790_vm0 }
 0xa2a   :  { %8160 = vmatpush1.bf16.xpose.msra.mxu0 %v11428_v14  ;;  %8246 = vmatpush1.bf16.xpose.msra.mxu1 %v11429_v40  ;;  %v11483_v14 = vld [vmem:[%s18273_s4 + $0x320] ss:$16 sps:$4 sm:$0xff]   ;;  %v11484_v40 = vld [vmem:[%s18273_s4 + $0x144] ss:$16 sps:$4 sm:$0xff]  }
 0xa2b   :  { %10134 = vmatprep.subr.msk.bf16.mxu0 %vm19813_vm5, %v11430_v7  ;;  %10151 = vmatprep.subr.msk.bf16.mxu1 %vm19814_vm11, %v11431_v22  ;;  %v11485_v7 = vld [vmem:[%s18273_s4 + $0x344] ss:$16 sps:$4 sm:$0xff]   ;;  %v11486_v22 = vld [vmem:[%s18273_s4 + $0x140] ss:$16 sps:$4 sm:$0xff]   ;;  %vm19830_vm5 = vmmov %vm19790_vm0 }
 0xa2c   :  { %vm19831_vm11 = vmmov %vm19790_vm0 }
 0xa32   :  { %8162 = vmatpush1.bf16.xpose.msra.mxu0 %v11432_v9  ;;  %8248 = vmatpush1.bf16.xpose.msra.mxu1 %v11433_v15  ;;  %v11487_v9 = vld [vmem:[%s18273_s4 + $0x340] ss:$16 sps:$4 sm:$0xff]   ;;  %v11488_v15 = vld [vmem:[%s18273_s4 + $0x164] ss:$16 sps:$4 sm:$0xff]  }
 0xa33   :  { %10135 = vmatprep.subr.msk.bf16.mxu0 %vm19815_vm4, %v11434_v12  ;;  %10152 = vmatprep.subr.msk.bf16.mxu1 %vm19816_vm12, %v11435_v34  ;;  %v11489_v12 = vld [vmem:[%s18273_s4 + $0x364] ss:$16 sps:$4 sm:$0xff]   ;;  %v11490_v34 = vld [vmem:[%s18273_s4 + $0x160] ss:$16 sps:$4 sm:$0xff]   ;;  %vm19832_vm4 = vmmov %vm19790_vm0 }
 0xa34   :  { %vm19833_vm12 = vmmov %vm19790_vm0 }
 0xa3a   :  { %8164 = vmatpush1.bf16.xpose.msra.mxu0 %v11436_v6  ;;  %8250 = vmatpush1.bf16.xpose.msra.mxu1 %v11437_v60  ;;  %v11491_v6 = vld [vmem:[%s18273_s4 + $0x360] ss:$16 sps:$4 sm:$0xff]   ;;  %v11492_v60 = vld [vmem:[%s18273_s4 + $0x184] ss:$16 sps:$4 sm:$0xff]  }
 0xa3b   :  { %10136 = vmatprep.subr.msk.bf16.mxu0 %vm19817_vm9, %v11438_v42  ;;  %10153 = vmatprep.subr.msk.bf16.mxu1 %vm19818_vm10, %v11439_v33  ;;  %v11493_v42 = vld [vmem:[%s18273_s4 + $0x384] ss:$16 sps:$4 sm:$0xff]   ;;  %v11494_v33 = vld [vmem:[%s18273_s4 + $0x180] ss:$16 sps:$4 sm:$0xff]   ;;  %vm19834_vm9 = vmmov %vm19790_vm0 }
 0xa3c   :  { %vm19835_vm10 = vmmov %vm19790_vm0 }
 0xa42   :  { %8166 = vmatpush1.bf16.xpose.msra.mxu0 %v11440_v18  ;;  %8252 = vmatpush1.bf16.xpose.msra.mxu1 %v11441_v63  ;;  %v11495_v18 = vld [vmem:[%s18273_s4 + $0x380] ss:$16 sps:$4 sm:$0xff]   ;;  %v11496_v63 = vld [vmem:[%s18273_s4 + $0x1a4] ss:$16 sps:$4 sm:$0xff]  }
 0xa43   :  { %10137 = vmatprep.subr.msk.bf16.mxu0 %vm19819_vm3, %v11442_v47  ;;  %10154 = vmatprep.subr.msk.bf16.mxu1 %vm19821_vm7, %v19820_v32  ;;  %v11497_v47 = vld [vmem:[%s18273_s4 + $0x3a4] ss:$16 sps:$4 sm:$0xff]   ;;  %v11498_v32 = vld [vmem:[%s18273_s4 + $0x1a0] ss:$16 sps:$4 sm:$0xff]   ;;  %vm19836_vm3 = vmmov %vm19790_vm0 }
 0xa44   :  { %vm19837_vm7 = vmmov %vm19790_vm0 }
 0xa4a   :  { %8168 = vmatpush1.bf16.xpose.msra.mxu0 %v11443_v27  ;;  %8254 = vmatpush1.bf16.xpose.msra.mxu1 %v19822_v39  ;;  %v11499_v27 = vld [vmem:[%s18273_s4 + $0x3a0] ss:$16 sps:$4 sm:$0xff]   ;;  %v11500_v39 = vld [vmem:[%s18273_s4 + $0x1c4] ss:$16 sps:$4 sm:$0xff]  }
 0xa4b   :  { %8526 = vmatprep.subr.bf16.mxu0 %v11444_v51  ;;  %8612 = vmatprep.subr.bf16.mxu1 %v11445_v61  ;;  %v11501_v51 = vld [vmem:[%s18273_s4 + $0x3c4] ss:$16 sps:$4 sm:$0xff]   ;;  %v11502_v61 = vld [vmem:[%s18273_s4 + $0x1c0] ss:$16 sps:$4 sm:$0xff]  }
 0xa51   :  { %8170 = vmatmul.mubr.bf16.vlgmr.msra.gmra.mrb[28].mxu0 %v17257_v8  ;;  %8256 = vmatmul.mubr.bf16.vlgmr.msra.gmra.mrb[32].mxu1 %v17257_v8  ;;  %v11450_v8 = vld [vmem:[%s18273_s4 + $0x20] ss:$16 sps:$4 sm:$0xff]  }
 0xa52   :  { %8527 = vmatpush1.bf16.xpose.msra.mxu0 %v11446_v58  ;;  %8613 = vmatpush1.bf16.xpose.msra.mxu1 %v11447_v45  ;;  %v11503_v58 = vld [vmem:[%s18273_s4 + $0x3c0] ss:$16 sps:$4 sm:$0xff]   ;;  %v11504_v45 = vld [vmem:[%s18273_s4 + $0x1e4] ss:$16 sps:$4 sm:$0xff]  }
 0xa53   :  { %8528 = vmatprep.subr.bf16.mxu0 %v11448_v43  ;;  %8614 = vmatprep.subr.bf16.mxu1 %v11449_v3  ;;  %v11505_v43 = vld [vmem:[%s18273_s4 + $0x3e4] ss:$16 sps:$4 sm:$0xff]   ;;  %v11506_v3 = vld [vmem:[%s18273_s4 + $0x1e0] ss:$16 sps:$4 sm:$0xff]  }
 0xa5a   :  { %8529 = vmatpush1.bf16.xpose.msra.mxu0 %v11450_v8  ;;  %8615 = vmatpush1.bf16.xpose.msra.mxu1 %v11451_v46  ;;  %v11507_v8 = vld [vmem:[%s18273_s4 + $0x3e0] ss:$16 sps:$4 sm:$0xff]   ;;  %v11508_v46 = vld [vmem:[%s18273_s4 + $0xc] ss:$16 sps:$4 sm:$0xff]  }
 0xa5b   :  { %8530 = vmatprep.subr.bf16.mxu0 %v11452_v16  ;;  %8616 = vmatprep.subr.bf16.mxu1 %v11453_v53  ;;  %v11509_v16 = vld [vmem:[%s18273_s4 + $0x20c] ss:$16 sps:$4 sm:$0xff]   ;;  %v7971_v53 = vld [vmem:[%s18278_s9] sm:$0xf] }
 0xa62   :  { %8531 = vmatpush1.bf16.xpose.msra.mxu0 %v11454_v52  ;;  %8617 = vmatpush1.bf16.xpose.msra.mxu1 %v11455_v41  ;;  %v7976_v52 = vrot.slane %v7971_v53, %v19305_v20  ;;  %v7984_v41 = vrot.slane %v7971_v53, %v19307_v59 }
 0xa63   :  { %8532 = vmatprep.subr.bf16.mxu0 %v11456_v2  ;;  %8618 = vmatprep.subr.bf16.mxu1 %v11457_v25  ;;  %v7980_v2 = vrot.slane %v7971_v53, %v19308_v26  ;;  %v7988_v25 = vrot.slane %v7971_v53, %v19309_v37  ;;  %v11510_v53 = vld [vmem:[%s18273_s4 + $0x8] ss:$16 sps:$4 sm:$0xff]  }
 0xa6a   :  { %8533 = vmatpush1.bf16.xpose.msra.mxu0 %v11458_v44  ;;  %8619 = vmatpush1.bf16.xpose.msra.mxu1 %v11459_v29 }
 0xa6b   :  { %8534 = vmatprep.subr.bf16.mxu0 %v11460_v10  ;;  %8620 = vmatprep.subr.bf16.mxu1 %v11461_v24 }
 0xa72   :  { %8535 = vmatpush1.bf16.xpose.msra.mxu0 %v11462_v13  ;;  %8621 = vmatpush1.bf16.xpose.msra.mxu1 %v11463_v0 }
 0xa73   :  { %8536 = vmatprep.subr.bf16.mxu0 %v11464_v56  ;;  %8622 = vmatprep.subr.bf16.mxu1 %v11465_v19 }
 0xa7a   :  { %8537 = vmatpush1.bf16.xpose.msra.mxu0 %v11466_v48  ;;  %8623 = vmatpush1.bf16.xpose.msra.mxu1 %v11467_v21 }
 0xa7b   :  { %8538 = vmatprep.subr.bf16.mxu0 %v11468_v28  ;;  %8624 = vmatprep.subr.bf16.mxu1 %v11469_v31 }
 0xa82   :  { %8539 = vmatpush1.bf16.xpose.msra.mxu0 %v11470_v54  ;;  %8625 = vmatpush1.bf16.xpose.msra.mxu1 %v11471_v57 }
 0xa83   :  { %8540 = vmatprep.subr.bf16.mxu0 %v11472_v35  ;;  %8626 = vmatprep.subr.bf16.mxu1 %v11473_v17 }
 0xa8a   :  { %8541 = vmatpush1.bf16.xpose.msra.mxu0 %v11474_v62  ;;  %8627 = vmatpush1.bf16.xpose.msra.mxu1 %v11475_v38 }
 0xa8b   :  { %8542 = vmatprep.subr.bf16.mxu0 %v11476_v23  ;;  %8628 = vmatprep.subr.bf16.mxu1 %v11477_v49 }
 0xa92   :  { %8543 = vmatpush1.bf16.xpose.msra.mxu0 %v11478_v50  ;;  %8629 = vmatpush1.bf16.xpose.msra.mxu1 %v11479_v30 }
 0xa93   :  { %8544 = vmatprep.subr.bf16.mxu0 %v11480_v1  ;;  %8630 = vmatprep.subr.bf16.mxu1 %v11481_v4 }
 0xa9a   :  { %8545 = vmatpush1.bf16.xpose.msra.mxu0 %v11482_v11  ;;  %8631 = vmatpush1.bf16.xpose.msra.mxu1 %v11483_v14 }
 0xa9b   :  { %8546 = vmatprep.subr.bf16.mxu0 %v11484_v40  ;;  %8632 = vmatprep.subr.bf16.mxu1 %v11485_v7 }
 0xaa2   :  { %8547 = vmatpush1.bf16.xpose.msra.mxu0 %v11486_v22  ;;  %8633 = vmatpush1.bf16.xpose.msra.mxu1 %v11487_v9 }
 0xaa3   :  { %8548 = vmatprep.subr.bf16.mxu0 %v11488_v15  ;;  %8634 = vmatprep.subr.bf16.mxu1 %v11489_v12 }
 0xaaa   :  { %8549 = vmatpush1.bf16.xpose.msra.mxu0 %v11490_v34  ;;  %8635 = vmatpush1.bf16.xpose.msra.mxu1 %v11491_v6 }
 0xaab   :  { %8550 = vmatprep.subr.bf16.mxu0 %v11492_v60  ;;  %8636 = vmatprep.subr.bf16.mxu1 %v11493_v42 }
 0xab2   :  { %8551 = vmatpush1.bf16.xpose.msra.mxu0 %v11494_v33  ;;  %8637 = vmatpush1.bf16.xpose.msra.mxu1 %v11495_v18 }
 0xab3   :  { %8552 = vmatprep.subr.bf16.mxu0 %v11496_v63  ;;  %8638 = vmatprep.subr.bf16.mxu1 %v11497_v47 }
 0xaba   :  { %8553 = vmatpush1.bf16.xpose.msra.mxu0 %v11498_v32  ;;  %8639 = vmatpush1.bf16.xpose.msra.mxu1 %v11499_v27 }
 0xabb   :  { %8554 = vmatprep.subr.bf16.mxu0 %v11500_v39  ;;  %8640 = vmatprep.subr.bf16.mxu1 %v11501_v51 }
 0xac2   :  { %8555 = vmatpush1.bf16.xpose.msra.mxu0 %v11502_v61  ;;  %8641 = vmatpush1.bf16.xpose.msra.mxu1 %v11503_v58 }
 0xac3   :  { %8556 = vmatprep.subr.bf16.mxu0 %v11504_v45  ;;  %8642 = vmatprep.subr.bf16.mxu1 %v11505_v43 }
 0xaca   :  { %8557 = vmatpush1.bf16.xpose.msra.mxu0 %v11506_v3  ;;  %8643 = vmatpush1.bf16.xpose.msra.mxu1 %v11507_v8 }
 0xacb   :  { %10164 = vmatprep.subr.msk.bf16.mxu0 %vm19790_vm0, %v11508_v46  ;;  %10181 = vmatprep.subr.msk.bf16.mxu1 %vm19823_vm2, %v11509_v16  ;;  %vm19838_vm2 = vmmov %vm19790_vm0 }
 0xb24   :  { %v8171_v44 = vpop.f32.mrb[28].mxu0  ;;  %v8257_v29 = vpop.f32.mrb[32].mxu1 }
 0xb25   :  { %v10298_v10 = vadd.f32 %v8171_v44, %v7976_v52  ;;  %v10302_v24 = vadd.f32 %v8257_v29, %v7984_v41  ;;  %v8173_v13 = vpop.f32.mrb[29].mxu0  ;;  %v8259_v0 = vpop.f32.mrb[33].mxu1  ;;  %v11515_v44 = vld [vmem:[%s18273_s4 + $0x228] ss:$16 sps:$4 sm:$0xff]   ;;  %v11516_v29 = vld [vmem:[%s18273_s4 + $0x4c] ss:$16 sps:$4 sm:$0xff]  }
 0xb26   :  { %v10299_v56 = vadd.f32 %v8173_v13, %v7980_v2  ;;  %v10303_v19 = vadd.f32 %v8259_v0, %v7988_v25  ;;  %v8175_v48 = vpop.f32.mrb[30].mxu0  ;;  %v8261_v21 = vpop.f32.mrb[34].mxu1  ;;  %v11519_v13 = vld [vmem:[%s18273_s4 + $0x248] ss:$16 sps:$4 sm:$0xff]   ;;  %v11520_v0 = vld [vmem:[%s18273_s4 + $0x6c] ss:$16 sps:$4 sm:$0xff]  }
 0xb27   :  { %v10156_v28 = vmul.f32 -1.442695, %v10298_v10  ;;  %v10158_v31 = vmul.f32 -1.442695, %v10302_v24  ;;  %v10300_v54 = vadd.f32 %v8175_v48, %v7976_v52  ;;  %v10304_v57 = vadd.f32 %v8261_v21, %v7984_v41  ;;  %v8177_v35 = vpop.f32.mrb[31].mxu0  ;;  %v8263_v17 = vpop.f32.mrb[35].mxu1 }
 0xb28   :  { %v10157_v62 = vmul.f32 -1.442695, %v10299_v56  ;;  %v10159_v38 = vmul.f32 -1.442695, %v10303_v19  ;;  %v10301_v23 = vadd.f32 %v8177_v35, %v7980_v2  ;;  %v10305_v49 = vadd.f32 %v8263_v17, %v7988_v25  ;;  %v11511_v52 = vld [vmem:[%s18273_s4 + $0x208] ss:$16 sps:$4 sm:$0xff]  }
 0xb29   :  { %11232 = vpow2.f32 %v10156_v28  ;;  %v10160_v50 = vmul.f32 -1.442695, %v10300_v54  ;;  %v10162_v30 = vmul.f32 -1.442695, %v10304_v57  ;;  %v11512_v41 = vld [vmem:[%s18273_s4 + $0x2c] ss:$16 sps:$4 sm:$0xff]  }
 0xb2a   :  { %11234 = vpow2.f32 %v10158_v31  ;;  %v10161_v1 = vmul.f32 -1.442695, %v10301_v23  ;;  %v10163_v4 = vmul.f32 -1.442695, %v10305_v49  ;;  %v11513_v2 = vld [vmem:[%s18273_s4 + $0x22c] ss:$16 sps:$4 sm:$0xff]  }
 0xb2b   :  { %11236 = vpow2.f32 %v10157_v62  ;;  %v11514_v25 = vld [vmem:[%s18273_s4 + $0x28] ss:$16 sps:$4 sm:$0xff]   ;;  %v11517_v10 = vld [vmem:[%s18273_s4 + $0x24c] ss:$16 sps:$4 sm:$0xff]  }
 0xb2c   :  { %11238 = vpow2.f32 %v10159_v38  ;;  %v11518_v24 = vld [vmem:[%s18273_s4 + $0x48] ss:$16 sps:$4 sm:$0xff]   ;;  %v11521_v56 = vld [vmem:[%s18273_s4 + $0x26c] ss:$16 sps:$4 sm:$0xff]  }
 0xb2d   :  { %11240 = vpow2.f32 %v10160_v50  ;;  %v11522_v19 = vld [vmem:[%s18273_s4 + $0x68] ss:$16 sps:$4 sm:$0xff]   ;;  %v11524_v21 = vld [vmem:[%s18273_s4 + $0x8c] ss:$16 sps:$4 sm:$0xff]  }
 0xb2e   :  { %11242 = vpow2.f32 %v10162_v30  ;;  %v11523_v48 = vld [vmem:[%s18273_s4 + $0x268] ss:$16 sps:$4 sm:$0xff]   ;;  %v11525_v28 = vld [vmem:[%s18273_s4 + $0x28c] ss:$16 sps:$4 sm:$0xff]  }
 0xb2f   :  { %11244 = vpow2.f32 %v10161_v1  ;;  %v11526_v31 = vld [vmem:[%s18273_s4 + $0x88] ss:$16 sps:$4 sm:$0xff]   ;;  %v11528_v57 = vld [vmem:[%s18273_s4 + $0xac] ss:$16 sps:$4 sm:$0xff]  }
 0xb30   :  { %11246 = vpow2.f32 %v10163_v4  ;;  %v11527_v54 = vld [vmem:[%s18273_s4 + $0x288] ss:$16 sps:$4 sm:$0xff]   ;;  %v11529_v35 = vld [vmem:[%s18273_s4 + $0x2ac] ss:$16 sps:$4 sm:$0xff]  }
 0xb31   :  { %v11530_v17 = vld [vmem:[%s18273_s4 + $0xa8] ss:$16 sps:$4 sm:$0xff]   ;;  %v11532_v38 = vld [vmem:[%s18273_s4 + $0xcc] ss:$16 sps:$4 sm:$0xff]  }
 0xb32   :  { %v11531_v62 = vld [vmem:[%s18273_s4 + $0x2a8] ss:$16 sps:$4 sm:$0xff]   ;;  %v11533_v23 = vld [vmem:[%s18273_s4 + $0x2cc] ss:$16 sps:$4 sm:$0xff]  }
 0xb33   :  { %v11233_v11 = vpop.eup %11232  ;;  %v11534_v49 = vld [vmem:[%s18273_s4 + $0xc8] ss:$16 sps:$4 sm:$0xff]   ;;  %v11536_v30 = vld [vmem:[%s18273_s4 + $0xec] ss:$16 sps:$4 sm:$0xff]  }
 0xb34   :  { %v11235_v14 = vpop.eup %11234  ;;  %v8290_v40 = vadd.f32 1.0, %v11233_v11  ;;  %v11535_v50 = vld [vmem:[%s18273_s4 + $0x2c8] ss:$16 sps:$4 sm:$0xff]   ;;  %v11537_v1 = vld [vmem:[%s18273_s4 + $0x2ec] ss:$16 sps:$4 sm:$0xff]  }
 0xb35   :  { %v11237_v7 = vpop.eup %11236  ;;  %v8292_v22 = vadd.f32 1.0, %v11235_v14  ;;  %v11538_v4 = vld [vmem:[%s18273_s4 + $0xe8] ss:$16 sps:$4 sm:$0xff]   ;;  %v11540_v14 = vld [vmem:[%s18273_s4 + $0x10c] ss:$16 sps:$4 sm:$0xff]  }
 0xb36   :  { %v11239_v9 = vpop.eup %11238  ;;  %11248 = vrcp.f32 %v8290_v40  ;;  %v8291_v15 = vadd.f32 1.0, %v11237_v7  ;;  %v11539_v11 = vld [vmem:[%s18273_s4 + $0x2e8] ss:$16 sps:$4 sm:$0xff]   ;;  %v11541_v40 = vld [vmem:[%s18273_s4 + $0x30c] ss:$16 sps:$4 sm:$0xff]  }
 0xb37   :  { %v11241_v12 = vpop.eup %11240  ;;  %11250 = vrcp.f32 %v8292_v22  ;;  %v8293_v34 = vadd.f32 1.0, %v11239_v9  ;;  %v11542_v7 = vld [vmem:[%s18273_s4 + $0x108] ss:$16 sps:$4 sm:$0xff]   ;;  %v11544_v9 = vld [vmem:[%s18273_s4 + $0x12c] ss:$16 sps:$4 sm:$0xff]  }
 0xb38   :  { %v11243_v6 = vpop.eup %11242  ;;  %11252 = vrcp.f32 %v8291_v15  ;;  %v8294_v60 = vadd.f32 1.0, %v11241_v12  ;;  %v11543_v22 = vld [vmem:[%s18273_s4 + $0x308] ss:$16 sps:$4 sm:$0xff]   ;;  %v11545_v15 = vld [vmem:[%s18273_s4 + $0x32c] ss:$16 sps:$4 sm:$0xff]  }
 0xb39   :  { %v11245_v42 = vpop.eup %11244  ;;  %11254 = vrcp.f32 %v8293_v34  ;;  %v8296_v33 = vadd.f32 1.0, %v11243_v6  ;;  %v11546_v12 = vld [vmem:[%s18273_s4 + $0x128] ss:$16 sps:$4 sm:$0xff]   ;;  %v11548_v6 = vld [vmem:[%s18273_s4 + $0x14c] ss:$16 sps:$4 sm:$0xff]  }
 0xb3a   :  { %v11247_v18 = vpop.eup %11246  ;;  %11256 = vrcp.f32 %v8294_v60  ;;  %v8295_v63 = vadd.f32 1.0, %v11245_v42  ;;  %v11547_v34 = vld [vmem:[%s18273_s4 + $0x328] ss:$16 sps:$4 sm:$0xff]   ;;  %v11549_v60 = vld [vmem:[%s18273_s4 + $0x34c] ss:$16 sps:$4 sm:$0xff]  }
 0xb3b   :  { %11258 = vrcp.f32 %v8296_v33  ;;  %v8297_v47 = vadd.f32 1.0, %v11247_v18  ;;  %v11550_v42 = vld [vmem:[%s18273_s4 + $0x148] ss:$16 sps:$4 sm:$0xff]   ;;  %v11552_v18 = vld [vmem:[%s18273_s4 + $0x16c] ss:$16 sps:$4 sm:$0xff]  }
 0xb3c   :  { %11260 = vrcp.f32 %v8295_v63  ;;  %v11551_v33 = vld [vmem:[%s18273_s4 + $0x348] ss:$16 sps:$4 sm:$0xff]   ;;  %v11553_v63 = vld [vmem:[%s18273_s4 + $0x36c] ss:$16 sps:$4 sm:$0xff]  }
 0xb3d   :  { %11262 = vrcp.f32 %v8297_v47  ;;  %v11554_v47 = vld [vmem:[%s18273_s4 + $0x168] ss:$16 sps:$4 sm:$0xff]  }
 0xb40   :  { %v11249_v32 = vpop.eup %11248 }
 0xb41   :  { %v11251_v27 = vpop.eup %11250 }
 0xb42   :  { %v11253_v39 = vpop.eup %11252 }
 0xb43   :  { %v11255_v51 = vpop.eup %11254 }
 0xb44   :  { %v11257_v61 = vpop.eup %11256 }
 0xb45   :  { %v11259_v58 = vpop.eup %11258  ;;  %v17682_v45 = vpack.c.bf16 %v11257_v61, %v11249_v32  ;;  %v11555_v32 = vld [vmem:[%s18273_s4 + $0x368] ss:$16 sps:$4 sm:$0xff]  }
 0xb46   :  { %v11261_v43 = vpop.eup %11260  ;;  %v17684_v3 = vpack.c.bf16 %v11259_v58, %v11251_v27  ;;  %v11556_v27 = vld [vmem:[%s18273_s4 + $0x18c] ss:$16 sps:$4 sm:$0xff]   ;;  %v11559_v61 = vld [vmem:[%s18273_s4 + $0x388] ss:$16 sps:$4 sm:$0xff]  }
 0xb47   :  { %v11263_v8 = vpop.eup %11262  ;;  %v17686_v46 = vpack.c.bf16 %v11261_v43, %v11253_v39  ;;  %v11557_v39 = vld [vmem:[%s18273_s4 + $0x38c] ss:$16 sps:$4 sm:$0xff]  }
 0xb48   :  { %v17688_v16 = vpack.c.bf16 %v11263_v8, %v11255_v51  ;;  %v11558_v51 = vld [vmem:[%s18273_s4 + $0x188] ss:$16 sps:$4 sm:$0xff]   ;;  %v11560_v58 = vld [vmem:[%s18273_s4 + $0x1ac] ss:$16 sps:$4 sm:$0xff]  }
 0xb49   :  { %8558 = vmatprep.mubr.bf16.mxu0 %v17686_v46  ;;  %8644 = vmatprep.mubr.bf16.mxu1 %v17686_v46  ;;  %v11561_v43 = vld [vmem:[%s18273_s4 + $0x3ac] ss:$16 sps:$4 sm:$0xff]   ;;  %v11562_v8 = vld [vmem:[%s18273_s4 + $0x1a8] ss:$16 sps:$4 sm:$0xff]  }
 0xb4a   :  { %8559 = vmatmul.mubr.bf16.vlgmr.msra.gmra.mrb[32].mxu0 %v17682_v45  ;;  %8645 = vmatmul.mubr.bf16.vlgmr.msra.gmra.mrb[36].mxu1 %v17682_v45 }
 0xb4b   :  { %8570 = vmatpush1.bf16.xpose.msra.mxu0 %v11510_v53  ;;  %8656 = vmatpush1.bf16.xpose.msra.mxu1 %v11511_v52  ;;  %v11563_v53 = vld [vmem:[%s18273_s4 + $0x3a8] ss:$16 sps:$4 sm:$0xff]   ;;  %v11564_v52 = vld [vmem:[%s18273_s4 + $0x1cc] ss:$16 sps:$4 sm:$0xff]  }
 0xb4c   :  { %10180 = vmatprep.mubr.msk.bf16.mxu0 %vm19824_vm8, %v17688_v16  ;;  %10197 = vmatprep.mubr.msk.bf16.mxu1 %vm19825_vm13, %v17688_v16  ;;  %vm19839_vm8 = vmmov %vm19790_vm0 }
 0xb4d   :  { %10165 = vmatprep.subr.msk.bf16.mxu0 %vm19826_vm14, %v11512_v41  ;;  %10182 = vmatprep.subr.msk.bf16.mxu1 %vm19827_vm15, %v11513_v2  ;;  %vm19840_vm13 = vmmov %vm19790_vm0  ;;  %v11565_v41 = vld [vmem:[%s18273_s4 + $0x3cc] ss:$16 sps:$4 sm:$0xff]   ;;  %v11566_v2 = vld [vmem:[%s18273_s4 + $0x1c8] ss:$16 sps:$4 sm:$0xff]  }
 0xb4e   :  { %vm19841_vm14 = vmmov %vm19790_vm0 }
 0xb4f   :  { %vm19842_vm15 = vmmov %vm19790_vm0 }
 0xb53   :  { %8572 = vmatpush1.bf16.xpose.msra.mxu0 %v11514_v25  ;;  %8658 = vmatpush1.bf16.xpose.msra.mxu1 %v11515_v44  ;;  %v11567_v25 = vld [vmem:[%s18273_s4 + $0x3c8] ss:$16 sps:$4 sm:$0xff]   ;;  %v11568_v44 = vld [vmem:[%s18273_s4 + $0x1ec] ss:$16 sps:$4 sm:$0xff]  }
 0xb54   :  { %10166 = vmatprep.subr.msk.bf16.mxu0 %vm19828_vm1, %v11516_v29  ;;  %10183 = vmatprep.subr.msk.bf16.mxu1 %vm19829_vm6, %v11517_v10  ;;  %vm19843_vm1 = vmmov %vm19790_vm0  ;;  %v11569_v29 = vld [vmem:[%s18273_s4 + $0x3ec] ss:$16 sps:$4 sm:$0xff]   ;;  %v11570_v10 = vld [vmem:[%s18273_s4 + $0x1e8] ss:$16 sps:$4 sm:$0xff]  }
 0xb55   :  { %vm19844_vm6 = vmmov %vm19790_vm0 }
 0xb5b   :  { %8574 = vmatpush1.bf16.xpose.msra.mxu0 %v11518_v24  ;;  %8660 = vmatpush1.bf16.xpose.msra.mxu1 %v11519_v13  ;;  %v11571_v24 = vld [vmem:[%s18273_s4 + $0x3e8] ss:$16 sps:$4 sm:$0xff]   ;;  %v11572_v13 = vld [vmem:[%s18273_s4 + $0x404] ss:$16 sps:$4 sm:$0xff]  }
 0xb5c   :  { %10167 = vmatprep.subr.msk.bf16.mxu0 %vm19830_vm5, %v11520_v0  ;;  %10184 = vmatprep.subr.msk.bf16.mxu1 %vm19831_vm11, %v11521_v56  ;;  %vm19845_vm5 = vmmov %vm19790_vm0  ;;  %v11573_v0 = vld [vmem:[%s18273_s4 + $0x604] ss:$16 sps:$4 sm:$0xff]   ;;  %v11574_v56 = vld [vmem:[%s18273_s4 + $0x400] ss:$16 sps:$4 sm:$0xff]  }
 0xb5d   :  { %vm19846_vm11 = vmmov %vm19790_vm0 }
 0xb63   :  { %8576 = vmatpush1.bf16.xpose.msra.mxu0 %v11522_v19  ;;  %8662 = vmatpush1.bf16.xpose.msra.mxu1 %v11523_v48  ;;  %v11575_v19 = vld [vmem:[%s18273_s4 + $0x600] ss:$16 sps:$4 sm:$0xff]   ;;  %v11576_v48 = vld [vmem:[%s18273_s4 + $0x424] ss:$16 sps:$4 sm:$0xff]  }
 0xb64   :  { %10168 = vmatprep.subr.msk.bf16.mxu0 %vm19832_vm4, %v11524_v21  ;;  %10185 = vmatprep.subr.msk.bf16.mxu1 %vm19833_vm12, %v11525_v28  ;;  %vm19847_vm4 = vmmov %vm19790_vm0  ;;  %v11577_v21 = vld [vmem:[%s18273_s4 + $0x624] ss:$16 sps:$4 sm:$0xff]   ;;  %v11578_v28 = vld [vmem:[%s18273_s4 + $0x420] ss:$16 sps:$4 sm:$0xff]  }
 0xb65   :  { %vm19848_vm12 = vmmov %vm19790_vm0 }
 0xb6b   :  { %8578 = vmatpush1.bf16.xpose.msra.mxu0 %v11526_v31  ;;  %8664 = vmatpush1.bf16.xpose.msra.mxu1 %v11527_v54  ;;  %v11579_v31 = vld [vmem:[%s18273_s4 + $0x620] ss:$16 sps:$4 sm:$0xff]   ;;  %v11581_v54 = vld [vmem:[%s18273_s4 + $0x644] ss:$16 sps:$4 sm:$0xff]  }
 0xb6c   :  { %10169 = vmatprep.subr.msk.bf16.mxu0 %vm19834_vm9, %v11528_v57  ;;  %10186 = vmatprep.subr.msk.bf16.mxu1 %vm19835_vm10, %v11529_v35  ;;  %vm19849_vm9 = vmmov %vm19790_vm0  ;;  %v11582_v57 = vld [vmem:[%s18273_s4 + $0x440] ss:$16 sps:$4 sm:$0xff]  }
 0xb6d   :  { %vm19850_vm10 = vmmov %vm19790_vm0  ;;  %v11583_v35 = vld [vmem:[%s18273_s4 + $0x640] ss:$16 sps:$4 sm:$0xff]  }
 0xb73   :  { %8580 = vmatpush1.bf16.xpose.msra.mxu0 %v11530_v17  ;;  %8666 = vmatpush1.bf16.xpose.msra.mxu1 %v11531_v62  ;;  %v11584_v17 = vld [vmem:[%s18273_s4 + $0x464] ss:$16 sps:$4 sm:$0xff]  }
 0xb74   :  { %10170 = vmatprep.subr.msk.bf16.mxu0 %vm19836_vm3, %v11532_v38  ;;  %10187 = vmatprep.subr.msk.bf16.mxu1 %vm19837_vm7, %v11533_v23  ;;  %vm19851_vm3 = vmmov %vm19790_vm0  ;;  %v11585_v62 = vld [vmem:[%s18273_s4 + $0x664] ss:$16 sps:$4 sm:$0xff]   ;;  %v11586_v38 = vld [vmem:[%s18273_s4 + $0x460] ss:$16 sps:$4 sm:$0xff]  }
 0xb75   :  { %vm19852_vm7 = vmmov %vm19790_vm0  ;;  %v11587_v23 = vld [vmem:[%s18273_s4 + $0x660] ss:$16 sps:$4 sm:$0xff]  }
 0xb7b   :  { %8582 = vmatpush1.bf16.xpose.msra.mxu0 %v11534_v49  ;;  %8668 = vmatpush1.bf16.xpose.msra.mxu1 %v11535_v50  ;;  %v11588_v49 = vld [vmem:[%s18273_s4 + $0x484] ss:$16 sps:$4 sm:$0xff]  }
 0xb7c   :  { %10171 = vmatprep.subr.msk.bf16.mxu0 %vm19790_vm0, %v11536_v30  ;;  %10188 = vmatprep.subr.msk.bf16.mxu1 %vm19838_vm2, %v11537_v1  ;;  %vm19853_vm2 = vmmov %vm19790_vm0  ;;  %v11589_v50 = vld [vmem:[%s18273_s4 + $0x684] ss:$16 sps:$4 sm:$0xff]   ;;  %v11590_v30 = vld [vmem:[%s18273_s4 + $0x480] ss:$16 sps:$4 sm:$0xff]  }
 0xb7d   :  { %v11591_v1 = vld [vmem:[%s18273_s4 + $0x680] ss:$16 sps:$4 sm:$0xff]  }
 0xb83   :  { %8584 = vmatpush1.bf16.xpose.msra.mxu0 %v11538_v4  ;;  %8670 = vmatpush1.bf16.xpose.msra.mxu1 %v11539_v11  ;;  %v11592_v4 = vld [vmem:[%s18273_s4 + $0x4a4] ss:$16 sps:$4 sm:$0xff]  }
 0xb84   :  { %10172 = vmatprep.subr.msk.bf16.mxu0 %vm19839_vm8, %v11540_v14  ;;  %10189 = vmatprep.subr.msk.bf16.mxu1 %vm19840_vm13, %v11541_v40  ;;  %v11593_v11 = vld [vmem:[%s18273_s4 + $0x6a4] ss:$16 sps:$4 sm:$0xff]   ;;  %v11594_v14 = vld [vmem:[%s18273_s4 + $0x4a0] ss:$16 sps:$4 sm:$0xff]   ;;  %vm19854_vm8 = vmmov %vm19790_vm0 }
 0xb85   :  { %v11595_v40 = vld [vmem:[%s18273_s4 + $0x6a0] ss:$16 sps:$4 sm:$0xff]   ;;  %vm19855_vm13 = vmmov %vm19790_vm0 }
 0xb8b   :  { %8586 = vmatpush1.bf16.xpose.msra.mxu0 %v11542_v7  ;;  %8672 = vmatpush1.bf16.xpose.msra.mxu1 %v11543_v22  ;;  %v11596_v7 = vld [vmem:[%s18273_s4 + $0x4c4] ss:$16 sps:$4 sm:$0xff]  }
 0xb8c   :  { %10173 = vmatprep.subr.msk.bf16.mxu0 %vm19841_vm14, %v11544_v9  ;;  %10190 = vmatprep.subr.msk.bf16.mxu1 %vm19842_vm15, %v11545_v15  ;;  %v11597_v22 = vld [vmem:[%s18273_s4 + $0x6c4] ss:$16 sps:$4 sm:$0xff]   ;;  %v11598_v9 = vld [vmem:[%s18273_s4 + $0x4c0] ss:$16 sps:$4 sm:$0xff]   ;;  %vm19856_vm14 = vmmov %vm19790_vm0 }
 0xb8d   :  { %v11599_v15 = vld [vmem:[%s18273_s4 + $0x6c0] ss:$16 sps:$4 sm:$0xff]   ;;  %vm19857_vm15 = vmmov %vm19790_vm0 }
 0xb93   :  { %8588 = vmatpush1.bf16.xpose.msra.mxu0 %v11546_v12  ;;  %8674 = vmatpush1.bf16.xpose.msra.mxu1 %v11547_v34  ;;  %v11600_v12 = vld [vmem:[%s18273_s4 + $0x4e4] ss:$16 sps:$4 sm:$0xff]  }
 0xb94   :  { %10174 = vmatprep.subr.msk.bf16.mxu0 %vm19843_vm1, %v11548_v6  ;;  %10191 = vmatprep.subr.msk.bf16.mxu1 %vm19844_vm6, %v11549_v60  ;;  %v11601_v34 = vld [vmem:[%s18273_s4 + $0x6e4] ss:$16 sps:$4 sm:$0xff]   ;;  %v11602_v6 = vld [vmem:[%s18273_s4 + $0x4e0] ss:$16 sps:$4 sm:$0xff]   ;;  %vm19858_vm1 = vmmov %vm19790_vm0 }
 0xb95   :  { %v11603_v60 = vld [vmem:[%s18273_s4 + $0x6e0] ss:$16 sps:$4 sm:$0xff]   ;;  %vm19859_vm6 = vmmov %vm19790_vm0 }
 0xb9b   :  { %8590 = vmatpush1.bf16.xpose.msra.mxu0 %v11550_v42  ;;  %8676 = vmatpush1.bf16.xpose.msra.mxu1 %v11551_v33  ;;  %v11604_v42 = vld [vmem:[%s18273_s4 + $0x504] ss:$16 sps:$4 sm:$0xff]   ;;  %v11605_v33 = vld [vmem:[%s18273_s4 + $0x60c] ss:$16 sps:$4 sm:$0xff]  }
 0xb9c   :  { %10175 = vmatprep.subr.msk.bf16.mxu0 %vm19845_vm5, %v11552_v18  ;;  %10192 = vmatprep.subr.msk.bf16.mxu1 %vm19846_vm11, %v11553_v63  ;;  %v11606_v18 = vld [vmem:[%s18273_s4 + $0x500] ss:$16 sps:$4 sm:$0xff]   ;;  %v11607_v63 = vld [vmem:[%s18273_s4 + $0x608] ss:$16 sps:$4 sm:$0xff]   ;;  %vm19860_vm5 = vmmov %vm19790_vm0 }
 0xb9d   :  { %vm19861_vm11 = vmmov %vm19790_vm0 }
 0xba3   :  { %8592 = vmatpush1.bf16.xpose.msra.mxu0 %v11554_v47  ;;  %8678 = vmatpush1.bf16.xpose.msra.mxu1 %v11555_v32  ;;  %v11608_v47 = vld [vmem:[%s18273_s4 + $0x524] ss:$16 sps:$4 sm:$0xff]   ;;  %v11609_v32 = vld [vmem:[%s18273_s4 + $0x62c] ss:$16 sps:$4 sm:$0xff]  }
 0xba4   :  { %10176 = vmatprep.subr.msk.bf16.mxu0 %vm19847_vm4, %v11556_v27  ;;  %10193 = vmatprep.subr.msk.bf16.mxu1 %vm19848_vm12, %v11557_v39  ;;  %v11610_v27 = vld [vmem:[%s18273_s4 + $0x520] ss:$16 sps:$4 sm:$0xff]   ;;  %v11611_v39 = vld [vmem:[%s18273_s4 + $0x628] ss:$16 sps:$4 sm:$0xff]   ;;  %vm19862_vm4 = vmmov %vm19790_vm0 }
 0xba5   :  { %vm19863_vm12 = vmmov %vm19790_vm0 }
 0xbab   :  { %8594 = vmatpush1.bf16.xpose.msra.mxu0 %v11558_v51  ;;  %8680 = vmatpush1.bf16.xpose.msra.mxu1 %v11559_v61  ;;  %v11612_v51 = vld [vmem:[%s18273_s4 + $0x544] ss:$16 sps:$4 sm:$0xff]   ;;  %v11613_v61 = vld [vmem:[%s18273_s4 + $0x64c] ss:$16 sps:$4 sm:$0xff]  }
 0xbac   :  { %10177 = vmatprep.subr.msk.bf16.mxu0 %vm19849_vm9, %v11560_v58  ;;  %10194 = vmatprep.subr.msk.bf16.mxu1 %vm19850_vm10, %v11561_v43  ;;  %v11614_v58 = vld [vmem:[%s18273_s4 + $0x540] ss:$16 sps:$4 sm:$0xff]   ;;  %v11615_v43 = vld [vmem:[%s18273_s4 + $0x648] ss:$16 sps:$4 sm:$0xff]   ;;  %vm19864_vm9 = vmmov %vm19790_vm0 }
 0xbad   :  { %vm19865_vm10 = vmmov %vm19790_vm0 }
 0xbb3   :  { %8596 = vmatpush1.bf16.xpose.msra.mxu0 %v11562_v8  ;;  %8682 = vmatpush1.bf16.xpose.msra.mxu1 %v11563_v53  ;;  %v11616_v8 = vld [vmem:[%s18273_s4 + $0x564] ss:$16 sps:$4 sm:$0xff]   ;;  %v11617_v53 = vld [vmem:[%s18273_s4 + $0x66c] ss:$16 sps:$4 sm:$0xff]  }
 0xbb4   :  { %10178 = vmatprep.subr.msk.bf16.mxu0 %vm19851_vm3, %v11564_v52  ;;  %10195 = vmatprep.subr.msk.bf16.mxu1 %vm19852_vm7, %v11565_v41  ;;  %v11618_v52 = vld [vmem:[%s18273_s4 + $0x560] ss:$16 sps:$4 sm:$0xff]   ;;  %v11619_v41 = vld [vmem:[%s18273_s4 + $0x668] ss:$16 sps:$4 sm:$0xff]   ;;  %vm19866_vm3 = vmmov %vm19790_vm0 }
 0xbb5   :  { %vm19867_vm7 = vmmov %vm19790_vm0 }
 0xbbb   :  { %8598 = vmatpush1.bf16.xpose.msra.mxu0 %v11566_v2  ;;  %8684 = vmatpush1.bf16.xpose.msra.mxu1 %v11567_v25  ;;  %v11620_v2 = vld [vmem:[%s18273_s4 + $0x584] ss:$16 sps:$4 sm:$0xff]   ;;  %v11621_v25 = vld [vmem:[%s18273_s4 + $0x68c] ss:$16 sps:$4 sm:$0xff]  }
 0xbbc   :  { %10179 = vmatprep.subr.msk.bf16.mxu0 %vm19790_vm0, %v11568_v44  ;;  %10196 = vmatprep.subr.msk.bf16.mxu1 %vm19853_vm2, %v11569_v29  ;;  %v11622_v44 = vld [vmem:[%s18273_s4 + $0x580] ss:$16 sps:$4 sm:$0xff]   ;;  %v11623_v29 = vld [vmem:[%s18273_s4 + $0x688] ss:$16 sps:$4 sm:$0xff]   ;;  %vm19868_vm2 = vmmov %vm19790_vm0 }
 0xbc3   :  { %8600 = vmatpush1.bf16.xpose.msra.mxu0 %v11570_v10  ;;  %8686 = vmatpush1.bf16.xpose.msra.mxu1 %v11571_v24  ;;  %v11624_v10 = vld [vmem:[%s18273_s4 + $0x5a4] ss:$16 sps:$4 sm:$0xff]   ;;  %v11625_v24 = vld [vmem:[%s18273_s4 + $0x6ac] ss:$16 sps:$4 sm:$0xff]  }
 0xbc4   :  { %8698 = vmatprep.subr.bf16.mxu0 %v11572_v13  ;;  %8784 = vmatprep.subr.bf16.mxu1 %v11573_v0  ;;  %v11626_v13 = vld [vmem:[%s18273_s4 + $0x5a0] ss:$16 sps:$4 sm:$0xff]   ;;  %v11627_v0 = vld [vmem:[%s18273_s4 + $0x6a8] ss:$16 sps:$4 sm:$0xff]  }
 0xbca   :  { %8602 = vmatmul.mubr.bf16.vlgmr.msra.gmra.mrb[32].mxu0 %v17684_v3  ;;  %8688 = vmatmul.mubr.bf16.vlgmr.msra.gmra.mrb[36].mxu1 %v17684_v3 }
 0xbcb   :  { %8699 = vmatpush1.bf16.xpose.msra.mxu0 %v11574_v56  ;;  %8730 = vmatprep.mubr.bf16.mxu0 %v17686_v46  ;;  %v11628_v56 = vld [vmem:[%s18273_s4 + $0x5c4] ss:$16 sps:$4 sm:$0xff]  }
 0xbcc   :  { %8785 = vmatpush1.bf16.xpose.msra.mxu1 %v11575_v19  ;;  %8816 = vmatprep.mubr.bf16.mxu1 %v17686_v46  ;;  %v11580_v46 = vld [vmem:[%s18273_s4 + $0x444] ss:$16 sps:$4 sm:$0xff]   ;;  %v11629_v19 = vld [vmem:[%s18273_s4 + $0x6cc] ss:$16 sps:$4 sm:$0xff]  }
 0xbcd   :  { %8700 = vmatprep.subr.bf16.mxu0 %v11576_v48  ;;  %8786 = vmatprep.subr.bf16.mxu1 %v11577_v21  ;;  %v11630_v48 = vld [vmem:[%s18273_s4 + $0x5c0] ss:$16 sps:$4 sm:$0xff]   ;;  %v11631_v21 = vld [vmem:[%s18273_s4 + $0x6c8] ss:$16 sps:$4 sm:$0xff]  }
 0xbd3   :  { %8701 = vmatpush1.bf16.xpose.msra.mxu0 %v11578_v28  ;;  %v11632_v28 = vld [vmem:[%s18273_s4 + $0x5e4] ss:$16 sps:$4 sm:$0xff]  }
 0xbd4   :  { %8787 = vmatpush1.bf16.xpose.msra.mxu1 %v11579_v31  ;;  %8702 = vmatprep.subr.bf16.mxu0 %v11580_v46  ;;  %v11633_v31 = vld [vmem:[%s18273_s4 + $0x6ec] ss:$16 sps:$4 sm:$0xff]   ;;  %v11634_v46 = vld [vmem:[%s18273_s4 + $0x5e0] ss:$16 sps:$4 sm:$0xff]  }
 0xbd5   :  { %8788 = vmatprep.subr.bf16.mxu1 %v11581_v54  ;;  %v11635_v54 = vld [vmem:[%s18273_s4 + $0x6e8] ss:$16 sps:$4 sm:$0xff]  }
 0xbdb   :  { %8703 = vmatpush1.bf16.xpose.msra.mxu0 %v11582_v57  ;;  %v11636_v57 = vld [vmem:[%s18273_s4 + $0x40c] ss:$16 sps:$4 sm:$0xff]  }
 0xbdc   :  { %8789 = vmatpush1.bf16.xpose.msra.mxu1 %v11583_v35  ;;  %8704 = vmatprep.subr.bf16.mxu0 %v11584_v17  ;;  %v11637_v35 = vld [vmem:[%s18273_s4 + $0x408] ss:$16 sps:$4 sm:$0xff]   ;;  %v11638_v17 = vld [vmem:[%s18273_s4 + $0x42c] ss:$16 sps:$4 sm:$0xff]  }
 0xbdd   :  { %8790 = vmatprep.subr.bf16.mxu1 %v11585_v62  ;;  %v11640_v62 = vld [vmem:[%s18273_s4 + $0x44c] ss:$16 sps:$4 sm:$0xff]  }
 0xbe3   :  { %8705 = vmatpush1.bf16.xpose.msra.mxu0 %v11586_v38  ;;  %v11642_v38 = vld [vmem:[%s18273_s4 + $0x46c] ss:$16 sps:$4 sm:$0xff]  }
 0xbe4   :  { %8791 = vmatpush1.bf16.xpose.msra.mxu1 %v11587_v23  ;;  %8706 = vmatprep.subr.bf16.mxu0 %v11588_v49  ;;  %v11643_v23 = vld [vmem:[%s18273_s4 + $0x468] ss:$16 sps:$4 sm:$0xff]   ;;  %v11644_v49 = vld [vmem:[%s18273_s4 + $0x48c] ss:$16 sps:$4 sm:$0xff]  }
 0xbe5   :  { %8792 = vmatprep.subr.bf16.mxu1 %v11589_v50  ;;  %v11645_v50 = vld [vmem:[%s18273_s4 + $0x488] ss:$16 sps:$4 sm:$0xff]  }
 0xbeb   :  { %8707 = vmatpush1.bf16.xpose.msra.mxu0 %v11590_v30  ;;  %v11646_v30 = vld [vmem:[%s18273_s4 + $0x4ac] ss:$16 sps:$4 sm:$0xff]  }
 0xbec   :  { %8793 = vmatpush1.bf16.xpose.msra.mxu1 %v11591_v1  ;;  %8708 = vmatprep.subr.bf16.mxu0 %v11592_v4  ;;  %v11647_v1 = vld [vmem:[%s18273_s4 + $0x4a8] ss:$16 sps:$4 sm:$0xff]   ;;  %v11648_v4 = vld [vmem:[%s18273_s4 + $0x4cc] ss:$16 sps:$4 sm:$0xff]  }
 0xbed   :  { %8794 = vmatprep.subr.bf16.mxu1 %v11593_v11  ;;  %v11649_v11 = vld [vmem:[%s18273_s4 + $0x4c8] ss:$16 sps:$4 sm:$0xff]  }
 0xbf3   :  { %8709 = vmatpush1.bf16.xpose.msra.mxu0 %v11594_v14  ;;  %v11650_v14 = vld [vmem:[%s18273_s4 + $0x4ec] ss:$16 sps:$4 sm:$0xff]  }
 0xbf4   :  { %8795 = vmatpush1.bf16.xpose.msra.mxu1 %v11595_v40  ;;  %8710 = vmatprep.subr.bf16.mxu0 %v11596_v7  ;;  %v11651_v40 = vld [vmem:[%s18273_s4 + $0x4e8] ss:$16 sps:$4 sm:$0xff]   ;;  %v11652_v7 = vld [vmem:[%s18273_s4 + $0x50c] ss:$16 sps:$4 sm:$0xff]  }
 0xbf5   :  { %8796 = vmatprep.subr.bf16.mxu1 %v11597_v22  ;;  %v11653_v22 = vld [vmem:[%s18273_s4 + $0x508] ss:$16 sps:$4 sm:$0xff]  }
 0xbfb   :  { %8711 = vmatpush1.bf16.xpose.msra.mxu0 %v11598_v9  ;;  %v11654_v9 = vld [vmem:[%s18273_s4 + $0x52c] ss:$16 sps:$4 sm:$0xff]  }
 0xbfc   :  { %8797 = vmatpush1.bf16.xpose.msra.mxu1 %v11599_v15  ;;  %8712 = vmatprep.subr.bf16.mxu0 %v11600_v12  ;;  %v11655_v15 = vld [vmem:[%s18273_s4 + $0x528] ss:$16 sps:$4 sm:$0xff]   ;;  %v11656_v12 = vld [vmem:[%s18273_s4 + $0x54c] ss:$16 sps:$4 sm:$0xff]  }
 0xbfd   :  { %8798 = vmatprep.subr.bf16.mxu1 %v11601_v34  ;;  %v18202_v34 = vld [vmem:[%s18275_s6] sm:$0xff] }
 0xc03   :  { %8713 = vmatpush1.bf16.xpose.msra.mxu0 %v11602_v6  ;;  %v8323_v6 = vrot.slane %v18202_v34, %v19305_v20 }
 0xc04   :  { %8799 = vmatpush1.bf16.xpose.msra.mxu1 %v11603_v60  ;;  %8714 = vmatprep.subr.bf16.mxu0 %v11604_v42  ;;  %v8331_v60 = vrot.slane %v18202_v34, %v19307_v59  ;;  %v11657_v42 = vld [vmem:[%s18273_s4 + $0x548] ss:$16 sps:$4 sm:$0xff]  }
 0xc05   :  { %10215 = vmatprep.subr.msk.bf16.mxu1 %vm19854_vm8, %v11605_v33  ;;  %vm19869_vm8 = vmmov %vm19790_vm0  ;;  %v8327_v33 = vrot.slane %v18202_v34, %v19308_v26 }
 0xc0b   :  { %8817 = vmatmul.mubr.bf16.vlgmr.msra.gmra.mrb[40].mxu1 %v17682_v45  ;;  %8715 = vmatpush1.bf16.xpose.msra.mxu0 %v11606_v18  ;;  %v8335_v18 = vrot.slane %v18202_v34, %v19309_v37 }
 0xc0c   :  { %8826 = vmatpush1.bf16.xpose.msra.mxu1 %v11607_v63  ;;  %10223 = vmatprep.mubr.msk.bf16.mxu1 %vm19855_vm13, %v17688_v16  ;;  %vm19870_vm13 = vmmov %vm19790_vm0  ;;  %v11658_v63 = vld [vmem:[%s18273_s4 + $0x56c] ss:$16 sps:$4 sm:$0xff]  }
 0xc0d   :  { %8716 = vmatprep.subr.bf16.mxu0 %v11608_v47  ;;  %10216 = vmatprep.subr.msk.bf16.mxu1 %vm19856_vm14, %v11609_v32  ;;  %vm19871_vm14 = vmmov %vm19790_vm0 }
 0xc13   :  { %8717 = vmatpush1.bf16.xpose.msra.mxu0 %v11610_v27 }
 0xc14   :  { %8828 = vmatpush1.bf16.xpose.msra.mxu1 %v11611_v39  ;;  %8718 = vmatprep.subr.bf16.mxu0 %v11612_v51 }
 0xc15   :  { %10217 = vmatprep.subr.msk.bf16.mxu1 %vm19857_vm15, %v11613_v61  ;;  %vm19872_vm15 = vmmov %vm19790_vm0 }
 0xc1b   :  { %8719 = vmatpush1.bf16.xpose.msra.mxu0 %v11614_v58 }
 0xc1c   :  { %8830 = vmatpush1.bf16.xpose.msra.mxu1 %v11615_v43  ;;  %8720 = vmatprep.subr.bf16.mxu0 %v11616_v8 }
 0xc1d   :  { %10218 = vmatprep.subr.msk.bf16.mxu1 %vm19858_vm1, %v11617_v53  ;;  %vm19873_vm1 = vmmov %vm19790_vm0 }
 0xc23   :  { %8721 = vmatpush1.bf16.xpose.msra.mxu0 %v11618_v52 }
 0xc24   :  { %8832 = vmatpush1.bf16.xpose.msra.mxu1 %v11619_v41  ;;  %8722 = vmatprep.subr.bf16.mxu0 %v11620_v2 }
 0xc25   :  { %10219 = vmatprep.subr.msk.bf16.mxu1 %vm19859_vm6, %v11621_v25  ;;  %vm19874_vm6 = vmmov %vm19790_vm0 }
 0xc2b   :  { %8723 = vmatpush1.bf16.xpose.msra.mxu0 %v11622_v44 }
 0xc2c   :  { %8834 = vmatpush1.bf16.xpose.msra.mxu1 %v11623_v29  ;;  %8724 = vmatprep.subr.bf16.mxu0 %v11624_v10 }
 0xc2d   :  { %10220 = vmatprep.subr.msk.bf16.mxu1 %vm19860_vm5, %v11625_v24  ;;  %vm19875_vm5 = vmmov %vm19790_vm0 }
 0xc33   :  { %8725 = vmatpush1.bf16.xpose.msra.mxu0 %v11626_v13  ;;  %v11659_v13 = vld [vmem:[%s18273_s4 + $0x568] ss:$16 sps:$4 sm:$0xff]  }
 0xc34   :  { %8836 = vmatpush1.bf16.xpose.msra.mxu1 %v11627_v0  ;;  %8726 = vmatprep.subr.bf16.mxu0 %v11628_v56  ;;  %v11660_v56 = vld [vmem:[%s18273_s4 + $0x58c] ss:$16 sps:$4 sm:$0xff]  }
 0xc35   :  { %10221 = vmatprep.subr.msk.bf16.mxu1 %vm19861_vm11, %v11629_v19  ;;  %vm19876_vm11 = vmmov %vm19790_vm0 }
 0xc3b   :  { %8727 = vmatpush1.bf16.xpose.msra.mxu0 %v11630_v48  ;;  %v11661_v48 = vld [vmem:[%s18273_s4 + $0x588] ss:$16 sps:$4 sm:$0xff]  }
 0xc3c   :  { %8838 = vmatpush1.bf16.xpose.msra.mxu1 %v11631_v21  ;;  %8728 = vmatprep.subr.bf16.mxu0 %v11632_v28  ;;  %v11662_v28 = vld [vmem:[%s18273_s4 + $0x5ac] ss:$16 sps:$4 sm:$0xff]  }
 0xc3d   :  { %10222 = vmatprep.subr.msk.bf16.mxu1 %vm19862_vm4, %v11633_v31  ;;  %vm19877_vm4 = vmmov %vm19790_vm0 }
 0xc43   :  { %8729 = vmatpush1.bf16.xpose.msra.mxu0 %v11634_v46 }
 0xc44   :  { %8840 = vmatpush1.bf16.xpose.msra.mxu1 %v11635_v54  ;;  %10198 = vmatprep.subr.msk.bf16.mxu0 %vm19863_vm12, %v11636_v57  ;;  %vm19878_vm12 = vmmov %vm19790_vm0 }
 0xc4a   :  { %8731 = vmatmul.mubr.bf16.vlgmr.msra.gmra.mrb[36].mxu0 %v17682_v45  ;;  %v11639_v45 = vld [vmem:[%s18273_s4 + $0x428] ss:$16 sps:$4 sm:$0xff]  }
 0xc4b   :  { %8858 = vmatmul.mubr.bf16.vlgmr.msra.gmra.mrb[40].mxu1 %v17684_v3  ;;  %8742 = vmatpush1.bf16.xpose.msra.mxu0 %v11637_v35 }
 0xc4c   :  { %10214 = vmatprep.mubr.msk.bf16.mxu0 %vm19864_vm9, %v17688_v16  ;;  %10199 = vmatprep.subr.msk.bf16.mxu0 %vm19865_vm10, %v11638_v17  ;;  %v11641_v16 = vld [vmem:[%s18273_s4 + $0x448] ss:$16 sps:$4 sm:$0xff]  }
 0xc53   :  { %8744 = vmatpush1.bf16.xpose.msra.mxu0 %v11639_v45 }
 0xc54   :  { %10200 = vmatprep.subr.msk.bf16.mxu0 %vm19866_vm3, %v11640_v62 }
 0xc5b   :  { %8746 = vmatpush1.bf16.xpose.msra.mxu0 %v11641_v16 }
 0xc5c   :  { %10201 = vmatprep.subr.msk.bf16.mxu0 %vm19867_vm7, %v11642_v38 }
 0xc63   :  { %8748 = vmatpush1.bf16.xpose.msra.mxu0 %v11643_v23 }
 0xc64   :  { %10202 = vmatprep.subr.msk.bf16.mxu0 %vm19790_vm0, %v11644_v49 }
 0xc6b   :  { %8750 = vmatpush1.bf16.xpose.msra.mxu0 %v11645_v50 }
 0xc6c   :  { %10203 = vmatprep.subr.msk.bf16.mxu0 %vm19868_vm2, %v11646_v30 }
 0xc73   :  { %8752 = vmatpush1.bf16.xpose.msra.mxu0 %v11647_v1  ;;  %v11663_v1 = vld [vmem:[%s18273_s4 + $0x5a8] ss:$16 sps:$4 sm:$0xff]  }
 0xc74   :  { %10204 = vmatprep.subr.msk.bf16.mxu0 %vm19869_vm8, %v11648_v4 }
 0xc7b   :  { %8754 = vmatpush1.bf16.xpose.msra.mxu0 %v11649_v11  ;;  %v11664_v11 = vld [vmem:[%s18273_s4 + $0x5cc] ss:$16 sps:$4 sm:$0xff]  }
 0xc7c   :  { %10205 = vmatprep.subr.msk.bf16.mxu0 %vm19870_vm13, %v11650_v14 }
 0xc83   :  { %8756 = vmatpush1.bf16.xpose.msra.mxu0 %v11651_v40 }
 0xc84   :  { %10206 = vmatprep.subr.msk.bf16.mxu0 %vm19871_vm14, %v11652_v7 }
 0xc8b   :  { %8758 = vmatpush1.bf16.xpose.msra.mxu0 %v11653_v22  ;;  %v11665_v22 = vld [vmem:[%s18273_s4 + $0x5c8] ss:$16 sps:$4 sm:$0xff]  }
 0xc8c   :  { %10207 = vmatprep.subr.msk.bf16.mxu0 %vm19872_vm15, %v11654_v9 }
 0xc93   :  { %8760 = vmatpush1.bf16.xpose.msra.mxu0 %v11655_v15  ;;  %v11666_v15 = vld [vmem:[%s18273_s4 + $0x5ec] ss:$16 sps:$4 sm:$0xff]  }
 0xc94   :  { %10208 = vmatprep.subr.msk.bf16.mxu0 %vm19873_vm1, %v11656_v12 }
 0xc9b   :  { %8762 = vmatpush1.bf16.xpose.msra.mxu0 %v11657_v42 }
 0xc9c   :  { %10209 = vmatprep.subr.msk.bf16.mxu0 %vm19874_vm6, %v11658_v63 }
 0xc9d   :  { %v8603_v20 = vpop.f32.mrb[32].mxu0  ;;  %v8689_v47 = vpop.f32.mrb[36].mxu1 }
 0xc9e   :  { %v10306_v59 = vadd.f32 %v8603_v20, %v8323_v6  ;;  %v10310_v32 = vadd.f32 %v8689_v47, %v8331_v60  ;;  %v8605_v27 = vpop.f32.mrb[33].mxu0  ;;  %v8691_v39 = vpop.f32.mrb[37].mxu1 }
 0xc9f   :  { %v10307_v51 = vadd.f32 %v8605_v27, %v8327_v33  ;;  %v10311_v61 = vadd.f32 %v8691_v39, %v8335_v18  ;;  %v8607_v58 = vpop.f32.mrb[34].mxu0  ;;  %v8693_v43 = vpop.f32.mrb[38].mxu1 }
 0xca0   :  { %v10224_v26 = vmul.f32 -1.442695, %v10306_v59  ;;  %v10226_v8 = vmul.f32 -1.442695, %v10310_v32  ;;  %v10308_v53 = vadd.f32 %v8607_v58, %v8323_v6  ;;  %v10312_v37 = vadd.f32 %v8693_v43, %v8331_v60  ;;  %v8609_v52 = vpop.f32.mrb[35].mxu0  ;;  %v8695_v41 = vpop.f32.mrb[39].mxu1 }
 0xca1   :  { %v10225_v2 = vmul.f32 -1.442695, %v10307_v51  ;;  %v10227_v25 = vmul.f32 -1.442695, %v10311_v61  ;;  %v10309_v44 = vadd.f32 %v8609_v52, %v8327_v33  ;;  %v10313_v29 = vadd.f32 %v8695_v41, %v8335_v18  ;;  %v11667_v33 = vld [vmem:[%s18273_s4 + $0x5e8] ss:$16 sps:$4 sm:$0xff]  }
 0xca2   :  { %11264 = vpow2.f32 %v10224_v26  ;;  %v10231_v10 = vmul.f32 -1.442695, %v10308_v53  ;;  %v10233_v24 = vmul.f32 -1.442695, %v10312_v37  ;;  %v8347_v18 = vrot.slane %v18202_v34, %v15996_v5  ;;  %s11695_s4 = smov [#allocation2]  }
 0xca3   :  { %11266 = vpow2.f32 %v10226_v8  ;;  %8764 = vmatpush1.bf16.xpose.msra.mxu0 %v11659_v13  ;;  %v10232_v0 = vmul.f32 -1.442695, %v10309_v44  ;;  %v10234_v19 = vmul.f32 -1.442695, %v10313_v29  ;;  %v8339_v5 = vrot.slane %v18202_v34, %v15984_v55  ;;  %s8969_s30 = sshll.u32 %s11695_s4, 4  ;;  %s8970_s30 = int_to_ptr.vmem [resolvable:$true] %s8969_s30 }
 0xca4   :  { %11268 = vpow2.f32 %v10225_v2  ;;  %10210 = vmatprep.subr.msk.bf16.mxu0 %vm19875_vm5, %v11660_v56  ;;  %v8343_v53 = vrot.slane %v18202_v34, %v15999_v36  ;;  %s11668_s14 = scalar_lea.vmem %s8970_s30, 1792  ;;  %p11673_p1 = scmp.lt.s32.totalorder %s8970_s30, %s8970_s30 }
 0xca5   :  { %11270 = vpow2.f32 %v10227_v25  ;;  %p11669_p0 = scmp.ne.s32.totalorder %s8970_s30, %s11668_s14  ;;  %p11674_p2 = scmp.lt.s32.totalorder %s11668_s14, %s11668_s14 }
 0xca6   :  { %11272 = vpow2.f32 %v10231_v10 }
 0xca7   :  { %11274 = vpow2.f32 %v10233_v24  ;;  %p11675_p3 = por %p11674_p2, %p11673_p1 }
 0xca8   :  { %11276 = vpow2.f32 %v10232_v0 }
 0xca9   :  { %11278 = vpow2.f32 %v10234_v19  ;;  %p11676_p4 = pnand %p11675_p3, %p11669_p0 }
 0xcab   :  { %8766 = vmatpush1.bf16.xpose.msra.mxu0 %v11661_v48 }
 0xcac   :  { %v11265_v21 = vpop.eup %11264  ;;  %10211 = vmatprep.subr.msk.bf16.mxu0 %vm19876_vm11, %v11662_v28 }
 0xcad   :  { %v11267_v31 = vpop.eup %11266  ;;  %v8908_v46 = vadd.f32 1.0, %v11265_v21 }
 0xcae   :  { %v11269_v54 = vpop.eup %11268  ;;  %v8910_v57 = vadd.f32 1.0, %v11267_v31 }
 0xcaf   :  { %v11271_v35 = vpop.eup %11270  ;;  %11280 = vrcp.f32 %v8908_v46  ;;  %v8909_v17 = vadd.f32 1.0, %v11269_v54 }
 0xcb0   :  { %v11273_v45 = vpop.eup %11272  ;;  %11282 = vrcp.f32 %v8910_v57  ;;  %v8911_v62 = vadd.f32 1.0, %v11271_v35 }
 0xcb1   :  { %v11275_v16 = vpop.eup %11274  ;;  %11284 = vrcp.f32 %v8909_v17  ;;  %v8915_v38 = vadd.f32 1.0, %v11273_v45 }
 0xcb2   :  { %v11277_v23 = vpop.eup %11276  ;;  %11286 = vrcp.f32 %v8911_v62  ;;  %v8917_v49 = vadd.f32 1.0, %v11275_v16 }
 0xcb3   :  { %v11279_v50 = vpop.eup %11278  ;;  %11288 = vrcp.f32 %v8915_v38  ;;  %v8916_v30 = vadd.f32 1.0, %v11277_v23  ;;  %8768 = vmatpush1.bf16.xpose.msra.mxu0 %v11663_v1 }
 0xcb4   :  { %11290 = vrcp.f32 %v8917_v49  ;;  %v8918_v4 = vadd.f32 1.0, %v11279_v50  ;;  %10212 = vmatprep.subr.msk.bf16.mxu0 %vm19877_vm4, %v11664_v11 }
 0xcb5   :  { %11292 = vrcp.f32 %v8916_v30 }
 0xcb6   :  { %11294 = vrcp.f32 %v8918_v4 }
 0xcb9   :  { %v11281_v14 = vpop.eup %11280 }
 0xcba   :  { %v11283_v40 = vpop.eup %11282  ;;  %8950 = vst [vmem:[#allocation2] sm:$0xff] %v11281_v14 }
 0xcbb   :  { %v11285_v7 = vpop.eup %11284  ;;  %8952 = vst [vmem:[#allocation2 + $0x10] sm:$0xff] %v11283_v40  ;;  %8770 = vmatpush1.bf16.xpose.msra.mxu0 %v11665_v22 }
 0xcbc   :  { %v11287_v9 = vpop.eup %11286  ;;  %8951 = vst [vmem:[#allocation2 + $0x8] sm:$0xff] %v11285_v7  ;;  %10213 = vmatprep.subr.msk.bf16.mxu0 %vm19878_vm12, %v11666_v15 }
 0xcbd   :  { %v11289_v12 = vpop.eup %11288  ;;  %8953 = vst [vmem:[#allocation2 + $0x18] sm:$0xff] %v11287_v9 }
 0xcbe   :  { %v11291_v6 = vpop.eup %11290  ;;  %8957 = vst [vmem:[#allocation2 + $0x38] sm:$0xff] %v11289_v12 }
 0xcbf   :  { %v11293_v60 = vpop.eup %11292  ;;  %8959 = vst [vmem:[#allocation2 + $0x48] sm:$0xff] %v11291_v6 }
 0xcc0   :  { %v11295_v42 = vpop.eup %11294  ;;  %8958 = vst [vmem:[#allocation2 + $0x40] sm:$0xff] %v11293_v60 }
 0xcc1   :  { %8960 = vst [vmem:[#allocation2 + $0x50] sm:$0xff] %v11295_v42 }
 0xcc3   :  { %8772 = vmatpush1.bf16.xpose.msra.mxu0 %v11667_v33 }
 0xcca   :  { %8774 = vmatmul.mubr.bf16.vlgmr.msra.gmra.mrb[36].mxu0 %v17684_v3 }
 0xd1e   :  { %v8859_v63 = vpop.f32.mrb[40].mxu1 }
 0xd1f   :  { %v10318_v20 = vadd.f32 %v8859_v63, %v8347_v18  ;;  %v8861_v47 = vpop.f32.mrb[41].mxu1 }
 0xd20   :  { %v8862_v59 = vpop.f32.mrb[42].mxu1 }
 0xd21   :  { %v10230_v32 = vmul.f32 -1.442695, %v10318_v20  ;;  %v10319_v27 = vadd.f32 %v8862_v59, %v8347_v18  ;;  %v8864_v39 = vpop.f32.mrb[43].mxu1 }
 0xd23   :  { %11296 = vpow2.f32 %v10230_v32  ;;  %v10237_v51 = vmul.f32 -1.442695, %v10319_v27 }
 0xd25   :  { %11298 = vpow2.f32 %v10237_v51 }
 0xd2d   :  { %v11297_v61 = vpop.eup %11296 }
 0xd2e   :  { %v8914_v58 = vadd.f32 1.0, %v11297_v61 }
 0xd2f   :  { %v11299_v43 = vpop.eup %11298 }
 0xd30   :  { %11300 = vrcp.f32 %v8914_v58  ;;  %v8921_v26 = vadd.f32 1.0, %v11299_v43 }
 0xd32   :  { %11302 = vrcp.f32 %v8921_v26 }
 0xd3a   :  { %v11301_v3 = vpop.eup %11300 }
 0xd3b   :  { %8956 = vst [vmem:[#allocation2 + $0x30] sm:$0xff] %v11301_v3 }
 0xd3c   :  { %v11303_v8 = vpop.eup %11302 }
 0xd3d   :  { %8963 = vst [vmem:[#allocation2 + $0x68] sm:$0xff] %v11303_v8 }
 0xd9d   :  { %v8775_v37 = vpop.f32.mrb[36].mxu0 }
 0xd9e   :  { %v10314_v52 = vadd.f32 %v8775_v37, %v8339_v5  ;;  %v8777_v41 = vpop.f32.mrb[37].mxu0 }
 0xd9f   :  { %v10315_v2 = vadd.f32 %v8777_v41, %v8343_v53  ;;  %v8779_v25 = vpop.f32.mrb[38].mxu0 }
 0xda0   :  { %v10228_v44 = vmul.f32 -1.442695, %v10314_v52  ;;  %v10316_v29 = vadd.f32 %v8779_v25, %v8339_v5  ;;  %v8781_v10 = vpop.f32.mrb[39].mxu0 }
 0xda1   :  { %v10229_v24 = vmul.f32 -1.442695, %v10315_v2  ;;  %v10317_v13 = vadd.f32 %v8781_v10, %v8343_v53 }
 0xda2   :  { %11304 = vpow2.f32 %v10228_v44  ;;  %v10235_v0 = vmul.f32 -1.442695, %v10316_v29 }
 0xda3   :  { %11306 = vpow2.f32 %v10229_v24  ;;  %v10236_v56 = vmul.f32 -1.442695, %v10317_v13 }
 0xda4   :  { %11308 = vpow2.f32 %v10235_v0 }
 0xda5   :  { %11310 = vpow2.f32 %v10236_v56 }
 0xdac   :  { %v11305_v55 = vpop.eup %11304 }
 0xdad   :  { %v11307_v19 = vpop.eup %11306  ;;  %v8912_v48 = vadd.f32 1.0, %v11305_v55 }
 0xdae   :  { %v11309_v36 = vpop.eup %11308  ;;  %v8913_v34 = vadd.f32 1.0, %v11307_v19 }
 0xdaf   :  { %v11311_v21 = vpop.eup %11310  ;;  %11312 = vrcp.f32 %v8912_v48  ;;  %v8919_v28 = vadd.f32 1.0, %v11309_v36 }
 0xdb0   :  { %11314 = vrcp.f32 %v8913_v34  ;;  %v8920_v31 = vadd.f32 1.0, %v11311_v21 }
 0xdb1   :  { %11316 = vrcp.f32 %v8919_v28 }
 0xdb2   :  { %11318 = vrcp.f32 %v8920_v31 }
 0xdb9   :  { %v11313_v46 = vpop.eup %11312 }
 0xdba   :  { %v11315_v54 = vpop.eup %11314  ;;  %8954 = vst [vmem:[#allocation2 + $0x20] sm:$0xff] %v11313_v46 }
 0xdbb   :  { %v11317_v57 = vpop.eup %11316  ;;  %8955 = vst [vmem:[#allocation2 + $0x28] sm:$0xff] %v11315_v54 }
 0xdbc   :  { %v11319_v35 = vpop.eup %11318  ;;  %8961 = vst [vmem:[#allocation2 + $0x58] sm:$0xff] %v11317_v57 }
 0xdbd   :  { %8962 = vst [vmem:[#allocation2 + $0x60] sm:$0xff] %v11319_v35 }
 0xdbe   :  { %11679 = shalt.err (!%p11676_p4)
}
 0xdbf   :  { %s11680_s12 = scalar_lea.hbm %s18282_s13, 1792 }
 0xdc0   :  { %p11681_p5 = scmp.ne.s32.totalorder %s18282_s13, %s11680_s12  ;;  %p11684_p6 = scmp.lt.u32.totalorder %s11680_s12, %s18282_s13 }
 0xdc2   :  { %p11686_p7 = pnand %p11684_p6, %p11681_p5 }
 0xdc4   :  { %11689 = shalt.err (!%p11686_p7)
}
 0xdc5   :  { %s11696_s21 = smov 896   ;;  %s11697_s6 = smov 56  }
 0xdc6   :  { %8975 = dma.vmem_to_hbm [thread:$0]  %s8970_s30, 1792, %s18282_s13, [#allocation3], %s11696_s21, %s11696_s21, %s11697_s6  }
 0xdc7   :  { %11690 = dma.done.wait [#allocation3], 1792  }
 0xdc8   :  { %11691 = vsyncadd [#allocation3], 4294965504 }
 0xdc9   :  { %8979 = vsyncpa [#allocation3], 1 }

</bundles_post_ra>
